<compile_context>
chip_gen: v5e
topology: v5e:2x2
jax: 0.10.0
libtpu: 0.0.40
codegen_flags: <defaults>
</compile_context>

<pallas_src>
import functools

import jax
import jax.numpy as jnp
from jax.experimental import pallas as pl
from jax.experimental.pallas import tpu as pltpu


def _round_up(x, m):
    return (x + m - 1) // m * m


def _mlp_kernel(x_ref,
                w1_ref, b1_ref, w2_ref, b2_ref, w3_ref, b3_ref,
                w4_ref, b4_ref, w5_ref, b5_ref,
                w6_ref, b6_ref,
                o_ref, h_ref):
    """Fused 6-layer MLP. Grid = (batch tiles, output-column tiles).

    Layers 1-5 are grid-invariant along the column axis, so they are computed
    once per batch tile (column step 0) and the layer-5 activation is kept in
    a VMEM scratch (bf16). Every column step then runs the final matmul
    against its slice of w6/b6 plus the tanh epilogue."""

    @pl.when(pl.program_id(1) == 0)
    def _():
        h = x_ref[...].astype(jnp.bfloat16)
        acc = None
        for w_ref, b_ref in ((w1_ref, b1_ref), (w2_ref, b2_ref),
                             (w3_ref, b3_ref), (w4_ref, b4_ref),
                             (w5_ref, b5_ref)):
            acc = jnp.dot(h, w_ref[...], preferred_element_type=jnp.float32)
            acc = jnp.maximum(acc + b_ref[...], 0.0)   # bias + ReLU in f32
            h = acc.astype(jnp.bfloat16)               # bf16 operand for MXU
        h_ref[...] = acc.astype(jnp.bfloat16)

    y = jnp.dot(h_ref[...], w6_ref[...], preferred_element_type=jnp.float32)
    y = y + b6_ref[...]
    o_ref[...] = jnp.tanh(y).astype(o_ref.dtype)       # tanh in f32 (EUP)


@functools.lru_cache(maxsize=1)
def _vmem_limit_bytes():
    cap = 128 << 20
    try:
        cap = int(getattr(pltpu.get_tpu_info(), "vmem_capacity_bytes", cap))
    except Exception:
        pass
    # Leave headroom; v7x (64 MiB physical) -> 48 MiB, v5e/v6e -> 96 MiB.
    return int(min(96 << 20, cap * 3 // 4))


@functools.lru_cache(maxsize=1)
def _supports_single_buffered_weights():
    """Eager (outside-jit) probe: does pipeline_mode=pl.Buffered(1) lower?"""
    def copy_kernel(x_ref, o_ref):
        o_ref[...] = x_ref[...] + 1.0

    try:
        x = jnp.zeros((8, 128), jnp.float32)
        y = pl.pallas_call(
            copy_kernel,
            out_shape=jax.ShapeDtypeStruct((8, 128), jnp.float32),
            grid=(1,),
            in_specs=[pl.BlockSpec((8, 128), lambda i: (0, 0),
                                   pipeline_mode=pl.Buffered(1))],
            out_specs=pl.BlockSpec((8, 128), lambda i: (0, 0)),
        )(x)
        return bool(jnp.all(jax.block_until_ready(y) == 1.0))
    except Exception:
        return False


def text2image_forward(text_embedding, params, image_size, *,
                       batch_tile=128, col_tile_max=2048,
                       single_buffer_weights=False):
    """params: 6 tuples (W [in, out] f32, b [1, out] f32). Returns
    [B, image_size, image_size] f32 (matches the PyTorch module)."""
    B, E = text_embedding.shape
    out_dim = image_size * image_size
    out_dim_pad = _round_up(out_dim, 128)          # lane-dense output stores

    # Batch padding / tile choice: MXU-friendly 128-row tiles for real
    # batches; a single grid step for tiny (latency-bound) batches.
    b_pad = _round_up(B, 8)
    bt = b_pad if b_pad < batch_tile else batch_tile
    b_pad = _round_up(b_pad, bt)
    x = text_embedding.astype(jnp.float32)
    if b_pad != B:
        x = jnp.concatenate([x, jnp.zeros((b_pad - B, E), jnp.float32)], 0)

    # Output-column tile for the last layer (bounds w6's VMEM slice).
    if out_dim_pad <= col_tile_max:
        tn = out_dim_pad
    else:
        tn = 128
        for cand in (2048, 1024, 512, 256):
            if cand <= col_tile_max and out_dim_pad % cand == 0:
                tn = cand
                break

    # Weights: bf16 MXU operands (f32 accumulate); biases stay f32.
    # Pad the last layer's columns up to out_dim_pad.
    proc = []
    for li, (w, b) in enumerate(params):
        w = w.astype(jnp.bfloat16)
        b = b.reshape(1, -1).astype(jnp.float32)
        if li == 5 and out_dim_pad != out_dim:
            w = jnp.pad(w, ((0, 0), (0, out_dim_pad - out_dim)))
            b = jnp.pad(b, ((0, 0), (0, out_dim_pad - out_dim)))
        proc.extend([w, b])

    grid = (b_pad // bt, out_dim_pad // tn)

    def invariant_spec(arr):
        kwargs = {}
        if single_buffer_weights:
            kwargs["pipeline_mode"] = pl.Buffered(1)   # grid-invariant operand
        return pl.BlockSpec(arr.shape, lambda i, n: (0,) * arr.ndim, **kwargs)

    in_specs = [pl.BlockSpec((bt, E), lambda i, n: (i, 0))]
    in_specs += [invariant_spec(a) for a in proc[:-2]]
    w6, b6 = proc[-2], proc[-1]
    in_specs.append(pl.BlockSpec((w6.shape[0], tn), lambda i, n: (0, n)))
    in_specs.append(pl.BlockSpec((1, tn), lambda i, n: (0, n)))
    out_specs = pl.BlockSpec((bt, tn), lambda i, n: (i, n))

    flops = 2 * b_pad * sum(proc[2 * k].shape[0] * proc[2 * k].shape[1]
                            for k in range(6))
    bytes_accessed = (x.size * x.dtype.itemsize
                      + sum(a.size * a.dtype.itemsize for a in proc)
                      + b_pad * out_dim_pad * 4)
    cost = pl.CostEstimate(flops=flops,
                           transcendentals=b_pad * out_dim_pad,
                           bytes_accessed=bytes_accessed)

    out = pl.pallas_call(
        _mlp_kernel,
        out_shape=jax.ShapeDtypeStruct((b_pad, out_dim_pad), jnp.float32),
        grid_spec=pltpu.PrefetchScalarGridSpec(
            num_scalar_prefetch=0,
            grid=grid,
            in_specs=in_specs,
            out_specs=out_specs,
            scratch_shapes=[pltpu.VMEM((bt, 1024), jnp.bfloat16)],
        ),
        compiler_params=pltpu.CompilerParams(
            dimension_semantics=("parallel", "arbitrary"),
            vmem_limit_bytes=_vmem_limit_bytes(),
        ),
        cost_estimate=cost,
    )(x, *proc)

    return out[:B, :out_dim].reshape(B, image_size, image_size)


def init_params(key, text_embedding_size, image_size):
    """f32 master weights matching the PyTorch layer shapes; W stored [in, out]
    (transposed w.r.t. torch.nn.Linear.weight), b stored [1, out]."""
    dims = [text_embedding_size, 256, 512, 1024, 1024, 1024,
            image_size * image_size]
    params = []
    for idx in range(6):
        fan_in, fan_out = dims[idx], dims[idx + 1]
        key, kw, kb = jax.random.split(key, 3)
        bound = 1.0 / float(fan_in) ** 0.5
        w = jax.random.uniform(kw, (fan_in, fan_out), jnp.float32, -bound, bound)
        b = jax.random.uniform(kb, (1, fan_out), jnp.float32, -bound, bound)
        params.append((w, b))
    return params


def reference_forward(text_embedding, params, image_size):
    h = text_embedding.astype(jnp.float32)
    for li, (w, b) in enumerate(params):
        h = h @ w + b
        h = jnp.maximum(h, 0.0) if li < 5 else jnp.tanh(h)
    return h.reshape(text_embedding.shape[0], image_size, image_size)


if __name__ == "__main__":
    text_embedding_size = 32
    image_size = 16

    key = jax.random.PRNGKey(0)
    key, kp = jax.random.split(key)
    params = init_params(kp, text_embedding_size, image_size)

    use_single_buffer = _supports_single_buffered_weights()

    fwd = jax.jit(functools.partial(
        text2image_forward, image_size=image_size,
        single_buffer_weights=use_single_buffer))

    # Two batch shapes: tiny (single grid step) and one that exercises the
    # 128-row batch tiling + padding path.
    for batch_size in (16, 200):
        key, kx = jax.random.split(key)
        text_embedding = jax.random.normal(
            kx, (batch_size, text_embedding_size), jnp.float32)
        out = jax.block_until_ready(fwd(text_embedding, params))
        ref = reference_forward(text_embedding, params, image_size)
        assert out.shape == (batch_size, image_size, image_size)
        max_err = float(jnp.max(jnp.abs(out - ref)))
        # bf16 matmul operands with f32 accumulation -> loosened tolerance.
        assert max_err < 2e-2, f"mismatch vs reference (max abs err {max_err})"

    print("KERNEL_OK")
</pallas_src>

<mosaic_0001>
module attributes {stable_mosaic.version = 11 : i64} {
  func.func @copy_kernel(%arg0: i32, %arg1: memref<8x128xf32, #tpu.memory_space<vmem>>, %arg2: memref<8x128xf32, #tpu.memory_space<vmem>>) attributes {dimension_semantics = [#tpu.dimension_semantics<arbitrary>], iteration_bounds = array<i64: 1>, scalar_prefetch = 0 : i64, scratch_operands = 0 : i64, tpu.core_type = #tpu.core_type<tc>, window_params = [{pipeline_mode = #tpu.pipeline_mode<synchronous>, transform_indices = @transform_0, window_bounds = array<i64: 8, 128>}, {pipeline_mode = #tpu.pipeline_mode<synchronous>, transform_indices = @transform_1, window_bounds = array<i64: 8, 128>}]} {
    %c0 = arith.constant 0 : index
    %c0_0 = arith.constant 0 : index
    %0 = vector.load %arg1[%c0, %c0_0] : memref<8x128xf32, #tpu.memory_space<vmem>>, vector<8x128xf32>
    %cst = arith.constant 1.000000e+00 : f32
    %1 = vector.broadcast %cst : f32 to vector<8x128xf32>
    %2 = arith.addf %0, %1 : vector<8x128xf32>
    %c0_1 = arith.constant 0 : index
    %c0_2 = arith.constant 0 : index
    %3 = vector.load %arg2[%c0_1, %c0_2] : memref<8x128xf32, #tpu.memory_space<vmem>>, vector<8x128xf32>
    tpu.vector_store %arg2[%c0_1, %c0_2], %2 {strides = array<i32>} : memref<8x128xf32, #tpu.memory_space<vmem>>, vector<8x128xf32>,
    return
  }
  func.func @transform_0(%arg0: i32) -> (i32, i32) {
    %c0_i32 = arith.constant 0 : i32
    %c0_i32_0 = arith.constant 0 : i32
    %c0_i32_1 = arith.constant 0 : i32
    return %c0_i32, %c0_i32_0 : i32, i32
  }
  func.func @transform_1(%arg0: i32) -> (i32, i32) {
    %c0_i32 = arith.constant 0 : i32
    %c0_i32_0 = arith.constant 0 : i32
    %c0_i32_1 = arith.constant 0 : i32
    return %c0_i32, %c0_i32_0 : i32, i32
  }
}

module attributes {stable_mosaic.version = 11 : i64} {
  func.func @_mlp_kernel(%arg0: i32, %arg1: i32, %arg2: memref<16x32xf32, #tpu.memory_space<vmem>>, %arg3: memref<32x256xbf16, #tpu.memory_space<vmem>>, %arg4: memref<1x256xf32, #tpu.memory_space<vmem>>, %arg5: memref<256x512xbf16, #tpu.memory_space<vmem>>, %arg6: memref<1x512xf32, #tpu.memory_space<vmem>>, %arg7: memref<512x1024xbf16, #tpu.memory_space<vmem>>, %arg8: memref<1x1024xf32, #tpu.memory_space<vmem>>, %arg9: memref<1024x1024xbf16, #tpu.memory_space<vmem>>, %arg10: memref<1x1024xf32, #tpu.memory_space<vmem>>, %arg11: memref<1024x1024xbf16, #tpu.memory_space<vmem>>, %arg12: memref<1x1024xf32, #tpu.memory_space<vmem>>, %arg13: memref<1024x256xbf16, #tpu.memory_space<vmem>>, %arg14: memref<1x256xf32, #tpu.memory_space<vmem>>, %arg15: memref<16x256xf32, #tpu.memory_space<vmem>>, %arg16: memref<16x1024xbf16, #tpu.memory_space<vmem>>) attributes {dimension_semantics = [#tpu.dimension_semantics<parallel>, #tpu.dimension_semantics<arbitrary>], iteration_bounds = array<i64: 1, 1>, scalar_prefetch = 0 : i64, scratch_operands = 1 : i64, tpu.core_type = #tpu.core_type<tc>, window_params = [{transform_indices = @transform_0, window_bounds = array<i64: 16, 32>}, {pipeline_mode = #tpu.pipeline_mode<synchronous>, transform_indices = @transform_1, window_bounds = array<i64: 32, 256>}, {pipeline_mode = #tpu.pipeline_mode<synchronous>, transform_indices = @transform_2, window_bounds = array<i64: 1, 256>}, {pipeline_mode = #tpu.pipeline_mode<synchronous>, transform_indices = @transform_3, window_bounds = array<i64: 256, 512>}, {pipeline_mode = #tpu.pipeline_mode<synchronous>, transform_indices = @transform_4, window_bounds = array<i64: 1, 512>}, {pipeline_mode = #tpu.pipeline_mode<synchronous>, transform_indices = @transform_5, window_bounds = array<i64: 512, 1024>}, {pipeline_mode = #tpu.pipeline_mode<synchronous>, transform_indices = @transform_6, window_bounds = array<i64: 1, 1024>}, {pipeline_mode = #tpu.pipeline_mode<synchronous>, transform_indices = @transform_7, window_bounds = array<i64: 1024, 1024>}, {pipeline_mode = #tpu.pipeline_mode<synchronous>, transform_indices = @transform_8, window_bounds = array<i64: 1, 1024>}, {pipeline_mode = #tpu.pipeline_mode<synchronous>, transform_indices = @transform_9, window_bounds = array<i64: 1024, 1024>}, {pipeline_mode = #tpu.pipeline_mode<synchronous>, transform_indices = @transform_10, window_bounds = array<i64: 1, 1024>}, {transform_indices = @transform_11, window_bounds = array<i64: 1024, 256>}, {transform_indices = @transform_12, window_bounds = array<i64: 1, 256>}, {transform_indices = @transform_13, window_bounds = array<i64: 16, 256>}]} {
    %c0_i32 = arith.constant 0 : i32
    %0 = arith.cmpi eq, %arg1, %c0_i32 : i32
    %1 = arith.extui %0 : i1 to i32
    %c0_i32_0 = arith.constant 0 : i32
    %2 = arith.cmpi ne, %1, %c0_i32_0 : i32
    scf.if %2 {
      %c0_8 = arith.constant 0 : index
      %c0_9 = arith.constant 0 : index
      %11 = vector.load %arg2[%c0_8, %c0_9] : memref<16x32xf32, #tpu.memory_space<vmem>>, vector<16x32xf32>
      %12 = arith.truncf %11 : vector<16x32xf32> to vector<16x32xbf16>
      %c0_10 = arith.constant 0 : index
      %c0_11 = arith.constant 0 : index
      %13 = vector.load %arg3[%c0_10, %c0_11] : memref<32x256xbf16, #tpu.memory_space<vmem>>, vector<32x256xbf16>
      %cst_12 = arith.constant dense<0.000000e+00> : vector<16x256xf32>
      %14 = tpu.matmul %12, %13, %cst_12 {dimension_numbers = #tpu.dot_dimension_numbers<[1], [0], [0], [1], [0, 0, 1, 1], [], []>} : vector<16x32xbf16>, vector<32x256xbf16>, vector<16x256xf32> -> vector<16x256xf32>
      %c0_13 = arith.constant 0 : index
      %c0_14 = arith.constant 0 : index
      %15 = vector.load %arg4[%c0_13, %c0_14] : memref<1x256xf32, #tpu.memory_space<vmem>>, vector<1x256xf32>
      %16 = vector.broadcast %15 : vector<1x256xf32> to vector<16x256xf32>
      %17 = arith.addf %14, %16 : vector<16x256xf32>
      %cst_15 = arith.constant 0.000000e+00 : f32
      %18 = vector.broadcast %cst_15 : f32 to vector<16x256xf32>
      %19 = arith.maximumf %17, %18 : vector<16x256xf32>
      %20 = arith.truncf %19 : vector<16x256xf32> to vector<16x256xbf16>
      %c0_16 = arith.constant 0 : index
      %c0_17 = arith.constant 0 : index
      %21 = vector.load %arg5[%c0_16, %c0_17] : memref<256x512xbf16, #tpu.memory_space<vmem>>, vector<256x512xbf16>
      %cst_18 = arith.constant dense<0.000000e+00> : vector<16x512xf32>
      %22 = tpu.matmul %20, %21, %cst_18 {dimension_numbers = #tpu.dot_dimension_numbers<[1], [0], [0], [1], [0, 0, 1, 1], [], []>} : vector<16x256xbf16>, vector<256x512xbf16>, vector<16x512xf32> -> vector<16x512xf32>
      %c0_19 = arith.constant 0 : index
      %c0_20 = arith.constant 0 : index
      %23 = vector.load %arg6[%c0_19, %c0_20] : memref<1x512xf32, #tpu.memory_space<vmem>>, vector<1x512xf32>
      %24 = vector.broadcast %23 : vector<1x512xf32> to vector<16x512xf32>
      %25 = arith.addf %22, %24 : vector<16x512xf32>
      %cst_21 = arith.constant 0.000000e+00 : f32
      %26 = vector.broadcast %cst_21 : f32 to vector<16x512xf32>
      %27 = arith.maximumf %25, %26 : vector<16x512xf32>
      %28 = arith.truncf %27 : vector<16x512xf32> to vector<16x512xbf16>
      %c0_22 = arith.constant 0 : index
      %c0_23 = arith.constant 0 : index
      %29 = vector.load %arg7[%c0_22, %c0_23] : memref<512x1024xbf16, #tpu.memory_space<vmem>>, vector<512x1024xbf16>
      %cst_24 = arith.constant dense<0.000000e+00> : vector<16x1024xf32>
      %30 = tpu.matmul %28, %29, %cst_24 {dimension_numbers = #tpu.dot_dimension_numbers<[1], [0], [0], [1], [0, 0, 1, 1], [], []>} : vector<16x512xbf16>, vector<512x1024xbf16>, vector<16x1024xf32> -> vector<16x1024xf32>
      %c0_25 = arith.constant 0 : index
      %c0_26 = arith.constant 0 : index
      %31 = vector.load %arg8[%c0_25, %c0_26] : memref<1x1024xf32, #tpu.memory_space<vmem>>, vector<1x1024xf32>
      %32 = vector.broadcast %31 : vector<1x1024xf32> to vector<16x1024xf32>
      %33 = arith.addf %30, %32 : vector<16x1024xf32>
      %cst_27 = arith.constant 0.000000e+00 : f32
      %34 = vector.broadcast %cst_27 : f32 to vector<16x1024xf32>
      %35 = arith.maximumf %33, %34 : vector<16x1024xf32>
      %36 = arith.truncf %35 : vector<16x1024xf32> to vector<16x1024xbf16>
      %c0_28 = arith.constant 0 : index
      %c0_29 = arith.constant 0 : index
      %37 = vector.load %arg9[%c0_28, %c0_29] : memref<1024x1024xbf16, #tpu.memory_space<vmem>>, vector<1024x1024xbf16>
      %cst_30 = arith.constant dense<0.000000e+00> : vector<16x1024xf32>
      %38 = tpu.matmul %36, %37, %cst_30 {dimension_numbers = #tpu.dot_dimension_numbers<[1], [0], [0], [1], [0, 0, 1, 1], [], []>} : vector<16x1024xbf16>, vector<1024x1024xbf16>, vector<16x1024xf32> -> vector<16x1024xf32>
      %c0_31 = arith.constant 0 : index
      %c0_32 = arith.constant 0 : index
      %39 = vector.load %arg10[%c0_31, %c0_32] : memref<1x1024xf32, #tpu.memory_space<vmem>>, vector<1x1024xf32>
      %40 = vector.broadcast %39 : vector<1x1024xf32> to vector<16x1024xf32>
      %41 = arith.addf %38, %40 : vector<16x1024xf32>
      %cst_33 = arith.constant 0.000000e+00 : f32
      %42 = vector.broadcast %cst_33 : f32 to vector<16x1024xf32>
      %43 = arith.maximumf %41, %42 : vector<16x1024xf32>
      %44 = arith.truncf %43 : vector<16x1024xf32> to vector<16x1024xbf16>
      %c0_34 = arith.constant 0 : index
      %c0_35 = arith.constant 0 : index
      %45 = vector.load %arg11[%c0_34, %c0_35] : memref<1024x1024xbf16, #tpu.memory_space<vmem>>, vector<1024x1024xbf16>
      %cst_36 = arith.constant dense<0.000000e+00> : vector<16x1024xf32>
      %46 = tpu.matmul %44, %45, %cst_36 {dimension_numbers = #tpu.dot_dimension_numbers<[1], [0], [0], [1], [0, 0, 1, 1], [], []>} : vector<16x1024xbf16>, vector<1024x1024xbf16>, vector<16x1024xf32> -> vector<16x1024xf32>
      %c0_37 = arith.constant 0 : index
      %c0_38 = arith.constant 0 : index
      %47 = vector.load %arg12[%c0_37, %c0_38] : memref<1x1024xf32, #tpu.memory_space<vmem>>, vector<1x1024xf32>
      %48 = vector.broadcast %47 : vector<1x1024xf32> to vector<16x1024xf32>
      %49 = arith.addf %46, %48 : vector<16x1024xf32>
      %cst_39 = arith.constant 0.000000e+00 : f32
      %50 = vector.broadcast %cst_39 : f32 to vector<16x1024xf32>
      %51 = arith.maximumf %49, %50 : vector<16x1024xf32>
      %52 = arith.truncf %51 : vector<16x1024xf32> to vector<16x1024xbf16>
      %c0_40 = arith.constant 0 : index
      %c0_41 = arith.constant 0 : index
      %53 = vector.load %arg16[%c0_40, %c0_41] : memref<16x1024xbf16, #tpu.memory_space<vmem>>, vector<16x1024xbf16>
      tpu.vector_store %arg16[%c0_40, %c0_41], %52 {strides = array<i32>} : memref<16x1024xbf16, #tpu.memory_space<vmem>>, vector<16x1024xbf16>,
    } else {
    }
    %c0 = arith.constant 0 : index
    %c0_1 = arith.constant 0 : index
    %3 = vector.load %arg16[%c0, %c0_1] : memref<16x1024xbf16, #tpu.memory_space<vmem>>, vector<16x1024xbf16>
    %c0_2 = arith.constant 0 : index
    %c0_3 = arith.constant 0 : index
    %4 = vector.load %arg13[%c0_2, %c0_3] : memref<1024x256xbf16, #tpu.memory_space<vmem>>, vector<1024x256xbf16>
    %cst = arith.constant dense<0.000000e+00> : vector<16x256xf32>
    %5 = tpu.matmul %3, %4, %cst {dimension_numbers = #tpu.dot_dimension_numbers<[1], [0], [0], [1], [0, 0, 1, 1], [], []>} : vector<16x1024xbf16>, vector<1024x256xbf16>, vector<16x256xf32> -> vector<16x256xf32>
    %c0_4 = arith.constant 0 : index
    %c0_5 = arith.constant 0 : index
    %6 = vector.load %arg14[%c0_4, %c0_5] : memref<1x256xf32, #tpu.memory_space<vmem>>, vector<1x256xf32>
    %7 = vector.broadcast %6 : vector<1x256xf32> to vector<16x256xf32>
    %8 = arith.addf %5, %7 : vector<16x256xf32>
    %9 = math.tanh %8 : vector<16x256xf32>
    %c0_6 = arith.constant 0 : index
    %c0_7 = arith.constant 0 : index
    %10 = vector.load %arg15[%c0_6, %c0_7] : memref<16x256xf32, #tpu.memory_space<vmem>>, vector<16x256xf32>
    tpu.vector_store %arg15[%c0_6, %c0_7], %9 {strides = array<i32>} : memref<16x256xf32, #tpu.memory_space<vmem>>, vector<16x256xf32>,
    return
  }
  func.func @transform_0(%arg0: i32, %arg1: i32) -> (i32, i32) {
    %c0_i32 = arith.constant 0 : i32
    %c0_i32_0 = arith.constant 0 : i32
    return %arg0, %c0_i32 : i32, i32
  }
  func.func @transform_1(%arg0: i32, %arg1: i32) -> (i32, i32) {
    %c0_i32 = arith.constant 0 : i32
    %c0_i32_0 = arith.constant 0 : i32
    %c0_i32_1 = arith.constant 0 : i32
    return %c0_i32, %c0_i32_0 : i32, i32
  }
  func.func @transform_2(%arg0: i32, %arg1: i32) -> (i32, i32) {
    %c0_i32 = arith.constant 0 : i32
    %c0_i32_0 = arith.constant 0 : i32
    %c0_i32_1 = arith.constant 0 : i32
    return %c0_i32, %c0_i32_0 : i32, i32
  }
  func.func @transform_3(%arg0: i32, %arg1: i32) -> (i32, i32) {
    %c0_i32 = arith.constant 0 : i32
    %c0_i32_0 = arith.constant 0 : i32
    %c0_i32_1 = arith.constant 0 : i32
    return %c0_i32, %c0_i32_0 : i32, i32
  }
  func.func @transform_4(%arg0: i32, %arg1: i32) -> (i32, i32) {
    %c0_i32 = arith.constant 0 : i32
    %c0_i32_0 = arith.constant 0 : i32
    %c0_i32_1 = arith.constant 0 : i32
    return %c0_i32, %c0_i32_0 : i32, i32
  }
  func.func @transform_5(%arg0: i32, %arg1: i32) -> (i32, i32) {
    %c0_i32 = arith.constant 0 : i32
    %c0_i32_0 = arith.constant 0 : i32
    %c0_i32_1 = arith.constant 0 : i32
    return %c0_i32, %c0_i32_0 : i32, i32
  }
  func.func @transform_6(%arg0: i32, %arg1: i32) -> (i32, i32) {
    %c0_i32 = arith.constant 0 : i32
    %c0_i32_0 = arith.constant 0 : i32
    %c0_i32_1 = arith.constant 0 : i32
    return %c0_i32, %c0_i32_0 : i32, i32
  }
  func.func @transform_7(%arg0: i32, %arg1: i32) -> (i32, i32) {
    %c0_i32 = arith.constant 0 : i32
    %c0_i32_0 = arith.constant 0 : i32
    %c0_i32_1 = arith.constant 0 : i32
    return %c0_i32, %c0_i32_0 : i32, i32
  }
  func.func @transform_8(%arg0: i32, %arg1: i32) -> (i32, i32) {
    %c0_i32 = arith.constant 0 : i32
    %c0_i32_0 = arith.constant 0 : i32
    %c0_i32_1 = arith.constant 0 : i32
    return %c0_i32, %c0_i32_0 : i32, i32
  }
  func.func @transform_9(%arg0: i32, %arg1: i32) -> (i32, i32) {
    %c0_i32 = arith.constant 0 : i32
    %c0_i32_0 = arith.constant 0 : i32
    %c0_i32_1 = arith.constant 0 : i32
    return %c0_i32, %c0_i32_0 : i32, i32
  }
  func.func @transform_10(%arg0: i32, %arg1: i32) -> (i32, i32) {
    %c0_i32 = arith.constant 0 : i32
    %c0_i32_0 = arith.constant 0 : i32
    %c0_i32_1 = arith.constant 0 : i32
    return %c0_i32, %c0_i32_0 : i32, i32
  }
  func.func @transform_11(%arg0: i32, %arg1: i32) -> (i32, i32) {
    %c0_i32 = arith.constant 0 : i32
    %c0_i32_0 = arith.constant 0 : i32
    return %c0_i32, %arg1 : i32, i32
  }
  func.func @transform_12(%arg0: i32, %arg1: i32) -> (i32, i32) {
    %c0_i32 = arith.constant 0 : i32
    %c0_i32_0 = arith.constant 0 : i32
    return %c0_i32, %arg1 : i32, i32
  }
  func.func @transform_13(%arg0: i32, %arg1: i32) -> (i32, i32) {
    %c0_i32 = arith.constant 0 : i32
    return %arg0, %arg1 : i32, i32
  }
}

</mosaic_0001>

<bundles_post_ra>
// kernel: tpu_custom_call.1
= control target key start
LH: loop header
LB: loop body
LE: loop exit
PB: predicated region body
PF: predicated region fallthrough
CT: control target
= control target key end

     0   :  { %6 = vsyncpa [#allocation3], 0  ;;  %s115_s0 = inlined_call_operand.hbm [shape: f32[8,128], index: 0, kind: input, shape index: {}]   ;;  %s116_s1 = inlined_call_operand.hbm [shape: f32[8,128], index: 1, kind: output, shape index: {}]  }
   0x1   :  { %7 = vsyncpa [#allocation4], 0  ;;  %s13_s8 = sshll.u32 %s115_s0, 4  ;;  %s97_s9 = smov [#allocation2]   ;;  %s14_s8 = int_to_ptr.hbm [resolvable:$true] %s13_s8 }
   0x2   :  { %s15_s10 = sshll.u32 %s97_s9, 4  ;;  %s16_s10 = int_to_ptr.vmem [resolvable:$true] %s15_s10 }
   0x3   :  { %18 = dma.hbm_to_vmem [thread:$0]  %s14_s8, 128, %s16_s10, [#allocation3]  }
   0x4   :  { %93 = dma.done.wait [#allocation3], 128  }
   0x5   :  { %94 = vsyncadd [#allocation3], 4294967168  ;;  %s98_s11 = smov [#allocation5]   ;;  %s33_s15 = sshll.u32 %s116_s1, 4  ;;  %v23_v0 = vld [vmem:[#allocation2] sm:$0xff]  ;;  %s34_s15 = int_to_ptr.hbm [resolvable:$true] %s33_s15 }
   0x6   :  { %s31_s12 = sshll.u32 %s98_s11, 4  ;;  %v24_v1 = vadd.f32 1.0, %v23_v0  ;;  %s32_s12 = int_to_ptr.vmem [resolvable:$true] %s31_s12 }
   0x8   :  { %25 = vst [vmem:[#allocation5] sm:$0xff] %v24_v1 }
   0x9   :  { %36 = dma.vmem_to_hbm [thread:$0]  %s32_s12, 128, %s34_s15, [#allocation4]  }
   0xa   :  { %95 = dma.done.wait [#allocation4], 128  }
   0xb   :  { %96 = vsyncadd [#allocation4], 4294967168 }
   0xc   :  { %41 = vsyncpa [#allocation3], 1 }
   0xd   :  { %42 = vsyncpa [#allocation4], 1 }

// kernel: text2image_forward.1
= control target key start
LH: loop header
LB: loop body
LE: loop exit
PB: predicated region body
PF: predicated region fallthrough
CT: control target
= control target key end

     0   :  { %vm82_vm0 = vcmask 261120   ;;  %s28956_s1 = inlined_call_operand.vmem [shape: bf16[32,256], index: 1, kind: input, shape index: {}]   ;;  %s28957_s0 = inlined_call_operand.vmem [shape: f32[16,32], index: 0, kind: input, shape index: {}]   ;;  %s28958_s3 = inlined_call_operand.vmem [shape: bf16[256,512], index: 3, kind: input, shape index: {}]   ;;  %s28959_s2 = inlined_call_operand.vmem [shape: f32[1,256], index: 2, kind: input, shape index: {}]   ;;  %s28960_s5 = inlined_call_operand.vmem [shape: bf16[512,1024], index: 5, kind: input, shape index: {}]   ;;  %s28961_s4 = inlined_call_operand.vmem [shape: f32[1,512], index: 4, kind: input, shape index: {}]   ;;  %s28962_s7 = inlined_call_operand.vmem [shape: bf16[1024,1024], index: 7, kind: input, shape index: {}]   ;;  %s28963_s6 = inlined_call_operand.vmem [shape: f32[1,1024], index: 6, kind: input, shape index: {}]   ;;  %s28964_s8 = inlined_call_operand.vmem [shape: f32[1,1024], index: 8, kind: input, shape index: {}]   ;;  %s28965_s9 = inlined_call_operand.vmem [shape: bf16[1024,1024], index: 9, kind: input, shape index: {}]   ;;  %s28966_s10 = inlined_call_operand.vmem [shape: f32[1,1024], index: 10, kind: input, shape index: {}]   ;;  %s28967_s11 = inlined_call_operand.vmem [shape: bf16[1024,256], index: 11, kind: input, shape index: {}]   ;;  %s28968_s12 = inlined_call_operand.vmem [shape: f32[1,256], index: 12, kind: input, shape index: {}]   ;;  %s28969_s13 = inlined_call_operand.vmem [shape: f32[16,256], index: 13, kind: output, shape index: {}]  }
   0x1   :  { %v11760_v0 = vld [vmem:[%s28956_s1 + $0x10] sm:$0xf]  ;;  %v17691_v1 = vld [vmem:[%s28956_s1 + $0x14] sm:$0xf0]  ;;  %v17690_v2 = vld [vmem:[%s28956_s1 + $0x14] sm:$0xf] }
   0x2   :  { %v11761_v3 = vor.u32 %v17691_v1, %v11760_v0  ;;  %v11762_v4 = vld [vmem:[%s28956_s1 + $0x18] sm:$0xf0]  ;;  %v11752_v5 = vld [vmem:[%s28956_s1] sm:$0xf]  ;;  %v17689_v6 = vld [vmem:[%s28956_s1 + $0x4] sm:$0xf0] }
   0x3   :  { %v11765_v7 = vor.u32 %v17690_v2, %v11762_v4  ;;  %v17688_v8 = vld [vmem:[%s28956_s1 + $0x4] sm:$0xf]  ;;  %v11754_v9 = vld [vmem:[%s28956_s1 + $0x8] sm:$0xf0]  ;;  %v11753_v11 = vor.u32 %v17689_v6, %v11752_v5  ;;  %v11882_v13 = vld [vmem:[%s28958_s3 + $0xe0] sm:$0xf] }
   0x4   :  { %v49_v10 = vld [vmem:[%s28957_s0] sm:$0xff]  ;;  %92 = vmatpush.bf16.msra.mxu0 %v11761_v3  ;;  %v50_v12 = vld [vmem:[%s28957_s0 + $0x8] sm:$0xff]  ;;  %v17722_v14 = vld [vmem:[%s28958_s3 + $0xec] sm:$0xf0]  ;;  %v11757_v15 = vor.u32 %v17688_v8, %v11754_v9 }
   0x5   :  { %106 = vmatpush.bf16.msra.mxu1 %v11765_v7  ;;  %v11883_v16 = vor.u32 %v17722_v14, %v11882_v13  ;;  %v12010_v17 = vld [vmem:[%s28958_s3 + $0x1e0] sm:$0xf]  ;;  %v17754_v18 = vld [vmem:[%s28958_s3 + $0x1ec] sm:$0xf0]  ;;  %v17720_v19 = vld [vmem:[%s28958_s3 + $0xe4] sm:$0xf]  ;;  %v51_v24 = vpack.c.bf16 %v50_v12, %v49_v10 }
   0x6   :  { %v12011_v20 = vor.u32 %v17754_v18, %v12010_v17  ;;  %v11884_v21 = vld [vmem:[%s28958_s3 + $0xf0] sm:$0xf0]  ;;  %v17752_v22 = vld [vmem:[%s28958_s3 + $0x1e4] sm:$0xf]  ;;  %v11866_v27 = vld [vmem:[%s28958_s3 + $0xc0] sm:$0xf] }
   0x7   :  { %v12012_v23 = vld [vmem:[%s28958_s3 + $0x1f0] sm:$0xf0]  ;;  %514 = vmatpush.bf16.msra.mxu2 %v11883_v16  ;;  %v11887_v25 = vor.u32 %v17720_v19, %v11884_v21  ;;  %v17718_v28 = vld [vmem:[%s28958_s3 + $0xcc] sm:$0xf0]  ;;  %v11994_v29 = vld [vmem:[%s28958_s3 + $0x1c0] sm:$0xf] }
   0x8   :  { %v12015_v26 = vor.u32 %v17752_v22, %v12012_v23  ;;  %93 = vmatpush.bf16.msra.mxu0 %v11753_v11  ;;  %528 = vmatpush.bf16.msra.mxu3 %v12011_v20  ;;  %v11867_v30 = vor.u32 %v17718_v28, %v11866_v27  ;;  %v17750_v31 = vld [vmem:[%s28958_s3 + $0x1cc] sm:$0xf0]  ;;  %v17716_v32 = vld [vmem:[%s28958_s3 + $0xc4] sm:$0xf]  ;;  %v11868_v33 = vld [vmem:[%s28958_s3 + $0xd0] sm:$0xf0] }
   0x9   :  { %107 = vmatpush.bf16.msra.mxu1 %v11757_v15  ;;  %v11995_v34 = vor.u32 %v17750_v31, %v11994_v29  ;;  %v11871_v35 = vor.u32 %v17716_v32, %v11868_v33  ;;  %v17748_v36 = vld [vmem:[%s28958_s3 + $0x1c4] sm:$0xf]  ;;  %v11996_v37 = vld [vmem:[%s28958_s3 + $0x1d0] sm:$0xf0]  ;;  %v11850_v38 = vld [vmem:[%s28958_s3 + $0xa0] sm:$0xf] }
   0xa   :  { %v11999_v39 = vor.u32 %v17748_v36, %v11996_v37  ;;  %v17714_v40 = vld [vmem:[%s28958_s3 + $0xac] sm:$0xf0]  ;;  %v11978_v41 = vld [vmem:[%s28958_s3 + $0x1a0] sm:$0xf]  ;;  %v17712_v44 = vld [vmem:[%s28958_s3 + $0xa4] sm:$0xf] }
   0xb   :  { %v17746_v42 = vld [vmem:[%s28958_s3 + $0x1ac] sm:$0xf0]  ;;  %11766 = vmatmul.msk.bf16.vlgmr.msra.gmra.mxu0 %vm82_vm0, %v51_v24  ;;  %515 = vmatpush.bf16.msra.mxu2 %v11867_v30  ;;  %v11851_v43 = vor.u32 %v17714_v40, %v11850_v38  ;;  %v11852_v45 = vld [vmem:[%s28958_s3 + $0xb0] sm:$0xf0]  ;;  %v17744_v46 = vld [vmem:[%s28958_s3 + $0x1a4] sm:$0xf] }
   0xc   :  { %542 = vmatpush.bf16.msrb.mxu0 %v11887_v25  ;;  %11767 = vmatmul.msk.bf16.vlgmr.msra.gmra.mxu1 %vm82_vm0, %v51_v24  ;;  %v11979_v47 = vor.u32 %v17746_v42, %v11978_v41  ;;  %v11980_v48 = vld [vmem:[%s28958_s3 + $0x1b0] sm:$0xf0]  ;;  %v11834_v49 = vld [vmem:[%s28958_s3 + $0x80] sm:$0xf]  ;;  %v17710_v50 = vld [vmem:[%s28958_s3 + $0x8c] sm:$0xf0]  ;;  %v11855_v51 = vor.u32 %v17712_v44, %v11852_v45 }
   0xd   :  { %556 = vmatpush.bf16.msrb.mxu1 %v12015_v26  ;;  %529 = vmatpush.bf16.msra.mxu3 %v11995_v34  ;;  %v11962_v52 = vld [vmem:[%s28958_s3 + $0x180] sm:$0xf]  ;;  %v17742_v53 = vld [vmem:[%s28958_s3 + $0x18c] sm:$0xf0]  ;;  %v11983_v54 = vor.u32 %v17744_v46, %v11980_v48  ;;  %v17708_v55 = vld [vmem:[%s28958_s3 + $0x84] sm:$0xf]  ;;  %v11835_v57 = vor.u32 %v17710_v50, %v11834_v49 }
   0xe   :  { %v11836_v56 = vld [vmem:[%s28958_s3 + $0x90] sm:$0xf0]  ;;  %v17740_v58 = vld [vmem:[%s28958_s3 + $0x184] sm:$0xf]  ;;  %v11963_v60 = vor.u32 %v17742_v53, %v11962_v52  ;;  %v11818_v61 = vld [vmem:[%s28958_s3 + $0x60] sm:$0xf] }
   0xf   :  { %516 = vmatpush.bf16.msra.mxu2 %v11851_v43  ;;  %v11964_v59 = vld [vmem:[%s28958_s3 + $0x190] sm:$0xf0]  ;;  %v17706_v62 = vld [vmem:[%s28958_s3 + $0x6c] sm:$0xf0]  ;;  %v11839_v63 = vor.u32 %v17708_v55, %v11836_v56  ;;  %v11946_v0 = vld [vmem:[%s28958_s3 + $0x160] sm:$0xf] }
  0x10   :  { %543 = vmatpush.bf16.msrb.mxu0 %v11871_v35  ;;  %v17738_v1 = vld [vmem:[%s28958_s3 + $0x16c] sm:$0xf0]  ;;  %v11967_v2 = vor.u32 %v17740_v58, %v11964_v59  ;;  %v17704_v3 = vld [vmem:[%s28958_s3 + $0x64] sm:$0xf]  ;;  %v11820_v4 = vld [vmem:[%s28958_s3 + $0x70] sm:$0xf0]  ;;  %v11819_v5 = vor.u32 %v17706_v62, %v11818_v61 }
  0x11   :  { %557 = vmatpush.bf16.msrb.mxu1 %v11999_v39  ;;  %530 = vmatpush.bf16.msra.mxu3 %v11979_v47  ;;  %v17736_v6 = vld [vmem:[%s28958_s3 + $0x164] sm:$0xf]  ;;  %v11948_v7 = vld [vmem:[%s28958_s3 + $0x170] sm:$0xf0]  ;;  %v11947_v8 = vor.u32 %v17738_v1, %v11946_v0  ;;  %v11802_v9 = vld [vmem:[%s28958_s3 + $0x40] sm:$0xf]  ;;  %v11823_v11 = vor.u32 %v17704_v3, %v11820_v4 }
  0x12   :  { %v17702_v10 = vld [vmem:[%s28958_s3 + $0x4c] sm:$0xf0]  ;;  %v11930_v12 = vld [vmem:[%s28958_s3 + $0x140] sm:$0xf]  ;;  %v11951_v14 = vor.u32 %v17736_v6, %v11948_v7  ;;  %v17700_v15 = vld [vmem:[%s28958_s3 + $0x44] sm:$0xf] }
  0x13   :  { %517 = vmatpush.bf16.msra.mxu2 %v11835_v57  ;;  %v17734_v13 = vld [vmem:[%s28958_s3 + $0x14c] sm:$0xf0]  ;;  %v11804_v16 = vld [vmem:[%s28958_s3 + $0x50] sm:$0xf0]  ;;  %v11803_v17 = vor.u32 %v17702_v10, %v11802_v9  ;;  %v17732_v18 = vld [vmem:[%s28958_s3 + $0x144] sm:$0xf] }
  0x14   :  { %544 = vmatpush.bf16.msrb.mxu0 %v11855_v51  ;;  %v11932_v19 = vld [vmem:[%s28958_s3 + $0x150] sm:$0xf0]  ;;  %v11931_v20 = vor.u32 %v17734_v13, %v11930_v12  ;;  %v11786_v21 = vld [vmem:[%s28958_s3 + $0x20] sm:$0xf]  ;;  %v17698_v22 = vld [vmem:[%s28958_s3 + $0x2c] sm:$0xf0]  ;;  %v11807_v23 = vor.u32 %v17700_v15, %v11804_v16 }
  0x15   :  { %558 = vmatpush.bf16.msrb.mxu1 %v11983_v54  ;;  %531 = vmatpush.bf16.msra.mxu3 %v11963_v60  ;;  %v11914_v24 = vld [vmem:[%s28958_s3 + $0x120] sm:$0xf]  ;;  %v17730_v25 = vld [vmem:[%s28958_s3 + $0x12c] sm:$0xf0]  ;;  %v11935_v26 = vor.u32 %v17732_v18, %v11932_v19  ;;  %v17696_v27 = vld [vmem:[%s28958_s3 + $0x24] sm:$0xf]  ;;  %v11787_v29 = vor.u32 %v17698_v22, %v11786_v21 }
  0x16   :  { %v11788_v28 = vld [vmem:[%s28958_s3 + $0x30] sm:$0xf0]  ;;  %v17728_v30 = vld [vmem:[%s28958_s3 + $0x124] sm:$0xf]  ;;  %v11915_v32 = vor.u32 %v17730_v25, %v11914_v24  ;;  %v11770_v33 = vld [vmem:[%s28958_s3] sm:$0xf] }
  0x17   :  { %518 = vmatpush.bf16.msra.mxu2 %v11819_v5  ;;  %v11916_v31 = vld [vmem:[%s28958_s3 + $0x130] sm:$0xf0]  ;;  %v17694_v34 = vld [vmem:[%s28958_s3 + $0xc] sm:$0xf0]  ;;  %v11791_v35 = vor.u32 %v17696_v27, %v11788_v28  ;;  %v11898_v36 = vld [vmem:[%s28958_s3 + $0x100] sm:$0xf] }
  0x18   :  { %545 = vmatpush.bf16.msrb.mxu0 %v11839_v63  ;;  %v17726_v37 = vld [vmem:[%s28958_s3 + $0x10c] sm:$0xf0]  ;;  %v11919_v38 = vor.u32 %v17728_v30, %v11916_v31  ;;  %v17692_v39 = vld [vmem:[%s28958_s3 + $0x4] sm:$0xf]  ;;  %v11772_v40 = vld [vmem:[%s28958_s3 + $0x10] sm:$0xf0]  ;;  %v11771_v41 = vor.u32 %v17694_v34, %v11770_v33 }
  0x19   :  { %559 = vmatpush.bf16.msrb.mxu1 %v11967_v2  ;;  %532 = vmatpush.bf16.msra.mxu3 %v11947_v8  ;;  %v17724_v42 = vld [vmem:[%s28958_s3 + $0x104] sm:$0xf]  ;;  %v11900_v43 = vld [vmem:[%s28958_s3 + $0x110] sm:$0xf0]  ;;  %v11899_v44 = vor.u32 %v17726_v37, %v11898_v36  ;;  %v11775_v45 = vor.u32 %v17692_v39, %v11772_v40  ;;  %v11890_v47 = vld [vmem:[%s28958_s3 + $0xe8] sm:$0xf] }
  0x1a   :  { %v11903_v46 = vor.u32 %v17724_v42, %v11900_v43  ;;  %v17723_v48 = vld [vmem:[%s28958_s3 + $0xf4] sm:$0xf0]  ;;  %v12018_v49 = vld [vmem:[%s28958_s3 + $0x1e8] sm:$0xf]  ;;  %v17721_v52 = vld [vmem:[%s28958_s3 + $0xec] sm:$0xf] }
  0x1b   :  { %519 = vmatpush.bf16.msra.mxu2 %v11803_v17  ;;  %v11891_v50 = vor.u32 %v17723_v48, %v11890_v47  ;;  %v17755_v51 = vld [vmem:[%s28958_s3 + $0x1f4] sm:$0xf0]  ;;  %v11892_v53 = vld [vmem:[%s28958_s3 + $0xf8] sm:$0xf0]  ;;  %v17753_v56 = vld [vmem:[%s28958_s3 + $0x1ec] sm:$0xf] }
  0x1c   :  { %546 = vmatpush.bf16.msrb.mxu0 %v11823_v11  ;;  %v12019_v54 = vor.u32 %v17755_v51, %v12018_v49  ;;  %v11895_v55 = vor.u32 %v17721_v52, %v11892_v53  ;;  %v12020_v57 = vld [vmem:[%s28958_s3 + $0x1f8] sm:$0xf0]  ;;  %v11874_v59 = vld [vmem:[%s28958_s3 + $0xc8] sm:$0xf]  ;;  %v17719_v60 = vld [vmem:[%s28958_s3 + $0xd4] sm:$0xf0] }
  0x1d   :  { %560 = vmatpush.bf16.msrb.mxu1 %v11951_v14  ;;  %533 = vmatpush.bf16.msra.mxu3 %v11931_v20  ;;  %v12023_v58 = vor.u32 %v17753_v56, %v12020_v57  ;;  %v11875_v61 = vor.u32 %v17719_v60, %v11874_v59  ;;  %v12002_v62 = vld [vmem:[%s28958_s3 + $0x1c8] sm:$0xf]  ;;  %v17751_v63 = vld [vmem:[%s28958_s3 + $0x1d4] sm:$0xf0]  ;;  %v17717_v0 = vld [vmem:[%s28958_s3 + $0xcc] sm:$0xf] }
  0x1e   :  { %v12003_v1 = vor.u32 %v17751_v63, %v12002_v62  ;;  %v11876_v2 = vld [vmem:[%s28958_s3 + $0xd8] sm:$0xf0]  ;;  %v17749_v3 = vld [vmem:[%s28958_s3 + $0x1cc] sm:$0xf]  ;;  %v11858_v7 = vld [vmem:[%s28958_s3 + $0xa8] sm:$0xf] }
  0x1f   :  { %520 = vmatpush.bf16.msra.mxu2 %v11787_v29  ;;  %v12004_v4 = vld [vmem:[%s28958_s3 + $0x1d8] sm:$0xf0]  ;;  %v11879_v5 = vor.u32 %v17717_v0, %v11876_v2  ;;  %v17715_v8 = vld [vmem:[%s28958_s3 + $0xb4] sm:$0xf0]  ;;  %v11986_v9 = vld [vmem:[%s28958_s3 + $0x1a8] sm:$0xf] }
  0x20   :  { %547 = vmatpush.bf16.msrb.mxu0 %v11807_v23  ;;  %v12007_v6 = vor.u32 %v17749_v3, %v12004_v4  ;;  %v11859_v10 = vor.u32 %v17715_v8, %v11858_v7  ;;  %v17747_v11 = vld [vmem:[%s28958_s3 + $0x1b4] sm:$0xf0]  ;;  %v17713_v12 = vld [vmem:[%s28958_s3 + $0xac] sm:$0xf]  ;;  %v11860_v13 = vld [vmem:[%s28958_s3 + $0xb8] sm:$0xf0] }
  0x21   :  { %561 = vmatpush.bf16.msrb.mxu1 %v11935_v26  ;;  %534 = vmatpush.bf16.msra.mxu3 %v11915_v32  ;;  %v11987_v14 = vor.u32 %v17747_v11, %v11986_v9  ;;  %v11863_v15 = vor.u32 %v17713_v12, %v11860_v13  ;;  %v17745_v16 = vld [vmem:[%s28958_s3 + $0x1ac] sm:$0xf]  ;;  %v11988_v17 = vld [vmem:[%s28958_s3 + $0x1b8] sm:$0xf0]  ;;  %v11842_v19 = vld [vmem:[%s28958_s3 + $0x88] sm:$0xf] }
  0x22   :  { %v11991_v18 = vor.u32 %v17745_v16, %v11988_v17  ;;  %v17711_v20 = vld [vmem:[%s28958_s3 + $0x94] sm:$0xf0]  ;;  %v11970_v21 = vld [vmem:[%s28958_s3 + $0x188] sm:$0xf]  ;;  %v17709_v24 = vld [vmem:[%s28958_s3 + $0x8c] sm:$0xf] }
  0x23   :  { %521 = vmatpush.bf16.msra.mxu2 %v11771_v41  ;;  %v11843_v22 = vor.u32 %v17711_v20, %v11842_v19  ;;  %v17743_v23 = vld [vmem:[%s28958_s3 + $0x194] sm:$0xf0]  ;;  %v11844_v25 = vld [vmem:[%s28958_s3 + $0x98] sm:$0xf0]  ;;  %v17741_v28 = vld [vmem:[%s28958_s3 + $0x18c] sm:$0xf] }
  0x24   :  { %548 = vmatpush.bf16.msrb.mxu0 %v11791_v35  ;;  %v11971_v26 = vor.u32 %v17743_v23, %v11970_v21  ;;  %v11847_v27 = vor.u32 %v17709_v24, %v11844_v25  ;;  %v11972_v29 = vld [vmem:[%s28958_s3 + $0x198] sm:$0xf0]  ;;  %v11826_v31 = vld [vmem:[%s28958_s3 + $0x68] sm:$0xf]  ;;  %v17707_v32 = vld [vmem:[%s28958_s3 + $0x74] sm:$0xf0] }
  0x25   :  { %562 = vmatpush.bf16.msrb.mxu1 %v11919_v38  ;;  %535 = vmatpush.bf16.msra.mxu3 %v11899_v44  ;;  %v11975_v30 = vor.u32 %v17741_v28, %v11972_v29  ;;  %v11954_v33 = vld [vmem:[%s28958_s3 + $0x168] sm:$0xf]  ;;  %v11827_v34 = vor.u32 %v17707_v32, %v11826_v31  ;;  %v17739_v35 = vld [vmem:[%s28958_s3 + $0x174] sm:$0xf0]  ;;  %v17705_v36 = vld [vmem:[%s28958_s3 + $0x6c] sm:$0xf] }
  0x26   :  { %v11828_v37 = vld [vmem:[%s28958_s3 + $0x78] sm:$0xf0]  ;;  %v11955_v38 = vor.u32 %v17739_v35, %v11954_v33  ;;  %v17737_v40 = vld [vmem:[%s28958_s3 + $0x16c] sm:$0xf]  ;;  %v11810_v42 = vld [vmem:[%s28958_s3 + $0x48] sm:$0xf] }
  0x27   :  { %570 = vmatpush.bf16.msrb.mxu2 %v11891_v50  ;;  %v11831_v39 = vor.u32 %v17705_v36, %v11828_v37  ;;  %v11956_v41 = vld [vmem:[%s28958_s3 + $0x178] sm:$0xf0]  ;;  %v17703_v44 = vld [vmem:[%s28958_s3 + $0x54] sm:$0xf0]  ;;  %v17701_v49 = vld [vmem:[%s28958_s3 + $0x4c] sm:$0xf] }
  0x28   :  { %549 = vmatpush.bf16.msrb.mxu0 %v11775_v45  ;;  %v11959_v43 = vor.u32 %v17737_v40, %v11956_v41  ;;  %v11938_v45 = vld [vmem:[%s28958_s3 + $0x148] sm:$0xf]  ;;  %v11811_v47 = vor.u32 %v17703_v44, %v11810_v42  ;;  %v11812_v50 = vld [vmem:[%s28958_s3 + $0x58] sm:$0xf0]  ;;  %v17733_v51 = vld [vmem:[%s28958_s3 + $0x14c] sm:$0xf] }
  0x29   :  { %563 = vmatpush.bf16.msrb.mxu1 %v11903_v46  ;;  %584 = vmatpush.bf16.msrb.mxu3 %v12019_v54  ;;  %v17735_v46 = vld [vmem:[%s28958_s3 + $0x154] sm:$0xf0]  ;;  %v11815_v52 = vor.u32 %v17701_v49, %v11812_v50  ;;  %v11940_v53 = vld [vmem:[%s28958_s3 + $0x158] sm:$0xf0]  ;;  %v11794_v54 = vld [vmem:[%s28958_s3 + $0x28] sm:$0xf] }
  0x2a   :  { %v11939_v48 = vor.u32 %v17735_v46, %v11938_v45  ;;  %v11943_v56 = vor.u32 %v17733_v51, %v11940_v53  ;;  %v11922_v57 = vld [vmem:[%s28958_s3 + $0x128] sm:$0xf]  ;;  %v17697_v59 = vld [vmem:[%s28958_s3 + $0x2c] sm:$0xf]  ;;  %v11924_v63 = vld [vmem:[%s28958_s3 + $0x138] sm:$0xf0] }
  0x2b   :  { %571 = vmatpush.bf16.msrb.mxu2 %v11875_v61  ;;  %v11796_v61 = vld [vmem:[%s28958_s3 + $0x38] sm:$0xf0]  ;;  %v17729_v62 = vld [vmem:[%s28958_s3 + $0x12c] sm:$0xf]  ;;  %v17695_v2 = vld [vmem:[%s28958_s3 + $0x14] sm:$0xf0] }
  0x2c   :  { %598 = vmatpush.bf16.msra.mxu0 %v11895_v55  ;;  %v17699_v55 = vld [vmem:[%s28958_s3 + $0x34] sm:$0xf0]  ;;  %v11799_v3 = vor.u32 %v17697_v59, %v11796_v61  ;;  %v11927_v4 = vor.u32 %v17729_v62, %v11924_v63  ;;  %v17693_v7 = vld [vmem:[%s28958_s3 + $0xc] sm:$0xf]  ;;  %v11780_v8 = vld [vmem:[%s28958_s3 + $0x18] sm:$0xf0] }
  0x2d   :  { %612 = vmatpush.bf16.msra.mxu1 %v12023_v58  ;;  %585 = vmatpush.bf16.msrb.mxu3 %v12003_v1  ;;  %v17731_v58 = vld [vmem:[%s28958_s3 + $0x134] sm:$0xf0]  ;;  %v11795_v60 = vor.u32 %v17699_v55, %v11794_v54  ;;  %v11778_v1 = vld [vmem:[%s28958_s3 + $0x8] sm:$0xf]  ;;  %v17725_v9 = vld [vmem:[%s28958_s3 + $0x10c] sm:$0xf]  ;;  %v11783_v13 = vor.u32 %v17693_v7, %v11780_v8 }
  0x2e   :  { %v11923_v0 = vor.u32 %v17731_v58, %v11922_v57  ;;  %v11779_v11 = vor.u32 %v17695_v2, %v11778_v1  ;;  %v12506_v25 = vld [vmem:[%s28960_s5 + $0x3c0] sm:$0xf] }
  0x2f   :  { %572 = vmatpush.bf16.msrb.mxu2 %v11859_v10  ;;  %v11908_v10 = vld [vmem:[%s28958_s3 + $0x118] sm:$0xf0]  ;;  %v17816_v29 = vld [vmem:[%s28960_s5 + $0x1dc] sm:$0xf0] }
  0x30   :  { %599 = vmatpush.bf16.msra.mxu0 %v11879_v5  ;;  %v11906_v5 = vld [vmem:[%s28958_s3 + $0x108] sm:$0xf]  ;;  %v18008_v31 = vld [vmem:[%s28960_s5 + $0x7dc] sm:$0xf0] }
  0x31   :  { %613 = vmatpush.bf16.msra.mxu1 %v12007_v6  ;;  %586 = vmatpush.bf16.msrb.mxu3 %v11987_v14  ;;  %v17727_v6 = vld [vmem:[%s28958_s3 + $0x114] sm:$0xf0]  ;;  %v11911_v14 = vor.u32 %v17725_v9, %v11908_v10  ;;  %v17944_v35 = vld [vmem:[%s28960_s5 + $0x5dc] sm:$0xf0] }
  0x32   :  { %v11907_v12 = vor.u32 %v17727_v6, %v11906_v5  ;;  %v12474_v40 = vld [vmem:[%s28960_s5 + $0x380] sm:$0xf] }
  0x33   :  { %573 = vmatpush.bf16.msrb.mxu2 %v11843_v22  ;;  %v17872_v41 = vld [vmem:[%s28960_s5 + $0x39c] sm:$0xf0] }
  0x34   :  { %600 = vmatpush.bf16.msra.mxu0 %v11863_v15  ;;  %v56_v15 = vld [vmem:[%s28959_s2] sm:$0x3] }
  0x35   :  { %614 = vmatpush.bf16.msra.mxu1 %v11991_v18  ;;  %587 = vmatpush.bf16.msrb.mxu3 %v11971_v26  ;;  %v58_v18 = vperm.slane %v56_v15, 0  ;;  %v59_v19 = vperm.slane %v56_v15, 1  ;;  %v17880_v26 = vld [vmem:[%s28960_s5 + $0x3dc] sm:$0xf0] }
  0x36   :  { %v12218_v44 = vld [vmem:[%s28960_s5 + $0x180] sm:$0xf] }
  0x37   :  { %574 = vmatpush.bf16.msrb.mxu2 %v11827_v34  ;;  %v12762_v34 = vld [vmem:[%s28960_s5 + $0x5c0] sm:$0xf] }
  0x38   :  { %601 = vmatpush.bf16.msra.mxu0 %v11847_v27  ;;  %v12250_v27 = vld [vmem:[%s28960_s5 + $0x1c0] sm:$0xf] }
  0x39   :  { %615 = vmatpush.bf16.msra.mxu1 %v11975_v30  ;;  %588 = vmatpush.bf16.msrb.mxu3 %v11955_v38  ;;  %v13018_v30 = vld [vmem:[%s28960_s5 + $0x7c0] sm:$0xf]  ;;  %v12251_v42 = vor.u32 %v17816_v29, %v12250_v27 }
  0x3a   :  { %v17808_v45 = vld [vmem:[%s28960_s5 + $0x19c] sm:$0xf0]  ;;  %v13019_v46 = vor.u32 %v18008_v31, %v13018_v30 }
  0x3b   :  { %575 = vmatpush.bf16.msrb.mxu2 %v11811_v47  ;;  %v12986_v47 = vld [vmem:[%s28960_s5 + $0x780] sm:$0xf]  ;;  %v12219_v55 = vor.u32 %v17808_v45, %v12218_v44 }
  0x3c   :  { %602 = vmatpush.bf16.msra.mxu0 %v11831_v39  ;;  %v12507_v39 = vor.u32 %v17880_v26, %v12506_v25  ;;  %v18000_v49 = vld [vmem:[%s28960_s5 + $0x79c] sm:$0xf0] }
  0x3d   :  { %616 = vmatpush.bf16.msra.mxu1 %v11959_v43  ;;  %589 = vmatpush.bf16.msrb.mxu3 %v11939_v48  ;;  %v12763_v48 = vor.u32 %v17944_v35, %v12762_v34  ;;  %v12730_v50 = vld [vmem:[%s28960_s5 + $0x580] sm:$0xf]  ;;  %v12987_v58 = vor.u32 %v18000_v49, %v12986_v47  ;;  %v17876_v47 = vld [vmem:[%s28960_s5 + $0x3c4] sm:$0xf] }
  0x3e   :  { %v17936_v51 = vld [vmem:[%s28960_s5 + $0x59c] sm:$0xf0] }
  0x3f   :  { %576 = vmatpush.bf16.msrb.mxu2 %v11795_v60  ;;  %v12442_v53 = vld [vmem:[%s28960_s5 + $0x340] sm:$0xf]  ;;  %v12731_v60 = vor.u32 %v17936_v51, %v12730_v50  ;;  %v12508_v51 = vld [vmem:[%s28960_s5 + $0x3e0] sm:$0xf0] }
  0x40   :  { %603 = vmatpush.bf16.msra.mxu0 %v11815_v52  ;;  %v12475_v52 = vor.u32 %v17872_v41, %v12474_v40  ;;  %v17864_v54 = vld [vmem:[%s28960_s5 + $0x35c] sm:$0xf0] }
  0x41   :  { %617 = vmatpush.bf16.msra.mxu1 %v11943_v56  ;;  %590 = vmatpush.bf16.msrb.mxu3 %v11923_v0  ;;  %v12186_v56 = vld [vmem:[%s28960_s5 + $0x140] sm:$0xf]  ;;  %v12443_v0 = vor.u32 %v17864_v54, %v12442_v53  ;;  %v12252_v53 = vld [vmem:[%s28960_s5 + $0x1e0] sm:$0xf0] }
  0x42   :  { %v17800_v57 = vld [vmem:[%s28960_s5 + $0x15c] sm:$0xf0] }
  0x43   :  { %577 = vmatpush.bf16.msrb.mxu2 %v11779_v11  ;;  %v12954_v59 = vld [vmem:[%s28960_s5 + $0x740] sm:$0xf] }
  0x44   :  { %604 = vmatpush.bf16.msra.mxu0 %v11799_v3  ;;  %v17992_v61 = vld [vmem:[%s28960_s5 + $0x75c] sm:$0xf0]  ;;  %v12187_v3 = vor.u32 %v17800_v57, %v12186_v56  ;;  %v12511_v56 = vor.u32 %v17876_v47, %v12508_v51  ;;  %v17868_v57 = vld [vmem:[%s28960_s5 + $0x384] sm:$0xf] }
  0x45   :  { %618 = vmatpush.bf16.msra.mxu1 %v11927_v4  ;;  %591 = vmatpush.bf16.msrb.mxu3 %v11907_v12  ;;  %v12698_v62 = vld [vmem:[%s28960_s5 + $0x540] sm:$0xf]  ;;  %v12955_v6 = vor.u32 %v17992_v61, %v12954_v59  ;;  %v12476_v59 = vld [vmem:[%s28960_s5 + $0x3a0] sm:$0xf0] }
  0x46   :  { %v17928_v63 = vld [vmem:[%s28960_s5 + $0x55c] sm:$0xf0]  ;;  %v12220_v61 = vld [vmem:[%s28960_s5 + $0x1a0] sm:$0xf0] }
  0x47   :  { %v12410_v1 = vld [vmem:[%s28960_s5 + $0x300] sm:$0xf]  ;;  %v12699_v8 = vor.u32 %v17928_v63, %v12698_v62  ;;  %v12479_v62 = vor.u32 %v17868_v57, %v12476_v59 }
  0x48   :  { %605 = vmatpush.bf16.msra.mxu0 %v11783_v13  ;;  %v17856_v2 = vld [vmem:[%s28960_s5 + $0x31c] sm:$0xf0] }
  0x49   :  { %619 = vmatpush.bf16.msra.mxu1 %v11911_v14  ;;  %v12154_v4 = vld [vmem:[%s28960_s5 + $0x100] sm:$0xf]  ;;  %v12411_v12 = vor.u32 %v17856_v2, %v12410_v1  ;;  %v12444_v1 = vld [vmem:[%s28960_s5 + $0x360] sm:$0xf0] }
  0x4a   :  { %v17792_v5 = vld [vmem:[%s28960_s5 + $0x11c] sm:$0xf0] }
  0x4b   :  { %v12922_v7 = vld [vmem:[%s28960_s5 + $0x700] sm:$0xf]  ;;  %v12155_v15 = vor.u32 %v17792_v5, %v12154_v4  ;;  %v12412_v4 = vld [vmem:[%s28960_s5 + $0x320] sm:$0xf0] }
  0x4c   :  { %v17984_v9 = vld [vmem:[%s28960_s5 + $0x71c] sm:$0xf0] }
  0x4d   :  { %v12666_v10 = vld [vmem:[%s28960_s5 + $0x500] sm:$0xf] }
  0x4e   :  { %v17920_v11 = vld [vmem:[%s28960_s5 + $0x51c] sm:$0xf0] }
  0x4f   :  { %v12378_v13 = vld [vmem:[%s28960_s5 + $0x2c0] sm:$0xf] }
  0x50   :  { %v17848_v14 = vld [vmem:[%s28960_s5 + $0x2dc] sm:$0xf0] }
  0x51   :  { %v12346_v25 = vld [vmem:[%s28960_s5 + $0x280] sm:$0xf] }
  0x52   :  { %v17840_v27 = vld [vmem:[%s28960_s5 + $0x29c] sm:$0xf0] }
  0x53   :  { %v17776_v29 = vld [vmem:[%s28960_s5 + $0x9c] sm:$0xf0]  ;;  %v12347_v34 = vor.u32 %v17840_v27, %v12346_v25  ;;  %v12156_v25 = vld [vmem:[%s28960_s5 + $0x120] sm:$0xf0] }
  0x54   :  { %v12314_v35 = vld [vmem:[%s28960_s5 + $0x240] sm:$0xf]  ;;  %v17836_v27 = vld [vmem:[%s28960_s5 + $0x284] sm:$0xf] }
  0x55   :  { %v12826_v41 = vld [vmem:[%s28960_s5 + $0x640] sm:$0xf] }
  0x56   :  { %v12282_v44 = vld [vmem:[%s28960_s5 + $0x200] sm:$0xf] }
  0x57   :  { %v17824_v45 = vld [vmem:[%s28960_s5 + $0x21c] sm:$0xf0] }
  0x58   :  { %v17760_v49 = vld [vmem:[%s28960_s5 + $0x1c] sm:$0xf0]  ;;  %v12283_v54 = vor.u32 %v17824_v45, %v12282_v44  ;;  %v17988_v44 = vld [vmem:[%s28960_s5 + $0x744] sm:$0xf] }
  0x88   :  { %v95_v16 = vpop.f32.mrf.mxu0 }
  0x89   :  { %v109_v17 = vpop.f32.mrf.mxu1  ;;  %v96_v20 = vadd.f32 %v95_v16, %v58_v18  ;;  %v12122_v16 = vld [vmem:[%s28960_s5 + $0xc0] sm:$0xf] }
  0x8a   :  { %v110_v21 = vadd.f32 %v109_v17, %v59_v19  ;;  %v17784_v17 = vld [vmem:[%s28960_s5 + $0xdc] sm:$0xf0] }
  0x8b   :  { %v114_v32 = vmax.f32 %v96_v20, 0.0  ;;  %v12667_v20 = vor.u32 %v17920_v11, %v12666_v10  ;;  %v12123_v26 = vor.u32 %v17784_v17, %v12122_v16  ;;  %v12188_v10 = vld [vmem:[%s28960_s5 + $0x160] sm:$0xf0] }
  0x8c   :  { %v115_v36 = vmax.f32 %v110_v21, 0.0  ;;  %v17976_v21 = vld [vmem:[%s28960_s5 + $0x6dc] sm:$0xf0]  ;;  %v12380_v16 = vld [vmem:[%s28960_s5 + $0x2e0] sm:$0xf0] }
  0x8d   :  { %v18004_v17 = vld [vmem:[%s28960_s5 + $0x7c4] sm:$0xf] }
  0x90   :  { %v97_v22 = vpop.f32.mrf.mxu0 }
  0x91   :  { %v98_v23 = vadd.f32 %v97_v22, %v58_v18  ;;  %v111_v24 = vpop.f32.mrf.mxu1  ;;  %v12923_v18 = vor.u32 %v17984_v9, %v12922_v7  ;;  %v12634_v22 = vld [vmem:[%s28960_s5 + $0x4c0] sm:$0xf]  ;;  %v17796_v9 = vld [vmem:[%s28960_s5 + $0x144] sm:$0xf] }
  0x92   :  { %v112_v28 = vadd.f32 %v111_v24, %v59_v19  ;;  %v12890_v19 = vld [vmem:[%s28960_s5 + $0x6c0] sm:$0xf]  ;;  %v12379_v24 = vor.u32 %v17848_v14, %v12378_v13  ;;  %v12191_v11 = vor.u32 %v17796_v9, %v12188_v10  ;;  %v12668_v9 = vld [vmem:[%s28960_s5 + $0x520] sm:$0xf0] }
  0x93   :  { %v116_v33 = vmax.f32 %v98_v23, 0.0  ;;  %v17912_v23 = vld [vmem:[%s28960_s5 + $0x4dc] sm:$0xf0]  ;;  %v12891_v30 = vor.u32 %v17976_v21, %v12890_v19  ;;  %v13020_v19 = vld [vmem:[%s28960_s5 + $0x7e0] sm:$0xf0] }
  0x94   :  { %v117_v37 = vmax.f32 %v112_v28, 0.0  ;;  %v12090_v28 = vld [vmem:[%s28960_s5 + $0x80] sm:$0xf]  ;;  %v12635_v31 = vor.u32 %v17912_v23, %v12634_v22  ;;  %v13023_v22 = vor.u32 %v18004_v17, %v13020_v19  ;;  %v17956_v17 = vld [vmem:[%s28960_s5 + $0x644] sm:$0xf] }
  0x95   :  { %v19699_v38 = vpack.c.bf16 %v116_v33, %v114_v32  ;;  %v12858_v32 = vld [vmem:[%s28960_s5 + $0x680] sm:$0xf] }
  0x96   :  { %v19707_v43 = vpack.c.bf16 %v117_v37, %v115_v36  ;;  %v17968_v33 = vld [vmem:[%s28960_s5 + $0x69c] sm:$0xf0]  ;;  %v12091_v36 = vor.u32 %v17776_v29, %v12090_v28  ;;  %v12348_v28 = vld [vmem:[%s28960_s5 + $0x2a0] sm:$0xf0] }
  0x97   :  { %522 = vmatmul.bf16.vlgmr.msra.gmra.mxu2 %v19699_v38  ;;  %550 = vmatmul.bf16.vlgmr.msrb.gmra.mxu0 %v19699_v38  ;;  %v17832_v37 = vld [vmem:[%s28960_s5 + $0x25c] sm:$0xf0]  ;;  %v12859_v40 = vor.u32 %v17968_v33, %v12858_v32  ;;  %v17996_v29 = vld [vmem:[%s28960_s5 + $0x784] sm:$0xf] }
  0x98   :  { %536 = vmatmul.bf16.vlgmr.msra.gmra.mxu3 %v19707_v43  ;;  %564 = vmatmul.bf16.vlgmr.msrb.gmra.mxu1 %v19707_v43  ;;  %v17904_v7 = vld [vmem:[%s28960_s5 + $0x49c] sm:$0xf0] }
  0x99   :  { %2206 = vmatpush.bf16.msra.mxu3 %v12507_v39  ;;  %2192 = vmatpush.bf16.msra.mxu2 %v12251_v42  ;;  %v17768_v39 = vld [vmem:[%s28960_s5 + $0x5c] sm:$0xf0] }
  0x9a   :  { %2234 = vmatpush.bf16.msrb.mxu1 %v13019_v46  ;;  %2220 = vmatpush.bf16.msrb.mxu0 %v12763_v48  ;;  %v17960_v42 = vld [vmem:[%s28960_s5 + $0x65c] sm:$0xf0] }
  0x9b   :  { %v12026_v48 = vld [vmem:[%s28960_s5] sm:$0xf]  ;;  %v12827_v50 = vor.u32 %v17960_v42, %v12826_v41  ;;  %v17828_v42 = vld [vmem:[%s28960_s5 + $0x244] sm:$0xf] }
  0x9c   :  { %v17952_v13 = vld [vmem:[%s28960_s5 + $0x61c] sm:$0xf0] }
  0x9d   :  { %2207 = vmatpush.bf16.msra.mxu3 %v12475_v52  ;;  %2193 = vmatpush.bf16.msra.mxu2 %v12219_v55  ;;  %v17812_v52 = vld [vmem:[%s28960_s5 + $0x1c4] sm:$0xf]  ;;  %v12027_v55 = vor.u32 %v17760_v49, %v12026_v48  ;;  %v17896_v21 = vld [vmem:[%s28960_s5 + $0x45c] sm:$0xf0] }
  0x9e   :  { %2235 = vmatpush.bf16.msrb.mxu1 %v12987_v58  ;;  %2221 = vmatpush.bf16.msrb.mxu0 %v12731_v60  ;;  %v12255_v58 = vor.u32 %v17812_v52, %v12252_v53  ;;  %v17804_v60 = vld [vmem:[%s28960_s5 + $0x184] sm:$0xf]  ;;  %v12538_v32 = vld [vmem:[%s28960_s5 + $0x400] sm:$0xf] }
  0x9f   :  { %v12223_v63 = vor.u32 %v17804_v60, %v12220_v61  ;;  %v17888_v33 = vld [vmem:[%s28960_s5 + $0x41c] sm:$0xf0]  ;;  %v17772_v48 = vld [vmem:[%s28960_s5 + $0x84] sm:$0xf] }
  0xa0   :  { %v12092_v49 = vld [vmem:[%s28960_s5 + $0xa0] sm:$0xf0] }
  0xa1   :  { %2208 = vmatpush.bf16.msra.mxu3 %v12443_v0  ;;  %2194 = vmatpush.bf16.msra.mxu2 %v12187_v3  ;;  %v17860_v0 = vld [vmem:[%s28960_s5 + $0x344] sm:$0xf]  ;;  %v12095_v51 = vor.u32 %v17772_v48, %v12092_v49 }
  0xa2   :  { %2236 = vmatpush.bf16.msrb.mxu1 %v12955_v6  ;;  %2222 = vmatpush.bf16.msrb.mxu0 %v12699_v8  ;;  %v12447_v2 = vor.u32 %v17860_v0, %v12444_v1  ;;  %v17852_v3 = vld [vmem:[%s28960_s5 + $0x304] sm:$0xf]  ;;  %v12602_v6 = vld [vmem:[%s28960_s5 + $0x480] sm:$0xf] }
  0xa3   :  { %v12415_v5 = vor.u32 %v17852_v3, %v12412_v4  ;;  %v12603_v8 = vor.u32 %v17904_v7, %v12602_v6  ;;  %v12732_v52 = vld [vmem:[%s28960_s5 + $0x5a0] sm:$0xf0] }
  0xa4   :  { %v17764_v60 = vld [vmem:[%s28960_s5 + $0x44] sm:$0xf] }
  0xa5   :  { %2209 = vmatpush.bf16.msra.mxu3 %v12411_v12  ;;  %2195 = vmatpush.bf16.msra.mxu2 %v12155_v15  ;;  %v12794_v12 = vld [vmem:[%s28960_s5 + $0x600] sm:$0xf]  ;;  %v17844_v15 = vld [vmem:[%s28960_s5 + $0x2c4] sm:$0xf] }
  0xa6   :  { %2237 = vmatpush.bf16.msrb.mxu1 %v12923_v18  ;;  %2223 = vmatpush.bf16.msrb.mxu0 %v12667_v20  ;;  %v12795_v14 = vor.u32 %v17952_v13, %v12794_v12  ;;  %v12383_v18 = vor.u32 %v17844_v15, %v12380_v16  ;;  %v12570_v20 = vld [vmem:[%s28960_s5 + $0x440] sm:$0xf]  ;;  %v12060_v61 = vld [vmem:[%s28960_s5 + $0x60] sm:$0xf0] }
  0xa7   :  { %578 = vmatmul.bf16.vlgmr.msrb.gmra.mxu2 %v19699_v38  ;;  %606 = vmatmul.bf16.vlgmr.msra.gmra.mxu0 %v19699_v38  ;;  %v12058_v38 = vld [vmem:[%s28960_s5 + $0x40] sm:$0xf]  ;;  %v12571_v23 = vor.u32 %v17896_v21, %v12570_v20  ;;  %v12700_v0 = vld [vmem:[%s28960_s5 + $0x560] sm:$0xf0] }
  0xa8   :  { %592 = vmatmul.bf16.vlgmr.msrb.gmra.mxu3 %v19707_v43  ;;  %620 = vmatmul.bf16.vlgmr.msra.gmra.mxu1 %v19707_v43  ;;  %v12315_v43 = vor.u32 %v17832_v37, %v12314_v35  ;;  %v12059_v46 = vor.u32 %v17768_v39, %v12058_v38  ;;  %v12539_v35 = vor.u32 %v17888_v33, %v12538_v32  ;;  %v12124_v37 = vld [vmem:[%s28960_s5 + $0xe0] sm:$0xf0] }
  0xa9   :  { %2210 = vmatpush.bf16.msra.mxu3 %v12379_v24  ;;  %2196 = vmatpush.bf16.msra.mxu2 %v12123_v26  ;;  %v17788_v24 = vld [vmem:[%s28960_s5 + $0x104] sm:$0xf] }
  0xaa   :  { %2238 = vmatpush.bf16.msrb.mxu1 %v12891_v30  ;;  %2224 = vmatpush.bf16.msrb.mxu0 %v12635_v31  ;;  %v12159_v26 = vor.u32 %v17788_v24, %v12156_v25  ;;  %v12351_v30 = vor.u32 %v17836_v27, %v12348_v28  ;;  %v12988_v31 = vld [vmem:[%s28960_s5 + $0x7a0] sm:$0xf0] }
  0xab   :  { %v17940_v38 = vld [vmem:[%s28960_s5 + $0x5c4] sm:$0xf] }
  0xac   :  { %v12892_v3 = vld [vmem:[%s28960_s5 + $0x6e0] sm:$0xf0] }
  0xad   :  { %2211 = vmatpush.bf16.msra.mxu3 %v12347_v34  ;;  %2197 = vmatpush.bf16.msra.mxu2 %v12091_v36  ;;  %v12991_v34 = vor.u32 %v17996_v29, %v12988_v31  ;;  %v17780_v36 = vld [vmem:[%s28960_s5 + $0xc4] sm:$0xf] }
  0xae   :  { %2239 = vmatpush.bf16.msrb.mxu1 %v12859_v40  ;;  %2225 = vmatpush.bf16.msrb.mxu0 %v12603_v8  ;;  %v12127_v39 = vor.u32 %v17780_v36, %v12124_v37  ;;  %v12764_v40 = vld [vmem:[%s28960_s5 + $0x5e0] sm:$0xf0] }
  0xaf   :  { %v12767_v41 = vor.u32 %v17940_v38, %v12764_v40  ;;  %v12028_v6 = vld [vmem:[%s28960_s5 + $0x20] sm:$0xf0] }
  0xb0   :  { %v17916_v7 = vld [vmem:[%s28960_s5 + $0x504] sm:$0xf] }
  0xb1   :  { %2212 = vmatpush.bf16.msra.mxu3 %v12315_v43  ;;  %2198 = vmatpush.bf16.msra.mxu2 %v12059_v46  ;;  %v12316_v43 = vld [vmem:[%s28960_s5 + $0x260] sm:$0xf0]  ;;  %v12671_v10 = vor.u32 %v17916_v7, %v12668_v9  ;;  %v17809_v9 = vld [vmem:[%s28960_s5 + $0x1a4] sm:$0xf0] }
  0xb2   :  { %2240 = vmatpush.bf16.msrb.mxu1 %v12827_v50  ;;  %2226 = vmatpush.bf16.msrb.mxu0 %v12571_v23  ;;  %v12319_v45 = vor.u32 %v17828_v42, %v12316_v43  ;;  %v12956_v46 = vld [vmem:[%s28960_s5 + $0x760] sm:$0xf0]  ;;  %v20056_v23 = vld [vmem:[%s28961_s4] sm:$0xf] }
  0xb3   :  { %v12959_v47 = vor.u32 %v17988_v44, %v12956_v46  ;;  %v17932_v50 = vld [vmem:[%s28960_s5 + $0x584] sm:$0xf]  ;;  %v186_v38 = vperm.slane %v20056_v23, 0  ;;  %v12514_v46 = vld [vmem:[%s28960_s5 + $0x3c8] sm:$0xf] }
  0xb4   :  { %v12735_v53 = vor.u32 %v17932_v50, %v12732_v52  ;;  %v12860_v12 = vld [vmem:[%s28960_s5 + $0x6a0] sm:$0xf0] }
  0xb5   :  { %2213 = vmatpush.bf16.msra.mxu3 %v12283_v54  ;;  %2199 = vmatpush.bf16.msra.mxu2 %v12027_v55  ;;  %v17820_v54 = vld [vmem:[%s28960_s5 + $0x204] sm:$0xf] }
  0xb6   :  { %2241 = vmatpush.bf16.msrb.mxu1 %v12795_v14  ;;  %2227 = vmatpush.bf16.msrb.mxu0 %v12539_v35  ;;  %v12284_v55 = vld [vmem:[%s28960_s5 + $0x220] sm:$0xf0] }
  0xb7   :  { %v12287_v57 = vor.u32 %v17820_v54, %v12284_v55  ;;  %v17908_v14 = vld [vmem:[%s28960_s5 + $0x4c4] sm:$0xf] }
  0xb8   :  { %v12636_v15 = vld [vmem:[%s28960_s5 + $0x4e0] sm:$0xf0] }
  0xb9   :  { %2262 = vmatpush.bf16.msrb.mxu3 %v12511_v56  ;;  %2248 = vmatpush.bf16.msrb.mxu2 %v12255_v58  ;;  %v17980_v56 = vld [vmem:[%s28960_s5 + $0x704] sm:$0xf]  ;;  %v12639_v16 = vor.u32 %v17908_v14, %v12636_v15  ;;  %v12418_v14 = vld [vmem:[%s28960_s5 + $0x308] sm:$0xf] }
  0xba   :  { %2290 = vmatpush.bf16.msra.mxu1 %v13023_v22  ;;  %2276 = vmatpush.bf16.msra.mxu0 %v12767_v41  ;;  %v12924_v58 = vld [vmem:[%s28960_s5 + $0x720] sm:$0xf0]  ;;  %v17857_v15 = vld [vmem:[%s28960_s5 + $0x324] sm:$0xf0] }
  0xbb   :  { %v12927_v59 = vor.u32 %v17980_v56, %v12924_v58  ;;  %v17900_v20 = vld [vmem:[%s28960_s5 + $0x484] sm:$0xf]  ;;  %v12482_v56 = vld [vmem:[%s28960_s5 + $0x388] sm:$0xf] }
  0xbc   :  { %v12604_v21 = vld [vmem:[%s28960_s5 + $0x4a0] sm:$0xf0] }
  0xbd   :  { %2263 = vmatpush.bf16.msrb.mxu3 %v12479_v62  ;;  %2249 = vmatpush.bf16.msrb.mxu2 %v12223_v63  ;;  %v12063_v62 = vor.u32 %v17764_v60, %v12060_v61  ;;  %v17924_v63 = vld [vmem:[%s28960_s5 + $0x544] sm:$0xf]  ;;  %v12607_v22 = vor.u32 %v17900_v20, %v12604_v21  ;;  %v189_v60 = vperm.slane %v20056_v23, 3  ;;  %v12194_v20 = vld [vmem:[%s28960_s5 + $0x148] sm:$0xf] }
  0xbe   :  { %2291 = vmatpush.bf16.msra.mxu1 %v12991_v34  ;;  %2277 = vmatpush.bf16.msra.mxu0 %v12735_v53  ;;  %v12703_v1 = vor.u32 %v17924_v63, %v12700_v0  ;;  %v17948_v24 = vld [vmem:[%s28960_s5 + $0x604] sm:$0xf]  ;;  %v17817_v63 = vld [vmem:[%s28960_s5 + $0x1e4] sm:$0xf0] }
  0xbf   :  { %v12796_v25 = vld [vmem:[%s28960_s5 + $0x620] sm:$0xf0]  ;;  %v17801_v21 = vld [vmem:[%s28960_s5 + $0x164] sm:$0xf0] }
  0xc0   :  { %v17892_v28 = vld [vmem:[%s28960_s5 + $0x444] sm:$0xf] }
  0xc1   :  { %2264 = vmatpush.bf16.msrb.mxu3 %v12447_v2  ;;  %2250 = vmatpush.bf16.msrb.mxu2 %v12191_v11  ;;  %v17972_v2 = vld [vmem:[%s28960_s5 + $0x6c4] sm:$0xf] }
  0xc2   :  { %2292 = vmatpush.bf16.msra.mxu1 %v12959_v47  ;;  %v12895_v4 = vor.u32 %v17972_v2, %v12892_v3  ;;  %2278 = vmatpush.bf16.msra.mxu0 %v12703_v1  ;;  %v17964_v11 = vld [vmem:[%s28960_s5 + $0x684] sm:$0xf]  ;;  %v17881_v47 = vld [vmem:[%s28960_s5 + $0x3e4] sm:$0xf0] }
  0xc3   :  { %v12863_v13 = vor.u32 %v17964_v11, %v12860_v12  ;;  %v12572_v29 = vld [vmem:[%s28960_s5 + $0x460] sm:$0xf0]  ;;  %v12450_v3 = vld [vmem:[%s28960_s5 + $0x348] sm:$0xf]  ;;  %v188_v12 = vperm.slane %v20056_v23, 2 }
  0xc4   :  { %v12575_v32 = vor.u32 %v17892_v28, %v12572_v29  ;;  %v17884_v33 = vld [vmem:[%s28960_s5 + $0x404] sm:$0xf]  ;;  %v13026_v28 = vld [vmem:[%s28960_s5 + $0x7c8] sm:$0xf] }
  0xc5   :  { %2265 = vmatpush.bf16.msrb.mxu3 %v12415_v5  ;;  %2251 = vmatpush.bf16.msrb.mxu2 %v12159_v26  ;;  %v17756_v5 = vld [vmem:[%s28960_s5 + $0x4] sm:$0xf]  ;;  %v12799_v26 = vor.u32 %v17948_v24, %v12796_v25  ;;  %v12386_v24 = vld [vmem:[%s28960_s5 + $0x2c8] sm:$0xf] }
  0xc6   :  { %2293 = vmatpush.bf16.msra.mxu1 %v12927_v59  ;;  %v12031_v8 = vor.u32 %v17756_v5, %v12028_v6  ;;  %2279 = vmatpush.bf16.msra.mxu0 %v12671_v10  ;;  %v12540_v34 = vld [vmem:[%s28960_s5 + $0x420] sm:$0xf0]  ;;  %v18009_v29 = vld [vmem:[%s28960_s5 + $0x7e4] sm:$0xf0] }
  0xc7   :  { %v12543_v36 = vor.u32 %v17884_v33, %v12540_v34  ;;  %v12162_v33 = vld [vmem:[%s28960_s5 + $0x108] sm:$0xf] }
  0xc8   :  { %v17793_v34 = vld [vmem:[%s28960_s5 + $0x124] sm:$0xf0] }
  0xc9   :  { %2266 = vmatpush.bf16.msrb.mxu3 %v12383_v18  ;;  %2252 = vmatpush.bf16.msrb.mxu2 %v12127_v39  ;;  %v12828_v18 = vld [vmem:[%s28960_s5 + $0x660] sm:$0xf0] }
  0xca   :  { %2294 = vmatpush.bf16.msra.mxu1 %v12895_v4  ;;  %v12831_v19 = vor.u32 %v17956_v17, %v12828_v18  ;;  %2280 = vmatpush.bf16.msra.mxu0 %v12639_v16  ;;  %v17865_v4 = vld [vmem:[%s28960_s5 + $0x364] sm:$0xf0] }
  0xcb   :  { %v12451_v11 = vor.u32 %v17865_v4, %v12450_v3  ;;  %v17937_v3 = vld [vmem:[%s28960_s5 + $0x5a4] sm:$0xf0] }
  0xcd   :  { %2267 = vmatpush.bf16.msrb.mxu3 %v12351_v30  ;;  %2253 = vmatpush.bf16.msrb.mxu2 %v12095_v51  ;;  %v187_v30 = vperm.slane %v20056_v23, 1  ;;  %v12515_v51 = vor.u32 %v17881_v47, %v12514_v46  ;;  %v12419_v23 = vor.u32 %v17857_v15, %v12418_v14  ;;  %v12163_v46 = vor.u32 %v17793_v34, %v12162_v33  ;;  %v12130_v47 = vld [vmem:[%s28960_s5 + $0xc8] sm:$0xf]  ;;  %v12516_v14 = vld [vmem:[%s28960_s5 + $0x3e8] sm:$0xf0] }
  0xce   :  { %2295 = vmatpush.bf16.msra.mxu1 %v12863_v13  ;;  %2281 = vmatpush.bf16.msra.mxu0 %v12607_v22  ;;  %v12066_v15 = vld [vmem:[%s28960_s5 + $0x48] sm:$0xf]  ;;  %v17813_v33 = vld [vmem:[%s28960_s5 + $0x1cc] sm:$0xf] }
  0xcf   :  { %v12260_v34 = vld [vmem:[%s28960_s5 + $0x1e8] sm:$0xf0] }
  0xd1   :  { %2268 = vmatpush.bf16.msrb.mxu3 %v12319_v45  ;;  %2254 = vmatpush.bf16.msrb.mxu2 %v12063_v62  ;;  %v12258_v62 = vld [vmem:[%s28960_s5 + $0x1c8] sm:$0xf] }
  0xd2   :  { %2296 = vmatpush.bf16.msra.mxu1 %v12831_v19  ;;  %2282 = vmatpush.bf16.msra.mxu0 %v12575_v32  ;;  %v12259_v5 = vor.u32 %v17817_v63, %v12258_v62  ;;  %v12098_v63 = vld [vmem:[%s28960_s5 + $0x88] sm:$0xf] }
  0xd5   :  { %2269 = vmatpush.bf16.msrb.mxu3 %v12287_v57  ;;  %2255 = vmatpush.bf16.msrb.mxu2 %v12031_v8  ;;  %v17873_v57 = vld [vmem:[%s28960_s5 + $0x3a4] sm:$0xf0] }
  0xd6   :  { %2297 = vmatpush.bf16.msra.mxu1 %v12799_v26  ;;  %2283 = vmatpush.bf16.msra.mxu0 %v12543_v36  ;;  %v12483_v0 = vor.u32 %v17873_v57, %v12482_v56  ;;  %v12226_v8 = vld [vmem:[%s28960_s5 + $0x188] sm:$0xf] }
  0xd7   :  { %v12227_v17 = vor.u32 %v17809_v9, %v12226_v8  ;;  %v17833_v56 = vld [vmem:[%s28960_s5 + $0x264] sm:$0xf0] }
  0xd8   :  { %v17825_v8 = vld [vmem:[%s28960_s5 + $0x224] sm:$0xf0] }
  0xd9   :  { %v12930_v9 = vld [vmem:[%s28960_s5 + $0x708] sm:$0xf] }
 0x114   :  { %v551_v27 = vpop.f32.mrf.mxu0 }
 0x115   :  { %v565_v31 = vpop.f32.mrf.mxu1  ;;  %v552_v35 = vadd.f32 %v551_v27, %v187_v30  ;;  %v17849_v27 = vld [vmem:[%s28960_s5 + $0x2e4] sm:$0xf0] }
 0x116   :  { %v12387_v36 = vor.u32 %v17849_v27, %v12386_v24  ;;  %v12484_v27 = vld [vmem:[%s28960_s5 + $0x3a8] sm:$0xf0] }
 0x117   :  { %v566_v41 = vadd.f32 %v565_v31, %v552_v35 }
 0x119   :  { %v627_v48 = vmax.f32 %v566_v41, 0.0 }
 0x11a   :  { %v523_v37 = vpop.f32.mrf.mxu2 }
 0x11b   :  { %v537_v39 = vpop.f32.mrf.mxu3  ;;  %v524_v44 = vadd.f32 %v523_v37, %v186_v38  ;;  %v13027_v37 = vor.u32 %v18009_v29, %v13026_v28  ;;  %v12034_v28 = vld [vmem:[%s28960_s5 + $0x8] sm:$0xf] }
 0x11c   :  { %v553_v40 = vpop.f32.mrf.mxu0  ;;  %v17761_v29 = vld [vmem:[%s28960_s5 + $0x24] sm:$0xf0] }
 0x11d   :  { %v554_v42 = vadd.f32 %v553_v40, %v187_v30  ;;  %v567_v43 = vpop.f32.mrf.mxu1  ;;  %v538_v52 = vadd.f32 %v537_v39, %v524_v44  ;;  %v12195_v30 = vor.u32 %v17801_v21, %v12194_v20  ;;  %v18001_v44 = vld [vmem:[%s28960_s5 + $0x7a4] sm:$0xf0] }
 0x11f   :  { %v568_v45 = vadd.f32 %v567_v43, %v554_v42  ;;  %v626_v1 = vmax.f32 %v538_v52, 0.0  ;;  %v17841_v42 = vld [vmem:[%s28960_s5 + $0x2a4] sm:$0xf0] }
 0x120   :  { %v12994_v43 = vld [vmem:[%s28960_s5 + $0x788] sm:$0xf] }
 0x121   :  { %v631_v49 = vmax.f32 %v568_v45, 0.0 }
 0x122   :  { %v525_v50 = vpop.f32.mrf.mxu2 }
 0x123   :  { %v20084_v53 = vpack.c.bf16 %v631_v49, %v627_v48  ;;  %v526_v54 = vadd.f32 %v525_v50, %v186_v38  ;;  %v539_v55 = vpop.f32.mrf.mxu3  ;;  %v12354_v38 = vld [vmem:[%s28960_s5 + $0x288] sm:$0xf] }
 0x124   :  { %v607_v58 = vpop.f32.mrf.mxu0  ;;  %v17785_v49 = vld [vmem:[%s28960_s5 + $0xe4] sm:$0xf0]  ;;  %v12355_v52 = vor.u32 %v17841_v42, %v12354_v38  ;;  %v12035_v38 = vor.u32 %v17761_v29, %v12034_v28  ;;  %v12452_v42 = vld [vmem:[%s28960_s5 + $0x368] sm:$0xf0] }
 0x125   :  { %v540_v59 = vadd.f32 %v539_v55, %v526_v54  ;;  %v621_v61 = vpop.f32.mrf.mxu1  ;;  %2214 = vmatmul.bf16.vlgmr.msra.gmra.mxu3 %v20084_v53  ;;  %v608_v7 = vadd.f32 %v607_v58, %v189_v60  ;;  %v12770_v50 = vld [vmem:[%s28960_s5 + $0x5c8] sm:$0xf]  ;;  %v12995_v54 = vor.u32 %v18001_v44, %v12994_v43  ;;  %v12263_v43 = vor.u32 %v17813_v33, %v12260_v34  ;;  %v17989_v33 = vld [vmem:[%s28960_s5 + $0x74c] sm:$0xf] }
 0x126   :  { %2318 = vmatpush.bf16.msra.mxu3 %v12515_v51  ;;  %v17945_v51 = vld [vmem:[%s28960_s5 + $0x5e4] sm:$0xf0]  ;;  %v12964_v34 = vld [vmem:[%s28960_s5 + $0x768] sm:$0xf0] }
 0x127   :  { %v630_v2 = vmax.f32 %v540_v59, 0.0  ;;  %v622_v18 = vadd.f32 %v621_v61, %v608_v7  ;;  %v12322_v55 = vld [vmem:[%s28960_s5 + $0x248] sm:$0xf]  ;;  %v12131_v61 = vor.u32 %v17785_v49, %v12130_v47  ;;  %v12771_v62 = vor.u32 %v17945_v51, %v12770_v50  ;;  %v17805_v47 = vld [vmem:[%s28960_s5 + $0x18c] sm:$0xf] }
 0x128   :  { %v12962_v59 = vld [vmem:[%s28960_s5 + $0x748] sm:$0xf]  ;;  %v12323_v4 = vor.u32 %v17833_v56, %v12322_v55  ;;  %v12420_v55 = vld [vmem:[%s28960_s5 + $0x328] sm:$0xf0] }
 0x129   :  { %v20106_v6 = vpack.c.bf16 %v630_v2, %v626_v1  ;;  %v629_v31 = vmax.f32 %v622_v18, 0.0  ;;  %v17777_v1 = vld [vmem:[%s28960_s5 + $0xa4] sm:$0xf0] }
 0x12a   :  { %2319 = vmatpush.bf16.msra.mxu3 %v12483_v0  ;;  %v579_v10 = vpop.f32.mrf.mxu2  ;;  %v12738_v2 = vld [vmem:[%s28960_s5 + $0x588] sm:$0xf] }
 0x12b   :  { %v593_v13 = vpop.f32.mrf.mxu3  ;;  %2200 = vmatmul.bf16.vlgmr.msra.gmra.mxu2 %v20106_v6  ;;  %v580_v25 = vadd.f32 %v579_v10, %v188_v12  ;;  %v12290_v7 = vld [vmem:[%s28960_s5 + $0x208] sm:$0xf] }
 0x12c   :  { %2304 = vmatpush.bf16.msra.mxu2 %v12259_v5  ;;  %v609_v16 = vpop.f32.mrf.mxu0  ;;  %v17985_v10 = vld [vmem:[%s28960_s5 + $0x724] sm:$0xf0] }
 0x12d   :  { %v610_v19 = vadd.f32 %v609_v16, %v189_v60  ;;  %v623_v22 = vpop.f32.mrf.mxu1  ;;  %v594_v39 = vadd.f32 %v593_v13, %v580_v25  ;;  %v17993_v60 = vld [vmem:[%s28960_s5 + $0x764] sm:$0xf0]  ;;  %v17877_v13 = vld [vmem:[%s28960_s5 + $0x3cc] sm:$0xf]  ;;  %v12931_v20 = vor.u32 %v17985_v10, %v12930_v9 }
 0x12e   :  { %2320 = vmatpush.bf16.msra.mxu3 %v12451_v11  ;;  %v12963_v5 = vor.u32 %v17993_v60, %v12962_v59  ;;  %v12099_v11 = vor.u32 %v17777_v1, %v12098_v63  ;;  %v17769_v16 = vld [vmem:[%s28960_s5 + $0x64] sm:$0xf0]  ;;  %v12519_v21 = vor.u32 %v17877_v13, %v12516_v14  ;;  %v17797_v60 = vld [vmem:[%s28960_s5 + $0x14c] sm:$0xf] }
 0x12f   :  { %v624_v26 = vadd.f32 %v623_v22, %v610_v19  ;;  %v628_v57 = vmax.f32 %v594_v39, 0.0  ;;  %v17929_v18 = vld [vmem:[%s28960_s5 + $0x564] sm:$0xf0]  ;;  %v12291_v19 = vor.u32 %v17825_v8, %v12290_v7  ;;  %v12067_v24 = vor.u32 %v17769_v16, %v12066_v15  ;;  %v13028_v7 = vld [vmem:[%s28960_s5 + $0x7e8] sm:$0xf0] }
 0x130   :  { %2305 = vmatpush.bf16.msra.mxu2 %v12227_v17  ;;  %v12706_v17 = vld [vmem:[%s28960_s5 + $0x548] sm:$0xf]  ;;  %v12164_v13 = vld [vmem:[%s28960_s5 + $0x128] sm:$0xf0] }
 0x131   :  { %v633_v32 = vmax.f32 %v624_v26, 0.0  ;;  %v12898_v22 = vld [vmem:[%s28960_s5 + $0x6c8] sm:$0xf]  ;;  %v12707_v25 = vor.u32 %v17929_v18, %v12706_v17  ;;  %v17869_v26 = vld [vmem:[%s28960_s5 + $0x38c] sm:$0xf] }
 0x132   :  { %2321 = vmatpush.bf16.msra.mxu3 %v12419_v23  ;;  %v581_v35 = vpop.f32.mrf.mxu2  ;;  %v17977_v23 = vld [vmem:[%s28960_s5 + $0x6e4] sm:$0xf0]  ;;  %v17837_v16 = vld [vmem:[%s28960_s5 + $0x28c] sm:$0xf] }
 0x133   :  { %v20149_v40 = vpack.c.bf16 %v633_v32, %v629_v31  ;;  %v582_v41 = vadd.f32 %v581_v35, %v188_v12  ;;  %v595_v45 = vpop.f32.mrf.mxu3  ;;  %v12739_v12 = vor.u32 %v17937_v3, %v12738_v2  ;;  %v17921_v31 = vld [vmem:[%s28960_s5 + $0x524] sm:$0xf0]  ;;  %v12899_v32 = vor.u32 %v17977_v23, %v12898_v22  ;;  %v17845_v2 = vld [vmem:[%s28960_s5 + $0x2cc] sm:$0xf] }
 0x134   :  { %2306 = vmatpush.bf16.msra.mxu2 %v12195_v30  ;;  %v12674_v30 = vld [vmem:[%s28960_s5 + $0x508] sm:$0xf]  ;;  %v12487_v35 = vor.u32 %v17869_v26, %v12484_v27  ;;  %v12356_v18 = vld [vmem:[%s28960_s5 + $0x2a8] sm:$0xf0] }
 0x135   :  { %v596_v48 = vadd.f32 %v595_v45, %v582_v41  ;;  %2242 = vmatmul.bf16.vlgmr.msrb.gmra.mxu1 %v20149_v40  ;;  %2270 = vmatmul.bf16.vlgmr.msrb.gmra.mxu3 %v20084_v53  ;;  %v12675_v39 = vor.u32 %v17921_v31, %v12674_v30  ;;  %v17861_v41 = vld [vmem:[%s28960_s5 + $0x34c] sm:$0xf]  ;;  %v12642_v44 = vld [vmem:[%s28960_s5 + $0x4c8] sm:$0xf]  ;;  %v12359_v28 = vor.u32 %v17837_v16, %v12356_v18  ;;  %v12458_v16 = vld [vmem:[%s28960_s5 + $0x350] sm:$0xf] }
 0x136   :  { %2322 = vmatpush.bf16.msra.mxu3 %v12387_v36  ;;  %2346 = vmatpush.bf16.msrb.mxu1 %v13027_v37  ;;  %v12866_v36 = vld [vmem:[%s28960_s5 + $0x688] sm:$0xf]  ;;  %v12455_v49 = vor.u32 %v17861_v41, %v12452_v42  ;;  %v17941_v26 = vld [vmem:[%s28960_s5 + $0x5cc] sm:$0xf] }
 0x137   :  { %v632_v58 = vmax.f32 %v596_v48, 0.0  ;;  %v17969_v37 = vld [vmem:[%s28960_s5 + $0x6a4] sm:$0xf0]  ;;  %v12228_v48 = vld [vmem:[%s28960_s5 + $0x1a8] sm:$0xf0] }
 0x138   :  { %2307 = vmatpush.bf16.msra.mxu2 %v12163_v46  ;;  %v17913_v45 = vld [vmem:[%s28960_s5 + $0x4e4] sm:$0xf0]  ;;  %v12867_v46 = vor.u32 %v17969_v37, %v12866_v36  ;;  %v12231_v56 = vor.u32 %v17805_v47, %v12228_v48  ;;  %v12772_v27 = vld [vmem:[%s28960_s5 + $0x5e8] sm:$0xf0] }
 0x139   :  { %v20189_v0 = vpack.c.bf16 %v632_v58, %v628_v57  ;;  %v12834_v50 = vld [vmem:[%s28960_s5 + $0x648] sm:$0xf]  ;;  %v17829_v30 = vld [vmem:[%s28960_s5 + $0x24c] sm:$0xf]  ;;  %v12775_v36 = vor.u32 %v17941_v26, %v12772_v27 }
 0x13a   :  { %2323 = vmatpush.bf16.msra.mxu3 %v12355_v52  ;;  %2347 = vmatpush.bf16.msrb.mxu1 %v12995_v54  ;;  %v17961_v51 = vld [vmem:[%s28960_s5 + $0x664] sm:$0xf0]  ;;  %v12643_v52 = vor.u32 %v17913_v45, %v12642_v44  ;;  %v17853_v54 = vld [vmem:[%s28960_s5 + $0x30c] sm:$0xf] }
 0x13b   :  { %2228 = vmatmul.bf16.vlgmr.msrb.gmra.mxu0 %v20189_v0  ;;  %2256 = vmatmul.bf16.vlgmr.msrb.gmra.mxu2 %v20106_v6  ;;  %v12610_v57 = vld [vmem:[%s28960_s5 + $0x488] sm:$0xf]  ;;  %v12835_v59 = vor.u32 %v17961_v51, %v12834_v50  ;;  %v17773_v37 = vld [vmem:[%s28960_s5 + $0x8c] sm:$0xf]  ;;  %v12522_v50 = vld [vmem:[%s28960_s5 + $0x3d0] sm:$0xf] }
 0x13c   :  { %2308 = vmatpush.bf16.msra.mxu2 %v12131_v61  ;;  %2332 = vmatpush.bf16.msrb.mxu0 %v12771_v62  ;;  %v17905_v58 = vld [vmem:[%s28960_s5 + $0x4a4] sm:$0xf0]  ;;  %v12196_v61 = vld [vmem:[%s28960_s5 + $0x168] sm:$0xf0]  ;;  %v12423_v62 = vor.u32 %v17853_v54, %v12420_v55  ;;  %v17882_v51 = vld [vmem:[%s28960_s5 + $0x3ec] sm:$0xf0] }
 0x13d   :  { %v12802_v63 = vld [vmem:[%s28960_s5 + $0x608] sm:$0xf]  ;;  %v12611_v3 = vor.u32 %v17905_v58, %v12610_v57  ;;  %v12199_v8 = vor.u32 %v17797_v60, %v12196_v61  ;;  %v12740_v41 = vld [vmem:[%s28960_s5 + $0x5a8] sm:$0xf0] }
 0x13e   :  { %2324 = vmatpush.bf16.msra.mxu3 %v12323_v4  ;;  %2348 = vmatpush.bf16.msrb.mxu1 %v12963_v5  ;;  %v17953_v1 = vld [vmem:[%s28960_s5 + $0x624] sm:$0xf0]  ;;  %v12388_v4 = vld [vmem:[%s28960_s5 + $0x2e8] sm:$0xf0] }
 0x13f   :  { %v18005_v5 = vld [vmem:[%s28960_s5 + $0x7cc] sm:$0xf]  ;;  %v12578_v9 = vld [vmem:[%s28960_s5 + $0x448] sm:$0xf]  ;;  %v12391_v14 = vor.u32 %v17845_v2, %v12388_v4  ;;  %v17874_v2 = vld [vmem:[%s28960_s5 + $0x3ac] sm:$0xf0] }
 0x140   :  { %2309 = vmatpush.bf16.msra.mxu2 %v12099_v11  ;;  %2333 = vmatpush.bf16.msrb.mxu0 %v12739_v12  ;;  %v17897_v10 = vld [vmem:[%s28960_s5 + $0x464] sm:$0xf0]  ;;  %v12803_v11 = vor.u32 %v17953_v1, %v12802_v63  ;;  %v17789_v12 = vld [vmem:[%s28960_s5 + $0x10c] sm:$0xf]  ;;  %v13031_v15 = vor.u32 %v18005_v5, %v13028_v7  ;;  %v12490_v1 = vld [vmem:[%s28960_s5 + $0x390] sm:$0xf] }
 0x141   :  { %v12579_v17 = vor.u32 %v17897_v10, %v12578_v9  ;;  %v12546_v22 = vld [vmem:[%s28960_s5 + $0x408] sm:$0xf]  ;;  %v17821_v44 = vld [vmem:[%s28960_s5 + $0x20c] sm:$0xf]  ;;  %v12266_v9 = vld [vmem:[%s28960_s5 + $0x1d0] sm:$0xf] }
 0x142   :  { %2325 = vmatpush.bf16.msra.mxu3 %v12291_v19  ;;  %2349 = vmatpush.bf16.msrb.mxu1 %v12931_v20  ;;  %v17997_v19 = vld [vmem:[%s28960_s5 + $0x78c] sm:$0xf]  ;;  %v17889_v23 = vld [vmem:[%s28960_s5 + $0x424] sm:$0xf0]  ;;  %v17818_v10 = vld [vmem:[%s28960_s5 + $0x1ec] sm:$0xf0] }
 0x143   :  { %v12996_v20 = vld [vmem:[%s28960_s5 + $0x7a8] sm:$0xf0]  ;;  %v12547_v31 = vor.u32 %v17889_v23, %v12546_v22  ;;  %v12267_v18 = vor.u32 %v17818_v10, %v12266_v9  ;;  %v12234_v22 = vld [vmem:[%s28960_s5 + $0x190] sm:$0xf] }
 0x144   :  { %2310 = vmatpush.bf16.msra.mxu2 %v12067_v24  ;;  %2334 = vmatpush.bf16.msrb.mxu0 %v12707_v25  ;;  %v17781_v24 = vld [vmem:[%s28960_s5 + $0xcc] sm:$0xf]  ;;  %v12999_v29 = vor.u32 %v17997_v19, %v12996_v20  ;;  %v17810_v23 = vld [vmem:[%s28960_s5 + $0x1ac] sm:$0xf0] }
 0x145   :  { %2298 = vmatmul.bf16.vlgmr.msra.gmra.mxu1 %v20149_v40  ;;  %2326 = vmatmul.bf16.vlgmr.msra.gmra.mxu3 %v20084_v53  ;;  %v12132_v25 = vld [vmem:[%s28960_s5 + $0xe8] sm:$0xf0] }
 0x146   :  { %2374 = vmatpush.bf16.msrb.mxu3 %v12519_v21  ;;  %2350 = vmatpush.bf16.msrb.mxu1 %v12899_v32  ;;  %v12167_v21 = vor.u32 %v17789_v12, %v12164_v13  ;;  %v12324_v32 = vld [vmem:[%s28960_s5 + $0x268] sm:$0xf0] }
 0x147   :  { %v12327_v42 = vor.u32 %v17829_v30, %v12324_v32  ;;  %v12292_v45 = vld [vmem:[%s28960_s5 + $0x228] sm:$0xf0]  ;;  %v12235_v30 = vor.u32 %v17810_v23, %v12234_v22  ;;  %v17986_v22 = vld [vmem:[%s28960_s5 + $0x72c] sm:$0xf0] }
 0x148   :  { %2311 = vmatpush.bf16.msra.mxu2 %v12035_v38  ;;  %2335 = vmatpush.bf16.msrb.mxu0 %v12675_v39  ;;  %v12100_v38 = vld [vmem:[%s28960_s5 + $0xa8] sm:$0xf0]  ;;  %v12295_v57 = vor.u32 %v17821_v44, %v12292_v45  ;;  %v18010_v44 = vld [vmem:[%s28960_s5 + $0x7ec] sm:$0xf0] }
 0x149   :  { %v17933_v39 = vld [vmem:[%s28960_s5 + $0x58c] sm:$0xf]  ;;  %v12103_v48 = vor.u32 %v17773_v37, %v12100_v38 }
 0x14a   :  { %2375 = vmatpush.bf16.msrb.mxu3 %v12487_v35  ;;  %2351 = vmatpush.bf16.msrb.mxu1 %v12867_v46  ;;  %v12135_v35 = vor.u32 %v17781_v24, %v12132_v25  ;;  %v17981_v46 = vld [vmem:[%s28960_s5 + $0x70c] sm:$0xf] }
 0x14b   :  { %2284 = vmatmul.bf16.vlgmr.msra.gmra.mxu0 %v20189_v0  ;;  %2312 = vmatmul.bf16.vlgmr.msra.gmra.mxu2 %v20106_v6  ;;  %v12932_v47 = vld [vmem:[%s28960_s5 + $0x728] sm:$0xf0] }
 0x14c   :  { %2360 = vmatpush.bf16.msrb.mxu2 %v12263_v43  ;;  %2336 = vmatpush.bf16.msrb.mxu0 %v12643_v52  ;;  %v12967_v43 = vor.u32 %v17989_v33, %v12964_v34  ;;  %v17765_v52 = vld [vmem:[%s28960_s5 + $0x4c] sm:$0xf]  ;;  %v12935_v58 = vor.u32 %v17981_v46, %v12932_v47  ;;  %v12202_v34 = vld [vmem:[%s28960_s5 + $0x150] sm:$0xf] }
 0x14d   :  { %v12068_v54 = vld [vmem:[%s28960_s5 + $0x68] sm:$0xf0] }
 0x14e   :  { %2376 = vmatpush.bf16.msrb.mxu3 %v12455_v49  ;;  %2352 = vmatpush.bf16.msrb.mxu1 %v12835_v59  ;;  %v12743_v49 = vor.u32 %v17933_v39, %v12740_v41  ;;  %v17925_v55 = vld [vmem:[%s28960_s5 + $0x54c] sm:$0xf]  ;;  %v12523_v59 = vor.u32 %v17882_v51, %v12522_v50  ;;  %v12394_v39 = vld [vmem:[%s28960_s5 + $0x2d0] sm:$0xf] }
 0x14f   :  { %v17973_v60 = vld [vmem:[%s28960_s5 + $0x6cc] sm:$0xf]  ;;  %v17794_v50 = vld [vmem:[%s28960_s5 + $0x12c] sm:$0xf0] }
 0x150   :  { %2361 = vmatpush.bf16.msrb.mxu2 %v12231_v56  ;;  %2337 = vmatpush.bf16.msrb.mxu0 %v12611_v3  ;;  %v12708_v56 = vld [vmem:[%s28960_s5 + $0x568] sm:$0xf0] }
 0x151   :  { %v12900_v61 = vld [vmem:[%s28960_s5 + $0x6e8] sm:$0xf0]  ;;  %v12711_v63 = vor.u32 %v17925_v55, %v12708_v56  ;;  %v17842_v56 = vld [vmem:[%s28960_s5 + $0x2ac] sm:$0xf0] }
 0x152   :  { %2377 = vmatpush.bf16.msrb.mxu3 %v12423_v62  ;;  %2353 = vmatpush.bf16.msrb.mxu1 %v12803_v11  ;;  %v12071_v62 = vor.u32 %v17765_v52, %v12068_v54  ;;  %v17757_v3 = vld [vmem:[%s28960_s5 + $0xc] sm:$0xf]  ;;  %v12491_v11 = vor.u32 %v17874_v2, %v12490_v1  ;;  %v12362_v54 = vld [vmem:[%s28960_s5 + $0x290] sm:$0xf] }
 0x153   :  { %v12036_v4 = vld [vmem:[%s28960_s5 + $0x28] sm:$0xf0]  ;;  %v12778_v1 = vld [vmem:[%s28960_s5 + $0x5d0] sm:$0xf] }
 0x154   :  { %2362 = vmatpush.bf16.msrb.mxu2 %v12199_v8  ;;  %2338 = vmatpush.bf16.msrb.mxu0 %v12579_v17  ;;  %v17917_v5 = vld [vmem:[%s28960_s5 + $0x50c] sm:$0xf]  ;;  %v12903_v8 = vor.u32 %v17973_v60, %v12900_v61  ;;  %v17866_v17 = vld [vmem:[%s28960_s5 + $0x36c] sm:$0xf0] }
 0x155   :  { %2354 = vmatmul.bf16.vlgmr.msrb.gmra.mxu1 %v20149_v40  ;;  %v12676_v7 = vld [vmem:[%s28960_s5 + $0x528] sm:$0xf0]  ;;  %v12459_v24 = vor.u32 %v17866_v17, %v12458_v16  ;;  %v17946_v2 = vld [vmem:[%s28960_s5 + $0x5ec] sm:$0xf0] }
 0x156   :  { %2378 = vmatpush.bf16.msrb.mxu3 %v12391_v14  ;;  %2402 = vmatpush.bf16.msra.mxu1 %v13031_v15  ;;  %v17965_v12 = vld [vmem:[%s28960_s5 + $0x68c] sm:$0xf]  ;;  %v12039_v14 = vor.u32 %v17757_v3, %v12036_v4  ;;  %v12679_v15 = vor.u32 %v17917_v5, %v12676_v7  ;;  %v12363_v3 = vor.u32 %v17842_v56, %v12362_v54  ;;  %v12330_v7 = vld [vmem:[%s28960_s5 + $0x250] sm:$0xf]  ;;  %v17862_v54 = vld [vmem:[%s28960_s5 + $0x354] sm:$0xf] }
 0x157   :  { %v12868_v13 = vld [vmem:[%s28960_s5 + $0x6a8] sm:$0xf0]  ;;  %v12779_v10 = vor.u32 %v17946_v2, %v12778_v1  ;;  %v17938_v16 = vld [vmem:[%s28960_s5 + $0x5ac] sm:$0xf0]  ;;  %v12460_v56 = vld [vmem:[%s28960_s5 + $0x370] sm:$0xf0] }
 0x158   :  { %2363 = vmatpush.bf16.msrb.mxu2 %v12167_v21  ;;  %2339 = vmatpush.bf16.msrb.mxu0 %v12547_v31  ;;  %v17909_v19 = vld [vmem:[%s28960_s5 + $0x4cc] sm:$0xf]  ;;  %v12871_v21 = vor.u32 %v17965_v12, %v12868_v13  ;;  %v17994_v12 = vld [vmem:[%s28960_s5 + $0x76c] sm:$0xf0] }
 0x159   :  { %v12644_v20 = vld [vmem:[%s28960_s5 + $0x4e8] sm:$0xf0]  ;;  %v12106_v13 = vld [vmem:[%s28960_s5 + $0x90] sm:$0xf] }
 0x15a   :  { %2379 = vmatpush.bf16.msrb.mxu3 %v12359_v28  ;;  %2403 = vmatpush.bf16.msra.mxu1 %v12999_v29  ;;  %v17957_v25 = vld [vmem:[%s28960_s5 + $0x64c] sm:$0xf]  ;;  %v12647_v27 = vor.u32 %v17909_v19, %v12644_v20  ;;  %v12426_v28 = vld [vmem:[%s28960_s5 + $0x310] sm:$0xf] }
 0x15b   :  { %2340 = vmatmul.bf16.vlgmr.msrb.gmra.mxu0 %v20189_v0  ;;  %v12836_v26 = vld [vmem:[%s28960_s5 + $0x668] sm:$0xf0]  ;;  %v17858_v29 = vld [vmem:[%s28960_s5 + $0x32c] sm:$0xf0] }
 0x15c   :  { %2364 = vmatpush.bf16.msrb.mxu2 %v12135_v35  ;;  %2388 = vmatpush.bf16.msra.mxu0 %v12775_v36  ;;  %v17901_v31 = vld [vmem:[%s28960_s5 + $0x48c] sm:$0xf]  ;;  %v12839_v33 = vor.u32 %v17957_v25, %v12836_v26  ;;  %v17802_v35 = vld [vmem:[%s28960_s5 + $0x16c] sm:$0xf0]  ;;  %v12427_v36 = vor.u32 %v17858_v29, %v12426_v28  ;;  %v17878_v25 = vld [vmem:[%s28960_s5 + $0x3d4] sm:$0xf] }
 0x15d   :  { %v12612_v32 = vld [vmem:[%s28960_s5 + $0x4a8] sm:$0xf0]  ;;  %v12203_v45 = vor.u32 %v17802_v35, %v12202_v34  ;;  %v17826_v20 = vld [vmem:[%s28960_s5 + $0x22c] sm:$0xf0]  ;;  %v12524_v26 = vld [vmem:[%s28960_s5 + $0x3f0] sm:$0xf0] }
 0x15e   :  { %2380 = vmatpush.bf16.msrb.mxu3 %v12327_v42  ;;  %2404 = vmatpush.bf16.msra.mxu1 %v12967_v43  ;;  %v17949_v37 = vld [vmem:[%s28960_s5 + $0x60c] sm:$0xf]  ;;  %v12615_v41 = vor.u32 %v17901_v31, %v12612_v32  ;;  %v17850_v42 = vld [vmem:[%s28960_s5 + $0x2ec] sm:$0xf0] }
 0x15f   :  { %v12804_v38 = vld [vmem:[%s28960_s5 + $0x628] sm:$0xf0]  ;;  %v13034_v43 = vld [vmem:[%s28960_s5 + $0x7d0] sm:$0xf]  ;;  %v12395_v51 = vor.u32 %v17850_v42, %v12394_v39  ;;  %v12492_v39 = vld [vmem:[%s28960_s5 + $0x3b0] sm:$0xf0] }
 0x160   :  { %2365 = vmatpush.bf16.msrb.mxu2 %v12103_v48  ;;  %2389 = vmatpush.bf16.msra.mxu0 %v12743_v49  ;;  %v17893_v46 = vld [vmem:[%s28960_s5 + $0x44c] sm:$0xf]  ;;  %v12807_v48 = vor.u32 %v17949_v37, %v12804_v38  ;;  %v12170_v49 = vld [vmem:[%s28960_s5 + $0x110] sm:$0xf]  ;;  %v13035_v52 = vor.u32 %v18010_v44, %v13034_v43  ;;  %v17870_v38 = vld [vmem:[%s28960_s5 + $0x394] sm:$0xf] }
 0x161   :  { %v12580_v47 = vld [vmem:[%s28960_s5 + $0x468] sm:$0xf0]  ;;  %v17770_v28 = vld [vmem:[%s28960_s5 + $0x6c] sm:$0xf0] }
 0x162   :  { %2381 = vmatpush.bf16.msrb.mxu3 %v12295_v57  ;;  %2405 = vmatpush.bf16.msra.mxu1 %v12935_v58  ;;  %v12583_v55 = vor.u32 %v17893_v46, %v12580_v47  ;;  %v13002_v57 = vld [vmem:[%s28960_s5 + $0x790] sm:$0xf]  ;;  %v17885_v60 = vld [vmem:[%s28960_s5 + $0x40c] sm:$0xf]  ;;  %v12268_v46 = vld [vmem:[%s28960_s5 + $0x1f0] sm:$0xf0] }
 0x163   :  { %v18002_v58 = vld [vmem:[%s28960_s5 + $0x7ac] sm:$0xf0]  ;;  %v12548_v61 = vld [vmem:[%s28960_s5 + $0x428] sm:$0xf0] }
 0x164   :  { %2366 = vmatpush.bf16.msrb.mxu2 %v12071_v62  ;;  %2390 = vmatpush.bf16.msra.mxu0 %v12711_v63  ;;  %v12138_v62 = vld [vmem:[%s28960_s5 + $0xd0] sm:$0xf]  ;;  %v13003_v4 = vor.u32 %v18002_v58, %v13002_v57  ;;  %v12551_v5 = vor.u32 %v17885_v60, %v12548_v61  ;;  %v12236_v60 = vld [vmem:[%s28960_s5 + $0x1b0] sm:$0xf0] }
 0x165   :  { %2382 = vmatmul.bf16.vlgmr.msrb.gmra.mxu3 %v20084_v53  ;;  %v17786_v63 = vld [vmem:[%s28960_s5 + $0xec] sm:$0xf0] }
 0x166   :  { %2430 = vmatpush.bf16.msra.mxu3 %v12523_v59  ;;  %2406 = vmatpush.bf16.msra.mxu1 %v12903_v8  ;;  %v12171_v59 = vor.u32 %v17794_v50, %v12170_v49  ;;  %v17834_v8 = vld [vmem:[%s28960_s5 + $0x26c] sm:$0xf0]  ;;  %v12139_v9 = vor.u32 %v17786_v63, %v12138_v62  ;;  %v12463_v62 = vor.u32 %v17862_v54, %v12460_v56  ;;  %v12748_v54 = vld [vmem:[%s28960_s5 + $0x5b0] sm:$0xf0] }
 0x167   :  { %v12331_v17 = vor.u32 %v17834_v8, %v12330_v7  ;;  %v12714_v29 = vld [vmem:[%s28960_s5 + $0x550] sm:$0xf]  ;;  %v17822_v56 = vld [vmem:[%s28960_s5 + $0x214] sm:$0xf] }
 0x168   :  { %2367 = vmatpush.bf16.msrb.mxu2 %v12039_v14  ;;  %2391 = vmatpush.bf16.msra.mxu0 %v12679_v15  ;;  %v17778_v14 = vld [vmem:[%s28960_s5 + $0xac] sm:$0xf0] }
 0x169   :  { %v12746_v15 = vld [vmem:[%s28960_s5 + $0x590] sm:$0xf]  ;;  %v12107_v23 = vor.u32 %v17778_v14, %v12106_v13 }
 0x16a   :  { %2431 = vmatpush.bf16.msra.mxu3 %v12491_v11  ;;  %2407 = vmatpush.bf16.msra.mxu1 %v12871_v21  ;;  %v12970_v11 = vld [vmem:[%s28960_s5 + $0x750] sm:$0xf] }
 0x16b   :  { %2368 = vmatmul.bf16.vlgmr.msrb.gmra.mxu2 %v20106_v6  ;;  %v12971_v19 = vor.u32 %v17994_v12, %v12970_v11  ;;  %v12938_v21 = vld [vmem:[%s28960_s5 + $0x710] sm:$0xf] }
 0x16c   :  { %2416 = vmatpush.bf16.msra.mxu2 %v12267_v18  ;;  %2392 = vmatpush.bf16.msra.mxu0 %v12647_v27  ;;  %v12298_v18 = vld [vmem:[%s28960_s5 + $0x210] sm:$0xf]  ;;  %v12939_v32 = vor.u32 %v17986_v22, %v12938_v21 }
 0x16d   :  { %v12074_v27 = vld [vmem:[%s28960_s5 + $0x50] sm:$0xf]  ;;  %v12299_v31 = vor.u32 %v17826_v20, %v12298_v18  ;;  %v13036_v20 = vld [vmem:[%s28960_s5 + $0x7f0] sm:$0xf0] }
 0x16e   :  { %2432 = vmatpush.bf16.msra.mxu3 %v12459_v24  ;;  %2408 = vmatpush.bf16.msra.mxu1 %v12839_v33  ;;  %v12747_v24 = vor.u32 %v17938_v16, %v12746_v15  ;;  %v12527_v33 = vor.u32 %v17878_v25, %v12524_v26  ;;  %v12906_v34 = vld [vmem:[%s28960_s5 + $0x6d0] sm:$0xf]  ;;  %v17846_v16 = vld [vmem:[%s28960_s5 + $0x2d4] sm:$0xf] }
 0x16f   :  { %v17978_v35 = vld [vmem:[%s28960_s5 + $0x6ec] sm:$0xf0] }
 0x170   :  { %2417 = vmatpush.bf16.msra.mxu2 %v12235_v30  ;;  %2393 = vmatpush.bf16.msra.mxu0 %v12615_v41  ;;  %v17930_v30 = vld [vmem:[%s28960_s5 + $0x56c] sm:$0xf0]  ;;  %v12907_v47 = vor.u32 %v17978_v35, %v12906_v34 }
 0x171   :  { %v12715_v37 = vor.u32 %v17930_v30, %v12714_v29  ;;  %v12042_v41 = vld [vmem:[%s28960_s5 + $0x10] sm:$0xf]  ;;  %v12364_v29 = vld [vmem:[%s28960_s5 + $0x2b0] sm:$0xf0] }
 0x172   :  { %2433 = vmatpush.bf16.msra.mxu3 %v12427_v36  ;;  %2409 = vmatpush.bf16.msra.mxu1 %v12807_v48  ;;  %v12075_v36 = vor.u32 %v17770_v28, %v12074_v27  ;;  %v17762_v42 = vld [vmem:[%s28960_s5 + $0x2c] sm:$0xf0]  ;;  %v12495_v48 = vor.u32 %v17870_v38, %v12492_v39  ;;  %v17838_v28 = vld [vmem:[%s28960_s5 + $0x294] sm:$0xf] }
 0x173   :  { %v12682_v43 = vld [vmem:[%s28960_s5 + $0x510] sm:$0xf]  ;;  %v12043_v49 = vor.u32 %v17762_v42, %v12042_v41  ;;  %v17942_v38 = vld [vmem:[%s28960_s5 + $0x5d4] sm:$0xf]  ;;  %v12367_v41 = vor.u32 %v17838_v28, %v12364_v29  ;;  %v12466_v28 = vld [vmem:[%s28960_s5 + $0x358] sm:$0xf] }
 0x174   :  { %2418 = vmatpush.bf16.msra.mxu2 %v12203_v45  ;;  %2394 = vmatpush.bf16.msra.mxu0 %v12583_v55  ;;  %v17922_v44 = vld [vmem:[%s28960_s5 + $0x52c] sm:$0xf0]  ;;  %v17814_v45 = vld [vmem:[%s28960_s5 + $0x1d4] sm:$0xf] }
 0x175   :  { %2410 = vmatmul.bf16.vlgmr.msra.gmra.mxu1 %v20149_v40  ;;  %v12683_v50 = vor.u32 %v17922_v44, %v12682_v43  ;;  %v12271_v55 = vor.u32 %v17814_v45, %v12268_v46  ;;  %v12650_v57 = vld [vmem:[%s28960_s5 + $0x4d0] sm:$0xf]  ;;  %v12780_v39 = vld [vmem:[%s28960_s5 + $0x5f0] sm:$0xf0] }
 0x176   :  { %2434 = vmatpush.bf16.msra.mxu3 %v12395_v51  ;;  %2458 = vmatpush.bf16.msrb.mxu1 %v13035_v52  ;;  %v12874_v51 = vld [vmem:[%s28960_s5 + $0x690] sm:$0xf]  ;;  %v17830_v45 = vld [vmem:[%s28960_s5 + $0x254] sm:$0xf] }
 0x177   :  { %v17970_v52 = vld [vmem:[%s28960_s5 + $0x6ac] sm:$0xf0]  ;;  %v12332_v46 = vld [vmem:[%s28960_s5 + $0x270] sm:$0xf0] }
 0x178   :  { %2419 = vmatpush.bf16.msra.mxu2 %v12171_v59  ;;  %2395 = vmatpush.bf16.msra.mxu0 %v12551_v5  ;;  %v17914_v58 = vld [vmem:[%s28960_s5 + $0x4ec] sm:$0xf0]  ;;  %v17806_v59 = vld [vmem:[%s28960_s5 + $0x194] sm:$0xf]  ;;  %v12875_v61 = vor.u32 %v17970_v52, %v12874_v51 }
 0x179   :  { %v12651_v63 = vor.u32 %v17914_v58, %v12650_v57  ;;  %v12842_v1 = vld [vmem:[%s28960_s5 + $0x650] sm:$0xf]  ;;  %v12428_v5 = vld [vmem:[%s28960_s5 + $0x330] sm:$0xf0] }
 0x17a   :  { %2435 = vmatpush.bf16.msra.mxu3 %v12363_v3  ;;  %2459 = vmatpush.bf16.msrb.mxu1 %v13003_v4  ;;  %v17962_v2 = vld [vmem:[%s28960_s5 + $0x66c] sm:$0xf0]  ;;  %v17854_v3 = vld [vmem:[%s28960_s5 + $0x314] sm:$0xf]  ;;  %v12239_v4 = vor.u32 %v17806_v59, %v12236_v60 }
 0x17b   :  { %2396 = vmatmul.bf16.vlgmr.msra.gmra.mxu0 %v20189_v0  ;;  %v12618_v7 = vld [vmem:[%s28960_s5 + $0x490] sm:$0xf]  ;;  %v12843_v11 = vor.u32 %v17962_v2, %v12842_v1  ;;  %v12431_v13 = vor.u32 %v17854_v3, %v12428_v5  ;;  %v12108_v51 = vld [vmem:[%s28960_s5 + $0xb0] sm:$0xf0]  ;;  %v17883_v1 = vld [vmem:[%s28960_s5 + $0x3f4] sm:$0xf0] }
 0x17c   :  { %2420 = vmatpush.bf16.msra.mxu2 %v12139_v9  ;;  %2444 = vmatpush.bf16.msrb.mxu0 %v12779_v10  ;;  %v17906_v8 = vld [vmem:[%s28960_s5 + $0x4ac] sm:$0xf0]  ;;  %v17798_v9 = vld [vmem:[%s28960_s5 + $0x154] sm:$0xf] }
 0x17d   :  { %v12204_v10 = vld [vmem:[%s28960_s5 + $0x170] sm:$0xf0]  ;;  %v12810_v12 = vld [vmem:[%s28960_s5 + $0x610] sm:$0xf]  ;;  %v12619_v14 = vor.u32 %v17906_v8, %v12618_v7 }
 0x17e   :  { %2436 = vmatpush.bf16.msra.mxu3 %v12331_v17  ;;  %2460 = vmatpush.bf16.msrb.mxu1 %v12971_v19  ;;  %v17954_v15 = vld [vmem:[%s28960_s5 + $0x62c] sm:$0xf0]  ;;  %v12396_v17 = vld [vmem:[%s28960_s5 + $0x2f0] sm:$0xf0]  ;;  %v12207_v18 = vor.u32 %v17798_v9, %v12204_v10 }
 0x17f   :  { %v18006_v19 = vld [vmem:[%s28960_s5 + $0x7d4] sm:$0xf]  ;;  %v12586_v21 = vld [vmem:[%s28960_s5 + $0x450] sm:$0xf]  ;;  %v12811_v25 = vor.u32 %v17954_v15, %v12810_v12  ;;  %v12399_v26 = vor.u32 %v17846_v16, %v12396_v17  ;;  %v17875_v15 = vld [vmem:[%s28960_s5 + $0x3b4] sm:$0xf0] }
 0x180   :  { %2421 = vmatpush.bf16.msra.mxu2 %v12107_v23  ;;  %2445 = vmatpush.bf16.msrb.mxu0 %v12747_v24  ;;  %v17898_v22 = vld [vmem:[%s28960_s5 + $0x46c] sm:$0xf0]  ;;  %v17790_v23 = vld [vmem:[%s28960_s5 + $0x114] sm:$0xf]  ;;  %v13039_v27 = vor.u32 %v18006_v19, %v13036_v20  ;;  %v12274_v20 = vld [vmem:[%s28960_s5 + $0x1d8] sm:$0xf] }
 0x181   :  { %v12172_v24 = vld [vmem:[%s28960_s5 + $0x130] sm:$0xf0]  ;;  %v12587_v30 = vor.u32 %v17898_v22, %v12586_v21  ;;  %v12554_v34 = vld [vmem:[%s28960_s5 + $0x410] sm:$0xf]  ;;  %v17819_v21 = vld [vmem:[%s28960_s5 + $0x1f4] sm:$0xf0] }
 0x182   :  { %2437 = vmatpush.bf16.msra.mxu3 %v12299_v31  ;;  %2461 = vmatpush.bf16.msrb.mxu1 %v12939_v32  ;;  %v12175_v31 = vor.u32 %v17790_v23, %v12172_v24  ;;  %v17998_v32 = vld [vmem:[%s28960_s5 + $0x794] sm:$0xf]  ;;  %v17890_v35 = vld [vmem:[%s28960_s5 + $0x42c] sm:$0xf0]  ;;  %v12275_v29 = vor.u32 %v17819_v21, %v12274_v20  ;;  %v12338_v20 = vld [vmem:[%s28960_s5 + $0x258] sm:$0xf] }
 0x183   :  { %v12555_v43 = vor.u32 %v17890_v35, %v12554_v34  ;;  %v17934_v52 = vld [vmem:[%s28960_s5 + $0x594] sm:$0xf]  ;;  %v17811_v34 = vld [vmem:[%s28960_s5 + $0x1b4] sm:$0xf0] }
 0x184   :  { %2422 = vmatpush.bf16.msra.mxu2 %v12075_v36  ;;  %2446 = vmatpush.bf16.msrb.mxu0 %v12715_v37  ;;  %v17782_v36 = vld [vmem:[%s28960_s5 + $0xd4] sm:$0xf]  ;;  %v17835_v21 = vld [vmem:[%s28960_s5 + $0x274] sm:$0xf0] }
 0x185   :  { %2438 = vmatmul.bf16.vlgmr.msra.gmra.mxu3 %v20084_v53  ;;  %v12140_v37 = vld [vmem:[%s28960_s5 + $0xf0] sm:$0xf0] }
 0x186   :  { %2486 = vmatpush.bf16.msrb.mxu3 %v12527_v33  ;;  %2462 = vmatpush.bf16.msrb.mxu1 %v12907_v47  ;;  %v13004_v33 = vld [vmem:[%s28960_s5 + $0x7b0] sm:$0xf0]  ;;  %v12143_v44 = vor.u32 %v17782_v36, %v12140_v37 }
 0x187   :  { %v13007_v42 = vor.u32 %v17998_v32, %v13004_v33  ;;  %v17990_v47 = vld [vmem:[%s28960_s5 + $0x754] sm:$0xf]  ;;  %v12242_v33 = vld [vmem:[%s28960_s5 + $0x198] sm:$0xf] }
 0x188   :  { %2423 = vmatpush.bf16.msra.mxu2 %v12043_v49  ;;  %2447 = vmatpush.bf16.msrb.mxu0 %v12683_v50  ;;  %v12972_v49 = vld [vmem:[%s28960_s5 + $0x770] sm:$0xf0] }
 0x189   :  { %v17774_v50 = vld [vmem:[%s28960_s5 + $0x94] sm:$0xf]  ;;  %v12975_v57 = vor.u32 %v17990_v47, %v12972_v49  ;;  %v17803_v47 = vld [vmem:[%s28960_s5 + $0x174] sm:$0xf0] }
 0x18a   :  { %2487 = vmatpush.bf16.msrb.mxu3 %v12495_v48  ;;  %2463 = vmatpush.bf16.msrb.mxu1 %v12875_v61  ;;  %v12783_v48 = vor.u32 %v17942_v38, %v12780_v39  ;;  %v12111_v58 = vor.u32 %v17774_v50, %v12108_v51  ;;  %v12300_v59 = vld [vmem:[%s28960_s5 + $0x230] sm:$0xf0] }
 0x18b   :  { %2424 = vmatmul.bf16.vlgmr.msra.gmra.mxu2 %v20106_v6  ;;  %v17982_v60 = vld [vmem:[%s28960_s5 + $0x714] sm:$0xf]  ;;  %v12303_v7 = vor.u32 %v17822_v56, %v12300_v59 }
 0x18c   :  { %2472 = vmatpush.bf16.msrb.mxu2 %v12271_v55  ;;  %2448 = vmatpush.bf16.msrb.mxu0 %v12651_v63  ;;  %v12335_v55 = vor.u32 %v17830_v45, %v12332_v46  ;;  %v12940_v61 = vld [vmem:[%s28960_s5 + $0x730] sm:$0xf0]  ;;  %v12530_v63 = vld [vmem:[%s28960_s5 + $0x3d8] sm:$0xf] }
 0x18d   :  { %v17766_v2 = vld [vmem:[%s28960_s5 + $0x54] sm:$0xf]  ;;  %v12943_v8 = vor.u32 %v17982_v60, %v12940_v61  ;;  %v12531_v9 = vor.u32 %v17883_v1, %v12530_v63  ;;  %v12210_v46 = vld [vmem:[%s28960_s5 + $0x158] sm:$0xf] }
 0x18e   :  { %2488 = vmatpush.bf16.msrb.mxu3 %v12463_v62  ;;  %2464 = vmatpush.bf16.msrb.mxu1 %v12843_v11  ;;  %v12751_v62 = vor.u32 %v17934_v52, %v12748_v54  ;;  %v12076_v3 = vld [vmem:[%s28960_s5 + $0x70] sm:$0xf0]  ;;  %v12402_v54 = vld [vmem:[%s28960_s5 + $0x2d8] sm:$0xf]  ;;  %v12211_v56 = vor.u32 %v17803_v47, %v12210_v46 }
 0x18f   :  { %v12716_v5 = vld [vmem:[%s28960_s5 + $0x570] sm:$0xf0]  ;;  %v12079_v12 = vor.u32 %v17766_v2, %v12076_v3  ;;  %v12178_v61 = vld [vmem:[%s28960_s5 + $0x118] sm:$0xf] }
 0x190   :  { %2473 = vmatpush.bf16.msrb.mxu2 %v12239_v4  ;;  %2449 = vmatpush.bf16.msrb.mxu0 %v12619_v14  ;;  %v17926_v4 = vld [vmem:[%s28960_s5 + $0x554] sm:$0xf]  ;;  %v12498_v14 = vld [vmem:[%s28960_s5 + $0x398] sm:$0xf] }
 0x191   :  { %v17974_v10 = vld [vmem:[%s28960_s5 + $0x6d4] sm:$0xf]  ;;  %v12499_v23 = vor.u32 %v17875_v15, %v12498_v14  ;;  %v12370_v3 = vld [vmem:[%s28960_s5 + $0x298] sm:$0xf] }
 0x192   :  { %2489 = vmatpush.bf16.msrb.mxu3 %v12431_v13  ;;  %2465 = vmatpush.bf16.msrb.mxu1 %v12811_v25  ;;  %v12908_v11 = vld [vmem:[%s28960_s5 + $0x6f0] sm:$0xf0]  ;;  %v12719_v13 = vor.u32 %v17926_v4, %v12716_v5  ;;  %v17843_v4 = vld [vmem:[%s28960_s5 + $0x2b4] sm:$0xf0] }
 0x193   :  { %v17758_v16 = vld [vmem:[%s28960_s5 + $0x14] sm:$0xf]  ;;  %v12911_v22 = vor.u32 %v17974_v10, %v12908_v11  ;;  %v12786_v14 = vld [vmem:[%s28960_s5 + $0x5d8] sm:$0xf] }
 0x194   :  { %2474 = vmatpush.bf16.msrb.mxu2 %v12207_v18  ;;  %2450 = vmatpush.bf16.msrb.mxu0 %v12587_v30  ;;  %v12044_v17 = vld [vmem:[%s28960_s5 + $0x30] sm:$0xf0]  ;;  %v17867_v30 = vld [vmem:[%s28960_s5 + $0x374] sm:$0xf0] }
 0x195   :  { %2466 = vmatmul.bf16.vlgmr.msrb.gmra.mxu1 %v20149_v40  ;;  %v17918_v18 = vld [vmem:[%s28960_s5 + $0x514] sm:$0xf]  ;;  %v12047_v24 = vor.u32 %v17758_v16, %v12044_v17  ;;  %v12467_v36 = vor.u32 %v17867_v30, %v12466_v28  ;;  %v17947_v15 = vld [vmem:[%s28960_s5 + $0x5f4] sm:$0xf0]  ;;  %v12371_v16 = vor.u32 %v17843_v4, %v12370_v3 }
 0x196   :  { %2490 = vmatpush.bf16.msrb.mxu3 %v12399_v26  ;;  %2514 = vmatpush.bf16.msra.mxu1 %v13039_v27  ;;  %v12684_v19 = vld [vmem:[%s28960_s5 + $0x530] sm:$0xf0]  ;;  %v17939_v28 = vld [vmem:[%s28960_s5 + $0x5b4] sm:$0xf0] }
 0x197   :  { %v12687_v25 = vor.u32 %v17918_v18, %v12684_v19  ;;  %v17966_v26 = vld [vmem:[%s28960_s5 + $0x694] sm:$0xf]  ;;  %v12306_v30 = vld [vmem:[%s28960_s5 + $0x218] sm:$0xf] }
 0x198   :  { %2475 = vmatpush.bf16.msrb.mxu2 %v12175_v31  ;;  %2451 = vmatpush.bf16.msrb.mxu0 %v12555_v43  ;;  %v12876_v27 = vld [vmem:[%s28960_s5 + $0x6b0] sm:$0xf0]  ;;  %v17859_v43 = vld [vmem:[%s28960_s5 + $0x334] sm:$0xf0] }
 0x199   :  { %v17910_v31 = vld [vmem:[%s28960_s5 + $0x4d4] sm:$0xf]  ;;  %v12879_v35 = vor.u32 %v17966_v26, %v12876_v27  ;;  %v17779_v26 = vld [vmem:[%s28960_s5 + $0xb4] sm:$0xf0] }
 0x19a   :  { %2491 = vmatpush.bf16.msrb.mxu3 %v12367_v41  ;;  %2515 = vmatpush.bf16.msra.mxu1 %v13007_v42  ;;  %v12652_v32 = vld [vmem:[%s28960_s5 + $0x4f0] sm:$0xf0]  ;;  %v12434_v41 = vld [vmem:[%s28960_s5 + $0x318] sm:$0xf]  ;;  %v12243_v42 = vor.u32 %v17811_v34, %v12242_v33 }
 0x19b   :  { %2452 = vmatmul.bf16.vlgmr.msrb.gmra.mxu0 %v20189_v0  ;;  %v12655_v37 = vor.u32 %v17910_v31, %v12652_v32  ;;  %v17958_v38 = vld [vmem:[%s28960_s5 + $0x654] sm:$0xf]  ;;  %v12435_v50 = vor.u32 %v17859_v43, %v12434_v41  ;;  %v12754_v27 = vld [vmem:[%s28960_s5 + $0x598] sm:$0xf] }
 0x19c   :  { %2476 = vmatpush.bf16.msrb.mxu2 %v12143_v44  ;;  %2500 = vmatpush.bf16.msra.mxu0 %v12783_v48  ;;  %v12844_v39 = vld [vmem:[%s28960_s5 + $0x670] sm:$0xf0]  ;;  %v17827_v34 = vld [vmem:[%s28960_s5 + $0x234] sm:$0xf0] }
 0x19d   :  { %v17902_v44 = vld [vmem:[%s28960_s5 + $0x494] sm:$0xf]  ;;  %v12847_v48 = vor.u32 %v17958_v38, %v12844_v39  ;;  %v17879_v38 = vld [vmem:[%s28960_s5 + $0x3dc] sm:$0xf]  ;;  %v12082_v41 = vld [vmem:[%s28960_s5 + $0x58] sm:$0xf] }
 0x19e   :  { %2492 = vmatpush.bf16.msrb.mxu3 %v12335_v55  ;;  %2516 = vmatpush.bf16.msra.mxu1 %v12975_v57  ;;  %v12620_v45 = vld [vmem:[%s28960_s5 + $0x4b0] sm:$0xf0]  ;;  %v17851_v55 = vld [vmem:[%s28960_s5 + $0x2f4] sm:$0xf0]  ;;  %v12532_v39 = vld [vmem:[%s28960_s5 + $0x3f8] sm:$0xf0] }
 0x19f   :  { %v17950_v49 = vld [vmem:[%s28960_s5 + $0x614] sm:$0xf]  ;;  %v12623_v51 = vor.u32 %v17902_v44, %v12620_v45  ;;  %v13042_v57 = vld [vmem:[%s28960_s5 + $0x7d8] sm:$0xf]  ;;  %v12403_v1 = vor.u32 %v17851_v55, %v12402_v54  ;;  %v12307_v45 = vor.u32 %v17827_v34, %v12306_v30  ;;  %v12535_v47 = vor.u32 %v17879_v38, %v12532_v39  ;;  %v12500_v54 = vld [vmem:[%s28960_s5 + $0x3b8] sm:$0xf0] }
 0x1a0   :  { %2477 = vmatpush.bf16.msrb.mxu2 %v12111_v58  ;;  %2501 = vmatpush.bf16.msra.mxu0 %v12751_v62  ;;  %v12812_v52 = vld [vmem:[%s28960_s5 + $0x630] sm:$0xf0]  ;;  %v18011_v58 = vld [vmem:[%s28960_s5 + $0x7f4] sm:$0xf0]  ;;  %v18007_v38 = vld [vmem:[%s28960_s5 + $0x7dc] sm:$0xf] }
 0x1a1   :  { %v17894_v59 = vld [vmem:[%s28960_s5 + $0x454] sm:$0xf]  ;;  %v17795_v62 = vld [vmem:[%s28960_s5 + $0x134] sm:$0xf0]  ;;  %v12815_v63 = vor.u32 %v17950_v49, %v12812_v52  ;;  %v13043_v2 = vor.u32 %v18011_v58, %v13042_v57  ;;  %v17871_v52 = vld [vmem:[%s28960_s5 + $0x39c] sm:$0xf] }
 0x1a2   :  { %2493 = vmatpush.bf16.msrb.mxu3 %v12303_v7  ;;  %2517 = vmatpush.bf16.msra.mxu1 %v12943_v8  ;;  %v12588_v60 = vld [vmem:[%s28960_s5 + $0x470] sm:$0xf0]  ;;  %v12179_v7 = vor.u32 %v17795_v62, %v12178_v61  ;;  %v13010_v8 = vld [vmem:[%s28960_s5 + $0x798] sm:$0xf]  ;;  %v12276_v61 = vld [vmem:[%s28960_s5 + $0x1f8] sm:$0xf0] }
 0x1a3   :  { %v12591_v5 = vor.u32 %v17894_v59, %v12588_v60  ;;  %v17886_v10 = vld [vmem:[%s28960_s5 + $0x414] sm:$0xf]  ;;  %v12722_v43 = vld [vmem:[%s28960_s5 + $0x558] sm:$0xf]  ;;  %v17815_v60 = vld [vmem:[%s28960_s5 + $0x1dc] sm:$0xf] }
 0x1a4   :  { %2478 = vmatpush.bf16.msrb.mxu2 %v12079_v12  ;;  %2502 = vmatpush.bf16.msra.mxu0 %v12719_v13  ;;  %v12556_v11 = vld [vmem:[%s28960_s5 + $0x430] sm:$0xf0]  ;;  %v12146_v12 = vld [vmem:[%s28960_s5 + $0xd8] sm:$0xf]  ;;  %v13044_v39 = vld [vmem:[%s28960_s5 + $0x7f8] sm:$0xf0] }
 0x1a5   :  { %2494 = vmatmul.bf16.vlgmr.msrb.gmra.mxu3 %v20084_v53  ;;  %v17787_v13 = vld [vmem:[%s28960_s5 + $0xf4] sm:$0xf0]  ;;  %v12559_v18 = vor.u32 %v17886_v10, %v12556_v11  ;;  %v12279_v10 = vor.u32 %v17815_v60, %v12276_v61  ;;  %v12468_v11 = vld [vmem:[%s28960_s5 + $0x378] sm:$0xf0] }
 0x1a6   :  { %2542 = vmatpush.bf16.msra.mxu3 %v12531_v9  ;;  %2518 = vmatpush.bf16.msra.mxu1 %v12911_v22  ;;  %v18003_v9 = vld [vmem:[%s28960_s5 + $0x7b4] sm:$0xf0]  ;;  %v12147_v19 = vor.u32 %v17787_v13, %v12146_v12  ;;  %v17783_v61 = vld [vmem:[%s28960_s5 + $0xdc] sm:$0xf] }
 0x1a7   :  { %v13011_v17 = vor.u32 %v18003_v9, %v13010_v8  ;;  %v12978_v22 = vld [vmem:[%s28960_s5 + $0x758] sm:$0xf] }
 0x1a8   :  { %2479 = vmatpush.bf16.msrb.mxu2 %v12047_v24  ;;  %2503 = vmatpush.bf16.msra.mxu0 %v12687_v25  ;;  %v17995_v24 = vld [vmem:[%s28960_s5 + $0x774] sm:$0xf0] }
 0x1a9   :  { %v12114_v25 = vld [vmem:[%s28960_s5 + $0x98] sm:$0xf]  ;;  %v12979_v32 = vor.u32 %v17995_v24, %v12978_v22 }
 0x1aa   :  { %2543 = vmatpush.bf16.msra.mxu3 %v12499_v23  ;;  %2519 = vmatpush.bf16.msra.mxu1 %v12879_v35  ;;  %v12787_v23 = vor.u32 %v17947_v15, %v12786_v14  ;;  %v12115_v33 = vor.u32 %v17779_v26, %v12114_v25  ;;  %v12946_v35 = vld [vmem:[%s28960_s5 + $0x718] sm:$0xf]  ;;  %v17807_v14 = vld [vmem:[%s28960_s5 + $0x19c] sm:$0xf] }
 0x1ab   :  { %2480 = vmatmul.bf16.vlgmr.msrb.gmra.mxu2 %v20106_v6  ;;  %v17931_v44 = vld [vmem:[%s28960_s5 + $0x574] sm:$0xf0]  ;;  %v12244_v15 = vld [vmem:[%s28960_s5 + $0x1b8] sm:$0xf0] }
 0x1ac   :  { %2528 = vmatpush.bf16.msra.mxu2 %v12275_v29  ;;  %2504 = vmatpush.bf16.msra.mxu0 %v12655_v37  ;;  %v12339_v29 = vor.u32 %v17835_v21, %v12338_v20  ;;  %v12755_v37 = vor.u32 %v17939_v28, %v12754_v27  ;;  %v17979_v49 = vld [vmem:[%s28960_s5 + $0x6f4] sm:$0xf0]  ;;  %v17855_v21 = vld [vmem:[%s28960_s5 + $0x31c] sm:$0xf]  ;;  %v12247_v22 = vor.u32 %v17807_v14, %v12244_v15 }
 0x1ad   :  { %v12050_v55 = vld [vmem:[%s28960_s5 + $0x18] sm:$0xf]  ;;  %v17799_v26 = vld [vmem:[%s28960_s5 + $0x15c] sm:$0xf] }
 0x1ae   :  { %2544 = vmatpush.bf16.msra.mxu3 %v12467_v36  ;;  %2520 = vmatpush.bf16.msra.mxu1 %v12847_v48  ;;  %v20990_v31 = vpop.f32.mrf.mxu2  ;;  %v17987_v36 = vld [vmem:[%s28960_s5 + $0x734] sm:$0xf0]  ;;  %v12212_v27 = vld [vmem:[%s28960_s5 + $0x178] sm:$0xf0] }
 0x1af   :  { %v12947_v46 = vor.u32 %v17987_v36, %v12946_v35  ;;  %v12914_v48 = vld [vmem:[%s28960_s5 + $0x6d8] sm:$0xf]  ;;  %v17847_v35 = vld [vmem:[%s28960_s5 + $0x2dc] sm:$0xf] }
 0x1b0   :  { %2529 = vmatpush.bf16.msra.mxu2 %v12243_v42  ;;  %2505 = vmatpush.bf16.msra.mxu0 %v12623_v51  ;;  %v17771_v42 = vld [vmem:[%s28960_s5 + $0x74] sm:$0xf0]  ;;  %v12723_v51 = vor.u32 %v17931_v44, %v12722_v43  ;;  %v12915_v62 = vor.u32 %v17979_v49, %v12914_v48  ;;  %v12404_v36 = vld [vmem:[%s28960_s5 + $0x2f8] sm:$0xf0] }
 0x1b1   :  { %v17763_v57 = vld [vmem:[%s28960_s5 + $0x34] sm:$0xf0]  ;;  %v17791_v44 = vld [vmem:[%s28960_s5 + $0x11c] sm:$0xf]  ;;  %v12407_v49 = vor.u32 %v17847_v35, %v12404_v36 }
 0x1b2   :  { %2545 = vmatpush.bf16.msra.mxu3 %v12435_v50  ;;  %2521 = vmatpush.bf16.msra.mxu1 %v12815_v63  ;;  %v12083_v50 = vor.u32 %v17771_v42, %v12082_v41  ;;  %v12690_v58 = vld [vmem:[%s28960_s5 + $0x518] sm:$0xf]  ;;  %v12503_v63 = vor.u32 %v17871_v52, %v12500_v54  ;;  %v12372_v52 = vld [vmem:[%s28960_s5 + $0x2b8] sm:$0xf0] }
 0x1b3   :  { %v17923_v59 = vld [vmem:[%s28960_s5 + $0x534] sm:$0xf0]  ;;  %v12980_v15 = vld [vmem:[%s28960_s5 + $0x778] sm:$0xf0] }
 0x1b4   :  { %2530 = vmatpush.bf16.msra.mxu2 %v12211_v56  ;;  %2506 = vmatpush.bf16.msra.mxu0 %v12591_v5  ;;  %v21035_v56 = vpop.f32.mrf.mxu3  ;;  %v12691_v3 = vor.u32 %v17923_v59, %v12690_v58  ;;  %v12882_v4 = vld [vmem:[%s28960_s5 + $0x698] sm:$0xf]  ;;  %v13012_v58 = vld [vmem:[%s28960_s5 + $0x7b8] sm:$0xf0] }
 0x1b5   :  { %2522 = vmatmul.bf16.vlgmr.msra.gmra.mxu1 %v20149_v40  ;;  %v17971_v5 = vld [vmem:[%s28960_s5 + $0x6b4] sm:$0xf0]  ;;  %v17767_v35 = vld [vmem:[%s28960_s5 + $0x5c] sm:$0xf] }
 0x1b6   :  { %2546 = vmatpush.bf16.msra.mxu3 %v12403_v1  ;;  %2570 = vmatpush.bf16.msrb.mxu1 %v13043_v2  ;;  %v21052_v1 = vpop.f32.mrf.mxu1  ;;  %v12051_v2 = vor.u32 %v17763_v57, %v12050_v55  ;;  %v21063_v8 = vpop.f32.mrf.mxu2  ;;  %v12658_v12 = vld [vmem:[%s28960_s5 + $0x4d8] sm:$0xf]  ;;  %v17999_v57 = vld [vmem:[%s28960_s5 + $0x79c] sm:$0xf] }
 0x1b7   :  { %v17915_v13 = vld [vmem:[%s28960_s5 + $0x4f4] sm:$0xf0]  ;;  %v12084_v36 = vld [vmem:[%s28960_s5 + $0x78] sm:$0xf0] }
 0x1b8   :  { %2531 = vmatpush.bf16.msra.mxu2 %v12179_v7  ;;  %2507 = vmatpush.bf16.msra.mxu0 %v12559_v18  ;;  %v17863_v7 = vld [vmem:[%s28960_s5 + $0x35c] sm:$0xf]  ;;  %v21065_v9 = vpop.f32.mrf.mxu0  ;;  %v12659_v18 = vor.u32 %v17915_v13, %v12658_v12  ;;  %v17963_v20 = vld [vmem:[%s28960_s5 + $0x674] sm:$0xf0] }
 0x1b9   :  { %v12626_v24 = vld [vmem:[%s28960_s5 + $0x498] sm:$0xf]  ;;  %v12340_v12 = vld [vmem:[%s28960_s5 + $0x278] sm:$0xf0] }
 0x1ba   :  { %2547 = vmatpush.bf16.msra.mxu3 %v12371_v16  ;;  %2571 = vmatpush.bf16.msrb.mxu1 %v13011_v17  ;;  %v12883_v16 = vor.u32 %v17971_v5, %v12882_v4  ;;  %v12471_v17 = vor.u32 %v17863_v7, %v12468_v11  ;;  %v17907_v25 = vld [vmem:[%s28960_s5 + $0x4b4] sm:$0xf0]  ;;  %v13015_v4 = vor.u32 %v17999_v57, %v13012_v58  ;;  %v17831_v11 = vld [vmem:[%s28960_s5 + $0x25c] sm:$0xf] }
 0x1bb   :  { %2508 = vmatmul.bf16.vlgmr.msra.gmra.mxu0 %v20189_v0  ;;  %v12818_v30 = vld [vmem:[%s28960_s5 + $0x618] sm:$0xf]  ;;  %v17991_v13 = vld [vmem:[%s28960_s5 + $0x75c] sm:$0xf] }
 0x1bc   :  { %2532 = vmatpush.bf16.msra.mxu2 %v12147_v19  ;;  %2556 = vmatpush.bf16.msrb.mxu0 %v12787_v23  ;;  %v12850_v19 = vld [vmem:[%s28960_s5 + $0x658] sm:$0xf]  ;;  %v12436_v23 = vld [vmem:[%s28960_s5 + $0x338] sm:$0xf0]  ;;  %v21107_v28 = vpop.f32.mrf.mxu3 }
 0x1bd   :  { %v17955_v34 = vld [vmem:[%s28960_s5 + $0x634] sm:$0xf0]  ;;  %v17919_v57 = vld [vmem:[%s28960_s5 + $0x51c] sm:$0xf] }
 0x1be   :  { %2548 = vmatpush.bf16.msra.mxu3 %v12339_v29  ;;  %2572 = vmatpush.bf16.msrb.mxu1 %v12979_v32  ;;  %v12851_v29 = vor.u32 %v17963_v20, %v12850_v19  ;;  %v12439_v32 = vor.u32 %v17855_v21, %v12436_v23  ;;  %v12594_v41 = vld [vmem:[%s28960_s5 + $0x458] sm:$0xf]  ;;  %v21131_v42 = vpop.f32.mrf.mxu1  ;;  %v12819_v48 = vor.u32 %v17955_v34, %v12818_v30  ;;  %v12756_v19 = vld [vmem:[%s28960_s5 + $0x5b8] sm:$0xf0]  ;;  %v18136_v34 = vld [vmem:[%s28962_s7 + $0x3dc] sm:$0xf0] }
 0x1bf   :  { %v17899_v43 = vld [vmem:[%s28960_s5 + $0x474] sm:$0xf0]  ;;  %v12343_v21 = vor.u32 %v17831_v11, %v12340_v12  ;;  %v12948_v30 = vld [vmem:[%s28960_s5 + $0x738] sm:$0xf0] }
 0x1c0   :  { %2533 = vmatpush.bf16.msra.mxu2 %v12115_v33  ;;  %2557 = vmatpush.bf16.msrb.mxu0 %v12755_v37  ;;  %v12627_v33 = vor.u32 %v17907_v25, %v12626_v24  ;;  %v12215_v37 = vor.u32 %v17799_v26, %v12212_v27  ;;  %v12595_v54 = vor.u32 %v17899_v43, %v12594_v41  ;;  %v12562_v59 = vld [vmem:[%s28960_s5 + $0x418] sm:$0xf]  ;;  %v12308_v27 = vld [vmem:[%s28960_s5 + $0x238] sm:$0xf0] }
 0x1c1   :  { %v17891_v60 = vld [vmem:[%s28960_s5 + $0x434] sm:$0xf0]  ;;  %v12983_v25 = vor.u32 %v17991_v13, %v12980_v15  ;;  %v12692_v58 = vld [vmem:[%s28960_s5 + $0x538] sm:$0xf0] }
 0x1c2   :  { %2549 = vmatpush.bf16.msra.mxu3 %v12307_v45  ;;  %2573 = vmatpush.bf16.msrb.mxu1 %v12947_v46  ;;  %v12180_v45 = vld [vmem:[%s28960_s5 + $0x138] sm:$0xf0]  ;;  %v21142_v46 = vpop.f32.mrf.mxu2  ;;  %v12563_v7 = vor.u32 %v17891_v60, %v12562_v59  ;;  %v13274_v59 = vld [vmem:[%s28962_s7 + $0x1c0] sm:$0xf] }
 0x1c3   :  { %v12183_v55 = vor.u32 %v17791_v44, %v12180_v45  ;;  %v17975_v44 = vld [vmem:[%s28960_s5 + $0x6dc] sm:$0xf]  ;;  %v18072_v60 = vld [vmem:[%s28962_s7 + $0x1dc] sm:$0xf0] }
 0x1c4   :  { %2534 = vmatpush.bf16.msra.mxu2 %v12083_v50  ;;  %2558 = vmatpush.bf16.msrb.mxu0 %v12723_v51  ;;  %v13047_v50 = vor.u32 %v18007_v38, %v13044_v39  ;;  %v17839_v51 = vld [vmem:[%s28960_s5 + $0x29c] sm:$0xf]  ;;  %v21176_v5 = vpop.f32.mrf.mxu3  ;;  %v13275_v13 = vor.u32 %v18072_v60, %v13274_v59  ;;  %v18264_v59 = vld [vmem:[%s28962_s7 + $0x7dc] sm:$0xf0] }
 0x1c5   :  { %2550 = vmatmul.bf16.vlgmr.msra.gmra.mxu3 %v20084_v53  ;;  %v12724_v38 = vld [vmem:[%s28960_s5 + $0x578] sm:$0xf0] }
 0x1c6   :  { %2598 = vmatpush.bf16.msrb.mxu3 %v12535_v47  ;;  %2574 = vmatpush.bf16.msrb.mxu1 %v12915_v62  ;;  %v21144_v47 = vpop.f32.mrf.mxu0  ;;  %v12148_v62 = vld [vmem:[%s28960_s5 + $0xf8] sm:$0xf0]  ;;  %v21203_v20 = vpop.f32.mrf.mxu1 }
 0x1c7   :  { %v12916_v45 = vld [vmem:[%s28960_s5 + $0x6f8] sm:$0xf0] }
 0x1c8   :  { %2535 = vmatpush.bf16.msra.mxu2 %v12051_v2  ;;  %2559 = vmatpush.bf16.msrb.mxu0 %v12691_v3  ;;  %v12788_v2 = vld [vmem:[%s28960_s5 + $0x5f8] sm:$0xf0]  ;;  %v12375_v3 = vor.u32 %v17839_v51, %v12372_v52  ;;  %v18128_v51 = vld [vmem:[%s28962_s7 + $0x39c] sm:$0xf0] }
 0x1c9   :  { %v17759_v52 = vld [vmem:[%s28960_s5 + $0x1c] sm:$0xf] }
 0x1ca   :  { %2599 = vmatpush.bf16.msrb.mxu3 %v12503_v63  ;;  %2575 = vmatpush.bf16.msrb.mxu1 %v12883_v16  ;;  %v17943_v63 = vld [vmem:[%s28960_s5 + $0x5dc] sm:$0xf]  ;;  %v21208_v23 = vpop.f32.mrf.mxu2 }
 0x1cb   :  { %2536 = vmatmul.bf16.vlgmr.msra.gmra.mxu2 %v20106_v6  ;;  %v12791_v14 = vor.u32 %v17943_v63, %v12788_v2  ;;  %v17775_v16 = vld [vmem:[%s28960_s5 + $0x9c] sm:$0xf] }
 0x1cc   :  { %2584 = vmatpush.bf16.msrb.mxu2 %v12279_v10  ;;  %2560 = vmatpush.bf16.msrb.mxu0 %v12659_v18  ;;  %v12151_v10 = vor.u32 %v17783_v61, %v12148_v62  ;;  %v17935_v18 = vld [vmem:[%s28960_s5 + $0x59c] sm:$0xf]  ;;  %v12919_v61 = vor.u32 %v17975_v44, %v12916_v45  ;;  %v13402_v45 = vld [vmem:[%s28962_s7 + $0x2c0] sm:$0xf] }
 0x1cd   :  { %v17911_v15 = vld [vmem:[%s28960_s5 + $0x4dc] sm:$0xf] }
 0x1ce   :  { %2600 = vmatpush.bf16.msrb.mxu3 %v12471_v17  ;;  %2576 = vmatpush.bf16.msrb.mxu1 %v12851_v29  ;;  %v12116_v17 = vld [vmem:[%s28960_s5 + $0xb8] sm:$0xf0]  ;;  %v21210_v24 = vpop.f32.mrf.mxu0  ;;  %v21272_v63 = vpop.f32.mrf.mxu1 }
 0x1cf   :  { %v12119_v26 = vor.u32 %v17775_v16, %v12116_v17  ;;  %v17983_v29 = vld [vmem:[%s28960_s5 + $0x71c] sm:$0xf]  ;;  %v13242_v17 = vld [vmem:[%s28962_s7 + $0x180] sm:$0xf] }
 0x1d0   :  { %2585 = vmatpush.bf16.msrb.mxu2 %v12247_v22  ;;  %2561 = vmatpush.bf16.msrb.mxu0 %v12627_v33  ;;  %v17823_v22 = vld [vmem:[%s28960_s5 + $0x21c] sm:$0xf]  ;;  %v13530_v33 = vld [vmem:[%s28962_s7 + $0x3c0] sm:$0xf]  ;;  %v12951_v41 = vor.u32 %v17983_v29, %v12948_v30 }
 0x1d1   :  { %v12311_v39 = vor.u32 %v17823_v22, %v12308_v27  ;;  %v13531_v43 = vor.u32 %v18136_v34, %v13530_v33  ;;  %v12660_v16 = vld [vmem:[%s28960_s5 + $0x4f8] sm:$0xf0]  ;;  %v18112_v29 = vld [vmem:[%s28962_s7 + $0x31c] sm:$0xf0] }
 0x1d2   :  { %2601 = vmatpush.bf16.msrb.mxu3 %v12439_v32  ;;  %2577 = vmatpush.bf16.msrb.mxu1 %v12819_v48  ;;  %v12759_v32 = vor.u32 %v17935_v18, %v12756_v19  ;;  %v12087_v48 = vor.u32 %v17767_v35, %v12084_v36  ;;  %v21283_v11 = vpop.f32.mrf.mxu2  ;;  %v17959_v22 = vld [vmem:[%s28960_s5 + $0x65c] sm:$0xf]  ;;  %v21324_v33 = vld [vmem:[%s28963_s6] sm:$0xff] }
 0x1d3   :  { %v17903_v30 = vld [vmem:[%s28960_s5 + $0x49c] sm:$0xf]  ;;  %v13210_v34 = vld [vmem:[%s28962_s7 + $0x140] sm:$0xf]  ;;  %v897_v36 = vperm.slane %v21324_v33, 1 }
 0x1d4   :  { %2586 = vmatpush.bf16.msrb.mxu2 %v12215_v37  ;;  %2562 = vmatpush.bf16.msrb.mxu0 %v12595_v54  ;;  %v17927_v37 = vld [vmem:[%s28960_s5 + $0x55c] sm:$0xf]  ;;  %v21255_v54 = vpop.f32.mrf.mxu3  ;;  %v18056_v35 = vld [vmem:[%s28962_s7 + $0x15c] sm:$0xf0] }
 0x1d5   :  { %2578 = vmatmul.bf16.vlgmr.msrb.gmra.mxu1 %v20149_v40  ;;  %v12820_v44 = vld [vmem:[%s28960_s5 + $0x638] sm:$0xf0]  ;;  %v2258_v60 = vadd.f32 %v21142_v46, %v897_v36  ;;  %v18096_v46 = vld [vmem:[%s28962_s7 + $0x29c] sm:$0xf0] }
 0x1d6   :  { %2602 = vmatpush.bf16.msrb.mxu3 %v12407_v49  ;;  %2626 = vmatpush.bf16.msra.mxu1 %v13047_v50  ;;  %v12727_v49 = vor.u32 %v17927_v37, %v12724_v38  ;;  %v13498_v50 = vld [vmem:[%s28962_s7 + $0x380] sm:$0xf]  ;;  %v21285_v12 = vpop.f32.mrf.mxu0 }
 0x1d7   :  { %v13499_v62 = vor.u32 %v18128_v51, %v13498_v50  ;;  %v12596_v50 = vld [vmem:[%s28960_s5 + $0x478] sm:$0xf0]  ;;  %v13178_v51 = vld [vmem:[%s28962_s7 + $0x100] sm:$0xf] }
 0x1d8   :  { %2587 = vmatpush.bf16.msrb.mxu2 %v12183_v55  ;;  %2563 = vmatpush.bf16.msrb.mxu0 %v12563_v7  ;;  %v12052_v55 = vld [vmem:[%s28960_s5 + $0x38] sm:$0xf0] }
 0x1d9   :  { %v12055_v2 = vor.u32 %v17759_v52, %v12052_v55  ;;  %v12884_v7 = vld [vmem:[%s28960_s5 + $0x6b8] sm:$0xf0]  ;;  %v2260_v52 = vadd.f32 %v21208_v23, %v897_v36  ;;  %v21358_v55 = vpop.f32.mrf.mxu1 }
 0x1da   :  { %2603 = vmatpush.bf16.msrb.mxu3 %v12375_v3  ;;  %2627 = vmatpush.bf16.msra.mxu1 %v13015_v4  ;;  %v12695_v3 = vor.u32 %v17919_v57, %v12692_v58  ;;  %v17967_v4 = vld [vmem:[%s28960_s5 + $0x69c] sm:$0xf]  ;;  %v18048_v57 = vld [vmem:[%s28962_s7 + $0x11c] sm:$0xf0] }
 0x1db   :  { %2564 = vmatmul.bf16.vlgmr.msrb.gmra.mxu0 %v20189_v0  ;;  %v12887_v18 = vor.u32 %v17967_v4, %v12884_v7  ;;  %v14042_v58 = vld [vmem:[%s28962_s7 + $0x7c0] sm:$0xf] }
 0x1dc   :  { %2588 = vmatpush.bf16.msrb.mxu2 %v12151_v10  ;;  %2612 = vmatpush.bf16.msra.mxu0 %v12791_v14  ;;  %v13466_v10 = vld [vmem:[%s28962_s7 + $0x340] sm:$0xf]  ;;  %v21333_v37 = vpop.f32.mrf.mxu3 }
 0x1dd   :  { %v18120_v14 = vld [vmem:[%s28962_s7 + $0x35c] sm:$0xf0] }
 0x1de   :  { %2604 = vmatpush.bf16.msrb.mxu3 %v12343_v21  ;;  %2628 = vmatpush.bf16.msra.mxu1 %v12983_v25  ;;  %v13467_v19 = vor.u32 %v18120_v14, %v13466_v10  ;;  %v12663_v21 = vor.u32 %v17911_v15, %v12660_v16  ;;  %v12852_v25 = vld [vmem:[%s28960_s5 + $0x678] sm:$0xf0]  ;;  %v13370_v7 = vld [vmem:[%s28962_s7 + $0x280] sm:$0xf]  ;;  %v13179_v10 = vor.u32 %v18048_v57, %v13178_v51 }
 0x1df   :  { %v12855_v38 = vor.u32 %v17959_v22, %v12852_v25  ;;  %v17887_v14 = vld [vmem:[%s28960_s5 + $0x41c] sm:$0xf]  ;;  %v13146_v16 = vld [vmem:[%s28962_s7 + $0xc0] sm:$0xf]  ;;  %v2272_v22 = vadd.f32 %v21176_v5, %v2258_v60 }
 0x1e0   :  { %2589 = vmatpush.bf16.msrb.mxu2 %v12119_v26  ;;  %2613 = vmatpush.bf16.msra.mxu0 %v12759_v32  ;;  %v13434_v26 = vld [vmem:[%s28962_s7 + $0x300] sm:$0xf]  ;;  %v12628_v32 = vld [vmem:[%s28960_s5 + $0x4b8] sm:$0xf0] }
 0x1e1   :  { %v12564_v15 = vld [vmem:[%s28960_s5 + $0x438] sm:$0xf0] }
 0x1e2   :  { %2605 = vmatpush.bf16.msrb.mxu3 %v12311_v39  ;;  %2629 = vmatpush.bf16.msra.mxu1 %v12951_v41  ;;  %v17951_v39 = vld [vmem:[%s28960_s5 + $0x61c] sm:$0xf]  ;;  %v13435_v41 = vor.u32 %v18112_v29, %v13434_v26  ;;  %v13371_v26 = vor.u32 %v18096_v46, %v13370_v7  ;;  %v2286_v29 = vadd.f32 %v21210_v24, %v2272_v22  ;;  %v18392_v7 = vld [vmem:[%s28962_s7 + $0xbdc] sm:$0xf0] }
 0x1e3   :  { %v12823_v23 = vor.u32 %v17951_v39, %v12820_v44  ;;  %v18032_v39 = vld [vmem:[%s28962_s7 + $0x9c] sm:$0xf0] }
 0x1e4   :  { %2590 = vmatpush.bf16.msrb.mxu2 %v12087_v48  ;;  %2614 = vmatpush.bf16.msra.mxu0 %v12727_v49  ;;  %v13211_v48 = vor.u32 %v18056_v35, %v13210_v34  ;;  %v17895_v49 = vld [vmem:[%s28960_s5 + $0x45c] sm:$0xf]  ;;  %v13338_v34 = vld [vmem:[%s28962_s7 + $0x240] sm:$0xf]  ;;  %v2300_v51 = vadd.f32 %v21203_v20, %v2286_v29 }
 0x1e5   :  { %2606 = vmatmul.bf16.vlgmr.msrb.gmra.mxu3 %v20084_v53  ;;  %v18064_v53 = vld [vmem:[%s28962_s7 + $0x19c] sm:$0xf0]  ;;  %v12599_v4 = vor.u32 %v17895_v49, %v12596_v50 }
 0x1e6   :  { %5768 = vmatpush.bf16.msra.mxu3 %v13531_v43  ;;  %2630 = vmatpush.bf16.msra.mxu1 %v12919_v61  ;;  %v13243_v27 = vor.u32 %v18064_v53, %v13242_v17  ;;  %v12631_v43 = vor.u32 %v17903_v30, %v12628_v32  ;;  %v21370_v61 = vpop.f32.mrf.mxu2  ;;  %v2274_v53 = vadd.f32 %v21255_v54, %v2260_v52  ;;  %v18256_v54 = vld [vmem:[%s28962_s7 + $0x79c] sm:$0xf0]  ;;  %v21410_v30 = vpop.f32.mrf.mxu3 }
 0x1e7   :  { %v13114_v35 = vld [vmem:[%s28962_s7 + $0x80] sm:$0xf] }
 0x1e8   :  { %2591 = vmatpush.bf16.msrb.mxu2 %v12055_v2  ;;  %2615 = vmatpush.bf16.msra.mxu0 %v12695_v3  ;;  %v896_v2 = vperm.slane %v21324_v33, 0  ;;  %v2288_v25 = vadd.f32 %v21285_v12, %v2274_v53  ;;  %v18088_v12 = vld [vmem:[%s28962_s7 + $0x25c] sm:$0xf0] }
 0x1e9   :  { %v13339_v49 = vor.u32 %v18088_v12, %v13338_v34  ;;  %v13306_v50 = vld [vmem:[%s28962_s7 + $0x200] sm:$0xf] }
 0x1ea   :  { %5769 = vmatpush.bf16.msra.mxu3 %v13499_v62  ;;  %2631 = vmatpush.bf16.msra.mxu1 %v12887_v18  ;;  %v21372_v62 = vpop.f32.mrf.mxu0  ;;  %v2204_v17 = vadd.f32 %v21063_v8, %v896_v2  ;;  %v18040_v18 = vld [vmem:[%s28962_s7 + $0xdc] sm:$0xf0]  ;;  %v2202_v24 = vadd.f32 %v20990_v31, %v896_v2 }
 0x1eb   :  { %2592 = vmatmul.bf16.vlgmr.msrb.gmra.mxu2 %v20106_v6  ;;  %v18104_v6 = vld [vmem:[%s28962_s7 + $0x2dc] sm:$0xf0]  ;;  %v13147_v5 = vor.u32 %v18040_v18, %v13146_v16  ;;  %v899_v16 = vperm.slane %v21324_v33, 3 }
 0x1ec   :  { %5754 = vmatpush.bf16.msra.mxu2 %v13275_v13  ;;  %2616 = vmatpush.bf16.msra.mxu0 %v12663_v21  ;;  %v13403_v3 = vor.u32 %v18104_v6, %v13402_v45  ;;  %v14043_v13 = vor.u32 %v18264_v59, %v14042_v58  ;;  %v18200_v21 = vld [vmem:[%s28962_s7 + $0x5dc] sm:$0xf0]  ;;  %v2218_v36 = vadd.f32 %v21107_v28, %v2204_v17  ;;  %v898_v45 = vperm.slane %v21324_v33, 2 }
 0x1ed   :  { %v14010_v8 = vld [vmem:[%s28962_s7 + $0x780] sm:$0xf]  ;;  %v2302_v6 = vadd.f32 %v21272_v63, %v2288_v25  ;;  %v2216_v20 = vadd.f32 %v21035_v56, %v2202_v24 }
 0x1ee   :  { %5770 = vmatpush.bf16.msra.mxu3 %v13467_v19  ;;  %2632 = vmatpush.bf16.msra.mxu1 %v12855_v38  ;;  %v13786_v19 = vld [vmem:[%s28962_s7 + $0x5c0] sm:$0xf]  ;;  %v14011_v38 = vor.u32 %v18256_v54, %v14010_v8  ;;  %v2369_v44 = vpop.f32.mrf.mxu2  ;;  %v2232_v28 = vadd.f32 %v21144_v47, %v2218_v36  ;;  %v13115_v47 = vor.u32 %v18032_v39, %v13114_v35 }
 0x1ef   :  { %v13787_v32 = vor.u32 %v18200_v21, %v13786_v19  ;;  %v13978_v31 = vld [vmem:[%s28962_s7 + $0x740] sm:$0xf]  ;;  %v2230_v46 = vadd.f32 %v21065_v9, %v2216_v20  ;;  %v2370_v35 = vadd.f32 %v2369_v44, %v899_v16 }
 0x1f0   :  { %5755 = vmatpush.bf16.msra.mxu2 %v13243_v27  ;;  %2617 = vmatpush.bf16.msra.mxu0 %v12631_v43  ;;  %v12567_v27 = vor.u32 %v17887_v14, %v12564_v15  ;;  %v18192_v43 = vld [vmem:[%s28962_s7 + $0x59c] sm:$0xf0]  ;;  %v2383_v15 = vpop.f32.mrf.mxu3 }
 0x1f1   :  { %v18080_v63 = vld [vmem:[%s28962_s7 + $0x21c] sm:$0xf0] }
 0x1f2   :  { %5771 = vmatpush.bf16.msra.mxu3 %v13435_v41  ;;  %2633 = vmatpush.bf16.msra.mxu1 %v12823_v23  ;;  %v13754_v41 = vld [vmem:[%s28962_s7 + $0x580] sm:$0xf]  ;;  %v21448_v52 = vpop.f32.mrf.mxu0  ;;  %v13307_v14 = vor.u32 %v18080_v63, %v13306_v50 }
 0x1f3   :  { %v13755_v57 = vor.u32 %v18192_v43, %v13754_v41  ;;  %v13082_v58 = vld [vmem:[%s28962_s7 + $0x40] sm:$0xf] }
 0x1f4   :  { %5756 = vmatpush.bf16.msra.mxu2 %v13211_v48  ;;  %2618 = vmatpush.bf16.msra.mxu0 %v12599_v4  ;;  %v21442_v48 = vpop.f32.mrf.mxu1  ;;  %v18024_v59 = vld [vmem:[%s28962_s7 + $0x5c] sm:$0xf0] }
 0x1f5   :  { %2634 = vmatmul.bf16.vlgmr.msra.gmra.mxu1 %v20149_v40  ;;  %v18248_v40 = vld [vmem:[%s28962_s7 + $0x75c] sm:$0xf0]  ;;  %v13083_v17 = vor.u32 %v18024_v59, %v13082_v58  ;;  %v2384_v58 = vadd.f32 %v2383_v15, %v2370_v35 }
 0x1f6   :  { %5772 = vmatpush.bf16.msra.mxu3 %v13403_v3  ;;  %5796 = vmatpush.bf16.msrb.mxu1 %v14043_v13  ;;  %v13979_v60 = vor.u32 %v18248_v40, %v13978_v31  ;;  %v13722_v23 = vld [vmem:[%s28962_s7 + $0x540] sm:$0xf]  ;;  %v2649_v13 = vmax.f32 %v2302_v6, 0.0  ;;  %v2371_v24 = vpop.f32.mrf.mxu2  ;;  %v2314_v40 = vadd.f32 %v21283_v11, %v898_v45  ;;  %v2316_v11 = vadd.f32 %v21370_v61, %v898_v45 }
 0x1f7   :  { %v18184_v2 = vld [vmem:[%s28962_s7 + $0x55c] sm:$0xf0] }
 0x1f8   :  { %5757 = vmatpush.bf16.msra.mxu2 %v13179_v10  ;;  %2619 = vmatpush.bf16.msra.mxu0 %v12567_v27  ;;  %v13946_v3 = vld [vmem:[%s28962_s7 + $0x700] sm:$0xf]  ;;  %v2246_v10 = vadd.f32 %v21131_v42, %v2232_v28  ;;  %v13723_v53 = vor.u32 %v18184_v2, %v13722_v23  ;;  %v2244_v27 = vadd.f32 %v21052_v1, %v2230_v46 }
 0x1f9   :  { %v18240_v56 = vld [vmem:[%s28962_s7 + $0x71c] sm:$0xf0] }
 0x1fa   :  { %5773 = vmatpush.bf16.msra.mxu3 %v13371_v26  ;;  %5797 = vmatpush.bf16.msrb.mxu1 %v14011_v38  ;;  %v14554_v4 = vld [vmem:[%s28962_s7 + $0xbc0] sm:$0xf]  ;;  %v13947_v42 = vor.u32 %v18240_v56, %v13946_v3  ;;  %v2648_v12 = vmax.f32 %v2246_v10, 0.0  ;;  %v2397_v36 = vpop.f32.mrf.mxu0  ;;  %v2328_v56 = vadd.f32 %v21333_v37, %v2314_v40 }
 0x1fb   :  { %2620 = vmatmul.bf16.vlgmr.msra.gmra.mxu0 %v20189_v0  ;;  %v2641_v0 = vmax.f32 %v2300_v51, 0.0  ;;  %v13050_v18 = vld [vmem:[%s28962_s7] sm:$0xf]  ;;  %v14555_v8 = vor.u32 %v18392_v7, %v14554_v4  ;;  %v2640_v51 = vmax.f32 %v2244_v27, 0.0  ;;  %v2385_v4 = vpop.f32.mrf.mxu3  ;;  %v2398_v7 = vadd.f32 %v2397_v36, %v2384_v58 }
 0x1fc   :  { %5758 = vmatpush.bf16.msra.mxu2 %v13147_v5  ;;  %5782 = vmatpush.bf16.msrb.mxu0 %v13787_v32  ;;  %v18016_v9 = vld [vmem:[%s28962_s7 + $0x1c] sm:$0xf0]  ;;  %v21509_v5 = vpop.f32.mrf.mxu1 }
 0x1fd   :  { %v13690_v19 = vld [vmem:[%s28962_s7 + $0x500] sm:$0xf]  ;;  %v21507_v29 = vpack.c.bf16 %v2649_v13, %v2641_v0  ;;  %v13051_v1 = vor.u32 %v18016_v9, %v13050_v18 }
 0x1fe   :  { %5774 = vmatpush.bf16.msra.mxu3 %v13339_v49  ;;  %5798 = vmatpush.bf16.msrb.mxu1 %v13979_v60  ;;  %v18176_v21 = vld [vmem:[%s28962_s7 + $0x51c] sm:$0xf0]  ;;  %v21551_v60 = vpack.c.bf16 %v2648_v12, %v2640_v51 }
 0x1ff   :  { %v13914_v22 = vld [vmem:[%s28962_s7 + $0x6c0] sm:$0xf]  ;;  %v13691_v38 = vor.u32 %v18176_v21, %v13690_v19 }
 0x200   :  { %5759 = vmatpush.bf16.msra.mxu2 %v13115_v47  ;;  %5783 = vmatpush.bf16.msrb.mxu0 %v13755_v57  ;;  %v18232_v54 = vld [vmem:[%s28962_s7 + $0x6dc] sm:$0xf0]  ;;  %v2372_v47 = vadd.f32 %v2371_v24, %v899_v16  ;;  %v2342_v16 = vadd.f32 %v21372_v62, %v2328_v56 }
 0x201   :  { %v14298_v25 = vld [vmem:[%s28962_s7 + $0x9c0] sm:$0xf]  ;;  %v13915_v39 = vor.u32 %v18232_v54, %v13914_v22  ;;  %v2412_v22 = vadd.f32 %v21509_v5, %v2398_v7 }
 0x202   :  { %v18328_v26 = vld [vmem:[%s28962_s7 + $0x9dc] sm:$0xf0]  ;;  %5775 = vmatpush.bf16.msra.mxu3 %v13307_v14  ;;  %5799 = vmatpush.bf16.msrb.mxu1 %v13947_v42  ;;  %v2330_v14 = vadd.f32 %v21410_v30, %v2316_v11  ;;  %v2386_v0 = vadd.f32 %v2385_v4, %v2372_v47 }
 0x203   :  { %v14522_v32 = vld [vmem:[%s28962_s7 + $0xb80] sm:$0xf]  ;;  %v14299_v41 = vor.u32 %v18328_v26, %v14298_v25 }
 0x204   :  { %v18384_v34 = vld [vmem:[%s28962_s7 + $0xb9c] sm:$0xf0]  ;;  %5760 = vmatpush.bf16.msra.mxu2 %v13083_v17  ;;  %5784 = vmatpush.bf16.msrb.mxu0 %v13723_v53  ;;  %v2399_v17 = vpop.f32.mrf.mxu0  ;;  %v2344_v9 = vadd.f32 %v21448_v52, %v2330_v14 }
 0x205   :  { %v13658_v43 = vld [vmem:[%s28962_s7 + $0x4c0] sm:$0xf]  ;;  %5776 = vmatmul.bf16.vlgmr.msra.gmra.mxu3 %v21507_v29  ;;  %v14523_v50 = vor.u32 %v18384_v34, %v14522_v32  ;;  %v2400_v30 = vadd.f32 %v2399_v17, %v2386_v0  ;;  %v2356_v34 = vadd.f32 %v21358_v55, %v2342_v16  ;;  %v900_v16 = vperm.slane %v21324_v33, 4 }
 0x206   :  { %v18168_v31 = vld [vmem:[%s28962_s7 + $0x4dc] sm:$0xf0]  ;;  %5824 = vmatpush.bf16.msrb.mxu3 %v14555_v8  ;;  %5800 = vmatpush.bf16.msrb.mxu1 %v13915_v39  ;;  %v2413_v8 = vpop.f32.mrf.mxu1  ;;  %v2358_v24 = vadd.f32 %v21442_v48, %v2344_v9 }
 0x207   :  { %v13882_v44 = vld [vmem:[%s28962_s7 + $0x680] sm:$0xf]  ;;  %v13659_v59 = vor.u32 %v18168_v31, %v13658_v43  ;;  %v2414_v27 = vadd.f32 %v2413_v8, %v2400_v30 }
 0x208   :  { %v18224_v28 = vld [vmem:[%s28962_s7 + $0x69c] sm:$0xf0]  ;;  %5761 = vmatpush.bf16.msra.mxu2 %v13051_v1  ;;  %5785 = vmatpush.bf16.msrb.mxu0 %v13691_v38  ;;  %v2650_v51 = vmax.f32 %v2358_v24, 0.0  ;;  %v13244_v24 = vld [vmem:[%s28962_s7 + $0x1a0] sm:$0xf0] }
 0x209   :  { %v14266_v6 = vld [vmem:[%s28962_s7 + $0x980] sm:$0xf]  ;;  %v13883_v61 = vor.u32 %v18224_v28, %v13882_v44  ;;  %v2651_v36 = vmax.f32 %v2414_v27, 0.0 }
 0x20a   :  { %v18320_v49 = vld [vmem:[%s28962_s7 + $0x99c] sm:$0xf0]  ;;  %5825 = vmatpush.bf16.msrb.mxu3 %v14523_v50  ;;  %v2642_v50 = vmax.f32 %v2356_v34, 0.0 }
 0x20b   :  { %v14490_v57 = vld [vmem:[%s28962_s7 + $0xb40] sm:$0xf]  ;;  %v14267_v45 = vor.u32 %v18320_v49, %v14266_v6  ;;  %5762 = vmatmul.bf16.vlgmr.msra.gmra.mxu2 %v21551_v60  ;;  %5801 = vmatpush.bf16.msrb.mxu1 %v13883_v61 }
 0x20c   :  { %v18376_v63 = vld [vmem:[%s28962_s7 + $0xb5c] sm:$0xf0]  ;;  %5810 = vmatpush.bf16.msrb.mxu2 %v14299_v41  ;;  %5786 = vmatpush.bf16.msrb.mxu0 %v13659_v59  ;;  %v2643_v41 = vmax.f32 %v2412_v22, 0.0 }
 0x20d   :  { %v13626_v20 = vld [vmem:[%s28962_s7 + $0x480] sm:$0xf]  ;;  %v14491_v13 = vor.u32 %v18376_v63, %v14490_v57 }
 0x20e   :  { %v18160_v23 = vld [vmem:[%s28962_s7 + $0x49c] sm:$0xf0]  ;;  %v21630_v6 = vpack.c.bf16 %v2651_v36, %v2643_v41 }
 0x20f   :  { %v13850_v2 = vld [vmem:[%s28962_s7 + $0x640] sm:$0xf]  ;;  %v13627_v53 = vor.u32 %v18160_v23, %v13626_v20  ;;  %5826 = vmatpush.bf16.msrb.mxu3 %v14491_v13  ;;  %v2425_v23 = vpop.f32.mrf.mxu2 }
 0x210   :  { %v18216_v3 = vld [vmem:[%s28962_s7 + $0x65c] sm:$0xf0]  ;;  %5811 = vmatpush.bf16.msrb.mxu2 %v14267_v45 }
 0x211   :  { %v14234_v46 = vld [vmem:[%s28962_s7 + $0x940] sm:$0xf]  ;;  %v13851_v18 = vor.u32 %v18216_v3, %v13850_v2  ;;  %5787 = vmatpush.bf16.msrb.mxu0 %v13627_v53  ;;  %v21651_v2 = vpack.c.bf16 %v2650_v51, %v2642_v50 }
 0x212   :  { %v18312_v10 = vld [vmem:[%s28962_s7 + $0x95c] sm:$0xf0] }
 0x213   :  { %v14458_v37 = vld [vmem:[%s28962_s7 + $0xb00] sm:$0xf]  ;;  %v14235_v42 = vor.u32 %v18312_v10, %v14234_v46  ;;  %5802 = vmatpush.bf16.msrb.mxu1 %v13851_v18  ;;  %v2439_v18 = vpop.f32.mrf.mxu3 }
 0x214   :  { %v18368_v15 = vld [vmem:[%s28962_s7 + $0xb1c] sm:$0xf0] }
 0x215   :  { %v13594_v19 = vld [vmem:[%s28962_s7 + $0x440] sm:$0xf]  ;;  %v14459_v26 = vor.u32 %v18368_v15, %v14458_v37  ;;  %5812 = vmatpush.bf16.msrb.mxu2 %v14235_v42  ;;  %v18132_v37 = vld [vmem:[%s28962_s7 + $0x3c4] sm:$0xf] }
 0x216   :  { %v18152_v21 = vld [vmem:[%s28962_s7 + $0x45c] sm:$0xf0]  ;;  %v13532_v15 = vld [vmem:[%s28962_s7 + $0x3e0] sm:$0xf0] }
 0x217   :  { %v13818_v62 = vld [vmem:[%s28962_s7 + $0x600] sm:$0xf]  ;;  %v13595_v12 = vor.u32 %v18152_v21, %v13594_v19  ;;  %5827 = vmatpush.bf16.msrb.mxu3 %v14459_v26  ;;  %v18068_v42 = vld [vmem:[%s28962_s7 + $0x1c4] sm:$0xf]  ;;  %v2467_v26 = vpop.f32.mrf.mxu1 }
 0x218   :  { %v18208_v52 = vld [vmem:[%s28962_s7 + $0x61c] sm:$0xf0]  ;;  %v13276_v21 = vld [vmem:[%s28962_s7 + $0x1e0] sm:$0xf0]  ;;  %v2453_v34 = vpop.f32.mrf.mxu0 }
 0x219   :  { %v14202_v54 = vld [vmem:[%s28962_s7 + $0x900] sm:$0xf]  ;;  %v13819_v1 = vor.u32 %v18208_v52, %v13818_v62  ;;  %5788 = vmatpush.bf16.msrb.mxu0 %v13595_v12  ;;  %v13535_v62 = vor.u32 %v18132_v37, %v13532_v15  ;;  %v18124_v52 = vld [vmem:[%s28962_s7 + $0x384] sm:$0xf]  ;;  %v13279_v12 = vor.u32 %v18068_v42, %v13276_v21 }
 0x21a   :  { %v18304_v25 = vld [vmem:[%s28962_s7 + $0x91c] sm:$0xf0]  ;;  %v18036_v15 = vld [vmem:[%s28962_s7 + $0xc4] sm:$0xf] }
 0x21b   :  { %v14426_v5 = vld [vmem:[%s28962_s7 + $0xac0] sm:$0xf]  ;;  %v14203_v38 = vor.u32 %v18304_v25, %v14202_v54  ;;  %5803 = vmatpush.bf16.msrb.mxu1 %v13819_v1  ;;  %v13500_v54 = vld [vmem:[%s28962_s7 + $0x3a0] sm:$0xf0]  ;;  %v2426_v25 = vadd.f32 %v2425_v23, %v900_v16 }
 0x21c   :  { %v18360_v32 = vld [vmem:[%s28962_s7 + $0xadc] sm:$0xf0]  ;;  %v13503_v36 = vor.u32 %v18124_v52, %v13500_v54  ;;  %v18092_v42 = vld [vmem:[%s28962_s7 + $0x284] sm:$0xf] }
 0x21d   :  { %v13562_v35 = vld [vmem:[%s28962_s7 + $0x400] sm:$0xf]  ;;  %v14427_v48 = vor.u32 %v18360_v32, %v14426_v5  ;;  %5813 = vmatpush.bf16.msrb.mxu2 %v14203_v38  ;;  %v2427_v32 = vpop.f32.mrf.mxu2  ;;  %v18196_v52 = vld [vmem:[%s28962_s7 + $0x5c4] sm:$0xf] }
 0x21e   :  { %v18144_v39 = vld [vmem:[%s28962_s7 + $0x41c] sm:$0xf0]  ;;  %5804 = vmatmul.bf16.vlgmr.msrb.gmra.mxu1 %v21630_v6  ;;  %v2428_v41 = vadd.f32 %v2427_v32, %v900_v16  ;;  %v13148_v16 = vld [vmem:[%s28962_s7 + $0xe0] sm:$0xf0] }
 0x21f   :  { %v14170_v55 = vld [vmem:[%s28962_s7 + $0x8c0] sm:$0xf]  ;;  %v13563_v49 = vor.u32 %v18144_v39, %v13562_v35  ;;  %5828 = vmatpush.bf16.msrb.mxu3 %v14427_v48  ;;  %v18060_v35 = vld [vmem:[%s28962_s7 + $0x184] sm:$0xf] }
 0x220   :  { %v18296_v43 = vld [vmem:[%s28962_s7 + $0x8dc] sm:$0xf0]  ;;  %v18116_v39 = vld [vmem:[%s28962_s7 + $0x344] sm:$0xf] }
 0x221   :  { %v14394_v31 = vld [vmem:[%s28962_s7 + $0xa80] sm:$0xf]  ;;  %v14171_v11 = vor.u32 %v18296_v43, %v14170_v55  ;;  %5789 = vmatpush.bf16.msrb.mxu0 %v13563_v49  ;;  %v13468_v55 = vld [vmem:[%s28962_s7 + $0x360] sm:$0xf0]  ;;  %v2440_v43 = vadd.f32 %v2439_v18, %v2426_v25  ;;  %v13151_v25 = vor.u32 %v18036_v15, %v13148_v16 }
 0x222   :  { %v18352_v44 = vld [vmem:[%s28962_s7 + $0xa9c] sm:$0xf0]  ;;  %v13471_v49 = vor.u32 %v18116_v39, %v13468_v55  ;;  %v13788_v54 = vld [vmem:[%s28962_s7 + $0x5e0] sm:$0xf0] }
 0x223   :  { %v14810_v40 = vld [vmem:[%s28962_s7 + $0xdc0] sm:$0xf]  ;;  %v14395_v58 = vor.u32 %v18352_v44, %v14394_v31  ;;  %5814 = vmatpush.bf16.msrb.mxu2 %v14171_v11  ;;  %v13247_v31 = vor.u32 %v18060_v35, %v13244_v24  ;;  %v18052_v44 = vld [vmem:[%s28962_s7 + $0x144] sm:$0xf]  ;;  %v2441_v11 = vpop.f32.mrf.mxu3 }
 0x224   :  { %v18456_v28 = vld [vmem:[%s28962_s7 + $0xddc] sm:$0xf0]  ;;  %5790 = vmatmul.bf16.vlgmr.msrb.gmra.mxu0 %v21651_v2  ;;  %v13116_v32 = vld [vmem:[%s28962_s7 + $0xa0] sm:$0xf0] }
 0x225   :  { %v14811_v47 = vor.u32 %v18456_v28, %v14810_v40  ;;  %v14138_v57 = vld [vmem:[%s28962_s7 + $0x880] sm:$0xf]  ;;  %5829 = vmatpush.bf16.msrb.mxu3 %v14395_v58  ;;  %v2454_v40 = vadd.f32 %v2453_v34, %v2440_v43  ;;  %v13212_v28 = vld [vmem:[%s28962_s7 + $0x160] sm:$0xf0] }
 0x226   :  { %v18288_v63 = vld [vmem:[%s28962_s7 + $0x89c] sm:$0xf0]  ;;  %v13340_v35 = vld [vmem:[%s28962_s7 + $0x260] sm:$0xf0] }
 0x227   :  { %v14362_v59 = vld [vmem:[%s28962_s7 + $0xa40] sm:$0xf]  ;;  %v14139_v3 = vor.u32 %v18288_v63, %v14138_v57  ;;  %5838 = vmatpush.bf16.msra.mxu0 %v14811_v47  ;;  %v18108_v47 = vld [vmem:[%s28962_s7 + $0x304] sm:$0xf]  ;;  %v2442_v63 = vadd.f32 %v2441_v11, %v2428_v41 }
 0x228   :  { %v18344_v20 = vld [vmem:[%s28962_s7 + $0xa5c] sm:$0xf0]  ;;  %v13436_v57 = vld [vmem:[%s28962_s7 + $0x320] sm:$0xf0] }
 0x229   :  { %v14778_v61 = vld [vmem:[%s28962_s7 + $0xd80] sm:$0xf]  ;;  %v14363_v46 = vor.u32 %v18344_v20, %v14362_v59  ;;  %5815 = vmatpush.bf16.msrb.mxu2 %v14139_v3  ;;  %v2455_v59 = vpop.f32.mrf.mxu0  ;;  %v13215_v20 = vor.u32 %v18052_v44, %v13212_v28  ;;  %v13180_v3 = vld [vmem:[%s28962_s7 + $0x120] sm:$0xf0] }
 0x22a   :  { %v18448_v45 = vld [vmem:[%s28962_s7 + $0xd9c] sm:$0xf0]  ;;  %v2456_v23 = vadd.f32 %v2455_v59, %v2442_v63  ;;  %v13756_v39 = vld [vmem:[%s28962_s7 + $0x5a0] sm:$0xf0] }
 0x22b   :  { %v14106_v56 = vld [vmem:[%s28962_s7 + $0x840] sm:$0xf]  ;;  %v14779_v4 = vor.u32 %v18448_v45, %v14778_v61  ;;  %5830 = vmatpush.bf16.msrb.mxu3 %v14363_v46  ;;  %v18044_v61 = vld [vmem:[%s28962_s7 + $0x104] sm:$0xf]  ;;  %v2468_v45 = vadd.f32 %v2467_v26, %v2454_v40  ;;  %v2469_v46 = vpop.f32.mrf.mxu1 }
 0x22c   :  { %v18280_v7 = vld [vmem:[%s28962_s7 + $0x85c] sm:$0xf0]  ;;  %v13183_v37 = vor.u32 %v18044_v61, %v13180_v3  ;;  %v18028_v26 = vld [vmem:[%s28962_s7 + $0x84] sm:$0xf] }
 0x22d   :  { %v14746_v10 = vld [vmem:[%s28962_s7 + $0xd40] sm:$0xf]  ;;  %v14107_v17 = vor.u32 %v18280_v7, %v14106_v56  ;;  %5839 = vmatpush.bf16.msra.mxu0 %v14779_v4  ;;  %v13439_v56 = vor.u32 %v18108_v47, %v13436_v57  ;;  %v13119_v41 = vor.u32 %v18028_v26, %v13116_v32  ;;  %v18020_v43 = vld [vmem:[%s28962_s7 + $0x44] sm:$0xf]  ;;  %v901_v57 = vperm.slane %v21324_v33, 5 }
 0x22e   :  { %v18440_v13 = vld [vmem:[%s28962_s7 + $0xd5c] sm:$0xf0]  ;;  %v2481_v55 = vpop.f32.mrf.mxu2  ;;  %v18076_v40 = vld [vmem:[%s28962_s7 + $0x204] sm:$0xf] }
 0x22f   :  { %v14330_v14 = vld [vmem:[%s28962_s7 + $0xa00] sm:$0xf]  ;;  %v14747_v53 = vor.u32 %v18440_v13, %v14746_v10  ;;  %5816 = vmatpush.bf16.msrb.mxu2 %v14107_v17  ;;  %v18100_v10 = vld [vmem:[%s28962_s7 + $0x2c4] sm:$0xf]  ;;  %v2644_v17 = vmax.f32 %v2468_v45, 0.0 }
 0x230   :  { %v18336_v0 = vld [vmem:[%s28962_s7 + $0xa1c] sm:$0xf0]  ;;  %v13404_v13 = vld [vmem:[%s28962_s7 + $0x2e0] sm:$0xf0] }
 0x231   :  { %v14074_v9 = vld [vmem:[%s28962_s7 + $0x800] sm:$0xf]  ;;  %v14331_v19 = vor.u32 %v18336_v0, %v14330_v14  ;;  %5840 = vmatpush.bf16.msra.mxu0 %v14747_v53  ;;  %v2470_v14 = vadd.f32 %v2469_v46, %v2456_v23  ;;  %v13407_v18 = vor.u32 %v18100_v10, %v13404_v13  ;;  %v13308_v28 = vld [vmem:[%s28962_s7 + $0x220] sm:$0xf0]  ;;  %v2495_v23 = vpop.f32.mrf.mxu3 }
 0x232   :  { %v18272_v30 = vld [vmem:[%s28962_s7 + $0x81c] sm:$0xf0]  ;;  %v13724_v47 = vld [vmem:[%s28962_s7 + $0x560] sm:$0xf0]  ;;  %v13311_v45 = vor.u32 %v18076_v40, %v13308_v28 }
 0x233   :  { %v14714_v22 = vld [vmem:[%s28962_s7 + $0xd00] sm:$0xf]  ;;  %v14075_v27 = vor.u32 %v18272_v30, %v14074_v9  ;;  %5831 = vmatpush.bf16.msrb.mxu3 %v14331_v19  ;;  %v2652_v53 = vmax.f32 %v2470_v14, 0.0  ;;  %v13372_v19 = vld [vmem:[%s28962_s7 + $0x2a0] sm:$0xf0]  ;;  %v2482_v14 = vadd.f32 %v2481_v55, %v901_v57 }
 0x234   :  { %v18432_v8 = vld [vmem:[%s28962_s7 + $0xd1c] sm:$0xf0]  ;;  %v13375_v34 = vor.u32 %v18092_v42, %v13372_v19  ;;  %v18324_v61 = vld [vmem:[%s28962_s7 + $0x9c4] sm:$0xf] }
 0x235   :  { %v14715_v5 = vor.u32 %v18432_v8, %v14714_v22  ;;  %v14682_v1 = vld [vmem:[%s28962_s7 + $0xcc0] sm:$0xf]  ;;  %5817 = vmatpush.bf16.msrb.mxu2 %v14075_v27  ;;  %v14300_v33 = vld [vmem:[%s28962_s7 + $0x9e0] sm:$0xf0] }
 0x236   :  { %v18424_v38 = vld [vmem:[%s28962_s7 + $0xcdc] sm:$0xf0]  ;;  %v13692_v46 = vld [vmem:[%s28962_s7 + $0x520] sm:$0xf0] }
 0x237   :  { %5880 = vmatpush.bf16.msra.mxu3 %v13535_v62  ;;  %5841 = vmatpush.bf16.msra.mxu0 %v14715_v5  ;;  %v14683_v48 = vor.u32 %v18424_v38, %v14682_v1  ;;  %v14650_v50 = vld [vmem:[%s28962_s7 + $0xc80] sm:$0xf]  ;;  %v21778_v62 = vpack.c.bf16 %v2652_v53, %v2644_v17  ;;  %v13791_v5 = vor.u32 %v18196_v52, %v13788_v54  ;;  %v18188_v1 = vld [vmem:[%s28962_s7 + $0x584] sm:$0xf]  ;;  %v2483_v17 = vpop.f32.mrf.mxu2 }
 0x238   :  { %v18416_v51 = vld [vmem:[%s28962_s7 + $0xc9c] sm:$0xf0]  ;;  %v18316_v15 = vld [vmem:[%s28962_s7 + $0x984] sm:$0xf]  ;;  %v2509_v53 = vpop.f32.mrf.mxu0 }
 0x239   :  { %5866 = vmatpush.bf16.msra.mxu2 %v13279_v12  ;;  %v14651_v58 = vor.u32 %v18416_v51, %v14650_v50  ;;  %v14618_v4 = vld [vmem:[%s28962_s7 + $0xc40] sm:$0xf]  ;;  %v18084_v12 = vld [vmem:[%s28962_s7 + $0x244] sm:$0xf] }
 0x23a   :  { %v18408_v7 = vld [vmem:[%s28962_s7 + $0xc5c] sm:$0xf0]  ;;  %5818 = vmatmul.bf16.vlgmr.msrb.gmra.mxu2 %v21778_v62  ;;  %v13343_v44 = vor.u32 %v18084_v12, %v13340_v35  ;;  %v18180_v51 = vld [vmem:[%s28962_s7 + $0x544] sm:$0xf]  ;;  %v2497_v35 = vpop.f32.mrf.mxu3 }
 0x23b   :  { %5881 = vmatpush.bf16.msra.mxu3 %v13503_v36  ;;  %5842 = vmatpush.bf16.msra.mxu0 %v14683_v48  ;;  %v14619_v0 = vor.u32 %v18408_v7, %v14618_v4  ;;  %v14586_v9 = vld [vmem:[%s28962_s7 + $0xc00] sm:$0xf]  ;;  %v13759_v48 = vor.u32 %v18188_v1, %v13756_v39  ;;  %v13727_v59 = vor.u32 %v18180_v51, %v13724_v47  ;;  %v18172_v4 = vld [vmem:[%s28962_s7 + $0x504] sm:$0xf] }
 0x23c   :  { %v18400_v30 = vld [vmem:[%s28962_s7 + $0xc1c] sm:$0xf0]  ;;  %v13695_v13 = vor.u32 %v18172_v4, %v13692_v46  ;;  %v14268_v16 = vld [vmem:[%s28962_s7 + $0x9a0] sm:$0xf0] }
 0x23d   :  { %5867 = vmatpush.bf16.msra.mxu2 %v13247_v31  ;;  %v15066_v21 = vld [vmem:[%s28962_s7 + $0xfc0] sm:$0xf]  ;;  %v14587_v22 = vor.u32 %v18400_v30, %v14586_v9  ;;  %v13084_v31 = vld [vmem:[%s28962_s7 + $0x60] sm:$0xf0]  ;;  %v14271_v52 = vor.u32 %v18316_v15, %v14268_v16 }
 0x23e   :  { %v18520_v8 = vld [vmem:[%s28962_s7 + $0xfdc] sm:$0xf0]  ;;  %v13087_v63 = vor.u32 %v18020_v43, %v13084_v31  ;;  %v18164_v30 = vld [vmem:[%s28962_s7 + $0x4c4] sm:$0xf] }
 0x23f   :  { %5882 = vmatpush.bf16.msra.mxu3 %v13471_v49  ;;  %5843 = vmatpush.bf16.msra.mxu0 %v14651_v58  ;;  %v15067_v27 = vor.u32 %v18520_v8, %v15066_v21  ;;  %v15034_v24 = vld [vmem:[%s28962_s7 + $0xf80] sm:$0xf]  ;;  %v18012_v58 = vld [vmem:[%s28962_s7 + $0x4] sm:$0xf]  ;;  %v2496_v8 = vadd.f32 %v2495_v23, %v2482_v14 }
 0x240   :  { %v18512_v36 = vld [vmem:[%s28962_s7 + $0xf9c] sm:$0xf0]  ;;  %v13660_v19 = vld [vmem:[%s28962_s7 + $0x4e0] sm:$0xf0]  ;;  %v2511_v55 = vpop.f32.mrf.mxu0 }
 0x241   :  { %5868 = vmatpush.bf16.msra.mxu2 %v13215_v20  ;;  %5852 = vmatpush.bf16.msra.mxu1 %v15067_v27  ;;  %v15035_v38 = vor.u32 %v18512_v36, %v15034_v24  ;;  %v15002_v49 = vld [vmem:[%s28962_s7 + $0xf40] sm:$0xf]  ;;  %v13052_v20 = vld [vmem:[%s28962_s7 + $0x20] sm:$0xf0]  ;;  %v13663_v21 = vor.u32 %v18164_v30, %v13660_v19  ;;  %v2510_v32 = vadd.f32 %v2509_v53, %v2496_v8 }
 0x242   :  { %v18504_v50 = vld [vmem:[%s28962_s7 + $0xf5c] sm:$0xf0]  ;;  %v13055_v10 = vor.u32 %v18012_v58, %v13052_v20  ;;  %v18308_v54 = vld [vmem:[%s28962_s7 + $0x944] sm:$0xf] }
 0x243   :  { %5883 = vmatpush.bf16.msra.mxu3 %v13439_v56  ;;  %5844 = vmatpush.bf16.msra.mxu0 %v14619_v0  ;;  %v15003_v11 = vor.u32 %v18504_v50, %v15002_v49  ;;  %v14970_v3 = vld [vmem:[%s28962_s7 + $0xf00] sm:$0xf]  ;;  %v2523_v0 = vpop.f32.mrf.mxu1  ;;  %v13628_v12 = vld [vmem:[%s28962_s7 + $0x4a0] sm:$0xf0] }
 0x244   :  { %v18496_v56 = vld [vmem:[%s28962_s7 + $0xf1c] sm:$0xf0]  ;;  %v14204_v39 = vld [vmem:[%s28962_s7 + $0x920] sm:$0xf0]  ;;  %v2524_v31 = vadd.f32 %v2523_v0, %v2510_v32 }
 0x245   :  { %5869 = vmatpush.bf16.msra.mxu2 %v13183_v37  ;;  %5853 = vmatpush.bf16.msra.mxu1 %v15035_v38  ;;  %v14971_v7 = vor.u32 %v18496_v56, %v14970_v3  ;;  %v14303_v37 = vor.u32 %v18324_v61, %v14300_v33  ;;  %v18488_v9 = vld [vmem:[%s28962_s7 + $0xedc] sm:$0xf0]  ;;  %v18300_v38 = vld [vmem:[%s28962_s7 + $0x904] sm:$0xf] }
 0x246   :  { %v14906_v26 = vld [vmem:[%s28962_s7 + $0xe80] sm:$0xf]  ;;  %v13596_v28 = vld [vmem:[%s28962_s7 + $0x460] sm:$0xf0]  ;;  %v14207_v47 = vor.u32 %v18300_v38, %v14204_v39  ;;  %v2645_v33 = vmax.f32 %v2524_v31, 0.0 }
 0x247   :  { %5884 = vmatpush.bf16.msra.mxu3 %v13407_v18  ;;  %5845 = vmatpush.bf16.msra.mxu0 %v14587_v22  ;;  %v14938_v18 = vld [vmem:[%s28962_s7 + $0xec0] sm:$0xf]  ;;  %v2484_v22 = vadd.f32 %v2483_v17, %v901_v57  ;;  %v18388_v50 = vld [vmem:[%s28962_s7 + $0xbc4] sm:$0xf] }
 0x248   :  { %v14939_v42 = vor.u32 %v18488_v9, %v14938_v18  ;;  %v18480_v27 = vld [vmem:[%s28962_s7 + $0xe9c] sm:$0xf0]  ;;  %v14556_v57 = vld [vmem:[%s28962_s7 + $0xbe0] sm:$0xf0] }
 0x249   :  { %5870 = vmatpush.bf16.msra.mxu2 %v13151_v25  ;;  %5854 = vmatpush.bf16.msra.mxu1 %v15003_v11  ;;  %v14236_v25 = vld [vmem:[%s28962_s7 + $0x960] sm:$0xf0]  ;;  %v2498_v36 = vadd.f32 %v2497_v35, %v2484_v22  ;;  %v18472_v43 = vld [vmem:[%s28962_s7 + $0xe5c] sm:$0xf0]  ;;  %v14559_v56 = vor.u32 %v18388_v50, %v14556_v57 }
 0x24a   :  { %v14239_v1 = vor.u32 %v18308_v54, %v14236_v25  ;;  %v14172_v58 = vld [vmem:[%s28962_s7 + $0x8e0] sm:$0xf0]  ;;  %v18464_v20 = vld [vmem:[%s28962_s7 + $0xe1c] sm:$0xf0] }
 0x24b   :  { %5894 = vmatpush.bf16.msrb.mxu0 %v13791_v5  ;;  %5885 = vmatpush.bf16.msra.mxu3 %v13375_v34  ;;  %v18156_v5 = vld [vmem:[%s28962_s7 + $0x484] sm:$0xf]  ;;  %v14907_v34 = vor.u32 %v18480_v27, %v14906_v26  ;;  %v2525_v49 = vpop.f32.mrf.mxu1 }
 0x24c   :  { %v13631_v24 = vor.u32 %v18156_v5, %v13628_v12  ;;  %v18140_v61 = vld [vmem:[%s28962_s7 + $0x404] sm:$0xf] }
 0x24d   :  { %5871 = vmatpush.bf16.msra.mxu2 %v13119_v41  ;;  %5855 = vmatpush.bf16.msra.mxu1 %v14971_v7  ;;  %v14874_v41 = vld [vmem:[%s28962_s7 + $0xe40] sm:$0xf]  ;;  %v13564_v3 = vld [vmem:[%s28962_s7 + $0x420] sm:$0xf0] }
 0x24e   :  { %v14875_v40 = vor.u32 %v18472_v43, %v14874_v41  ;;  %v13567_v4 = vor.u32 %v18140_v61, %v13564_v3  ;;  %v18260_v7 = vld [vmem:[%s28962_s7 + $0x7c4] sm:$0xf] }
 0x24f   :  { %5895 = vmatpush.bf16.msrb.mxu0 %v13759_v48  ;;  %5886 = vmatpush.bf16.msra.mxu3 %v13343_v44  ;;  %v18148_v48 = vld [vmem:[%s28962_s7 + $0x444] sm:$0xf]  ;;  %v2512_v44 = vadd.f32 %v2511_v55, %v2498_v36  ;;  %v13282_v36 = vld [vmem:[%s28962_s7 + $0x1c8] sm:$0xf]  ;;  %v2551_v55 = vpop.f32.mrf.mxu3 }
 0x250   :  { %v13599_v51 = vor.u32 %v18148_v48, %v13596_v28  ;;  %v14044_v46 = vld [vmem:[%s28962_s7 + $0x7e0] sm:$0xf0]  ;;  %v13250_v28 = vld [vmem:[%s28962_s7 + $0x188] sm:$0xf] }
 0x251   :  { %5872 = vmatpush.bf16.msra.mxu2 %v13087_v63  ;;  %5856 = vmatpush.bf16.msra.mxu1 %v14939_v42  ;;  %v2526_v11 = vadd.f32 %v2525_v49, %v2512_v44  ;;  %v18292_v63 = vld [vmem:[%s28962_s7 + $0x8c4] sm:$0xf] }
 0x252   :  { %v18380_v14 = vld [vmem:[%s28962_s7 + $0xb84] sm:$0xf] }
 0x253   :  { %5896 = vmatpush.bf16.msrb.mxu0 %v13727_v59  ;;  %5887 = vmatpush.bf16.msra.mxu3 %v13311_v45  ;;  %v14842_v59 = vld [vmem:[%s28962_s7 + $0xe00] sm:$0xf]  ;;  %v2653_v45 = vmax.f32 %v2526_v11, 0.0  ;;  %v14524_v0 = vld [vmem:[%s28962_s7 + $0xba0] sm:$0xf0]  ;;  %v2579_v50 = vpop.f32.mrf.mxu1 }
 0x254   :  { %v14843_v23 = vor.u32 %v18464_v20, %v14842_v59  ;;  %v18284_v15 = vld [vmem:[%s28962_s7 + $0x884] sm:$0xf]  ;;  %v14527_v18 = vor.u32 %v18380_v14, %v14524_v0 }
 0x255   :  { %5873 = vmatpush.bf16.msra.mxu2 %v13055_v10  ;;  %5857 = vmatpush.bf16.msra.mxu1 %v14907_v34  ;;  %v21948_v10 = vpack.c.bf16 %v2653_v45, %v2645_v33  ;;  %v14140_v16 = vld [vmem:[%s28962_s7 + $0x8a0] sm:$0xf0]  ;;  %v13218_v45 = vld [vmem:[%s28962_s7 + $0x148] sm:$0xf] }
 0x256   :  { %v18252_v17 = vld [vmem:[%s28962_s7 + $0x784] sm:$0xf]  ;;  %v14143_v30 = vor.u32 %v18284_v15, %v14140_v16 }
 0x257   :  { %5897 = vmatpush.bf16.msrb.mxu0 %v13695_v13  ;;  %v14175_v13 = vor.u32 %v18292_v63, %v14172_v58  ;;  %5832 = vmatmul.bf16.vlgmr.msrb.gmra.mxu3 %v21948_v10  ;;  %v14012_v53 = vld [vmem:[%s28962_s7 + $0x7a0] sm:$0xf0]  ;;  %v2553_v15 = vpop.f32.mrf.mxu3 }
 0x258   :  { %5874 = vmatmul.bf16.vlgmr.msra.gmra.mxu2 %v21551_v60  ;;  %5936 = vmatpush.bf16.msrb.mxu3 %v14559_v56  ;;  %v14015_v9 = vor.u32 %v18252_v17, %v14012_v53  ;;  %v18372_v42 = vld [vmem:[%s28962_s7 + $0xb44] sm:$0xf]  ;;  %v2565_v63 = vpop.f32.mrf.mxu0  ;;  %v18057_v56 = vld [vmem:[%s28962_s7 + $0x164] sm:$0xf0] }
 0x259   :  { %5922 = vmatpush.bf16.msrb.mxu2 %v14303_v37  ;;  %5858 = vmatpush.bf16.msra.mxu1 %v14875_v40  ;;  %v14047_v37 = vor.u32 %v18260_v7, %v14044_v46  ;;  %v14492_v19 = vld [vmem:[%s28962_s7 + $0xb60] sm:$0xf0]  ;;  %v13219_v16 = vor.u32 %v18057_v56, %v13218_v45  ;;  %v13186_v17 = vld [vmem:[%s28962_s7 + $0x108] sm:$0xf] }
 0x25a   :  { %v18276_v22 = vld [vmem:[%s28962_s7 + $0x844] sm:$0xf]  ;;  %v14495_v25 = vor.u32 %v18372_v42, %v14492_v19 }
 0x25b   :  { %5898 = vmatpush.bf16.msrb.mxu0 %v13663_v21  ;;  %v2537_v21 = vpop.f32.mrf.mxu2  ;;  %v14108_v8 = vld [vmem:[%s28962_s7 + $0x860] sm:$0xf0] }
 0x25c   :  { %v13980_v54 = vld [vmem:[%s28962_s7 + $0x760] sm:$0xf0]  ;;  %5937 = vmatpush.bf16.msrb.mxu3 %v14527_v18  ;;  %v14111_v32 = vor.u32 %v18276_v22, %v14108_v8  ;;  %v18049_v18 = vld [vmem:[%s28962_s7 + $0x124] sm:$0xf0] }
 0x25d   :  { %5923 = vmatpush.bf16.msrb.mxu2 %v14271_v52  ;;  %5859 = vmatpush.bf16.msra.mxu1 %v14843_v23  ;;  %v18244_v52 = vld [vmem:[%s28962_s7 + $0x744] sm:$0xf] }
 0x25e   :  { %v13983_v26 = vor.u32 %v18244_v52, %v13980_v54  ;;  %v21990_v27 = vld [vmem:[%s28963_s6] sm:$0xff] }
 0x25f   :  { %5899 = vmatpush.bf16.msrb.mxu0 %v13631_v24  ;;  %v902_v5 = vperm.slane %v21990_v27, 6  ;;  %v18364_v34 = vld [vmem:[%s28962_s7 + $0xb04] sm:$0xf] }
 0x260   :  { %v14460_v12 = vld [vmem:[%s28962_s7 + $0xb20] sm:$0xf0]  ;;  %5938 = vmatpush.bf16.msrb.mxu3 %v14495_v25  ;;  %v2567_v42 = vpop.f32.mrf.mxu0 }
 0x261   :  { %5924 = vmatpush.bf16.msrb.mxu2 %v14239_v1  ;;  %5908 = vmatpush.bf16.msrb.mxu1 %v14047_v37  ;;  %v18268_v35 = vld [vmem:[%s28962_s7 + $0x804] sm:$0xf]  ;;  %v18073_v1 = vld [vmem:[%s28962_s7 + $0x1e4] sm:$0xf0]  ;;  %v14463_v41 = vor.u32 %v18364_v34, %v14460_v12  ;;  %v2538_v49 = vadd.f32 %v2537_v21, %v902_v5 }
 0x262   :  { %v14076_v24 = vld [vmem:[%s28962_s7 + $0x820] sm:$0xf0]  ;;  %v13283_v40 = vor.u32 %v18073_v1, %v13282_v36  ;;  %v13538_v34 = vld [vmem:[%s28962_s7 + $0x3c8] sm:$0xf] }
 0x263   :  { %5900 = vmatpush.bf16.msrb.mxu0 %v13599_v51  ;;  %v18236_v38 = vld [vmem:[%s28962_s7 + $0x704] sm:$0xf]  ;;  %v14079_v48 = vor.u32 %v18268_v35, %v14076_v24  ;;  %v18065_v51 = vld [vmem:[%s28962_s7 + $0x1a4] sm:$0xf0]  ;;  %v2539_v57 = vpop.f32.mrf.mxu2  ;;  %v2552_v3 = vadd.f32 %v2551_v55, %v2538_v49 }
 0x264   :  { %v13948_v39 = vld [vmem:[%s28962_s7 + $0x720] sm:$0xf0]  ;;  %5939 = vmatpush.bf16.msrb.mxu3 %v14463_v41  ;;  %v13251_v33 = vor.u32 %v18065_v51, %v13250_v28  ;;  %v2540_v23 = vadd.f32 %v2539_v57, %v902_v5  ;;  %v2581_v5 = vpop.f32.mrf.mxu1  ;;  %v18137_v12 = vld [vmem:[%s28962_s7 + $0x3e4] sm:$0xf0] }
 0x265   :  { %5925 = vmatpush.bf16.msrb.mxu2 %v14207_v47  ;;  %5909 = vmatpush.bf16.msrb.mxu1 %v14015_v9  ;;  %v13951_v43 = vor.u32 %v18236_v38, %v13948_v39  ;;  %v18356_v31 = vld [vmem:[%s28962_s7 + $0xac4] sm:$0xf]  ;;  %v2566_v14 = vadd.f32 %v2565_v63, %v2552_v3  ;;  %v13154_v35 = vld [vmem:[%s28962_s7 + $0xc8] sm:$0xf] }
 0x266   :  { %v14428_v44 = vld [vmem:[%s28962_s7 + $0xae0] sm:$0xf0]  ;;  %v2554_v53 = vadd.f32 %v2553_v15, %v2540_v23  ;;  %v18041_v36 = vld [vmem:[%s28962_s7 + $0xe4] sm:$0xf0] }
 0x267   :  { %5901 = vmatpush.bf16.msrb.mxu0 %v13567_v4  ;;  %v18228_v11 = vld [vmem:[%s28962_s7 + $0x6c4] sm:$0xf]  ;;  %v14431_v58 = vor.u32 %v18356_v31, %v14428_v44  ;;  %5888 = vmatmul.bf16.vlgmr.msra.gmra.mxu3 %v21507_v29  ;;  %v2580_v8 = vadd.f32 %v2579_v50, %v2566_v14  ;;  %v13155_v44 = vor.u32 %v18041_v36, %v13154_v35  ;;  %v13506_v28 = vld [vmem:[%s28962_s7 + $0x388] sm:$0xf] }
 0x268   :  { %v13916_v47 = vld [vmem:[%s28962_s7 + $0x6e0] sm:$0xf0]  ;;  %v2568_v52 = vadd.f32 %v2567_v42, %v2554_v53  ;;  %v18129_v49 = vld [vmem:[%s28962_s7 + $0x3a4] sm:$0xf0] }
 0x269   :  { %5926 = vmatpush.bf16.msrb.mxu2 %v14175_v13  ;;  %5910 = vmatpush.bf16.msrb.mxu1 %v13983_v26  ;;  %v13919_v59 = vor.u32 %v18228_v11, %v13916_v47  ;;  %v18348_v20 = vld [vmem:[%s28962_s7 + $0xa84] sm:$0xf]  ;;  %v2646_v41 = vmax.f32 %v2580_v8, 0.0  ;;  %v13122_v11 = vld [vmem:[%s28962_s7 + $0x88] sm:$0xf]  ;;  %v13507_v57 = vor.u32 %v18129_v49, %v13506_v28 }
 0x26a   :  { %v14396_v61 = vld [vmem:[%s28962_s7 + $0xaa0] sm:$0xf0]  ;;  %5940 = vmatpush.bf16.msrb.mxu3 %v14431_v58  ;;  %v2582_v24 = vadd.f32 %v2581_v5, %v2568_v52  ;;  %v18033_v47 = vld [vmem:[%s28962_s7 + $0xa4] sm:$0xf0] }
 0x26b   :  { %v18220_v4 = vld [vmem:[%s28962_s7 + $0x684] sm:$0xf]  ;;  %v14399_v46 = vor.u32 %v18348_v20, %v14396_v61  ;;  %v13123_v58 = vor.u32 %v18033_v47, %v13122_v11  ;;  %v13474_v20 = vld [vmem:[%s28962_s7 + $0x348] sm:$0xf] }
 0x26c   :  { %v13884_v7 = vld [vmem:[%s28962_s7 + $0x6a0] sm:$0xf0]  ;;  %v18121_v61 = vld [vmem:[%s28962_s7 + $0x364] sm:$0xf0] }
 0x26d   :  { %5927 = vmatpush.bf16.msrb.mxu2 %v14143_v30  ;;  %5911 = vmatpush.bf16.msrb.mxu1 %v13951_v43  ;;  %v13887_v13 = vor.u32 %v18220_v4, %v13884_v7  ;;  %v18340_v0 = vld [vmem:[%s28962_s7 + $0xa44] sm:$0xf]  ;;  %v2654_v43 = vmax.f32 %v2582_v24, 0.0  ;;  %v13090_v23 = vld [vmem:[%s28962_s7 + $0x48] sm:$0xf]  ;;  %v13475_v56 = vor.u32 %v18121_v61, %v13474_v20 }
 0x26e   :  { %v14364_v37 = vld [vmem:[%s28962_s7 + $0xa60] sm:$0xf0]  ;;  %5941 = vmatpush.bf16.msrb.mxu3 %v14399_v46  ;;  %v18025_v3 = vld [vmem:[%s28962_s7 + $0x64] sm:$0xf0] }
 0x26f   :  { %v18212_v9 = vld [vmem:[%s28962_s7 + $0x644] sm:$0xf]  ;;  %v14367_v19 = vor.u32 %v18340_v0, %v14364_v37  ;;  %v22112_v50 = vpack.c.bf16 %v2654_v43, %v2646_v41  ;;  %v13091_v7 = vor.u32 %v18025_v3, %v13090_v23  ;;  %v18113_v14 = vld [vmem:[%s28962_s7 + $0x324] sm:$0xf0] }
 0x270   :  { %v13852_v30 = vld [vmem:[%s28962_s7 + $0x660] sm:$0xf0]  ;;  %v13058_v37 = vld [vmem:[%s28962_s7 + $0x8] sm:$0xf] }
 0x271   :  { %5928 = vmatpush.bf16.msrb.mxu2 %v14111_v32  ;;  %5912 = vmatpush.bf16.msrb.mxu1 %v13919_v59  ;;  %v18332_v21 = vld [vmem:[%s28962_s7 + $0xa04] sm:$0xf]  ;;  %v13855_v22 = vor.u32 %v18212_v9, %v13852_v30  ;;  %v13187_v32 = vor.u32 %v18049_v18, %v13186_v17  ;;  %v18017_v15 = vld [vmem:[%s28962_s7 + $0x24] sm:$0xf0]  ;;  %v2607_v18 = vpop.f32.mrf.mxu3 }
 0x272   :  { %v14332_v54 = vld [vmem:[%s28962_s7 + $0xa20] sm:$0xf0]  ;;  %5942 = vmatpush.bf16.msrb.mxu3 %v14367_v19  ;;  %5846 = vmatmul.bf16.vlgmr.msra.gmra.mxu0 %v22112_v50  ;;  %v14306_v17 = vld [vmem:[%s28962_s7 + $0x9c8] sm:$0xf]  ;;  %v13059_v42 = vor.u32 %v18017_v15, %v13058_v37 }
 0x273   :  { %v18452_v25 = vld [vmem:[%s28962_s7 + $0xdc4] sm:$0xf]  ;;  %v14335_v39 = vor.u32 %v18332_v21, %v14332_v54  ;;  %v18329_v53 = vld [vmem:[%s28962_s7 + $0x9e4] sm:$0xf0]  ;;  %v2635_v54 = vpop.f32.mrf.mxu1 }
 0x274   :  { %v14812_v26 = vld [vmem:[%s28962_s7 + $0xde0] sm:$0xf0]  ;;  %v18105_v8 = vld [vmem:[%s28962_s7 + $0x2e4] sm:$0xf0] }
 0x275   :  { %5929 = vmatpush.bf16.msrb.mxu2 %v14079_v48  ;;  %5913 = vmatpush.bf16.msrb.mxu1 %v13887_v13  ;;  %v18204_v1 = vld [vmem:[%s28962_s7 + $0x604] sm:$0xf]  ;;  %v13539_v48 = vor.u32 %v18137_v12, %v13538_v34  ;;  %v14815_v31 = vor.u32 %v18452_v25, %v14812_v26  ;;  %v13442_v13 = vld [vmem:[%s28962_s7 + $0x308] sm:$0xf] }
 0x276   :  { %v13820_v38 = vld [vmem:[%s28962_s7 + $0x620] sm:$0xf0]  ;;  %5943 = vmatpush.bf16.msrb.mxu3 %v14335_v39  ;;  %v13443_v9 = vor.u32 %v18113_v14, %v13442_v13  ;;  %v14274_v25 = vld [vmem:[%s28962_s7 + $0x988] sm:$0xf] }
 0x277   :  { %v13823_v55 = vor.u32 %v18204_v1, %v13820_v38  ;;  %v14780_v51 = vld [vmem:[%s28962_s7 + $0xda0] sm:$0xf0]  ;;  %5950 = vmatpush.bf16.msra.mxu0 %v14815_v31  ;;  %v18321_v26 = vld [vmem:[%s28962_s7 + $0x9a4] sm:$0xf0] }
 0x278   :  { %5930 = vmatmul.bf16.vlgmr.msrb.gmra.mxu2 %v21778_v62  ;;  %v18436_v59 = vld [vmem:[%s28962_s7 + $0xd44] sm:$0xf]  ;;  %v14275_v24 = vor.u32 %v18321_v26, %v14274_v25  ;;  %v13378_v1 = vld [vmem:[%s28962_s7 + $0x288] sm:$0xf] }
 0x279   :  { %5978 = vmatpush.bf16.msra.mxu2 %v13283_v40  ;;  %5914 = vmatpush.bf16.msrb.mxu1 %v13855_v22  ;;  %v18444_v40 = vld [vmem:[%s28962_s7 + $0xd84] sm:$0xf]  ;;  %v13410_v22 = vld [vmem:[%s28962_s7 + $0x2c8] sm:$0xf]  ;;  %v2609_v49 = vpop.f32.mrf.mxu3 }
 0x27a   :  { %5992 = vmatpush.bf16.msra.mxu3 %v13539_v48  ;;  %v14783_v63 = vor.u32 %v18444_v40, %v14780_v51  ;;  %v14748_v45 = vld [vmem:[%s28962_s7 + $0xd60] sm:$0xf0]  ;;  %v13411_v12 = vor.u32 %v18105_v8, %v13410_v22  ;;  %v18097_v38 = vld [vmem:[%s28962_s7 + $0x2a4] sm:$0xf0] }
 0x27b   :  { %5944 = vmatmul.bf16.vlgmr.msrb.gmra.mxu3 %v21948_v10  ;;  %v14751_v4 = vor.u32 %v18436_v59, %v14748_v45  ;;  %v18428_v46 = vld [vmem:[%s28962_s7 + $0xd04] sm:$0xf]  ;;  %v14242_v41 = vld [vmem:[%s28962_s7 + $0x948] sm:$0xf] }
 0x27c   :  { %5951 = vmatpush.bf16.msra.mxu0 %v14783_v63  ;;  %v14716_v0 = vld [vmem:[%s28962_s7 + $0xd20] sm:$0xf0]  ;;  %v18313_v43 = vld [vmem:[%s28962_s7 + $0x964] sm:$0xf0] }
 0x27d   :  { %5979 = vmatpush.bf16.msra.mxu2 %v13251_v33  ;;  %5915 = vmatpush.bf16.msrb.mxu1 %v13823_v55  ;;  %v2593_v33 = vpop.f32.mrf.mxu2  ;;  %v14719_v30 = vor.u32 %v18428_v46, %v14716_v0  ;;  %v18420_v19 = vld [vmem:[%s28962_s7 + $0xcc4] sm:$0xf]  ;;  %v14243_v51 = vor.u32 %v18313_v43, %v14242_v41  ;;  %v13346_v11 = vld [vmem:[%s28962_s7 + $0x248] sm:$0xf] }
 0x27e   :  { %5993 = vmatpush.bf16.msra.mxu3 %v13507_v57  ;;  %v14684_v21 = vld [vmem:[%s28962_s7 + $0xce0] sm:$0xf0]  ;;  %v18089_v47 = vld [vmem:[%s28962_s7 + $0x264] sm:$0xf0] }
 0x27f   :  { %v14687_v34 = vor.u32 %v18420_v19, %v14684_v21  ;;  %v18412_v35 = vld [vmem:[%s28962_s7 + $0xc84] sm:$0xf]  ;;  %v14210_v63 = vld [vmem:[%s28962_s7 + $0x908] sm:$0xf]  ;;  %v13347_v45 = vor.u32 %v18089_v47, %v13346_v11 }
 0x280   :  { %5952 = vmatpush.bf16.msra.mxu0 %v14751_v4  ;;  %v14652_v36 = vld [vmem:[%s28962_s7 + $0xca0] sm:$0xf0]  ;;  %v18081_v46 = vld [vmem:[%s28962_s7 + $0x224] sm:$0xf0] }
 0x281   :  { %5980 = vmatpush.bf16.msra.mxu2 %v13219_v16  ;;  %v903_v16 = vperm.slane %v21990_v27, 7  ;;  %v14307_v27 = vor.u32 %v18329_v53, %v14306_v17  ;;  %v14655_v31 = vor.u32 %v18412_v35, %v14652_v36  ;;  %v18404_v40 = vld [vmem:[%s28962_s7 + $0xc44] sm:$0xf]  ;;  %v13794_v0 = vld [vmem:[%s28962_s7 + $0x5c8] sm:$0xf] }
 0x282   :  { %5994 = vmatpush.bf16.msra.mxu3 %v13475_v56  ;;  %5902 = vmatmul.bf16.vlgmr.msrb.gmra.mxu0 %v21651_v2  ;;  %v14620_v28 = vld [vmem:[%s28962_s7 + $0xc60] sm:$0xf0]  ;;  %v2637_v56 = vpop.f32.mrf.mxu1  ;;  %v18201_v37 = vld [vmem:[%s28962_s7 + $0x5e4] sm:$0xf0] }
 0x283   :  { %v2594_v52 = vadd.f32 %v2593_v33, %v903_v16  ;;  %v14623_v20 = vor.u32 %v18404_v40, %v14620_v28  ;;  %v18396_v23 = vld [vmem:[%s28962_s7 + $0xc04] sm:$0xf]  ;;  %v14562_v17 = vld [vmem:[%s28962_s7 + $0xbc8] sm:$0xf]  ;;  %v13795_v21 = vor.u32 %v18201_v37, %v13794_v0 }
 0x284   :  { %5953 = vmatpush.bf16.msra.mxu0 %v14719_v30  ;;  %v14588_v3 = vld [vmem:[%s28962_s7 + $0xc20] sm:$0xf0]  ;;  %v18393_v53 = vld [vmem:[%s28962_s7 + $0xbe4] sm:$0xf0] }
 0x285   :  { %5981 = vmatpush.bf16.msra.mxu2 %v13187_v32  ;;  %v2595_v5 = vpop.f32.mrf.mxu2  ;;  %v2621_v32 = vpop.f32.mrf.mxu0  ;;  %v2608_v55 = vadd.f32 %v2607_v18, %v2594_v52  ;;  %v18516_v13 = vld [vmem:[%s28962_s7 + $0xfc4] sm:$0xf]  ;;  %v14591_v30 = vor.u32 %v18396_v23, %v14588_v3  ;;  %v14178_v19 = vld [vmem:[%s28962_s7 + $0x8c8] sm:$0xf] }
 0x286   :  { %5995 = vmatpush.bf16.msra.mxu3 %v13443_v9  ;;  %v2596_v39 = vadd.f32 %v2595_v5, %v903_v16  ;;  %v22248_v15 = vld [vmem:[%s28964_s8] sm:$0xff]  ;;  %v13762_v26 = vld [vmem:[%s28962_s7 + $0x588] sm:$0xf] }
 0x287   :  { %v2622_v48 = vadd.f32 %v2621_v32, %v2608_v55  ;;  %v15068_v16 = vld [vmem:[%s28962_s7 + $0xfe0] sm:$0xf0]  ;;  %v28973_v22 = vperm.slane %v22248_v15, 0  ;;  %v18193_v5 = vld [vmem:[%s28962_s7 + $0x5a4] sm:$0xf0] }
 0x288   :  { %5954 = vmatpush.bf16.msra.mxu0 %v14687_v34  ;;  %v2610_v57 = vadd.f32 %v2609_v49, %v2596_v39  ;;  %v15071_v52 = vor.u32 %v18516_v13, %v15068_v16  ;;  %v18508_v25 = vld [vmem:[%s28962_s7 + $0xf84] sm:$0xf]  ;;  %v18385_v35 = vld [vmem:[%s28962_s7 + $0xba4] sm:$0xf0]  ;;  %v18069_v13 = vld [vmem:[%s28962_s7 + $0x1cc] sm:$0xf] }
 0x289   :  { %5982 = vmatpush.bf16.msra.mxu2 %v13155_v44  ;;  %v13379_v44 = vor.u32 %v18097_v38, %v13378_v1  ;;  %v2636_v61 = vadd.f32 %v2635_v54, %v2622_v48  ;;  %v14563_v54 = vor.u32 %v18393_v53, %v14562_v17  ;;  %v15036_v34 = vld [vmem:[%s28962_s7 + $0xfa0] sm:$0xf0]  ;;  %v18289_v36 = vld [vmem:[%s28962_s7 + $0x8a4] sm:$0xf0]  ;;  %v13763_v1 = vor.u32 %v18193_v5, %v13762_v26 }
 0x28a   :  { %5996 = vmatpush.bf16.msra.mxu3 %v13411_v12  ;;  %v14530_v12 = vld [vmem:[%s28962_s7 + $0xb88] sm:$0xf]  ;;  %v15039_v39 = vor.u32 %v18508_v25, %v15036_v34  ;;  %v18500_v41 = vld [vmem:[%s28962_s7 + $0xf44] sm:$0xf]  ;;  %v13252_v25 = vld [vmem:[%s28962_s7 + $0x1a8] sm:$0xf0] }
 0x28b   :  { %v2647_v18 = vmax.f32 %v2636_v61, 0.0  ;;  %v14531_v55 = vor.u32 %v18385_v35, %v14530_v12  ;;  %v13730_v43 = vld [vmem:[%s28962_s7 + $0x548] sm:$0xf]  ;;  %v15004_v40 = vld [vmem:[%s28962_s7 + $0xf60] sm:$0xf0] }
 0x28c   :  { %5955 = vmatpush.bf16.msra.mxu0 %v14655_v31  ;;  %v18185_v48 = vld [vmem:[%s28962_s7 + $0x564] sm:$0xf0]  ;;  %v14972_v23 = vld [vmem:[%s28962_s7 + $0xf20] sm:$0xf0] }
 0x28d   :  { %5983 = vmatpush.bf16.msra.mxu2 %v13123_v58  ;;  %v18305_v58 = vld [vmem:[%s28962_s7 + $0x924] sm:$0xf0]  ;;  %v2623_v59 = vpop.f32.mrf.mxu0  ;;  %v18476_v35 = vld [vmem:[%s28962_s7 + $0xe84] sm:$0xf] }
 0x28e   :  { %v2624_v33 = vadd.f32 %v2623_v59, %v2610_v57  ;;  %5997 = vmatpush.bf16.msra.mxu3 %v13379_v44  ;;  %v14211_v4 = vor.u32 %v18305_v58, %v14210_v63  ;;  %v5763_v38 = vpop.f32.mrf.mxu2  ;;  %v14498_v28 = vld [vmem:[%s28962_s7 + $0xb48] sm:$0xf]  ;;  %v13731_v57 = vor.u32 %v18185_v48, %v13730_v43  ;;  %v15007_v58 = vor.u32 %v18500_v41, %v15004_v40  ;;  %v18053_v41 = vld [vmem:[%s28962_s7 + $0x14c] sm:$0xf] }
 0x28f   :  { %v5764_v31 = vadd.f32 %v5763_v38, %v28973_v22  ;;  %v18377_v49 = vld [vmem:[%s28962_s7 + $0xb64] sm:$0xf0]  ;;  %v13220_v43 = vld [vmem:[%s28962_s7 + $0x168] sm:$0xf0] }
 0x290   :  { %v2638_v14 = vadd.f32 %v2637_v56, %v2624_v33  ;;  %5956 = vmatpush.bf16.msra.mxu0 %v14623_v20  ;;  %v14114_v11 = vld [vmem:[%s28962_s7 + $0x848] sm:$0xf]  ;;  %v14499_v59 = vor.u32 %v18377_v49, %v14498_v28  ;;  %v18492_v20 = vld [vmem:[%s28962_s7 + $0xf04] sm:$0xf] }
 0x291   :  { %5984 = vmatpush.bf16.msra.mxu2 %v13091_v7  ;;  %v13314_v7 = vld [vmem:[%s28962_s7 + $0x208] sm:$0xf]  ;;  %v14975_v0 = vor.u32 %v18492_v20, %v14972_v23  ;;  %v18468_v28 = vld [vmem:[%s28962_s7 + $0xe44] sm:$0xf] }
 0x292   :  { %v2655_v9 = vmax.f32 %v2638_v14, 0.0  ;;  %5998 = vmatpush.bf16.msra.mxu3 %v13347_v45  ;;  %v18281_v47 = vld [vmem:[%s28962_s7 + $0x864] sm:$0xf0]  ;;  %v13284_v14 = vld [vmem:[%s28962_s7 + $0x1e8] sm:$0xf0] }
 0x293   :  { %v13698_v61 = vld [vmem:[%s28962_s7 + $0x508] sm:$0xf]  ;;  %v14115_v45 = vor.u32 %v18281_v47, %v14114_v11  ;;  %v14876_v49 = vld [vmem:[%s28962_s7 + $0xe60] sm:$0xf0] }
 0x294   :  { %v22266_v8 = vpack.c.bf16 %v2655_v9, %v2647_v18  ;;  %5957 = vmatpush.bf16.msra.mxu0 %v14591_v30  ;;  %v18177_v33 = vld [vmem:[%s28962_s7 + $0x524] sm:$0xf0]  ;;  %v18484_v18 = vld [vmem:[%s28962_s7 + $0xec4] sm:$0xf] }
 0x295   :  { %5985 = vmatpush.bf16.msra.mxu2 %v13059_v42  ;;  %v13315_v42 = vor.u32 %v18081_v46, %v13314_v7  ;;  %v14466_v3 = vld [vmem:[%s28962_s7 + $0xb08] sm:$0xf]  ;;  %v13699_v46 = vor.u32 %v18177_v33, %v13698_v61  ;;  %v14940_v9 = vld [vmem:[%s28962_s7 + $0xee0] sm:$0xf0]  ;;  %v14879_v61 = vor.u32 %v18468_v28, %v14876_v49 }
 0x296   :  { %5860 = vmatmul.bf16.vlgmr.msra.gmra.mxu1 %v22266_v8  ;;  %v18369_v56 = vld [vmem:[%s28962_s7 + $0xb24] sm:$0xf0]  ;;  %v14943_v5 = vor.u32 %v18484_v18, %v14940_v9  ;;  %v14844_v20 = vld [vmem:[%s28962_s7 + $0xe20] sm:$0xf0] }
 0x297   :  { %5999 = vmatpush.bf16.msra.mxu3 %v13315_v42  ;;  %5964 = vmatpush.bf16.msra.mxu1 %v15071_v52  ;;  %v18273_v7 = vld [vmem:[%s28962_s7 + $0x824] sm:$0xf0]  ;;  %v14467_v37 = vor.u32 %v18369_v56, %v14466_v3  ;;  %v13287_v42 = vor.u32 %v18069_v13, %v13284_v14 }
 0x298   :  { %5986 = vmatmul.bf16.vlgmr.msra.gmra.mxu2 %v21551_v60  ;;  %6006 = vmatpush.bf16.msrb.mxu0 %v13795_v21  ;;  %v13666_v16 = vld [vmem:[%s28962_s7 + $0x4c8] sm:$0xf] }
 0x299   :  { %6034 = vmatpush.bf16.msrb.mxu2 %v14307_v27  ;;  %v18297_v27 = vld [vmem:[%s28962_s7 + $0x8e4] sm:$0xf0]  ;;  %5958 = vmatmul.bf16.vlgmr.msra.gmra.mxu0 %v22112_v50 }
 0x29a   :  { %v14179_v32 = vor.u32 %v18297_v27, %v14178_v19  ;;  %6000 = vmatmul.bf16.vlgmr.msra.gmra.mxu3 %v21507_v29  ;;  %v18169_v17 = vld [vmem:[%s28962_s7 + $0x4e4] sm:$0xf0] }
 0x29b   :  { %6048 = vmatpush.bf16.msrb.mxu3 %v14563_v54  ;;  %5965 = vmatpush.bf16.msra.mxu1 %v15039_v39  ;;  %v14434_v19 = vld [vmem:[%s28962_s7 + $0xac8] sm:$0xf]  ;;  %v13667_v52 = vor.u32 %v18169_v17, %v13666_v16  ;;  %v18061_v54 = vld [vmem:[%s28962_s7 + $0x18c] sm:$0xf]  ;;  %v5805_v26 = vpop.f32.mrf.mxu1 }
 0x29c   :  { %6007 = vmatpush.bf16.msrb.mxu0 %v13763_v1  ;;  %v18361_v27 = vld [vmem:[%s28962_s7 + $0xae4] sm:$0xf0]  ;;  %v13255_v1 = vor.u32 %v18061_v54, %v13252_v25  ;;  %v13540_v16 = vld [vmem:[%s28962_s7 + $0x3e8] sm:$0xf0] }
 0x29d   :  { %6035 = vmatpush.bf16.msrb.mxu2 %v14275_v24  ;;  %v14146_v24 = vld [vmem:[%s28962_s7 + $0x888] sm:$0xf]  ;;  %v14435_v12 = vor.u32 %v18361_v27, %v14434_v19  ;;  %v18037_v17 = vld [vmem:[%s28962_s7 + $0xcc] sm:$0xf] }
 0x29e   :  { %v14147_v44 = vor.u32 %v18289_v36, %v14146_v24  ;;  %v18161_v34 = vld [vmem:[%s28962_s7 + $0x4a4] sm:$0xf0]  ;;  %v14908_v24 = vld [vmem:[%s28962_s7 + $0xea0] sm:$0xf0] }
 0x29f   :  { %6049 = vmatpush.bf16.msrb.mxu3 %v14531_v55  ;;  %5966 = vmatpush.bf16.msra.mxu1 %v15007_v58  ;;  %v14402_v38 = vld [vmem:[%s28962_s7 + $0xa88] sm:$0xf]  ;;  %v14911_v48 = vor.u32 %v18476_v35, %v14908_v24  ;;  %v13188_v58 = vld [vmem:[%s28962_s7 + $0x128] sm:$0xf0] }
 0x2a0   :  { %6008 = vmatpush.bf16.msrb.mxu0 %v13731_v57  ;;  %v18353_v39 = vld [vmem:[%s28962_s7 + $0xaa4] sm:$0xf0]  ;;  %v18045_v57 = vld [vmem:[%s28962_s7 + $0x10c] sm:$0xf] }
 0x2a1   :  { %6036 = vmatpush.bf16.msrb.mxu2 %v14243_v51  ;;  %v5777_v51 = vpop.f32.mrf.mxu3  ;;  %v5791_v30 = vpop.f32.mrf.mxu0  ;;  %v14403_v40 = vor.u32 %v18353_v39, %v14402_v38  ;;  %v14370_v11 = vld [vmem:[%s28962_s7 + $0xa48] sm:$0xf] }
 0x2a2   :  { %v5778_v63 = vadd.f32 %v5777_v51, %v5764_v31  ;;  %v13602_v31 = vld [vmem:[%s28962_s7 + $0x448] sm:$0xf]  ;;  %v13223_v51 = vor.u32 %v18053_v41, %v13220_v43  ;;  %v18117_v43 = vld [vmem:[%s28962_s7 + $0x34c] sm:$0xf] }
 0x2a3   :  { %6050 = vmatpush.bf16.msrb.mxu3 %v14499_v59  ;;  %5967 = vmatpush.bf16.msra.mxu1 %v14975_v0  ;;  %v18345_v47 = vld [vmem:[%s28962_s7 + $0xa64] sm:$0xf0]  ;;  %v18460_v59 = vld [vmem:[%s28962_s7 + $0xe04] sm:$0xf]  ;;  %v18133_v0 = vld [vmem:[%s28962_s7 + $0x3cc] sm:$0xf] }
 0x2a4   :  { %v5792_v21 = vadd.f32 %v5791_v30, %v5778_v63  ;;  %6009 = vmatpush.bf16.msrb.mxu0 %v13699_v46  ;;  %v13570_v33 = vld [vmem:[%s28962_s7 + $0x408] sm:$0xf]  ;;  %v14371_v3 = vor.u32 %v18345_v47, %v14370_v11  ;;  %v13191_v46 = vor.u32 %v18045_v57, %v13188_v58  ;;  %v14847_v18 = vor.u32 %v18460_v59, %v14844_v20  ;;  %v18109_v59 = vld [vmem:[%s28962_s7 + $0x30c] sm:$0xf] }
 0x2a5   :  { %6037 = vmatpush.bf16.msrb.mxu2 %v14211_v4  ;;  %v14082_v4 = vld [vmem:[%s28962_s7 + $0x808] sm:$0xf]  ;;  %v13444_v20 = vld [vmem:[%s28962_s7 + $0x328] sm:$0xf0] }
 0x2a6   :  { %v14083_v53 = vor.u32 %v18273_v7, %v14082_v4  ;;  %v22387_v36 = vadd.f32 %v5805_v26, %v5792_v21  ;;  %5916 = vmatmul.bf16.vlgmr.msrb.gmra.mxu1 %v21630_v6  ;;  %v14338_v23 = vld [vmem:[%s28962_s7 + $0xa08] sm:$0xf]  ;;  %v13543_v21 = vor.u32 %v18133_v0, %v13540_v16  ;;  %v18125_v26 = vld [vmem:[%s28962_s7 + $0x38c] sm:$0xf] }
 0x2a7   :  { %6051 = vmatpush.bf16.msrb.mxu3 %v14467_v37  ;;  %5968 = vmatpush.bf16.msra.mxu1 %v14943_v5  ;;  %v18337_v56 = vld [vmem:[%s28962_s7 + $0xa24] sm:$0xf0]  ;;  %v13508_v5 = vld [vmem:[%s28962_s7 + $0x3a8] sm:$0xf0] }
 0x2a8   :  { %6010 = vmatpush.bf16.msrb.mxu0 %v13667_v52  ;;  %v14818_v4 = vld [vmem:[%s28962_s7 + $0xdc8] sm:$0xf]  ;;  %v14339_v30 = vor.u32 %v18337_v56, %v14338_v23  ;;  %v13511_v38 = vor.u32 %v18125_v26, %v13508_v5  ;;  %v18325_v23 = vld [vmem:[%s28962_s7 + $0x9cc] sm:$0xf] }
 0x2a9   :  { %6038 = vmatpush.bf16.msrb.mxu2 %v14179_v32  ;;  %v13634_v32 = vld [vmem:[%s28962_s7 + $0x488] sm:$0xf]  ;;  %v18101_v16 = vld [vmem:[%s28962_s7 + $0x2cc] sm:$0xf] }
 0x2aa   :  { %v13635_v55 = vor.u32 %v18161_v34, %v13634_v32  ;;  %v18457_v7 = vld [vmem:[%s28962_s7 + $0xde4] sm:$0xf0]  ;;  %v18029_v32 = vld [vmem:[%s28962_s7 + $0x8c] sm:$0xf] }
 0x2ab   :  { %6052 = vmatpush.bf16.msrb.mxu3 %v14435_v12  ;;  %5969 = vmatpush.bf16.msra.mxu1 %v14911_v48  ;;  %v14050_v13 = vld [vmem:[%s28962_s7 + $0x7c8] sm:$0xf]  ;;  %v14819_v9 = vor.u32 %v18457_v7, %v14818_v4  ;;  %v13124_v34 = vld [vmem:[%s28962_s7 + $0xa8] sm:$0xf0] }
 0x2ac   :  { %6011 = vmatpush.bf16.msrb.mxu0 %v13635_v55  ;;  %v18265_v14 = vld [vmem:[%s28962_s7 + $0x7e4] sm:$0xf0]  ;;  %v13127_v39 = vor.u32 %v18029_v32, %v13124_v34  ;;  %v13476_v48 = vld [vmem:[%s28962_s7 + $0x368] sm:$0xf0] }
 0x2ad   :  { %6039 = vmatpush.bf16.msrb.mxu2 %v14147_v44  ;;  %v18153_v44 = vld [vmem:[%s28962_s7 + $0x464] sm:$0xf0]  ;;  %v13479_v47 = vor.u32 %v18117_v43, %v13476_v48  ;;  %v18093_v26 = vld [vmem:[%s28962_s7 + $0x28c] sm:$0xf] }
 0x2ae   :  { %v13603_v63 = vor.u32 %v18153_v44, %v13602_v31  ;;  %v14786_v19 = vld [vmem:[%s28962_s7 + $0xd88] sm:$0xf]  ;;  %v18021_v31 = vld [vmem:[%s28962_s7 + $0x4c] sm:$0xf] }
 0x2af   :  { %6053 = vmatpush.bf16.msrb.mxu3 %v14403_v40  ;;  %5970 = vmatpush.bf16.msra.mxu1 %v14879_v61  ;;  %v18449_v27 = vld [vmem:[%s28962_s7 + $0xda4] sm:$0xf0]  ;;  %v13092_v44 = vld [vmem:[%s28962_s7 + $0x68] sm:$0xf0]  ;;  %v22519_v40 = vpop.f32.mrf.mxu2 }
 0x2b0   :  { %6012 = vmatpush.bf16.msrb.mxu0 %v13603_v63  ;;  %v14018_v54 = vld [vmem:[%s28962_s7 + $0x788] sm:$0xf]  ;;  %v14787_v12 = vor.u32 %v18449_v27, %v14786_v19  ;;  %v13095_v57 = vor.u32 %v18021_v31, %v13092_v44  ;;  %v18013_v61 = vld [vmem:[%s28962_s7 + $0xc] sm:$0xf] }
 0x2b1   :  { %6040 = vmatpush.bf16.msrb.mxu2 %v14115_v45  ;;  %v18145_v45 = vld [vmem:[%s28962_s7 + $0x424] sm:$0xf0]  ;;  %v13380_v5 = vld [vmem:[%s28962_s7 + $0x2a8] sm:$0xf0] }
 0x2b2   :  { %v13571_v37 = vor.u32 %v18145_v45, %v13570_v33  ;;  %v18257_v25 = vld [vmem:[%s28962_s7 + $0x7a4] sm:$0xf0]  ;;  %v13060_v33 = vld [vmem:[%s28962_s7 + $0x28] sm:$0xf0] }
 0x2b3   :  { %6054 = vmatpush.bf16.msrb.mxu3 %v14371_v3  ;;  %5971 = vmatpush.bf16.msra.mxu1 %v14847_v18  ;;  %v14019_v35 = vor.u32 %v18257_v25, %v14018_v54  ;;  %v14754_v24 = vld [vmem:[%s28962_s7 + $0xd48] sm:$0xf]  ;;  %v14308_v3 = vld [vmem:[%s28962_s7 + $0x9e8] sm:$0xf0] }
 0x2b4   :  { %6013 = vmatpush.bf16.msrb.mxu0 %v13571_v37  ;;  %v13986_v55 = vld [vmem:[%s28962_s7 + $0x748] sm:$0xf]  ;;  %v14311_v37 = vor.u32 %v18325_v23, %v14308_v3  ;;  %v18309_v34 = vld [vmem:[%s28962_s7 + $0x94c] sm:$0xf] }
 0x2b5   :  { %6041 = vmatpush.bf16.msrb.mxu2 %v14083_v53  ;;  %v13156_v53 = vld [vmem:[%s28962_s7 + $0xe8] sm:$0xf0]  ;;  %v18249_v41 = vld [vmem:[%s28962_s7 + $0x764] sm:$0xf0] }
 0x2b6   :  { %v13159_v52 = vor.u32 %v18037_v17, %v13156_v53  ;;  %5972 = vmatmul.bf16.vlgmr.msra.gmra.mxu1 %v22266_v8  ;;  %v13987_v49 = vor.u32 %v18249_v41, %v13986_v55  ;;  %v18433_v11 = vld [vmem:[%s28962_s7 + $0xd24] sm:$0xf0]  ;;  %v13412_v17 = vld [vmem:[%s28962_s7 + $0x2e8] sm:$0xf0] }
 0x2b7   :  { %6055 = vmatpush.bf16.msrb.mxu3 %v14339_v30  ;;  %6014 = vmatmul.bf16.vlgmr.msrb.gmra.mxu0 %v21651_v2  ;;  %v13954_v63 = vld [vmem:[%s28962_s7 + $0x708] sm:$0xf]  ;;  %v14276_v30 = vld [vmem:[%s28962_s7 + $0x9a8] sm:$0xf0] }
 0x2b8   :  { %6042 = vmatmul.bf16.vlgmr.msrb.gmra.mxu2 %v21778_v62  ;;  %6062 = vmatpush.bf16.msra.mxu0 %v14819_v9  ;;  %v18241_v58 = vld [vmem:[%s28962_s7 + $0x724] sm:$0xf0]  ;;  %v18317_v9 = vld [vmem:[%s28962_s7 + $0x98c] sm:$0xf] }
 0x2b9   :  { %6090 = vmatpush.bf16.msra.mxu2 %v13287_v42  ;;  %v14051_v42 = vor.u32 %v18265_v14, %v14050_v13  ;;  %v13955_v56 = vor.u32 %v18241_v58, %v13954_v63  ;;  %v14690_v4 = vld [vmem:[%s28962_s7 + $0xcc8] sm:$0xf]  ;;  %v13063_v13 = vor.u32 %v18013_v61, %v13060_v33  ;;  %v14279_v25 = vor.u32 %v18317_v9, %v14276_v30  ;;  %v18085_v43 = vld [vmem:[%s28962_s7 + $0x24c] sm:$0xf] }
 0x2ba   :  { %6056 = vmatmul.bf16.vlgmr.msrb.gmra.mxu3 %v21948_v10  ;;  %v18425_v7 = vld [vmem:[%s28962_s7 + $0xce4] sm:$0xf0]  ;;  %v13348_v48 = vld [vmem:[%s28962_s7 + $0x268] sm:$0xf0] }
 0x2bb   :  { %6020 = vmatpush.bf16.msrb.mxu1 %v14051_v42  ;;  %6104 = vmatpush.bf16.msra.mxu3 %v13543_v21  ;;  %v13922_v14 = vld [vmem:[%s28962_s7 + $0x6c8] sm:$0xf]  ;;  %v14691_v18 = vor.u32 %v18425_v7, %v14690_v4  ;;  %v18301_v31 = vld [vmem:[%s28962_s7 + $0x90c] sm:$0xf]  ;;  %v13351_v58 = vor.u32 %v18085_v43, %v13348_v48 }
 0x2bc   :  { %6063 = vmatpush.bf16.msra.mxu0 %v14787_v12  ;;  %v18233_v0 = vld [vmem:[%s28962_s7 + $0x6e4] sm:$0xf0]  ;;  %v14244_v12 = vld [vmem:[%s28962_s7 + $0x968] sm:$0xf0] }
 0x2bd   :  { %6091 = vmatpush.bf16.msra.mxu2 %v13255_v1  ;;  %v18441_v1 = vld [vmem:[%s28962_s7 + $0xd64] sm:$0xf0]  ;;  %v5819_v53 = vpop.f32.mrf.mxu2  ;;  %v13923_v19 = vor.u32 %v18233_v0, %v13922_v14  ;;  %v14247_v41 = vor.u32 %v18309_v34, %v14244_v12  ;;  %v18077_v63 = vld [vmem:[%s28962_s7 + $0x20c] sm:$0xf] }
 0x2be   :  { %v14755_v28 = vor.u32 %v18441_v1, %v14754_v24  ;;  %v22577_v42 = vadd.f32 %v5819_v53, %v22387_v36  ;;  %v14658_v27 = vld [vmem:[%s28962_s7 + $0xc88] sm:$0xf]  ;;  %v13796_v61 = vld [vmem:[%s28962_s7 + $0x5e8] sm:$0xf0] }
 0x2bf   :  { %6021 = vmatpush.bf16.msrb.mxu1 %v14019_v35  ;;  %6105 = vmatpush.bf16.msra.mxu3 %v13511_v38  ;;  %v18417_v21 = vld [vmem:[%s28962_s7 + $0xca4] sm:$0xf0]  ;;  %v13383_v38 = vor.u32 %v18093_v26, %v13380_v5  ;;  %v18389_v3 = vld [vmem:[%s28962_s7 + $0xbcc] sm:$0xf] }
 0x2c0   :  { %6064 = vmatpush.bf16.msra.mxu0 %v14755_v28  ;;  %v13890_v54 = vld [vmem:[%s28962_s7 + $0x688] sm:$0xf]  ;;  %v14659_v32 = vor.u32 %v18417_v21, %v14658_v27  ;;  %v14212_v28 = vld [vmem:[%s28962_s7 + $0x928] sm:$0xf0] }
 0x2c1   :  { %6092 = vmatpush.bf16.msra.mxu2 %v13223_v51  ;;  %v14722_v51 = vld [vmem:[%s28962_s7 + $0xd08] sm:$0xf]  ;;  %v14215_v33 = vor.u32 %v18301_v31, %v14212_v28  ;;  %v14564_v4 = vld [vmem:[%s28962_s7 + $0xbe8] sm:$0xf0] }
 0x2c2   :  { %v14723_v45 = vor.u32 %v18433_v11, %v14722_v51  ;;  %v18225_v36 = vld [vmem:[%s28962_s7 + $0x6a4] sm:$0xf0]  ;;  %v18293_v7 = vld [vmem:[%s28962_s7 + $0x8cc] sm:$0xf]  ;;  %v14567_v53 = vor.u32 %v18389_v3, %v14564_v4 }
 0x2c3   :  { %6022 = vmatpush.bf16.msrb.mxu1 %v13987_v49  ;;  %6106 = vmatpush.bf16.msra.mxu3 %v13479_v47  ;;  %v13891_v35 = vor.u32 %v18225_v36, %v13890_v54  ;;  %v14626_v24 = vld [vmem:[%s28962_s7 + $0xc48] sm:$0xf]  ;;  %v14532_v27 = vld [vmem:[%s28962_s7 + $0xba8] sm:$0xf0] }
 0x2c4   :  { %6065 = vmatpush.bf16.msra.mxu0 %v14723_v45  ;;  %v18409_v1 = vld [vmem:[%s28962_s7 + $0xc64] sm:$0xf0]  ;;  %v18285_v21 = vld [vmem:[%s28962_s7 + $0x88c] sm:$0xf] }
 0x2c5   :  { %6093 = vmatpush.bf16.msra.mxu2 %v13191_v46  ;;  %v13447_v46 = vor.u32 %v18109_v59, %v13444_v20  ;;  %v18217_v55 = vld [vmem:[%s28962_s7 + $0x664] sm:$0xf0]  ;;  %v14627_v44 = vor.u32 %v18409_v1, %v14626_v24  ;;  %v13316_v59 = vld [vmem:[%s28962_s7 + $0x228] sm:$0xf0] }
 0x2c6   :  { %v13826_v49 = vld [vmem:[%s28962_s7 + $0x608] sm:$0xf]  ;;  %v18197_v20 = vld [vmem:[%s28962_s7 + $0x5cc] sm:$0xf]  ;;  %v13319_v0 = vor.u32 %v18077_v63, %v13316_v59  ;;  %v18074_v59 = vld [vmem:[%s28962_s7 + $0x1ec] sm:$0xf0] }
 0x2c7   :  { %6023 = vmatpush.bf16.msrb.mxu1 %v13955_v56  ;;  %6107 = vmatpush.bf16.msra.mxu3 %v13447_v46  ;;  %v18209_v51 = vld [vmem:[%s28962_s7 + $0x624] sm:$0xf0]  ;;  %v14180_v46 = vld [vmem:[%s28962_s7 + $0x8e8] sm:$0xf0]  ;;  %v13799_v14 = vor.u32 %v18197_v20, %v13796_v61 }
 0x2c8   :  { %6066 = vmatpush.bf16.msra.mxu0 %v14691_v18  ;;  %v14594_v47 = vld [vmem:[%s28962_s7 + $0xc08] sm:$0xf]  ;;  %v14183_v18 = vor.u32 %v18293_v7, %v14180_v46  ;;  %v13732_v26 = vld [vmem:[%s28962_s7 + $0x568] sm:$0xf0] }
 0x2c9   :  { %6094 = vmatpush.bf16.msra.mxu2 %v13159_v52  ;;  %v13415_v52 = vor.u32 %v18101_v16, %v13412_v17  ;;  %v15074_v45 = vld [vmem:[%s28962_s7 + $0xfc8] sm:$0xf]  ;;  %v18189_v16 = vld [vmem:[%s28962_s7 + $0x58c] sm:$0xf] }
 0x2ca   :  { %v18521_v23 = vld [vmem:[%s28962_s7 + $0xfe4] sm:$0xf0]  ;;  %v13764_v17 = vld [vmem:[%s28962_s7 + $0x5a8] sm:$0xf0] }
 0x2cb   :  { %6024 = vmatpush.bf16.msrb.mxu1 %v13923_v19  ;;  %6108 = vmatpush.bf16.msra.mxu3 %v13415_v52  ;;  %v15042_v9 = vld [vmem:[%s28962_s7 + $0xf88] sm:$0xf]  ;;  %v18381_v19 = vld [vmem:[%s28962_s7 + $0xb8c] sm:$0xf]  ;;  %v13767_v54 = vor.u32 %v18189_v16, %v13764_v17 }
 0x2cc   :  { %6067 = vmatpush.bf16.msra.mxu0 %v14659_v32  ;;  %v18513_v30 = vld [vmem:[%s28962_s7 + $0xfa4] sm:$0xf0]  ;;  %v14148_v52 = vld [vmem:[%s28962_s7 + $0x8a8] sm:$0xf0]  ;;  %v14535_v5 = vor.u32 %v18381_v19, %v14532_v27  ;;  %v22792_v27 = vpop.f32.mrf.mxu2 }
 0x2cd   :  { %6095 = vmatpush.bf16.msra.mxu2 %v13127_v39  ;;  %v13858_v39 = vld [vmem:[%s28962_s7 + $0x648] sm:$0xf]  ;;  %v15043_v36 = vor.u32 %v18513_v30, %v15042_v9  ;;  %v14151_v32 = vor.u32 %v18285_v21, %v14148_v52  ;;  %v14500_v24 = vld [vmem:[%s28962_s7 + $0xb68] sm:$0xf0] }
 0x2ce   :  { %v13859_v11 = vor.u32 %v18217_v55, %v13858_v39  ;;  %v15010_v34 = vld [vmem:[%s28962_s7 + $0xf48] sm:$0xf]  ;;  %v18277_v1 = vld [vmem:[%s28962_s7 + $0x84c] sm:$0xf]  ;;  %v22721_v55 = vpop.f32.mrf.mxu3 }
 0x2cf   :  { %6025 = vmatpush.bf16.msrb.mxu1 %v13891_v35  ;;  %6109 = vmatpush.bf16.msra.mxu3 %v13383_v38  ;;  %v18505_v12 = vld [vmem:[%s28962_s7 + $0xf64] sm:$0xf0]  ;;  %v18373_v35 = vld [vmem:[%s28962_s7 + $0xb4c] sm:$0xf] }
 0x2d0   :  { %6068 = vmatpush.bf16.msra.mxu0 %v14627_v44  ;;  %v14116_v38 = vld [vmem:[%s28962_s7 + $0x868] sm:$0xf0]  ;;  %v14503_v31 = vor.u32 %v18373_v35, %v14500_v24  ;;  %v14978_v28 = vld [vmem:[%s28962_s7 + $0xf08] sm:$0xf] }
 0x2d1   :  { %6096 = vmatpush.bf16.msra.mxu2 %v13095_v57  ;;  %v18401_v57 = vld [vmem:[%s28962_s7 + $0xc24] sm:$0xf0]  ;;  %v18173_v43 = vld [vmem:[%s28962_s7 + $0x50c] sm:$0xf]  ;;  %v14119_v44 = vor.u32 %v18277_v1, %v14116_v38 }
 0x2d2   :  { %v14595_v56 = vor.u32 %v18401_v57, %v14594_v47  ;;  %v13700_v48 = vld [vmem:[%s28962_s7 + $0x528] sm:$0xf0]  ;;  %v14946_v3 = vld [vmem:[%s28962_s7 + $0xec8] sm:$0xf] }
 0x2d3   :  { %6026 = vmatpush.bf16.msrb.mxu1 %v13859_v11  ;;  %6110 = vmatpush.bf16.msra.mxu3 %v13351_v58  ;;  %v14468_v11 = vld [vmem:[%s28962_s7 + $0xb28] sm:$0xf0]  ;;  %v13703_v63 = vor.u32 %v18173_v43, %v13700_v48  ;;  %v13290_v58 = vld [vmem:[%s28962_s7 + $0x1d0] sm:$0xf]  ;;  %v14914_v30 = vld [vmem:[%s28962_s7 + $0xe88] sm:$0xf] }
 0x2d4   :  { %6069 = vmatpush.bf16.msra.mxu0 %v14595_v56  ;;  %v18269_v47 = vld [vmem:[%s28962_s7 + $0x80c] sm:$0xf]  ;;  %v18489_v56 = vld [vmem:[%s28962_s7 + $0xee4] sm:$0xf0]  ;;  %v13291_v4 = vor.u32 %v18074_v59, %v13290_v58  ;;  %v18050_v48 = vld [vmem:[%s28962_s7 + $0x12c] sm:$0xf0] }
 0x2d5   :  { %6097 = vmatpush.bf16.msra.mxu2 %v13063_v13  ;;  %v13827_v13 = vor.u32 %v18209_v51, %v13826_v49  ;;  %v18497_v49 = vld [vmem:[%s28962_s7 + $0xf24] sm:$0xf0]  ;;  %v18365_v51 = vld [vmem:[%s28962_s7 + $0xb0c] sm:$0xf]  ;;  %v14947_v16 = vor.u32 %v18489_v56, %v14946_v3  ;;  %v18138_v3 = vld [vmem:[%s28962_s7 + $0x3ec] sm:$0xf0] }
 0x2d6   :  { %v14084_v57 = vld [vmem:[%s28962_s7 + $0x828] sm:$0xf0]  ;;  %v14979_v20 = vor.u32 %v18497_v49, %v14978_v28  ;;  %v18481_v19 = vld [vmem:[%s28962_s7 + $0xea4] sm:$0xf0]  ;;  %v13162_v56 = vld [vmem:[%s28962_s7 + $0xd0] sm:$0xf] }
 0x2d7   :  { %6027 = vmatpush.bf16.msrb.mxu1 %v13827_v13  ;;  %6111 = vmatpush.bf16.msra.mxu3 %v13319_v0  ;;  %v18165_v61 = vld [vmem:[%s28962_s7 + $0x4cc] sm:$0xf]  ;;  %v18066_v0 = vld [vmem:[%s28962_s7 + $0x1ac] sm:$0xf0]  ;;  %v14882_v35 = vld [vmem:[%s28962_s7 + $0xe48] sm:$0xf] }
 0x2d8   :  { %6098 = vmatmul.bf16.vlgmr.msra.gmra.mxu2 %v21551_v60  ;;  %6118 = vmatpush.bf16.msrb.mxu0 %v13799_v14  ;;  %v18357_v7 = vld [vmem:[%s28962_s7 + $0xacc] sm:$0xf]  ;;  %v13258_v14 = vld [vmem:[%s28962_s7 + $0x190] sm:$0xf]  ;;  %v18473_v24 = vld [vmem:[%s28962_s7 + $0xe64] sm:$0xf0] }
 0x2d9   :  { %6146 = vmatpush.bf16.msrb.mxu2 %v14311_v37  ;;  %v15075_v37 = vor.u32 %v18521_v23, %v15074_v45  ;;  %6070 = vmatmul.bf16.vlgmr.msra.gmra.mxu0 %v22112_v50  ;;  %v14471_v45 = vor.u32 %v18365_v51, %v14468_v11  ;;  %v14087_v23 = vor.u32 %v18269_v47, %v14084_v57  ;;  %v14436_v46 = vld [vmem:[%s28962_s7 + $0xae8] sm:$0xf0] }
 0x2da   :  { %6028 = vmatmul.bf16.vlgmr.msrb.gmra.mxu1 %v21630_v6  ;;  %6112 = vmatmul.bf16.vlgmr.msra.gmra.mxu3 %v21507_v29  ;;  %v18157_v17 = vld [vmem:[%s28962_s7 + $0x48c] sm:$0xf]  ;;  %v14439_v9 = vor.u32 %v18357_v7, %v14436_v46  ;;  %v13259_v21 = vor.u32 %v18066_v0, %v13258_v14  ;;  %v14883_v49 = vor.u32 %v18473_v24, %v14882_v35 }
 0x2db   :  { %6076 = vmatpush.bf16.msra.mxu1 %v15075_v37  ;;  %6160 = vmatpush.bf16.msrb.mxu3 %v14567_v53  ;;  %v5833_v37 = vpop.f32.mrf.mxu3  ;;  %v13636_v53 = vld [vmem:[%s28962_s7 + $0x4a8] sm:$0xf0]  ;;  %v5875_v7 = vpop.f32.mrf.mxu2 }
 0x2dc   :  { %6119 = vmatpush.bf16.msrb.mxu0 %v13767_v54  ;;  %v18349_v52 = vld [vmem:[%s28962_s7 + $0xa8c] sm:$0xf]  ;;  %v13639_v54 = vor.u32 %v18157_v17, %v13636_v53 }
 0x2dd   :  { %6147 = vmatpush.bf16.msrb.mxu2 %v14279_v25  ;;  %v18181_v25 = vld [vmem:[%s28962_s7 + $0x54c] sm:$0xf] }
 0x2de   :  { %v13735_v39 = vor.u32 %v18181_v25, %v13732_v26  ;;  %v18058_v25 = vld [vmem:[%s28962_s7 + $0x16c] sm:$0xf0]  ;;  %v14915_v26 = vor.u32 %v18481_v19, %v14914_v30  ;;  %v18341_v38 = vld [vmem:[%s28962_s7 + $0xa4c] sm:$0xf] }
 0x2df   :  { %6077 = vmatpush.bf16.msra.mxu1 %v15043_v36  ;;  %6161 = vmatpush.bf16.msrb.mxu3 %v14535_v5  ;;  %v13226_v36 = vld [vmem:[%s28962_s7 + $0x150] sm:$0xf]  ;;  %v18149_v5 = vld [vmem:[%s28962_s7 + $0x44c] sm:$0xf] }
 0x2e0   :  { %6120 = vmatpush.bf16.msrb.mxu0 %v13735_v39  ;;  %v13227_v1 = vor.u32 %v18058_v25, %v13226_v36  ;;  %v14372_v39 = vld [vmem:[%s28962_s7 + $0xa68] sm:$0xf0]  ;;  %v13514_v19 = vld [vmem:[%s28962_s7 + $0x390] sm:$0xf]  ;;  %v22902_v36 = vpop.f32.mrf.mxu0 }
 0x2e1   :  { %6148 = vmatpush.bf16.msrb.mxu2 %v14247_v41  ;;  %v15011_v41 = vor.u32 %v18505_v12, %v15010_v34  ;;  %v28972_v34 = vperm.slane %v22248_v15, 1  ;;  %v18141_v51 = vld [vmem:[%s28962_s7 + $0x40c] sm:$0xf]  ;;  %v14375_v57 = vor.u32 %v18341_v38, %v14372_v39 }
 0x2e2   :  { %v13572_v11 = vld [vmem:[%s28962_s7 + $0x428] sm:$0xf0] }
 0x2e3   :  { %6078 = vmatpush.bf16.msra.mxu1 %v15011_v41  ;;  %6162 = vmatpush.bf16.msrb.mxu3 %v14503_v31  ;;  %v13194_v41 = vld [vmem:[%s28962_s7 + $0x110] sm:$0xf]  ;;  %v14850_v31 = vld [vmem:[%s28962_s7 + $0xe08] sm:$0xf]  ;;  %v22838_v28 = vpop.f32.mrf.mxu3  ;;  %v18333_v47 = vld [vmem:[%s28962_s7 + $0xa0c] sm:$0xf] }
 0x2e4   :  { %6121 = vmatpush.bf16.msrb.mxu0 %v13703_v63  ;;  %v14340_v63 = vld [vmem:[%s28962_s7 + $0xa28] sm:$0xf0] }
 0x2e5   :  { %6149 = vmatpush.bf16.msrb.mxu2 %v14215_v33  ;;  %v13668_v33 = vld [vmem:[%s28962_s7 + $0x4e8] sm:$0xf0]  ;;  %v14343_v14 = vor.u32 %v18333_v47, %v14340_v63 }
 0x2e6   :  { %v13671_v13 = vor.u32 %v18165_v61, %v13668_v33  ;;  %v18453_v58 = vld [vmem:[%s28962_s7 + $0xdcc] sm:$0xf] }
 0x2e7   :  { %6079 = vmatpush.bf16.msra.mxu1 %v14979_v20  ;;  %6163 = vmatpush.bf16.msrb.mxu3 %v14471_v45  ;;  %v14820_v59 = vld [vmem:[%s28962_s7 + $0xde8] sm:$0xf0]  ;;  %v13195_v20 = vor.u32 %v18050_v48, %v13194_v41  ;;  %v13546_v45 = vld [vmem:[%s28962_s7 + $0x3d0] sm:$0xf] }
 0x2e8   :  { %6122 = vmatpush.bf16.msrb.mxu0 %v13671_v13  ;;  %v18261_v61 = vld [vmem:[%s28962_s7 + $0x7cc] sm:$0xf]  ;;  %v14823_v13 = vor.u32 %v18453_v58, %v14820_v59  ;;  %v13547_v17 = vor.u32 %v18138_v3, %v13546_v45  ;;  %v13482_v41 = vld [vmem:[%s28962_s7 + $0x350] sm:$0xf] }
 0x2e9   :  { %6150 = vmatpush.bf16.msrb.mxu2 %v14183_v18  ;;  %v22784_v18 = vadd.f32 %v5833_v37, %v22577_v42  ;;  %v14404_v42 = vld [vmem:[%s28962_s7 + $0xaa8] sm:$0xf0]  ;;  %v13098_v48 = vld [vmem:[%s28962_s7 + $0x50] sm:$0xf] }
 0x2ea   :  { %v14407_v12 = vor.u32 %v18349_v52, %v14404_v42  ;;  %v14052_v33 = vld [vmem:[%s28962_s7 + $0x7e8] sm:$0xf0]  ;;  %v18130_v52 = vld [vmem:[%s28962_s7 + $0x3ac] sm:$0xf0] }
 0x2eb   :  { %6080 = vmatpush.bf16.msra.mxu1 %v14947_v16  ;;  %6164 = vmatpush.bf16.msrb.mxu3 %v14439_v9  ;;  %v14055_v0 = vor.u32 %v18261_v61, %v14052_v33  ;;  %v18445_v37 = vld [vmem:[%s28962_s7 + $0xd8c] sm:$0xf]  ;;  %v13130_v42 = vld [vmem:[%s28962_s7 + $0x90] sm:$0xf]  ;;  %v5889_v25 = vpop.f32.mrf.mxu3  ;;  %v13515_v24 = vor.u32 %v18130_v52, %v13514_v19 }
 0x2ec   :  { %6123 = vmatpush.bf16.msrb.mxu0 %v13639_v54  ;;  %v14788_v16 = vld [vmem:[%s28962_s7 + $0xda8] sm:$0xf0]  ;;  %v18034_v54 = vld [vmem:[%s28962_s7 + $0xac] sm:$0xf0] }
 0x2ed   :  { %6151 = vmatpush.bf16.msrb.mxu2 %v14151_v32  ;;  %v13604_v32 = vld [vmem:[%s28962_s7 + $0x468] sm:$0xf0]  ;;  %v13450_v59 = vld [vmem:[%s28962_s7 + $0x310] sm:$0xf] }
 0x2ee   :  { %v13607_v43 = vor.u32 %v18149_v5, %v13604_v32  ;;  %v18253_v9 = vld [vmem:[%s28962_s7 + $0x78c] sm:$0xf]  ;;  %v13066_v61 = vld [vmem:[%s28962_s7 + $0x10] sm:$0xf] }
 0x2ef   :  { %6081 = vmatpush.bf16.msra.mxu1 %v14915_v26  ;;  %6165 = vmatpush.bf16.msrb.mxu3 %v14407_v12  ;;  %v14020_v30 = vld [vmem:[%s28962_s7 + $0x7a8] sm:$0xf0]  ;;  %v14791_v26 = vor.u32 %v18445_v37, %v14788_v16  ;;  %v18018_v33 = vld [vmem:[%s28962_s7 + $0x2c] sm:$0xf0]  ;;  %v5847_v45 = vpop.f32.mrf.mxu0 }
 0x2f0   :  { %6124 = vmatpush.bf16.msrb.mxu0 %v13607_v43  ;;  %v14023_v32 = vor.u32 %v18253_v9, %v14020_v30  ;;  %v18437_v12 = vld [vmem:[%s28962_s7 + $0xd4c] sm:$0xf]  ;;  %v18122_v43 = vld [vmem:[%s28962_s7 + $0x36c] sm:$0xf0] }
 0x2f1   :  { %6152 = vmatpush.bf16.msrb.mxu2 %v14119_v44  ;;  %v18465_v44 = vld [vmem:[%s28962_s7 + $0xe24] sm:$0xf0]  ;;  %v14756_v35 = vld [vmem:[%s28962_s7 + $0xd68] sm:$0xf0]  ;;  %v13483_v47 = vor.u32 %v18122_v43, %v13482_v41  ;;  %v14314_v3 = vld [vmem:[%s28962_s7 + $0x9d0] sm:$0xf] }
 0x2f2   :  { %v14851_v46 = vor.u32 %v18465_v44, %v14850_v31  ;;  %v18245_v38 = vld [vmem:[%s28962_s7 + $0x74c] sm:$0xf]  ;;  %v18026_v31 = vld [vmem:[%s28962_s7 + $0x6c] sm:$0xf0]  ;;  %v14759_v44 = vor.u32 %v18437_v12, %v14756_v35 }
 0x2f3   :  { %6082 = vmatpush.bf16.msra.mxu1 %v14883_v49  ;;  %6166 = vmatpush.bf16.msrb.mxu3 %v14375_v57  ;;  %v13988_v39 = vld [vmem:[%s28962_s7 + $0x768] sm:$0xf0]  ;;  %v13099_v57 = vor.u32 %v18026_v31, %v13098_v48  ;;  %v14282_v30 = vld [vmem:[%s28962_s7 + $0x990] sm:$0xf] }
 0x2f4   :  { %v13991_v49 = vor.u32 %v18245_v38, %v13988_v39  ;;  %v18237_v63 = vld [vmem:[%s28962_s7 + $0x70c] sm:$0xf]  ;;  %v18322_v19 = vld [vmem:[%s28962_s7 + $0x9ac] sm:$0xf0] }
 0x2f5   :  { %6153 = vmatpush.bf16.msrb.mxu2 %v14087_v23  ;;  %v13575_v23 = vor.u32 %v18141_v51, %v13572_v11  ;;  %v18429_v51 = vld [vmem:[%s28962_s7 + $0xd0c] sm:$0xf]  ;;  %v13386_v12 = vld [vmem:[%s28962_s7 + $0x290] sm:$0xf] }
 0x2f6   :  { %v14724_v11 = vld [vmem:[%s28962_s7 + $0xd28] sm:$0xf0]  ;;  %v18098_v35 = vld [vmem:[%s28962_s7 + $0x2ac] sm:$0xf0] }
 0x2f7   :  { %6125 = vmatpush.bf16.msrb.mxu0 %v13575_v23  ;;  %6083 = vmatpush.bf16.msra.mxu1 %v14851_v46  ;;  %v13956_v58 = vld [vmem:[%s28962_s7 + $0x728] sm:$0xf0]  ;;  %v14727_v23 = vor.u32 %v18429_v51, %v14724_v11  ;;  %v14250_v39 = vld [vmem:[%s28962_s7 + $0x950] sm:$0xf] }
 0x2f8   :  { %6154 = vmatmul.bf16.vlgmr.msrb.gmra.mxu2 %v21778_v62  ;;  %6167 = vmatpush.bf16.msrb.mxu3 %v14343_v14  ;;  %v18421_v46 = vld [vmem:[%s28962_s7 + $0xccc] sm:$0xf]  ;;  %v18314_v41 = vld [vmem:[%s28962_s7 + $0x96c] sm:$0xf0] }
 0x2f9   :  { %6202 = vmatpush.bf16.msra.mxu2 %v13291_v4  ;;  %v18042_v4 = vld [vmem:[%s28962_s7 + $0xec] sm:$0xf0]  ;;  %v18229_v37 = vld [vmem:[%s28962_s7 + $0x6cc] sm:$0xf] }
 0x2fa   :  { %v13163_v53 = vor.u32 %v18042_v4, %v13162_v56  ;;  %6084 = vmatmul.bf16.vlgmr.msra.gmra.mxu1 %v22266_v8  ;;  %6126 = vmatmul.bf16.vlgmr.msrb.gmra.mxu0 %v21651_v2  ;;  %v18330_v56 = vld [vmem:[%s28962_s7 + $0x9ec] sm:$0xf0]  ;;  %v22964_v4 = vadd.f32 %v5847_v45, %v22784_v18  ;;  %v13924_v18 = vld [vmem:[%s28962_s7 + $0x6e8] sm:$0xf0] }
 0x2fb   :  { %6174 = vmatpush.bf16.msra.mxu0 %v14823_v13  ;;  %6132 = vmatpush.bf16.msrb.mxu1 %v14055_v0  ;;  %v14692_v13 = vld [vmem:[%s28962_s7 + $0xce8] sm:$0xf0]  ;;  %v13067_v0 = vor.u32 %v18018_v33, %v13066_v61  ;;  %v14315_v16 = vor.u32 %v18330_v56, %v14314_v3  ;;  %v13322_v56 = vld [vmem:[%s28962_s7 + $0x210] sm:$0xf] }
 0x2fc   :  { %6216 = vmatpush.bf16.msra.mxu3 %v13547_v17  ;;  %v13418_v17 = vld [vmem:[%s28962_s7 + $0x2d0] sm:$0xf]  ;;  %v14695_v9 = vor.u32 %v18421_v46, %v14692_v13  ;;  %v18413_v52 = vld [vmem:[%s28962_s7 + $0xc8c] sm:$0xf] }
 0x2fd   :  { %6203 = vmatpush.bf16.msra.mxu2 %v13259_v21  ;;  %v5876_v21 = vadd.f32 %v5875_v7, %v28972_v34  ;;  %6168 = vmatmul.bf16.vlgmr.msrb.gmra.mxu3 %v21948_v10  ;;  %v13959_v7 = vor.u32 %v18237_v63, %v13956_v58  ;;  %v18405_v48 = vld [vmem:[%s28962_s7 + $0xc4c] sm:$0xf]  ;;  %v18090_v63 = vld [vmem:[%s28962_s7 + $0x26c] sm:$0xf0] }
 0x2fe   :  { %v14628_v31 = vld [vmem:[%s28962_s7 + $0xc68] sm:$0xf0]  ;;  %v14218_v58 = vld [vmem:[%s28962_s7 + $0x910] sm:$0xf] }
 0x2ff   :  { %v22904_v5 = vadd.f32 %v5889_v25, %v5876_v21  ;;  %6175 = vmatpush.bf16.msra.mxu0 %v14791_v26  ;;  %6133 = vmatpush.bf16.msrb.mxu1 %v14023_v32  ;;  %v13927_v21 = vor.u32 %v18229_v37, %v13924_v18  ;;  %v18221_v25 = vld [vmem:[%s28962_s7 + $0x68c] sm:$0xf]  ;;  %v14283_v32 = vor.u32 %v18322_v19, %v14282_v30  ;;  %v18082_v46 = vld [vmem:[%s28962_s7 + $0x22c] sm:$0xf0] }
 0x300   :  { %6217 = vmatpush.bf16.msra.mxu3 %v13515_v24  ;;  %v13892_v26 = vld [vmem:[%s28962_s7 + $0x6a8] sm:$0xf0]  ;;  %v23008_v24 = vpop.f32.mrf.mxu2  ;;  %v13802_v13 = vld [vmem:[%s28962_s7 + $0x5d0] sm:$0xf] }
 0x301   :  { %6204 = vmatpush.bf16.msra.mxu2 %v13227_v1  ;;  %v13131_v1 = vor.u32 %v18034_v54, %v13130_v42  ;;  %v14660_v42 = vld [vmem:[%s28962_s7 + $0xca8] sm:$0xf0]  ;;  %v13895_v43 = vor.u32 %v18221_v25, %v13892_v26  ;;  %v18394_v30 = vld [vmem:[%s28962_s7 + $0xbec] sm:$0xf0]  ;;  %v13323_v25 = vor.u32 %v18082_v46, %v13322_v56 }
 0x302   :  { %v14663_v38 = vor.u32 %v18413_v52, %v14660_v42  ;;  %v18213_v51 = vld [vmem:[%s28962_s7 + $0x64c] sm:$0xf]  ;;  %v14186_v19 = vld [vmem:[%s28962_s7 + $0x8d0] sm:$0xf] }
 0x303   :  { %6176 = vmatpush.bf16.msra.mxu0 %v14759_v44  ;;  %6134 = vmatpush.bf16.msrb.mxu1 %v13991_v49  ;;  %v23025_v44 = vpop.f32.mrf.mxu3  ;;  %v13387_v49 = vor.u32 %v18098_v35, %v13386_v12  ;;  %v13860_v11 = vld [vmem:[%s28962_s7 + $0x668] sm:$0xf0]  ;;  %v18194_v12 = vld [vmem:[%s28962_s7 + $0x5ac] sm:$0xf0] }
 0x304   :  { %6218 = vmatpush.bf16.msra.mxu3 %v13483_v47  ;;  %v14251_v47 = vor.u32 %v18314_v41, %v14250_v39  ;;  %v18205_v61 = vld [vmem:[%s28962_s7 + $0x60c] sm:$0xf]  ;;  %v13863_v45 = vor.u32 %v18213_v51, %v13860_v11  ;;  %v14538_v41 = vld [vmem:[%s28962_s7 + $0xb90] sm:$0xf]  ;;  %v23118_v11 = vpop.f32.mrf.mxu1 }
 0x305   :  { %6205 = vmatpush.bf16.msra.mxu2 %v13195_v20  ;;  %v18114_v20 = vld [vmem:[%s28962_s7 + $0x32c] sm:$0xf0]  ;;  %v13828_v33 = vld [vmem:[%s28962_s7 + $0x628] sm:$0xf0] }
 0x306   :  { %v13451_v14 = vor.u32 %v18114_v20, %v13450_v59  ;;  %v14631_v59 = vor.u32 %v18405_v48, %v14628_v31  ;;  %v18306_v20 = vld [vmem:[%s28962_s7 + $0x92c] sm:$0xf0]  ;;  %v14596_v3 = vld [vmem:[%s28962_s7 + $0xc28] sm:$0xf0]  ;;  %v13831_v42 = vor.u32 %v18205_v61, %v13828_v33 }
 0x307   :  { %6177 = vmatpush.bf16.msra.mxu0 %v14727_v23  ;;  %6135 = vmatpush.bf16.msrb.mxu1 %v13959_v7  ;;  %v18397_v23 = vld [vmem:[%s28962_s7 + $0xc0c] sm:$0xf]  ;;  %v18386_v48 = vld [vmem:[%s28962_s7 + $0xbac] sm:$0xf0] }
 0x308   :  { %6219 = vmatpush.bf16.msra.mxu3 %v13451_v14  ;;  %v18202_v14 = vld [vmem:[%s28962_s7 + $0x5ec] sm:$0xf0]  ;;  %v18517_v37 = vld [vmem:[%s28962_s7 + $0xfcc] sm:$0xf] }
 0x309   :  { %6206 = vmatpush.bf16.msra.mxu2 %v13163_v53  ;;  %v18106_v53 = vld [vmem:[%s28962_s7 + $0x2ec] sm:$0xf0]  ;;  %v15076_v18 = vld [vmem:[%s28962_s7 + $0xfe8] sm:$0xf0] }
 0x30a   :  { %v13419_v54 = vor.u32 %v18106_v53, %v13418_v17  ;;  %v23078_v17 = vpop.f32.mrf.mxu2  ;;  %v15079_v26 = vor.u32 %v18517_v37, %v15076_v18  ;;  %v15044_v39 = vld [vmem:[%s28962_s7 + $0xfa8] sm:$0xf0]  ;;  %v14154_v31 = vld [vmem:[%s28962_s7 + $0x890] sm:$0xf] }
 0x30b   :  { %6178 = vmatpush.bf16.msra.mxu0 %v14695_v9  ;;  %6136 = vmatpush.bf16.msrb.mxu1 %v13927_v21  ;;  %v14599_v9 = vor.u32 %v18397_v23, %v14596_v3  ;;  %v18298_v21 = vld [vmem:[%s28962_s7 + $0x8ec] sm:$0xf0]  ;;  %v15012_v61 = vld [vmem:[%s28962_s7 + $0xf68] sm:$0xf0] }
 0x30c   :  { %6220 = vmatpush.bf16.msra.mxu3 %v13419_v54  ;;  %v13803_v54 = vor.u32 %v18202_v14, %v13802_v13  ;;  %v14506_v33 = vld [vmem:[%s28962_s7 + $0xb50] sm:$0xf]  ;;  %v18493_v18 = vld [vmem:[%s28962_s7 + $0xf0c] sm:$0xf] }
 0x30d   :  { %6207 = vmatpush.bf16.msra.mxu2 %v13131_v1  ;;  %v23010_v1 = vpop.f32.mrf.mxu0  ;;  %v14122_v23 = vld [vmem:[%s28962_s7 + $0x850] sm:$0xf] }
 0x30e   :  { %v18282_v3 = vld [vmem:[%s28962_s7 + $0x86c] sm:$0xf0] }
 0x30f   :  { %6179 = vmatpush.bf16.msra.mxu0 %v14663_v38  ;;  %6137 = vmatpush.bf16.msrb.mxu1 %v13895_v43  ;;  %v14187_v38 = vor.u32 %v18298_v21, %v14186_v19  ;;  %v23107_v43 = vpop.f32.mrf.mxu3  ;;  %v13706_v13 = vld [vmem:[%s28962_s7 + $0x510] sm:$0xf]  ;;  %v14123_v37 = vor.u32 %v18282_v3, %v14122_v23  ;;  %v18477_v3 = vld [vmem:[%s28962_s7 + $0xe8c] sm:$0xf] }
 0x310   :  { %6221 = vmatpush.bf16.msra.mxu3 %v13387_v49  ;;  %v18290_v49 = vld [vmem:[%s28962_s7 + $0x8ac] sm:$0xf0] }
 0x311   :  { %6208 = vmatpush.bf16.msra.mxu2 %v13099_v57  ;;  %v13354_v57 = vld [vmem:[%s28962_s7 + $0x250] sm:$0xf] }
 0x312   :  { %v13355_v7 = vor.u32 %v18090_v63, %v13354_v57  ;;  %v13738_v57 = vld [vmem:[%s28962_s7 + $0x550] sm:$0xf] }
 0x313   :  { %6180 = vmatpush.bf16.msra.mxu0 %v14631_v59  ;;  %6138 = vmatpush.bf16.msrb.mxu1 %v13863_v45  ;;  %v18186_v63 = vld [vmem:[%s28962_s7 + $0x56c] sm:$0xf0]  ;;  %v14155_v59 = vor.u32 %v18290_v49, %v14154_v31 }
 0x314   :  { %6222 = vmatpush.bf16.msra.mxu3 %v13355_v7  ;;  %v18378_v45 = vld [vmem:[%s28962_s7 + $0xb6c] sm:$0xf0]  ;;  %v13739_v56 = vor.u32 %v18186_v63, %v13738_v57  ;;  %v23147_v7 = vpop.f32.mrf.mxu2  ;;  %v18062_v63 = vld [vmem:[%s28962_s7 + $0x194] sm:$0xf] }
 0x315   :  { %6209 = vmatpush.bf16.msra.mxu2 %v13067_v0  ;;  %v14219_v0 = vor.u32 %v18306_v20, %v14218_v58  ;;  %v5903_v53 = vpop.f32.mrf.mxu0  ;;  %v14539_v58 = vor.u32 %v18386_v48, %v14538_v41  ;;  %v18501_v20 = vld [vmem:[%s28962_s7 + $0xf4c] sm:$0xf]  ;;  %v18178_v14 = vld [vmem:[%s28962_s7 + $0x52c] sm:$0xf0] }
 0x316   :  { %v23090_v52 = vadd.f32 %v5903_v53, %v22904_v5  ;;  %v18509_v5 = vld [vmem:[%s28962_s7 + $0xf8c] sm:$0xf]  ;;  %v15015_v46 = vor.u32 %v18501_v20, %v15012_v61  ;;  %v14474_v53 = vld [vmem:[%s28962_s7 + $0xb10] sm:$0xf]  ;;  %v13707_v21 = vor.u32 %v18178_v14, %v13706_v13 }
 0x317   :  { %6181 = vmatpush.bf16.msra.mxu0 %v14599_v9  ;;  %6139 = vmatpush.bf16.msrb.mxu1 %v13831_v42  ;;  %v18370_v9 = vld [vmem:[%s28962_s7 + $0xb2c] sm:$0xf0]  ;;  %v18070_v42 = vld [vmem:[%s28962_s7 + $0x1d4] sm:$0xf]  ;;  %v18485_v41 = vld [vmem:[%s28962_s7 + $0xecc] sm:$0xf] }
 0x318   :  { %6210 = vmatmul.bf16.vlgmr.msra.gmra.mxu2 %v21551_v60  ;;  %6223 = vmatpush.bf16.msra.mxu3 %v13323_v25  ;;  %v18274_v19 = vld [vmem:[%s28962_s7 + $0x82c] sm:$0xf0]  ;;  %v23179_v25 = vpop.f32.mrf.mxu3  ;;  %v14948_v48 = vld [vmem:[%s28962_s7 + $0xee8] sm:$0xf0] }
 0x319   :  { %6258 = vmatpush.bf16.msrb.mxu2 %v14315_v16  ;;  %v14570_v16 = vld [vmem:[%s28962_s7 + $0xbd0] sm:$0xf]  ;;  %v14951_v61 = vor.u32 %v18485_v41, %v14948_v48  ;;  %v13196_v48 = vld [vmem:[%s28962_s7 + $0x130] sm:$0xf0] }
 0x31a   :  { %v14571_v35 = vor.u32 %v18394_v30, %v14570_v16  ;;  %6140 = vmatmul.bf16.vlgmr.msrb.gmra.mxu1 %v21630_v6  ;;  %6182 = vmatmul.bf16.vlgmr.msra.gmra.mxu0 %v22112_v50  ;;  %v14980_v16 = vld [vmem:[%s28962_s7 + $0xf28] sm:$0xf0]  ;;  %v14090_v30 = vld [vmem:[%s28962_s7 + $0x810] sm:$0xf] }
 0x31b   :  { %6230 = vmatpush.bf16.msrb.mxu0 %v13803_v54  ;;  %6188 = vmatpush.bf16.msra.mxu1 %v15079_v26  ;;  %v13292_v54 = vld [vmem:[%s28962_s7 + $0x1f0] sm:$0xf0]  ;;  %v5861_v26 = vpop.f32.mrf.mxu1  ;;  %v14442_v49 = vld [vmem:[%s28962_s7 + $0xad0] sm:$0xf] }
 0x31c   :  { %6272 = vmatpush.bf16.msrb.mxu3 %v14571_v35  ;;  %v18170_v35 = vld [vmem:[%s28962_s7 + $0x4ec] sm:$0xf0]  ;;  %v13295_v31 = vor.u32 %v18070_v42, %v13292_v54 }
 0x31d   :  { %6259 = vmatpush.bf16.msrb.mxu2 %v14283_v32  ;;  %v13770_v32 = vld [vmem:[%s28962_s7 + $0x590] sm:$0xf]  ;;  %6224 = vmatmul.bf16.vlgmr.msra.gmra.mxu3 %v21507_v29  ;;  %v23214_v20 = vpop.f32.mrf.mxu0 }
 0x31e   :  { %v13771_v51 = vor.u32 %v18194_v12, %v13770_v32  ;;  %v14983_v32 = vor.u32 %v18493_v18, %v14980_v16  ;;  %v13674_v12 = vld [vmem:[%s28962_s7 + $0x4d0] sm:$0xf]  ;;  %v18054_v18 = vld [vmem:[%s28962_s7 + $0x154] sm:$0xf] }
 0x31f   :  { %v13675_v57 = vor.u32 %v18170_v35, %v13674_v12  ;;  %v14410_v13 = vld [vmem:[%s28962_s7 + $0xa90] sm:$0xf]  ;;  %v13228_v16 = vld [vmem:[%s28962_s7 + $0x170] sm:$0xf0] }
 0x320   :  { %6231 = vmatpush.bf16.msrb.mxu0 %v13771_v51  ;;  %6273 = vmatpush.bf16.msrb.mxu3 %v14539_v58  ;;  %v23205_v51 = vld [vmem:[%s28964_s8] sm:$0xff]  ;;  %v13260_v58 = vld [vmem:[%s28962_s7 + $0x1b0] sm:$0xf0]  ;;  %v18354_v14 = vld [vmem:[%s28962_s7 + $0xaac] sm:$0xf0]  ;;  %v13231_v12 = vor.u32 %v18054_v18, %v13228_v16 }
 0x321   :  { %6260 = vmatpush.bf16.msrb.mxu2 %v14251_v47  ;;  %v15047_v47 = vor.u32 %v18509_v5, %v15044_v39  ;;  %v14475_v5 = vor.u32 %v18370_v9, %v14474_v53  ;;  %v14091_v39 = vor.u32 %v18274_v19, %v14090_v30  ;;  %v6001_v9 = vpop.f32.mrf.mxu3  ;;  %v13610_v19 = vld [vmem:[%s28962_s7 + $0x450] sm:$0xf]  ;;  %v14411_v54 = vor.u32 %v18354_v14, %v14410_v13  ;;  %v18134_v13 = vld [vmem:[%s28962_s7 + $0x3d4] sm:$0xf] }
 0x322   :  { %v14378_v35 = vld [vmem:[%s28962_s7 + $0xa50] sm:$0xf]  ;;  %v13164_v18 = vld [vmem:[%s28962_s7 + $0xf0] sm:$0xf0] }
 0x323   :  { %6189 = vmatpush.bf16.msra.mxu1 %v15047_v47  ;;  %v28971_v47 = vperm.slane %v23205_v51, 2  ;;  %v23243_v53 = vpop.f32.mrf.mxu1 }
 0x324   :  { %6232 = vmatpush.bf16.msrb.mxu0 %v13739_v56  ;;  %v14916_v56 = vld [vmem:[%s28962_s7 + $0xea8] sm:$0xf0] }
 0x325   :  { %6261 = vmatpush.bf16.msrb.mxu2 %v14219_v0  ;;  %v14507_v0 = vor.u32 %v18378_v45, %v14506_v33  ;;  %v13642_v33 = vld [vmem:[%s28962_s7 + $0x490] sm:$0xf]  ;;  %v14919_v30 = vor.u32 %v18477_v3, %v14916_v56 }
 0x326   :  { %v18162_v45 = vld [vmem:[%s28962_s7 + $0x4ac] sm:$0xf0] }
 0x327   :  { %6190 = vmatpush.bf16.msra.mxu1 %v15015_v46  ;;  %6274 = vmatpush.bf16.msrb.mxu3 %v14507_v0  ;;  %v13263_v46 = vor.u32 %v18062_v63, %v13260_v58  ;;  %v18146_v63 = vld [vmem:[%s28962_s7 + $0x42c] sm:$0xf0] }
 0x328   :  { %6233 = vmatpush.bf16.msrb.mxu0 %v13707_v21  ;;  %v18154_v21 = vld [vmem:[%s28962_s7 + $0x46c] sm:$0xf0] }
 0x329   :  { %6262 = vmatpush.bf16.msrb.mxu2 %v14187_v38  ;;  %v23188_v38 = vadd.f32 %v5861_v26, %v22964_v4  ;;  %v18362_v4 = vld [vmem:[%s28962_s7 + $0xaec] sm:$0xf0]  ;;  %v18469_v26 = vld [vmem:[%s28962_s7 + $0xe4c] sm:$0xf]  ;;  %v13611_v41 = vor.u32 %v18154_v21, %v13610_v19 }
 0x32a   :  { %v14443_v23 = vor.u32 %v18362_v4, %v14442_v49  ;;  %v14852_v49 = vld [vmem:[%s28962_s7 + $0xe28] sm:$0xf0]  ;;  %v14346_v58 = vld [vmem:[%s28962_s7 + $0xa10] sm:$0xf] }
 0x32b   :  { %6191 = vmatpush.bf16.msra.mxu1 %v14983_v32  ;;  %6275 = vmatpush.bf16.msrb.mxu3 %v14475_v5  ;;  %v14884_v32 = vld [vmem:[%s28962_s7 + $0xe68] sm:$0xf0]  ;;  %v18346_v5 = vld [vmem:[%s28962_s7 + $0xa6c] sm:$0xf0]  ;;  %v5917_v16 = vpop.f32.mrf.mxu1 }
 0x32c   :  { %6234 = vmatpush.bf16.msrb.mxu0 %v13675_v57  ;;  %v14887_v4 = vor.u32 %v18469_v26, %v14884_v32  ;;  %v13578_v57 = vld [vmem:[%s28962_s7 + $0x410] sm:$0xf]  ;;  %v5918_v19 = vadd.f32 %v5917_v16, %v23090_v52 }
 0x32d   :  { %6263 = vmatpush.bf16.msrb.mxu2 %v14155_v59  ;;  %v5987_v59 = vpop.f32.mrf.mxu2  ;;  %v14058_v56 = vld [vmem:[%s28962_s7 + $0x7d0] sm:$0xf]  ;;  %v13579_v14 = vor.u32 %v18146_v63, %v13578_v57 }
 0x32e   :  { %v5988_v0 = vadd.f32 %v5987_v59, %v28971_v47  ;;  %v14379_v59 = vor.u32 %v18346_v5, %v14378_v35  ;;  %v14794_v26 = vld [vmem:[%s28962_s7 + $0xd90] sm:$0xf] }
 0x32f   :  { %6192 = vmatpush.bf16.msra.mxu1 %v14951_v61  ;;  %6276 = vmatpush.bf16.msrb.mxu3 %v14443_v23  ;;  %v18338_v61 = vld [vmem:[%s28962_s7 + $0xa2c] sm:$0xf0]  ;;  %v5959_v23 = vpop.f32.mrf.mxu0 }
 0x330   :  { %v23251_v42 = vadd.f32 %v6001_v9, %v5988_v0  ;;  %v13548_v0 = vld [vmem:[%s28962_s7 + $0x3f0] sm:$0xf0]  ;;  %v14347_v21 = vor.u32 %v18338_v61, %v14346_v58  ;;  %v18450_v32 = vld [vmem:[%s28962_s7 + $0xdac] sm:$0xf0] }
 0x331   :  { %6264 = vmatpush.bf16.msrb.mxu2 %v14123_v37  ;;  %v13643_v37 = vor.u32 %v18162_v45, %v13642_v33  ;;  %v14826_v33 = vld [vmem:[%s28962_s7 + $0xdd0] sm:$0xf] }
 0x332   :  { %v18458_v45 = vld [vmem:[%s28962_s7 + $0xdec] sm:$0xf0] }
 0x333   :  { %6235 = vmatpush.bf16.msrb.mxu0 %v13643_v37  ;;  %6193 = vmatpush.bf16.msra.mxu1 %v14919_v30  ;;  %v18038_v37 = vld [vmem:[%s28962_s7 + $0xd4] sm:$0xf]  ;;  %v14827_v30 = vor.u32 %v18458_v45, %v14826_v33  ;;  %v14026_v5 = vld [vmem:[%s28962_s7 + $0x790] sm:$0xf] }
 0x334   :  { %6277 = vmatpush.bf16.msrb.mxu3 %v14411_v54  ;;  %v13167_v35 = vor.u32 %v18038_v37, %v13164_v18  ;;  %v18258_v52 = vld [vmem:[%s28962_s7 + $0x7ac] sm:$0xf0] }
 0x335   :  { %6265 = vmatpush.bf16.msrb.mxu2 %v14091_v39  ;;  %v18046_v39 = vld [vmem:[%s28962_s7 + $0x114] sm:$0xf]  ;;  %v14027_v57 = vor.u32 %v18258_v52, %v14026_v5  ;;  %v18442_v63 = vld [vmem:[%s28962_s7 + $0xd6c] sm:$0xf0] }
 0x336   :  { %v13199_v3 = vor.u32 %v18046_v39, %v13196_v48  ;;  %v18126_v39 = vld [vmem:[%s28962_s7 + $0x394] sm:$0xf]  ;;  %v13994_v33 = vld [vmem:[%s28962_s7 + $0x750] sm:$0xf] }
 0x337   :  { %6236 = vmatpush.bf16.msrb.mxu0 %v13611_v41  ;;  %6194 = vmatpush.bf16.msra.mxu1 %v14887_v4  ;;  %v5932_v41 = vadd.f32 %v23078_v17, %v5918_v19  ;;  %v13516_v48 = vld [vmem:[%s28962_s7 + $0x3b0] sm:$0xf0]  ;;  %v14795_v4 = vor.u32 %v18450_v32, %v14794_v26  ;;  %v14762_v17 = vld [vmem:[%s28962_s7 + $0xd50] sm:$0xf] }
 0x338   :  { %6266 = vmatmul.bf16.vlgmr.msrb.gmra.mxu2 %v21778_v62  ;;  %6278 = vmatpush.bf16.msrb.mxu3 %v14379_v59  ;;  %v13519_v59 = vor.u32 %v18126_v39, %v13516_v48  ;;  %v18250_v45 = vld [vmem:[%s28962_s7 + $0x76c] sm:$0xf0]  ;;  %v14763_v37 = vor.u32 %v18442_v63, %v14762_v17  ;;  %v13452_v26 = vld [vmem:[%s28962_s7 + $0x330] sm:$0xf0] }
 0x339   :  { %6314 = vmatpush.bf16.msra.mxu2 %v13295_v31  ;;  %v18461_v31 = vld [vmem:[%s28962_s7 + $0xe0c] sm:$0xf]  ;;  %v5946_v58 = vadd.f32 %v23107_v43, %v5932_v41  ;;  %v13484_v43 = vld [vmem:[%s28962_s7 + $0x370] sm:$0xf0]  ;;  %v13995_v18 = vor.u32 %v18250_v45, %v13994_v33  ;;  %v14730_v16 = vld [vmem:[%s28962_s7 + $0xd10] sm:$0xf] }
 0x33a   :  { %v14855_v9 = vor.u32 %v18461_v31, %v14852_v49  ;;  %v18030_v31 = vld [vmem:[%s28962_s7 + $0x94] sm:$0xf]  ;;  %v13962_v19 = vld [vmem:[%s28962_s7 + $0x710] sm:$0xf] }
 0x33b   :  { %6237 = vmatpush.bf16.msrb.mxu0 %v13579_v14  ;;  %v13132_v49 = vld [vmem:[%s28962_s7 + $0xb0] sm:$0xf0]  ;;  %v23366_v14 = vpop.f32.mrf.mxu0  ;;  %v14698_v41 = vld [vmem:[%s28962_s7 + $0xcd0] sm:$0xf] }
 0x33c   :  { %6195 = vmatpush.bf16.msra.mxu1 %v14855_v9  ;;  %6279 = vmatpush.bf16.msrb.mxu3 %v14347_v21  ;;  %v13135_v61 = vor.u32 %v18030_v31, %v13132_v49  ;;  %v18434_v9 = vld [vmem:[%s28962_s7 + $0xd2c] sm:$0xf0]  ;;  %v18014_v32 = vld [vmem:[%s28962_s7 + $0x14] sm:$0xf] }
 0x33d   :  { %6315 = vmatpush.bf16.msra.mxu2 %v13263_v46  ;;  %v18266_v46 = vld [vmem:[%s28962_s7 + $0x7ec] sm:$0xf0]  ;;  %v18326_v5 = vld [vmem:[%s28962_s7 + $0x9d4] sm:$0xf] }
 0x33e   :  { %v14059_v54 = vor.u32 %v18266_v46, %v14058_v56  ;;  %6238 = vmatmul.bf16.vlgmr.msrb.gmra.mxu0 %v21651_v2  ;;  %v18022_v56 = vld [vmem:[%s28962_s7 + $0x54] sm:$0xf]  ;;  %v18242_v21 = vld [vmem:[%s28962_s7 + $0x72c] sm:$0xf0] }
 0x33f   :  { %6286 = vmatpush.bf16.msra.mxu0 %v14827_v30  ;;  %6196 = vmatmul.bf16.vlgmr.msra.gmra.mxu1 %v22266_v8  ;;  %v13100_v46 = vld [vmem:[%s28962_s7 + $0x70] sm:$0xf0]  ;;  %v13963_v39 = vor.u32 %v18242_v21, %v13962_v19  ;;  %v18426_v48 = vld [vmem:[%s28962_s7 + $0xcec] sm:$0xf0] }
 0x340   :  { %6244 = vmatpush.bf16.msrb.mxu1 %v14059_v54  ;;  %6280 = vmatmul.bf16.vlgmr.msrb.gmra.mxu3 %v21948_v10  ;;  %v13103_v30 = vor.u32 %v18022_v56, %v13100_v46  ;;  %v18110_v54 = vld [vmem:[%s28962_s7 + $0x314] sm:$0xf]  ;;  %v14699_v33 = vor.u32 %v18426_v48, %v14698_v41 }
 0x341   :  { %6316 = vmatpush.bf16.msra.mxu2 %v13231_v12  ;;  %v13551_v12 = vor.u32 %v18134_v13, %v13548_v0  ;;  %v5960_v13 = vadd.f32 %v5959_v23, %v5946_v58  ;;  %v23369_v0 = vpop.f32.mrf.mxu1  ;;  %v14316_v52 = vld [vmem:[%s28962_s7 + $0x9f0] sm:$0xf0]  ;;  %v13455_v31 = vor.u32 %v18110_v54, %v13452_v26 }
 0x342   :  { %v14319_v17 = vor.u32 %v18326_v5, %v14316_v52  ;;  %v18102_v63 = vld [vmem:[%s28962_s7 + $0x2d4] sm:$0xf]  ;;  %v13866_v52 = vld [vmem:[%s28962_s7 + $0x650] sm:$0xf] }
 0x343   :  { %6328 = vmatpush.bf16.msra.mxu3 %v13551_v12  ;;  %6287 = vmatpush.bf16.msra.mxu0 %v14795_v4  ;;  %v13068_v12 = vld [vmem:[%s28962_s7 + $0x30] sm:$0xf0]  ;;  %v13930_v4 = vld [vmem:[%s28962_s7 + $0x6d0] sm:$0xf] }
 0x344   :  { %6245 = vmatpush.bf16.msrb.mxu1 %v14027_v57  ;;  %v13071_v49 = vor.u32 %v18014_v32, %v13068_v12  ;;  %v18234_v57 = vld [vmem:[%s28962_s7 + $0x6ec] sm:$0xf0]  ;;  %v13420_v58 = vld [vmem:[%s28962_s7 + $0x2f0] sm:$0xf0] }
 0x345   :  { %6317 = vmatpush.bf16.msra.mxu2 %v13199_v3  ;;  %v18118_v3 = vld [vmem:[%s28962_s7 + $0x354] sm:$0xf]  ;;  %v13931_v46 = vor.u32 %v18234_v57, %v13930_v4  ;;  %v14634_v32 = vld [vmem:[%s28962_s7 + $0xc50] sm:$0xf] }
 0x346   :  { %v13487_v23 = vor.u32 %v18118_v3, %v13484_v43  ;;  %v18318_v45 = vld [vmem:[%s28962_s7 + $0x994] sm:$0xf]  ;;  %v18410_v12 = vld [vmem:[%s28962_s7 + $0xc6c] sm:$0xf0] }
 0x347   :  { %6329 = vmatpush.bf16.msra.mxu3 %v13519_v59  ;;  %6288 = vmatpush.bf16.msra.mxu0 %v14763_v37  ;;  %v6015_v59 = vpop.f32.mrf.mxu0  ;;  %v14284_v3 = vld [vmem:[%s28962_s7 + $0x9b0] sm:$0xf0]  ;;  %v14666_v37 = vld [vmem:[%s28962_s7 + $0xc90] sm:$0xf]  ;;  %v14635_v4 = vor.u32 %v18410_v12, %v14634_v32 }
 0x348   :  { %6246 = vmatpush.bf16.msrb.mxu1 %v13995_v18  ;;  %v23426_v43 = vadd.f32 %v6015_v59, %v23251_v42  ;;  %v18418_v18 = vld [vmem:[%s28962_s7 + $0xcac] sm:$0xf0]  ;;  %v18310_v21 = vld [vmem:[%s28962_s7 + $0x954] sm:$0xf] }
 0x349   :  { %6318 = vmatpush.bf16.msra.mxu2 %v13167_v35  ;;  %v14731_v35 = vor.u32 %v18434_v9, %v14730_v16  ;;  %v13423_v16 = vor.u32 %v18102_v63, %v13420_v58  ;;  %v13898_v42 = vld [vmem:[%s28962_s7 + $0x690] sm:$0xf]  ;;  %v14287_v9 = vor.u32 %v18318_v45, %v14284_v3  ;;  %v14667_v19 = vor.u32 %v18418_v18, %v14666_v37  ;;  %v14252_v54 = vld [vmem:[%s28962_s7 + $0x970] sm:$0xf0]  ;;  %v23496_v45 = vpop.f32.mrf.mxu3 }
 0x34a   :  { %v14255_v41 = vor.u32 %v18310_v21, %v14252_v54  ;;  %v18086_v48 = vld [vmem:[%s28962_s7 + $0x254] sm:$0xf]  ;;  %v18210_v63 = vld [vmem:[%s28962_s7 + $0x62c] sm:$0xf0] }
 0x34b   :  { %6330 = vmatpush.bf16.msra.mxu3 %v13487_v23  ;;  %6289 = vmatpush.bf16.msra.mxu0 %v14731_v35  ;;  %v18094_v23 = vld [vmem:[%s28962_s7 + $0x294] sm:$0xf]  ;;  %v23461_v35 = vpop.f32.mrf.mxu2  ;;  %v14602_v59 = vld [vmem:[%s28962_s7 + $0xc10] sm:$0xf] }
 0x34c   :  { %6247 = vmatpush.bf16.msrb.mxu1 %v13963_v39  ;;  %v18218_v39 = vld [vmem:[%s28962_s7 + $0x66c] sm:$0xf0]  ;;  %v14220_v57 = vld [vmem:[%s28962_s7 + $0x930] sm:$0xf0] }
 0x34d   :  { %6319 = vmatpush.bf16.msra.mxu2 %v13135_v61  ;;  %v5973_v61 = vpop.f32.mrf.mxu1  ;;  %v13867_v58 = vor.u32 %v18218_v39, %v13866_v52  ;;  %v18198_v37 = vld [vmem:[%s28962_s7 + $0x5d4] sm:$0xf] }
 0x34e   :  { %v23428_v56 = vadd.f32 %v5973_v61, %v5960_v13  ;;  %v18226_v13 = vld [vmem:[%s28962_s7 + $0x6ac] sm:$0xf0]  ;;  %v13804_v18 = vld [vmem:[%s28962_s7 + $0x5f0] sm:$0xf0] }
 0x34f   :  { %6331 = vmatpush.bf16.msra.mxu3 %v13455_v31  ;;  %6290 = vmatpush.bf16.msra.mxu0 %v14699_v33  ;;  %v13899_v26 = vor.u32 %v18226_v13, %v13898_v42  ;;  %v13356_v31 = vld [vmem:[%s28962_s7 + $0x270] sm:$0xf0]  ;;  %v18402_v61 = vld [vmem:[%s28962_s7 + $0xc2c] sm:$0xf0] }
 0x350   :  { %6248 = vmatpush.bf16.msrb.mxu1 %v13931_v46  ;;  %v18078_v33 = vld [vmem:[%s28962_s7 + $0x214] sm:$0xf]  ;;  %v13359_v3 = vor.u32 %v18086_v48, %v13356_v31  ;;  %v15082_v42 = vld [vmem:[%s28962_s7 + $0xfd0] sm:$0xf] }
 0x351   :  { %6320 = vmatpush.bf16.msra.mxu2 %v13103_v30  ;;  %v13388_v30 = vld [vmem:[%s28962_s7 + $0x2b0] sm:$0xf0]  ;;  %v18522_v13 = vld [vmem:[%s28962_s7 + $0xfec] sm:$0xf0] }
 0x352   :  { %v13391_v5 = vor.u32 %v18094_v23, %v13388_v30  ;;  %v13324_v46 = vld [vmem:[%s28962_s7 + $0x230] sm:$0xf0]  ;;  %v14603_v23 = vor.u32 %v18402_v61, %v14602_v59  ;;  %v15050_v31 = vld [vmem:[%s28962_s7 + $0xf90] sm:$0xf]  ;;  %v23551_v59 = vpop.f32.mrf.mxu3 }
 0x353   :  { %6332 = vmatpush.bf16.msra.mxu3 %v13423_v16  ;;  %6291 = vmatpush.bf16.msra.mxu0 %v14667_v19  ;;  %v14572_v30 = vld [vmem:[%s28962_s7 + $0xbf0] sm:$0xf0]  ;;  %v23525_v32 = vpop.f32.mrf.mxu2  ;;  %v13327_v12 = vor.u32 %v18078_v33, %v13324_v46 }
 0x354   :  { %6249 = vmatpush.bf16.msrb.mxu1 %v13899_v26  ;;  %v18294_v19 = vld [vmem:[%s28962_s7 + $0x8d4] sm:$0xf]  ;;  %v13807_v26 = vor.u32 %v18198_v37, %v13804_v18  ;;  %v15018_v18 = vld [vmem:[%s28962_s7 + $0xf50] sm:$0xf] }
 0x355   :  { %6321 = vmatpush.bf16.msra.mxu2 %v13071_v49  ;;  %v18302_v49 = vld [vmem:[%s28962_s7 + $0x914] sm:$0xf] }
 0x356   :  { %v14223_v16 = vor.u32 %v18302_v49, %v14220_v57  ;;  %v14188_v21 = vld [vmem:[%s28962_s7 + $0x8f0] sm:$0xf0]  ;;  %v18514_v49 = vld [vmem:[%s28962_s7 + $0xfac] sm:$0xf0] }
 0x357   :  { %6333 = vmatpush.bf16.msra.mxu3 %v13391_v5  ;;  %6292 = vmatpush.bf16.msra.mxu0 %v14635_v4  ;;  %v15083_v5 = vor.u32 %v18522_v13, %v15082_v42  ;;  %v18190_v52 = vld [vmem:[%s28962_s7 + $0x594] sm:$0xf]  ;;  %v14191_v48 = vor.u32 %v18294_v19, %v14188_v21  ;;  %v15051_v61 = vor.u32 %v18514_v49, %v15050_v31 }
 0x358   :  { %6322 = vmatmul.bf16.vlgmr.msra.gmra.mxu2 %v21551_v60  ;;  %6250 = vmatpush.bf16.msrb.mxu1 %v13867_v58  ;;  %v13772_v39 = vld [vmem:[%s28962_s7 + $0x5b0] sm:$0xf0] }
 0x359   :  { %6370 = vmatpush.bf16.msrb.mxu2 %v14319_v17  ;;  %v13834_v17 = vld [vmem:[%s28962_s7 + $0x610] sm:$0xf]  ;;  %v18382_v4 = vld [vmem:[%s28962_s7 + $0xb94] sm:$0xf]  ;;  %v13775_v58 = vor.u32 %v18190_v52, %v13772_v39 }
 0x35a   :  { %v13835_v54 = vor.u32 %v18210_v63, %v13834_v17  ;;  %v14540_v57 = vld [vmem:[%s28962_s7 + $0xbb0] sm:$0xf0]  ;;  %v14986_v52 = vld [vmem:[%s28962_s7 + $0xf10] sm:$0xf] }
 0x35b   :  { %6334 = vmatpush.bf16.msra.mxu3 %v13359_v3  ;;  %6293 = vmatpush.bf16.msra.mxu0 %v14603_v23  ;;  %v18286_v17 = vld [vmem:[%s28962_s7 + $0x894] sm:$0xf]  ;;  %v14543_v46 = vor.u32 %v18382_v4, %v14540_v57  ;;  %v18498_v39 = vld [vmem:[%s28962_s7 + $0xf2c] sm:$0xf0] }
 0x35c   :  { %v14156_v63 = vld [vmem:[%s28962_s7 + $0x8b0] sm:$0xf0]  ;;  %6251 = vmatpush.bf16.msrb.mxu1 %v13835_v54 }
 0x35d   :  { %6371 = vmatpush.bf16.msrb.mxu2 %v14287_v9  ;;  %v18390_v9 = vld [vmem:[%s28962_s7 + $0xbd4] sm:$0xf]  ;;  %v14159_v37 = vor.u32 %v18286_v17, %v14156_v63  ;;  %v13298_v17 = vld [vmem:[%s28962_s7 + $0x1d8] sm:$0xf] }
 0x35e   :  { %v18182_v33 = vld [vmem:[%s28962_s7 + $0x554] sm:$0xf]  ;;  %6294 = vmatmul.bf16.vlgmr.msra.gmra.mxu0 %v22112_v50  ;;  %v18075_v63 = vld [vmem:[%s28962_s7 + $0x1f4] sm:$0xf0] }
 0x35f   :  { %6342 = vmatpush.bf16.msrb.mxu0 %v13807_v26  ;;  %6335 = vmatpush.bf16.msra.mxu3 %v13327_v12  ;;  %v13740_v3 = vld [vmem:[%s28962_s7 + $0x570] sm:$0xf0] }
 0x360   :  { %6300 = vmatpush.bf16.msra.mxu1 %v15083_v5  ;;  %v18374_v42 = vld [vmem:[%s28962_s7 + $0xb54] sm:$0xf]  ;;  %v13743_v19 = vor.u32 %v18182_v33, %v13740_v3  ;;  %v23620_v3 = vpop.f32.mrf.mxu0 }
 0x361   :  { %6372 = vmatpush.bf16.msrb.mxu2 %v14255_v41  ;;  %v14575_v41 = vor.u32 %v18390_v9, %v14572_v30  ;;  %6252 = vmatmul.bf16.vlgmr.msrb.gmra.mxu1 %v21630_v6  ;;  %v14508_v13 = vld [vmem:[%s28962_s7 + $0xb70] sm:$0xf0]  ;;  %v23579_v30 = vpop.f32.mrf.mxu1 }
 0x362   :  { %v18278_v9 = vld [vmem:[%s28962_s7 + $0x854] sm:$0xf]  ;;  %6336 = vmatmul.bf16.vlgmr.msra.gmra.mxu3 %v21507_v29  ;;  %v14511_v12 = vor.u32 %v18374_v42, %v14508_v13  ;;  %v23628_v42 = vpop.f32.mrf.mxu3  ;;  %v13299_v13 = vor.u32 %v18075_v63, %v13298_v17 }
 0x363   :  { %6384 = vmatpush.bf16.msrb.mxu3 %v14575_v41  ;;  %v14124_v23 = vld [vmem:[%s28962_s7 + $0x870] sm:$0xf0]  ;;  %6343 = vmatpush.bf16.msrb.mxu0 %v13775_v58  ;;  %v14987_v58 = vor.u32 %v18498_v39, %v14986_v52 }
 0x364   :  { %6301 = vmatpush.bf16.msra.mxu1 %v15051_v61  ;;  %v18174_v54 = vld [vmem:[%s28962_s7 + $0x514] sm:$0xf]  ;;  %v14127_v5 = vor.u32 %v18278_v9, %v14124_v23 }
 0x365   :  { %6373 = vmatpush.bf16.msrb.mxu2 %v14223_v16  ;;  %v18506_v16 = vld [vmem:[%s28962_s7 + $0xf6c] sm:$0xf0]  ;;  %v13708_v26 = vld [vmem:[%s28962_s7 + $0x530] sm:$0xf0] }
 0x366   :  { %v15019_v21 = vor.u32 %v18506_v16, %v15018_v18  ;;  %v18366_v41 = vld [vmem:[%s28962_s7 + $0xb14] sm:$0xf]  ;;  %v13711_v57 = vor.u32 %v18174_v54, %v13708_v26  ;;  %v14954_v18 = vld [vmem:[%s28962_s7 + $0xed0] sm:$0xf]  ;;  %v13266_v54 = vld [vmem:[%s28962_s7 + $0x198] sm:$0xf] }
 0x367   :  { %6385 = vmatpush.bf16.msrb.mxu3 %v14543_v46  ;;  %v14476_v31 = vld [vmem:[%s28962_s7 + $0xb30] sm:$0xf0]  ;;  %6344 = vmatpush.bf16.msrb.mxu0 %v13743_v19  ;;  %v18490_v16 = vld [vmem:[%s28962_s7 + $0xeec] sm:$0xf0]  ;;  %v18067_v26 = vld [vmem:[%s28962_s7 + $0x1b4] sm:$0xf0] }
 0x368   :  { %v18270_v49 = vld [vmem:[%s28962_s7 + $0x814] sm:$0xf]  ;;  %6302 = vmatpush.bf16.msra.mxu1 %v15019_v21  ;;  %v14479_v46 = vor.u32 %v18366_v41, %v14476_v31  ;;  %v28970_v41 = vperm.slane %v23205_v51, 3  ;;  %v13267_v17 = vor.u32 %v18067_v26, %v13266_v54 }
 0x369   :  { %6374 = vmatpush.bf16.msrb.mxu2 %v14191_v48  ;;  %v23597_v48 = vpop.f32.mrf.mxu2  ;;  %v14092_v4 = vld [vmem:[%s28962_s7 + $0x830] sm:$0xf0]  ;;  %v6029_v19 = vpop.f32.mrf.mxu1 }
 0x36a   :  { %v18166_v61 = vld [vmem:[%s28962_s7 + $0x4d4] sm:$0xf]  ;;  %v6113_v54 = vpop.f32.mrf.mxu3 }
 0x36b   :  { %v13676_v33 = vld [vmem:[%s28962_s7 + $0x4f0] sm:$0xf0]  ;;  %6386 = vmatpush.bf16.msrb.mxu3 %v14511_v12  ;;  %6345 = vmatpush.bf16.msrb.mxu0 %v13711_v57  ;;  %v6030_v12 = vadd.f32 %v6029_v19, %v23426_v43  ;;  %v18482_v43 = vld [vmem:[%s28962_s7 + $0xeac] sm:$0xf0] }
 0x36c   :  { %v18358_v9 = vld [vmem:[%s28962_s7 + $0xad4] sm:$0xf]  ;;  %v13679_v21 = vor.u32 %v18166_v61, %v13676_v33  ;;  %6303 = vmatpush.bf16.msra.mxu1 %v14987_v58  ;;  %v13234_v33 = vld [vmem:[%s28962_s7 + $0x158] sm:$0xf]  ;;  %v18474_v19 = vld [vmem:[%s28962_s7 + $0xe6c] sm:$0xf0] }
 0x36d   :  { %6375 = vmatpush.bf16.msrb.mxu2 %v14159_v37  ;;  %v14095_v37 = vor.u32 %v18270_v49, %v14092_v4  ;;  %v14444_v23 = vld [vmem:[%s28962_s7 + $0xaf0] sm:$0xf0]  ;;  %v14922_v49 = vld [vmem:[%s28962_s7 + $0xe90] sm:$0xf]  ;;  %v6044_v57 = vadd.f32 %v23525_v32, %v6030_v12  ;;  %v18059_v32 = vld [vmem:[%s28962_s7 + $0x174] sm:$0xf0] }
 0x36e   :  { %v18158_v52 = vld [vmem:[%s28962_s7 + $0x494] sm:$0xf]  ;;  %v14447_v31 = vor.u32 %v18358_v9, %v14444_v23  ;;  %v6071_v9 = vpop.f32.mrf.mxu0  ;;  %v13235_v26 = vor.u32 %v18059_v32, %v13234_v33 }
 0x36f   :  { %v13644_v39 = vld [vmem:[%s28962_s7 + $0x4b0] sm:$0xf0]  ;;  %6387 = vmatpush.bf16.msrb.mxu3 %v14479_v46  ;;  %6346 = vmatpush.bf16.msrb.mxu0 %v13679_v21  ;;  %v6058_v46 = vadd.f32 %v23551_v59, %v6044_v57  ;;  %v14890_v59 = vld [vmem:[%s28962_s7 + $0xe50] sm:$0xf] }
 0x370   :  { %v18350_v63 = vld [vmem:[%s28962_s7 + $0xa94] sm:$0xf]  ;;  %v13647_v61 = vor.u32 %v18158_v52, %v13644_v39  ;;  %v13202_v52 = vld [vmem:[%s28962_s7 + $0x118] sm:$0xf]  ;;  %v14891_v57 = vor.u32 %v18474_v19, %v14890_v59 }
 0x371   :  { %6376 = vmatpush.bf16.msrb.mxu2 %v14127_v5  ;;  %v14955_v5 = vor.u32 %v18490_v16, %v14954_v18  ;;  %v6099_v4 = vpop.f32.mrf.mxu2  ;;  %v14412_v58 = vld [vmem:[%s28962_s7 + $0xab0] sm:$0xf0]  ;;  %v23685_v21 = vadd.f32 %v6071_v9, %v6058_v46  ;;  %v13170_v59 = vld [vmem:[%s28962_s7 + $0xd8] sm:$0xf] }
 0x372   :  { %v18150_v18 = vld [vmem:[%s28962_s7 + $0x454] sm:$0xf]  ;;  %v14415_v23 = vor.u32 %v18350_v63, %v14412_v58  ;;  %v18043_v19 = vld [vmem:[%s28962_s7 + $0xf4] sm:$0xf0] }
 0x373   :  { %6304 = vmatpush.bf16.msra.mxu1 %v14955_v5  ;;  %v13612_v16 = vld [vmem:[%s28962_s7 + $0x470] sm:$0xf0]  ;;  %6388 = vmatpush.bf16.msrb.mxu3 %v14447_v31 }
 0x374   :  { %v18342_v12 = vld [vmem:[%s28962_s7 + $0xa54] sm:$0xf]  ;;  %6347 = vmatpush.bf16.msrb.mxu0 %v13647_v61  ;;  %v13615_v31 = vor.u32 %v18150_v18, %v13612_v16 }
 0x375   :  { %6377 = vmatpush.bf16.msrb.mxu2 %v14095_v37  ;;  %v14923_v37 = vor.u32 %v18482_v43, %v14922_v49  ;;  %v14380_v5 = vld [vmem:[%s28962_s7 + $0xa70] sm:$0xf0]  ;;  %v18051_v49 = vld [vmem:[%s28962_s7 + $0x134] sm:$0xf0]  ;;  %v14858_v43 = vld [vmem:[%s28962_s7 + $0xe10] sm:$0xf] }
 0x376   :  { %v13580_v63 = vld [vmem:[%s28962_s7 + $0x430] sm:$0xf0]  ;;  %v14383_v61 = vor.u32 %v18342_v12, %v14380_v5 }
 0x377   :  { %6305 = vmatpush.bf16.msra.mxu1 %v14923_v37  ;;  %v18334_v58 = vld [vmem:[%s28962_s7 + $0xa14] sm:$0xf]  ;;  %6389 = vmatpush.bf16.msrb.mxu3 %v14415_v23  ;;  %v13203_v37 = vor.u32 %v18051_v49, %v13202_v52  ;;  %v18139_v23 = vld [vmem:[%s28962_s7 + $0x3f4] sm:$0xf0] }
 0x378   :  { %6378 = vmatmul.bf16.vlgmr.msrb.gmra.mxu2 %v21778_v62  ;;  %v14348_v33 = vld [vmem:[%s28962_s7 + $0xa30] sm:$0xf0]  ;;  %6348 = vmatpush.bf16.msrb.mxu0 %v13615_v31 }
 0x379   :  { %6426 = vmatpush.bf16.msra.mxu2 %v13299_v13  ;;  %v6100_v13 = vadd.f32 %v6099_v4, %v28970_v41  ;;  %v18466_v4 = vld [vmem:[%s28962_s7 + $0xe2c] sm:$0xf0]  ;;  %v18454_v32 = vld [vmem:[%s28962_s7 + $0xdd4] sm:$0xf]  ;;  %v14351_v12 = vor.u32 %v18334_v58, %v14348_v33  ;;  %v13138_v58 = vld [vmem:[%s28962_s7 + $0x98] sm:$0xf] }
 0x37a   :  { %v14828_v46 = vld [vmem:[%s28962_s7 + $0xdf0] sm:$0xf0] }
 0x37b   :  { %v23696_v39 = vadd.f32 %v6113_v54, %v6100_v13  ;;  %v18262_v18 = vld [vmem:[%s28962_s7 + $0x7d4] sm:$0xf]  ;;  %v13554_v13 = vld [vmem:[%s28962_s7 + $0x3d8] sm:$0xf]  ;;  %6306 = vmatpush.bf16.msra.mxu1 %v14891_v57  ;;  %v14859_v54 = vor.u32 %v18466_v4, %v14858_v43  ;;  %6390 = vmatpush.bf16.msrb.mxu3 %v14383_v61 }
 0x37c   :  { %v14060_v16 = vld [vmem:[%s28962_s7 + $0x7f0] sm:$0xf0]  ;;  %v13555_v49 = vor.u32 %v18139_v23, %v13554_v13  ;;  %v13522_v4 = vld [vmem:[%s28962_s7 + $0x398] sm:$0xf] }
 0x37d   :  { %6427 = vmatpush.bf16.msra.mxu2 %v13267_v17  ;;  %v18142_v17 = vld [vmem:[%s28962_s7 + $0x414] sm:$0xf]  ;;  %v14063_v5 = vor.u32 %v18262_v18, %v14060_v16  ;;  %v18035_v61 = vld [vmem:[%s28962_s7 + $0xb4] sm:$0xf0] }
 0x37e   :  { %v13583_v9 = vor.u32 %v18142_v17, %v13580_v63  ;;  %v18446_v52 = vld [vmem:[%s28962_s7 + $0xd94] sm:$0xf]  ;;  %v13171_v17 = vor.u32 %v18043_v19, %v13170_v59  ;;  %v18131_v63 = vld [vmem:[%s28962_s7 + $0x3b4] sm:$0xf0]  ;;  %v13139_v16 = vor.u32 %v18035_v61, %v13138_v58 }
 0x37f   :  { %v14796_v31 = vld [vmem:[%s28962_s7 + $0xdb0] sm:$0xf0]  ;;  %6307 = vmatpush.bf16.msra.mxu1 %v14859_v54  ;;  %6391 = vmatpush.bf16.msrb.mxu3 %v14351_v12  ;;  %v13523_v18 = vor.u32 %v18131_v63, %v13522_v4  ;;  %v13490_v23 = vld [vmem:[%s28962_s7 + $0x358] sm:$0xf]  ;;  %v23795_v12 = vpop.f32.mrf.mxu0 }
 0x380   :  { %v18254_v57 = vld [vmem:[%s28962_s7 + $0x794] sm:$0xf]  ;;  %6349 = vmatpush.bf16.msrb.mxu0 %v13583_v9  ;;  %v14799_v33 = vor.u32 %v18446_v52, %v14796_v31  ;;  %v18123_v59 = vld [vmem:[%s28962_s7 + $0x374] sm:$0xf0] }
 0x381   :  { %6428 = vmatpush.bf16.msra.mxu2 %v13235_v26  ;;  %v14831_v26 = vor.u32 %v18454_v32, %v14828_v46  ;;  %v14028_v43 = vld [vmem:[%s28962_s7 + $0x7b0] sm:$0xf0]  ;;  %v13106_v19 = vld [vmem:[%s28962_s7 + $0x58] sm:$0xf] }
 0x382   :  { %v14031_v32 = vor.u32 %v18254_v57, %v14028_v43  ;;  %v18438_v46 = vld [vmem:[%s28962_s7 + $0xd54] sm:$0xf]  ;;  %6308 = vmatmul.bf16.vlgmr.msra.gmra.mxu1 %v22266_v8  ;;  %v18027_v54 = vld [vmem:[%s28962_s7 + $0x74] sm:$0xf0]  ;;  %6392 = vmatmul.bf16.vlgmr.msrb.gmra.mxu3 %v21948_v10 }
 0x383   :  { %6356 = vmatpush.bf16.msrb.mxu1 %v14063_v5  ;;  %6440 = vmatpush.bf16.msra.mxu3 %v13555_v49  ;;  %v18246_v13 = vld [vmem:[%s28962_s7 + $0x754] sm:$0xf]  ;;  %v13107_v57 = vor.u32 %v18027_v54, %v13106_v19  ;;  %v13458_v63 = vld [vmem:[%s28962_s7 + $0x318] sm:$0xf] }
 0x384   :  { %6398 = vmatpush.bf16.msra.mxu0 %v14831_v26  ;;  %v13996_v9 = vld [vmem:[%s28962_s7 + $0x770] sm:$0xf0]  ;;  %v23793_v26 = vpop.f32.mrf.mxu1  ;;  %v18115_v58 = vld [vmem:[%s28962_s7 + $0x334] sm:$0xf0] }
 0x385   :  { %6429 = vmatpush.bf16.msra.mxu2 %v13203_v37  ;;  %v14764_v37 = vld [vmem:[%s28962_s7 + $0xd70] sm:$0xf0]  ;;  %6350 = vmatmul.bf16.vlgmr.msrb.gmra.mxu0 %v21651_v2  ;;  %v13999_v52 = vor.u32 %v18246_v13, %v13996_v9  ;;  %v13074_v61 = vld [vmem:[%s28962_s7 + $0x18] sm:$0xf]  ;;  %v13459_v9 = vor.u32 %v18115_v58, %v13458_v63 }
 0x386   :  { %v14767_v5 = vor.u32 %v18438_v46, %v14764_v37  ;;  %v18430_v31 = vld [vmem:[%s28962_s7 + $0xd14] sm:$0xf]  ;;  %v14322_v46 = vld [vmem:[%s28962_s7 + $0x9d8] sm:$0xf] }
 0x387   :  { %6357 = vmatpush.bf16.msrb.mxu1 %v14031_v32  ;;  %v14732_v49 = vld [vmem:[%s28962_s7 + $0xd30] sm:$0xf0]  ;;  %6441 = vmatpush.bf16.msra.mxu3 %v13523_v18  ;;  %v18331_v37 = vld [vmem:[%s28962_s7 + $0x9f4] sm:$0xf0] }
 0x388   :  { %6399 = vmatpush.bf16.msra.mxu0 %v14799_v33  ;;  %v18238_v43 = vld [vmem:[%s28962_s7 + $0x714] sm:$0xf]  ;;  %v18019_v33 = vld [vmem:[%s28962_s7 + $0x34] sm:$0xf0]  ;;  %v14735_v32 = vor.u32 %v18430_v31, %v14732_v49  ;;  %v14323_v54 = vor.u32 %v18331_v37, %v14322_v46  ;;  %v6127_v49 = vpop.f32.mrf.mxu0 }
 0x389   :  { %6430 = vmatpush.bf16.msra.mxu2 %v13171_v17  ;;  %v13491_v17 = vor.u32 %v18123_v59, %v13490_v23  ;;  %v13964_v4 = vld [vmem:[%s28962_s7 + $0x730] sm:$0xf0]  ;;  %v13075_v23 = vor.u32 %v18019_v33, %v13074_v61  ;;  %v23856_v63 = vadd.f32 %v6127_v49, %v23696_v39  ;;  %v13394_v37 = vld [vmem:[%s28962_s7 + $0x298] sm:$0xf] }
 0x38a   :  { %v13967_v18 = vor.u32 %v18238_v43, %v13964_v4  ;;  %v14700_v13 = vld [vmem:[%s28962_s7 + $0xcf0] sm:$0xf0]  ;;  %v18323_v43 = vld [vmem:[%s28962_s7 + $0x9b4] sm:$0xf0] }
 0x38b   :  { %6358 = vmatpush.bf16.msrb.mxu1 %v13999_v52  ;;  %6442 = vmatpush.bf16.msra.mxu3 %v13491_v17  ;;  %v18230_v59 = vld [vmem:[%s28962_s7 + $0x6d4] sm:$0xf]  ;;  %v18107_v52 = vld [vmem:[%s28962_s7 + $0x2f4] sm:$0xf0] }
 0x38c   :  { %6400 = vmatpush.bf16.msra.mxu0 %v14767_v5  ;;  %v13932_v19 = vld [vmem:[%s28962_s7 + $0x6f0] sm:$0xf0]  ;;  %v13426_v5 = vld [vmem:[%s28962_s7 + $0x2d8] sm:$0xf]  ;;  %v6085_v31 = vpop.f32.mrf.mxu1 }
 0x38d   :  { %6431 = vmatpush.bf16.msra.mxu2 %v13139_v16  ;;  %v18422_v16 = vld [vmem:[%s28962_s7 + $0xcd4] sm:$0xf]  ;;  %v23853_v4 = vadd.f32 %v6085_v31, %v23685_v21  ;;  %v13935_v58 = vor.u32 %v18230_v59, %v13932_v19  ;;  %v13362_v49 = vld [vmem:[%s28962_s7 + $0x258] sm:$0xf] }
 0x38e   :  { %v14703_v17 = vor.u32 %v18422_v16, %v14700_v13  ;;  %v18414_v61 = vld [vmem:[%s28962_s7 + $0xc94] sm:$0xf]  ;;  %v14258_v13 = vld [vmem:[%s28962_s7 + $0x958] sm:$0xf] }
 0x38f   :  { %6359 = vmatpush.bf16.msrb.mxu1 %v13967_v18  ;;  %v14668_v33 = vld [vmem:[%s28962_s7 + $0xcb0] sm:$0xf0]  ;;  %6443 = vmatpush.bf16.msra.mxu3 %v13459_v9  ;;  %v18099_v18 = vld [vmem:[%s28962_s7 + $0x2b4] sm:$0xf0] }
 0x390   :  { %6401 = vmatpush.bf16.msra.mxu0 %v14735_v32  ;;  %v13427_v32 = vor.u32 %v18107_v52, %v13426_v5  ;;  %v18222_v21 = vld [vmem:[%s28962_s7 + $0x694] sm:$0xf]  ;;  %v14671_v16 = vor.u32 %v18414_v61, %v14668_v33  ;;  %v18315_v9 = vld [vmem:[%s28962_s7 + $0x974] sm:$0xf0] }
 0x391   :  { %6432 = vmatpush.bf16.msra.mxu2 %v13107_v57  ;;  %v14290_v57 = vld [vmem:[%s28962_s7 + $0x998] sm:$0xf]  ;;  %v13900_v39 = vld [vmem:[%s28962_s7 + $0x6b0] sm:$0xf0]  ;;  %v14259_v31 = vor.u32 %v18315_v9, %v14258_v13 }
 0x392   :  { %v14291_v46 = vor.u32 %v18323_v43, %v14290_v57  ;;  %v18406_v59 = vld [vmem:[%s28962_s7 + $0xc54] sm:$0xf]  ;;  %v14226_v57 = vld [vmem:[%s28962_s7 + $0x918] sm:$0xf] }
 0x393   :  { %6360 = vmatpush.bf16.msrb.mxu1 %v13935_v58  ;;  %v14636_v19 = vld [vmem:[%s28962_s7 + $0xc70] sm:$0xf0]  ;;  %6444 = vmatpush.bf16.msra.mxu3 %v13427_v32  ;;  %v18307_v58 = vld [vmem:[%s28962_s7 + $0x934] sm:$0xf0] }
 0x394   :  { %6402 = vmatpush.bf16.msra.mxu0 %v14703_v17  ;;  %v18214_v5 = vld [vmem:[%s28962_s7 + $0x654] sm:$0xf]  ;;  %v18091_v17 = vld [vmem:[%s28962_s7 + $0x274] sm:$0xf0]  ;;  %v14639_v43 = vor.u32 %v18406_v59, %v14636_v19  ;;  %v14227_v9 = vor.u32 %v18307_v58, %v14226_v57 }
 0x395   :  { %6433 = vmatpush.bf16.msra.mxu2 %v13075_v23  ;;  %v13903_v23 = vor.u32 %v18222_v21, %v13900_v39  ;;  %v13868_v52 = vld [vmem:[%s28962_s7 + $0x670] sm:$0xf0]  ;;  %v18203_v13 = vld [vmem:[%s28962_s7 + $0x5f4] sm:$0xf0] }
 0x396   :  { %v18206_v61 = vld [vmem:[%s28962_s7 + $0x614] sm:$0xf]  ;;  %v13871_v32 = vor.u32 %v18214_v5, %v13868_v52  ;;  %v14578_v19 = vld [vmem:[%s28962_s7 + $0xbd8] sm:$0xf] }
 0x397   :  { %v13836_v33 = vld [vmem:[%s28962_s7 + $0x630] sm:$0xf0]  ;;  %6361 = vmatpush.bf16.msrb.mxu1 %v13903_v23  ;;  %v18395_v5 = vld [vmem:[%s28962_s7 + $0xbf4] sm:$0xf0] }
 0x398   :  { %6434 = vmatmul.bf16.vlgmr.msra.gmra.mxu2 %v21551_v60  ;;  %6403 = vmatpush.bf16.msra.mxu0 %v14671_v16  ;;  %v18398_v21 = vld [vmem:[%s28962_s7 + $0xc14] sm:$0xf]  ;;  %v13810_v16 = vld [vmem:[%s28962_s7 + $0x5d8] sm:$0xf] }
 0x399   :  { %6482 = vmatpush.bf16.msrb.mxu2 %v14323_v54  ;;  %v13395_v54 = vor.u32 %v18099_v18, %v13394_v37  ;;  %v14604_v39 = vld [vmem:[%s28962_s7 + $0xc30] sm:$0xf0]  ;;  %v13363_v37 = vor.u32 %v18091_v17, %v13362_v49  ;;  %v18083_v18 = vld [vmem:[%s28962_s7 + $0x234] sm:$0xf0]  ;;  %v13839_v49 = vor.u32 %v18206_v61, %v13836_v33  ;;  %v13811_v17 = vor.u32 %v18203_v13, %v13810_v16 }
 0x39a   :  { %v18518_v23 = vld [vmem:[%s28962_s7 + $0xfd4] sm:$0xf]  ;;  %v14194_v52 = vld [vmem:[%s28962_s7 + $0x8d8] sm:$0xf] }
 0x39b   :  { %6445 = vmatpush.bf16.msra.mxu3 %v13395_v54  ;;  %v15084_v59 = vld [vmem:[%s28962_s7 + $0xff0] sm:$0xf0]  ;;  %v14607_v54 = vor.u32 %v18398_v21, %v14604_v39  ;;  %6362 = vmatpush.bf16.msrb.mxu1 %v13871_v32  ;;  %v18195_v21 = vld [vmem:[%s28962_s7 + $0x5b4] sm:$0xf0]  ;;  %v14579_v39 = vor.u32 %v18395_v5, %v14578_v19 }
 0x39c   :  { %6404 = vmatpush.bf16.msra.mxu0 %v14639_v43  ;;  %v15087_v58 = vor.u32 %v18518_v23, %v15084_v59  ;;  %v13778_v43 = vld [vmem:[%s28962_s7 + $0x598] sm:$0xf]  ;;  %v18510_v32 = vld [vmem:[%s28962_s7 + $0xf94] sm:$0xf] }
 0x39d   :  { %6483 = vmatpush.bf16.msrb.mxu2 %v14291_v46  ;;  %v13330_v46 = vld [vmem:[%s28962_s7 + $0x218] sm:$0xf]  ;;  %v15052_v61 = vld [vmem:[%s28962_s7 + $0xfb0] sm:$0xf0]  ;;  %v13779_v16 = vor.u32 %v18195_v21, %v13778_v43 }
 0x39e   :  { %v13331_v57 = vor.u32 %v18083_v18, %v13330_v46  ;;  %v14546_v33 = vld [vmem:[%s28962_s7 + $0xb98] sm:$0xf]  ;;  %v15055_v13 = vor.u32 %v18510_v32, %v15052_v61  ;;  %v15020_v5 = vld [vmem:[%s28962_s7 + $0xf70] sm:$0xf0] }
 0x39f   :  { %6446 = vmatpush.bf16.msra.mxu3 %v13363_v37  ;;  %v18387_v46 = vld [vmem:[%s28962_s7 + $0xbb4] sm:$0xf0]  ;;  %6363 = vmatpush.bf16.msrb.mxu1 %v13839_v49 }
 0x3a0   :  { %6405 = vmatpush.bf16.msra.mxu0 %v14607_v54  ;;  %v14162_v37 = vld [vmem:[%s28962_s7 + $0x898] sm:$0xf]  ;;  %v14547_v59 = vor.u32 %v18387_v46, %v14546_v33  ;;  %v18502_v54 = vld [vmem:[%s28962_s7 + $0xf54] sm:$0xf] }
 0x3a1   :  { %6484 = vmatpush.bf16.msrb.mxu2 %v14259_v31  ;;  %v18299_v31 = vld [vmem:[%s28962_s7 + $0x8f4] sm:$0xf0]  ;;  %v18494_v33 = vld [vmem:[%s28962_s7 + $0xf14] sm:$0xf] }
 0x3a2   :  { %v14195_v41 = vor.u32 %v18299_v31, %v14194_v52  ;;  %v18291_v18 = vld [vmem:[%s28962_s7 + $0x8b4] sm:$0xf0]  ;;  %6364 = vmatmul.bf16.vlgmr.msrb.gmra.mxu1 %v21630_v6  ;;  %v14988_v46 = vld [vmem:[%s28962_s7 + $0xf30] sm:$0xf0] }
 0x3a3   :  { %6447 = vmatpush.bf16.msra.mxu3 %v13331_v57  ;;  %6412 = vmatpush.bf16.msra.mxu1 %v15087_v58  ;;  %v18187_v23 = vld [vmem:[%s28962_s7 + $0x574] sm:$0xf0]  ;;  %v14163_v19 = vor.u32 %v18291_v18, %v14162_v37  ;;  %v15023_v58 = vor.u32 %v18502_v54, %v15020_v5  ;;  %v14991_v54 = vor.u32 %v18494_v33, %v14988_v46  ;;  %v18063_v46 = vld [vmem:[%s28962_s7 + $0x19c] sm:$0xf] }
 0x3a4   :  { %6454 = vmatpush.bf16.msrb.mxu0 %v13811_v17  ;;  %v14514_v52 = vld [vmem:[%s28962_s7 + $0xb58] sm:$0xf]  ;;  %v23999_v17 = vpop.f32.mrf.mxu1 }
 0x3a5   :  { %6485 = vmatpush.bf16.msrb.mxu2 %v14227_v9  ;;  %v13746_v9 = vld [vmem:[%s28962_s7 + $0x558] sm:$0xf]  ;;  %6406 = vmatmul.bf16.vlgmr.msra.gmra.mxu0 %v22112_v50 }
 0x3a6   :  { %v14130_v31 = vld [vmem:[%s28962_s7 + $0x858] sm:$0xf]  ;;  %6448 = vmatmul.bf16.vlgmr.msra.gmra.mxu3 %v21507_v29  ;;  %v13747_v57 = vor.u32 %v18187_v23, %v13746_v9  ;;  %v24028_v9 = vpop.f32.mrf.mxu3 }
 0x3a7   :  { %6496 = vmatpush.bf16.msrb.mxu3 %v14579_v39  ;;  %v18283_v49 = vld [vmem:[%s28962_s7 + $0x874] sm:$0xf0]  ;;  %6413 = vmatpush.bf16.msra.mxu1 %v15055_v13  ;;  %v24008_v39 = vpop.f32.mrf.mxu2 }
 0x3a8   :  { %6455 = vmatpush.bf16.msrb.mxu0 %v13779_v16  ;;  %v13714_v43 = vld [vmem:[%s28962_s7 + $0x518] sm:$0xf]  ;;  %v14131_v61 = vor.u32 %v18283_v49, %v14130_v31 }
 0x3a9   :  { %6486 = vmatpush.bf16.msrb.mxu2 %v14195_v41  ;;  %v18379_v41 = vld [vmem:[%s28962_s7 + $0xb74] sm:$0xf0] }
 0x3aa   :  { %v18179_v21 = vld [vmem:[%s28962_s7 + $0x534] sm:$0xf0]  ;;  %v14515_v32 = vor.u32 %v18379_v41, %v14514_v52  ;;  %v24042_v41 = vpop.f32.mrf.mxu0 }
 0x3ab   :  { %6497 = vmatpush.bf16.msrb.mxu3 %v14547_v59  ;;  %v14482_v37 = vld [vmem:[%s28962_s7 + $0xb18] sm:$0xf]  ;;  %v13715_v23 = vor.u32 %v18179_v21, %v13714_v43  ;;  %v18071_v59 = vld [vmem:[%s28962_s7 + $0x1dc] sm:$0xf]  ;;  %6414 = vmatpush.bf16.msra.mxu1 %v15023_v58  ;;  %28974 = vst [vmem:[#allocation3_spill] sm:$0xff] %v24042_v41 }
 0x3ac   :  { %v18371_v18 = vld [vmem:[%s28962_s7 + $0xb34] sm:$0xf0]  ;;  %6456 = vmatpush.bf16.msrb.mxu0 %v13747_v57  ;;  %v18486_v57 = vld [vmem:[%s28962_s7 + $0xed4] sm:$0xf] }
 0x3ad   :  { %6487 = vmatpush.bf16.msrb.mxu2 %v14163_v19  ;;  %v14098_v16 = vld [vmem:[%s28962_s7 + $0x818] sm:$0xf]  ;;  %v13300_v19 = vld [vmem:[%s28962_s7 + $0x1f8] sm:$0xf0]  ;;  %v14483_v31 = vor.u32 %v18371_v18, %v14482_v37  ;;  %v14956_v58 = vld [vmem:[%s28962_s7 + $0xef0] sm:$0xf0] }
 0x3ae   :  { %v18275_v13 = vld [vmem:[%s28962_s7 + $0x834] sm:$0xf0]  ;;  %v13303_v43 = vor.u32 %v18071_v59, %v13300_v19  ;;  %v13268_v37 = vld [vmem:[%s28962_s7 + $0x1b8] sm:$0xf0] }
 0x3af   :  { %v13682_v5 = vld [vmem:[%s28962_s7 + $0x4d8] sm:$0xf]  ;;  %6498 = vmatpush.bf16.msrb.mxu3 %v14515_v32  ;;  %v14099_v49 = vor.u32 %v18275_v13, %v14098_v16  ;;  %6415 = vmatpush.bf16.msra.mxu1 %v14991_v54  ;;  %v14959_v16 = vor.u32 %v18486_v57, %v14956_v58  ;;  %v6155_v59 = vpop.f32.mrf.mxu2 }
 0x3b0   :  { %v18171_v52 = vld [vmem:[%s28962_s7 + $0x4f4] sm:$0xf0]  ;;  %6457 = vmatpush.bf16.msrb.mxu0 %v13715_v23 }
 0x3b1   :  { %6488 = vmatpush.bf16.msrb.mxu2 %v14131_v61  ;;  %v14450_v21 = vld [vmem:[%s28962_s7 + $0xad8] sm:$0xf]  ;;  %v6141_v61 = vpop.f32.mrf.mxu1  ;;  %v13683_v33 = vor.u32 %v18171_v52, %v13682_v5  ;;  %v18478_v5 = vld [vmem:[%s28962_s7 + $0xe94] sm:$0xf]  ;;  %v13271_v52 = vor.u32 %v18063_v46, %v13268_v37 }
 0x3b2   :  { %v18363_v32 = vld [vmem:[%s28962_s7 + $0xaf4] sm:$0xf0]  ;;  %v6142_v18 = vadd.f32 %v6141_v61, %v23856_v63  ;;  %v14924_v63 = vld [vmem:[%s28962_s7 + $0xeb0] sm:$0xf0]  ;;  %v6183_v37 = vpop.f32.mrf.mxu0 }
 0x3b3   :  { %v13650_v13 = vld [vmem:[%s28962_s7 + $0x498] sm:$0xf]  ;;  %6499 = vmatpush.bf16.msrb.mxu3 %v14483_v31  ;;  %v14451_v19 = vor.u32 %v18363_v32, %v14450_v21  ;;  %v18055_v21 = vld [vmem:[%s28962_s7 + $0x15c] sm:$0xf]  ;;  %6416 = vmatpush.bf16.msra.mxu1 %v14959_v16  ;;  %v14927_v61 = vor.u32 %v18478_v5, %v14924_v63  ;;  %v14892_v16 = vld [vmem:[%s28962_s7 + $0xe70] sm:$0xf0] }
 0x3b4   :  { %v18163_v23 = vld [vmem:[%s28962_s7 + $0x4b4] sm:$0xf0]  ;;  %v6156_v54 = vadd.f32 %v6155_v59, %v6142_v18  ;;  %6458 = vmatpush.bf16.msrb.mxu0 %v13683_v33  ;;  %v18047_v63 = vld [vmem:[%s28962_s7 + $0x11c] sm:$0xf] }
 0x3b5   :  { %6489 = vmatpush.bf16.msrb.mxu2 %v14099_v49  ;;  %v14418_v57 = vld [vmem:[%s28962_s7 + $0xa98] sm:$0xf]  ;;  %v6169_v49 = vpop.f32.mrf.mxu3  ;;  %v13651_v58 = vor.u32 %v18163_v23, %v13650_v13  ;;  %v18470_v13 = vld [vmem:[%s28962_s7 + $0xe54] sm:$0xf] }
 0x3b6   :  { %v18355_v31 = vld [vmem:[%s28962_s7 + $0xab4] sm:$0xf0]  ;;  %v6170_v32 = vadd.f32 %v6169_v49, %v6156_v54  ;;  %v14895_v49 = vor.u32 %v18470_v13, %v14892_v16  ;;  %v18135_v16 = vld [vmem:[%s28962_s7 + $0x3dc] sm:$0xf] }
 0x3b7   :  { %v13618_v46 = vld [vmem:[%s28962_s7 + $0x458] sm:$0xf]  ;;  %6500 = vmatpush.bf16.msrb.mxu3 %v14451_v19  ;;  %v14419_v18 = vor.u32 %v18355_v31, %v14418_v57  ;;  %v13204_v57 = vld [vmem:[%s28962_s7 + $0x138] sm:$0xf0]  ;;  %v14860_v31 = vld [vmem:[%s28962_s7 + $0xe30] sm:$0xf0]  ;;  %6417 = vmatpush.bf16.msra.mxu1 %v14927_v61 }
 0x3b8   :  { %6490 = vmatmul.bf16.vlgmr.msrb.gmra.mxu2 %v21778_v62  ;;  %v18155_v33 = vld [vmem:[%s28962_s7 + $0x474] sm:$0xf0]  ;;  %v24100_v23 = vadd.f32 %v6183_v37, %v6170_v32  ;;  %6459 = vmatpush.bf16.msrb.mxu0 %v13651_v58  ;;  %v13207_v37 = vor.u32 %v18047_v63, %v13204_v57  ;;  %v13172_v63 = vld [vmem:[%s28962_s7 + $0xf8] sm:$0xf0] }
 0x3b9   :  { %6538 = vmatpush.bf16.msra.mxu2 %v13303_v43  ;;  %v13236_v43 = vld [vmem:[%s28962_s7 + $0x178] sm:$0xf0]  ;;  %v14386_v5 = vld [vmem:[%s28962_s7 + $0xa58] sm:$0xf]  ;;  %v13619_v54 = vor.u32 %v18155_v33, %v13618_v46 }
 0x3ba   :  { %v13239_v59 = vor.u32 %v18055_v21, %v13236_v43  ;;  %v18347_v19 = vld [vmem:[%s28962_s7 + $0xa74] sm:$0xf0] }
 0x3bb   :  { %v13586_v21 = vld [vmem:[%s28962_s7 + $0x418] sm:$0xf]  ;;  %6501 = vmatpush.bf16.msrb.mxu3 %v14419_v18  ;;  %v14387_v32 = vor.u32 %v18347_v19, %v14386_v5  ;;  %v13556_v19 = vld [vmem:[%s28962_s7 + $0x3f8] sm:$0xf0]  ;;  %6418 = vmatpush.bf16.msra.mxu1 %v14895_v49 }
 0x3bc   :  { %v18147_v58 = vld [vmem:[%s28962_s7 + $0x434] sm:$0xf0]  ;;  %6460 = vmatpush.bf16.msrb.mxu0 %v13619_v54 }
 0x3bd   :  { %6539 = vmatpush.bf16.msra.mxu2 %v13271_v52  ;;  %v18462_v52 = vld [vmem:[%s28962_s7 + $0xe14] sm:$0xf]  ;;  %v14354_v43 = vld [vmem:[%s28962_s7 + $0xa18] sm:$0xf]  ;;  %v13587_v5 = vor.u32 %v18147_v58, %v13586_v21  ;;  %v13559_v58 = vor.u32 %v18135_v16, %v13556_v19  ;;  %v13108_v19 = vld [vmem:[%s28962_s7 + $0x78] sm:$0xf0] }
 0x3be   :  { %v18339_v46 = vld [vmem:[%s28962_s7 + $0xa34] sm:$0xf0]  ;;  %v14863_v57 = vor.u32 %v18462_v52, %v14860_v31  ;;  %v18127_v31 = vld [vmem:[%s28962_s7 + $0x39c] sm:$0xf] }
 0x3bf   :  { %v14834_v61 = vld [vmem:[%s28962_s7 + $0xdd8] sm:$0xf]  ;;  %6502 = vmatpush.bf16.msrb.mxu3 %v14387_v32  ;;  %v14355_v34 = vor.u32 %v18339_v46, %v14354_v43  ;;  %v13524_v43 = vld [vmem:[%s28962_s7 + $0x3b8] sm:$0xf0] }
 0x3c0   :  { %v18459_v33 = vld [vmem:[%s28962_s7 + $0xdf4] sm:$0xf0]  ;;  %6461 = vmatpush.bf16.msrb.mxu0 %v13587_v5  ;;  %v18031_v32 = vld [vmem:[%s28962_s7 + $0x9c] sm:$0xf]  ;;  %6419 = vmatpush.bf16.msra.mxu1 %v14863_v57 }
 0x3c1   :  { %6540 = vmatpush.bf16.msra.mxu2 %v13239_v59  ;;  %v14066_v13 = vld [vmem:[%s28962_s7 + $0x7d8] sm:$0xf]  ;;  %v18039_v59 = vld [vmem:[%s28962_s7 + $0xdc] sm:$0xf]  ;;  %v14835_v47 = vor.u32 %v18459_v33, %v14834_v61 }
 0x3c2   :  { %v18267_v18 = vld [vmem:[%s28962_s7 + $0x7f4] sm:$0xf0]  ;;  %v13175_v41 = vor.u32 %v18039_v59, %v13172_v63  ;;  %v13140_v46 = vld [vmem:[%s28962_s7 + $0xb8] sm:$0xf0]  ;;  %v24206_v59 = vpop.f32.mrf.mxu1 }
 0x3c3   :  { %v14067_v22 = vor.u32 %v18267_v18, %v14066_v13  ;;  %v14802_v54 = vld [vmem:[%s28962_s7 + $0xd98] sm:$0xf]  ;;  %6503 = vmatpush.bf16.msrb.mxu3 %v14355_v34  ;;  %v13527_v18 = vor.u32 %v18127_v31, %v13524_v43  ;;  %v13143_v16 = vor.u32 %v18031_v32, %v13140_v46  ;;  %v18119_v34 = vld [vmem:[%s28962_s7 + $0x35c] sm:$0xf]  ;;  %6420 = vmatmul.bf16.vlgmr.msra.gmra.mxu1 %v22266_v8 }
 0x3c4   :  { %v18451_v21 = vld [vmem:[%s28962_s7 + $0xdb4] sm:$0xf0]  ;;  %6510 = vmatpush.bf16.msra.mxu0 %v14835_v47  ;;  %v18023_v5 = vld [vmem:[%s28962_s7 + $0x5c] sm:$0xf] }
 0x3c5   :  { %6541 = vmatpush.bf16.msra.mxu2 %v13207_v37  ;;  %v14034_v49 = vld [vmem:[%s28962_s7 + $0x798] sm:$0xf]  ;;  %v14803_v61 = vor.u32 %v18451_v21, %v14802_v54  ;;  %6468 = vmatpush.bf16.msrb.mxu1 %v14067_v22  ;;  %v18111_v43 = vld [vmem:[%s28962_s7 + $0x31c] sm:$0xf] }
 0x3c6   :  { %v18259_v52 = vld [vmem:[%s28962_s7 + $0x7b4] sm:$0xf0]  ;;  %6462 = vmatmul.bf16.vlgmr.msrb.gmra.mxu0 %v21651_v2  ;;  %6504 = vmatmul.bf16.vlgmr.msrb.gmra.mxu3 %v21948_v10  ;;  %v13460_v32 = vld [vmem:[%s28962_s7 + $0x338] sm:$0xf0] }
 0x3c7   :  { %v14035_v33 = vor.u32 %v18259_v52, %v14034_v49  ;;  %v14770_v37 = vld [vmem:[%s28962_s7 + $0xd58] sm:$0xf]  ;;  %6552 = vmatpush.bf16.msra.mxu3 %v13559_v58  ;;  %v13111_v49 = vor.u32 %v18023_v5, %v13108_v19  ;;  %v18015_v46 = vld [vmem:[%s28962_s7 + $0x1c] sm:$0xf] }
 0x3c8   :  { %v18443_v13 = vld [vmem:[%s28962_s7 + $0xd74] sm:$0xf0]  ;;  %6511 = vmatpush.bf16.msra.mxu0 %v14803_v61  ;;  %v13076_v61 = vld [vmem:[%s28962_s7 + $0x38] sm:$0xf0] }
 0x3c9   :  { %6542 = vmatpush.bf16.msra.mxu2 %v13175_v41  ;;  %v14002_v47 = vld [vmem:[%s28962_s7 + $0x758] sm:$0xf]  ;;  %v13492_v41 = vld [vmem:[%s28962_s7 + $0x378] sm:$0xf0]  ;;  %v14771_v63 = vor.u32 %v18443_v13, %v14770_v37  ;;  %6469 = vmatpush.bf16.msrb.mxu1 %v14035_v33 }
 0x3ca   :  { %v18251_v22 = vld [vmem:[%s28962_s7 + $0x774] sm:$0xf0]  ;;  %v13495_v58 = vor.u32 %v18119_v34, %v13492_v41  ;;  %v18327_v37 = vld [vmem:[%s28962_s7 + $0x9dc] sm:$0xf]  ;;  %v13079_v34 = vor.u32 %v18015_v46, %v13076_v61 }
 0x3cb   :  { %v14003_v57 = vor.u32 %v18251_v22, %v14002_v47  ;;  %v14738_v54 = vld [vmem:[%s28962_s7 + $0xd18] sm:$0xf]  ;;  %6553 = vmatpush.bf16.msra.mxu3 %v13527_v18  ;;  %v14324_v13 = vld [vmem:[%s28962_s7 + $0x9f8] sm:$0xf0]  ;;  %v13463_v22 = vor.u32 %v18111_v43, %v13460_v32 }
 0x3cc   :  { %v18435_v21 = vld [vmem:[%s28962_s7 + $0xd34] sm:$0xf0]  ;;  %6512 = vmatpush.bf16.msra.mxu0 %v14771_v63  ;;  %v14327_v19 = vor.u32 %v18327_v37, %v14324_v13  ;;  %v18103_v63 = vld [vmem:[%s28962_s7 + $0x2dc] sm:$0xf] }
 0x3cd   :  { %6543 = vmatpush.bf16.msra.mxu2 %v13143_v16  ;;  %v13970_v52 = vld [vmem:[%s28962_s7 + $0x718] sm:$0xf]  ;;  %v14739_v33 = vor.u32 %v18435_v21, %v14738_v54  ;;  %6470 = vmatpush.bf16.msrb.mxu1 %v14003_v57  ;;  %v13428_v57 = vld [vmem:[%s28962_s7 + $0x2f8] sm:$0xf0]  ;;  %v6197_v54 = vpop.f32.mrf.mxu1 }
 0x3ce   :  { %v18243_v31 = vld [vmem:[%s28962_s7 + $0x734] sm:$0xf0]  ;;  %v13431_v46 = vor.u32 %v18103_v63, %v13428_v57  ;;  %v18095_v37 = vld [vmem:[%s28962_s7 + $0x29c] sm:$0xf] }
 0x3cf   :  { %v13971_v18 = vor.u32 %v18243_v31, %v13970_v52  ;;  %v14706_v16 = vld [vmem:[%s28962_s7 + $0xcd8] sm:$0xf]  ;;  %6554 = vmatpush.bf16.msra.mxu3 %v13495_v58  ;;  %v18319_v58 = vld [vmem:[%s28962_s7 + $0x99c] sm:$0xf]  ;;  %v24264_v52 = vadd.f32 %v6197_v54, %v24100_v23 }
 0x3d0   :  { %v18427_v47 = vld [vmem:[%s28962_s7 + $0xcf4] sm:$0xf0]  ;;  %6513 = vmatpush.bf16.msra.mxu0 %v14739_v33  ;;  %v13396_v13 = vld [vmem:[%s28962_s7 + $0x2b8] sm:$0xf0] }
 0x3d1   :  { %6544 = vmatpush.bf16.msra.mxu2 %v13111_v49  ;;  %v13938_v41 = vld [vmem:[%s28962_s7 + $0x6d8] sm:$0xf]  ;;  %v14707_v21 = vor.u32 %v18427_v47, %v14706_v16  ;;  %v14292_v49 = vld [vmem:[%s28962_s7 + $0x9b8] sm:$0xf0]  ;;  %6471 = vmatpush.bf16.msrb.mxu1 %v13971_v18 }
 0x3d2   :  { %v18235_v5 = vld [vmem:[%s28962_s7 + $0x6f4] sm:$0xf0]  ;;  %v14295_v33 = vor.u32 %v18319_v58, %v14292_v49  ;;  %v18311_v16 = vld [vmem:[%s28962_s7 + $0x95c] sm:$0xf] }
 0x3d3   :  { %v13939_v31 = vor.u32 %v18235_v5, %v13938_v41  ;;  %v14674_v43 = vld [vmem:[%s28962_s7 + $0xc98] sm:$0xf]  ;;  %6555 = vmatpush.bf16.msra.mxu3 %v13463_v22  ;;  %v14260_v47 = vld [vmem:[%s28962_s7 + $0x978] sm:$0xf0]  ;;  %v13399_v5 = vor.u32 %v18095_v37, %v13396_v13 }
 0x3d4   :  { %v18419_v32 = vld [vmem:[%s28962_s7 + $0xcb4] sm:$0xf0]  ;;  %6514 = vmatpush.bf16.msra.mxu0 %v14707_v21  ;;  %v18087_v57 = vld [vmem:[%s28962_s7 + $0x25c] sm:$0xf] }
 0x3d5   :  { %6545 = vmatpush.bf16.msra.mxu2 %v13079_v34  ;;  %v13906_v61 = vld [vmem:[%s28962_s7 + $0x698] sm:$0xf]  ;;  %v14675_v18 = vor.u32 %v18419_v32, %v14674_v43  ;;  %6472 = vmatpush.bf16.msrb.mxu1 %v13939_v31  ;;  %v13364_v54 = vld [vmem:[%s28962_s7 + $0x278] sm:$0xf0] }
 0x3d6   :  { %v18227_v23 = vld [vmem:[%s28962_s7 + $0x6b4] sm:$0xf0]  ;;  %v18303_v21 = vld [vmem:[%s28962_s7 + $0x91c] sm:$0xf] }
 0x3d7   :  { %v13907_v22 = vor.u32 %v18227_v23, %v13906_v61  ;;  %v14642_v34 = vld [vmem:[%s28962_s7 + $0xc58] sm:$0xf]  ;;  %6556 = vmatpush.bf16.msra.mxu3 %v13431_v46  ;;  %v14228_v49 = vld [vmem:[%s28962_s7 + $0x938] sm:$0xf0] }
 0x3d8   :  { %6546 = vmatmul.bf16.vlgmr.msra.gmra.mxu2 %v21551_v60  ;;  %v18411_v41 = vld [vmem:[%s28962_s7 + $0xc74] sm:$0xf0]  ;;  %v14263_v60 = vor.u32 %v18311_v16, %v14260_v47  ;;  %6515 = vmatpush.bf16.msra.mxu0 %v14675_v18  ;;  %v18079_v23 = vld [vmem:[%s28962_s7 + $0x21c] sm:$0xf]  ;;  %v14231_v16 = vor.u32 %v18303_v21, %v14228_v49 }
 0x3d9   :  { %6594 = vmatpush.bf16.msrb.mxu2 %v14327_v19  ;;  %v13874_v19 = vld [vmem:[%s28962_s7 + $0x658] sm:$0xf]  ;;  %v14643_v58 = vor.u32 %v18411_v41, %v14642_v34  ;;  %6473 = vmatpush.bf16.msrb.mxu1 %v13907_v22  ;;  %v13332_v37 = vld [vmem:[%s28962_s7 + $0x238] sm:$0xf0] }
 0x3da   :  { %v18219_v63 = vld [vmem:[%s28962_s7 + $0x674] sm:$0xf0]  ;;  %v18199_v13 = vld [vmem:[%s28962_s7 + $0x5dc] sm:$0xf] }
 0x3db   :  { %v13842_v31 = vld [vmem:[%s28962_s7 + $0x618] sm:$0xf]  ;;  %v13875_v32 = vor.u32 %v18219_v63, %v13874_v19  ;;  %6557 = vmatpush.bf16.msra.mxu3 %v13399_v5  ;;  %v13812_v18 = vld [vmem:[%s28962_s7 + $0x5f8] sm:$0xf0] }
 0x3dc   :  { %v18211_v43 = vld [vmem:[%s28962_s7 + $0x634] sm:$0xf0]  ;;  %v18391_v34 = vld [vmem:[%s28962_s7 + $0xbdc] sm:$0xf]  ;;  %6516 = vmatpush.bf16.msra.mxu0 %v14643_v58 }
 0x3dd   :  { %6595 = vmatpush.bf16.msrb.mxu2 %v14295_v33  ;;  %v14610_v46 = vld [vmem:[%s28962_s7 + $0xc18] sm:$0xf]  ;;  %v13367_v33 = vor.u32 %v18087_v57, %v13364_v54  ;;  %v14580_v5 = vld [vmem:[%s28962_s7 + $0xbf8] sm:$0xf0]  ;;  %6474 = vmatpush.bf16.msrb.mxu1 %v13875_v32  ;;  %v13815_v57 = vor.u32 %v18199_v13, %v13812_v18  ;;  %v13335_v54 = vor.u32 %v18079_v23, %v13332_v37 }
 0x3de   :  { %v18403_v61 = vld [vmem:[%s28962_s7 + $0xc34] sm:$0xf0]  ;;  %v18295_v19 = vld [vmem:[%s28962_s7 + $0x8dc] sm:$0xf] }
 0x3df   :  { %v15090_v47 = vld [vmem:[%s28962_s7 + $0xfd8] sm:$0xf]  ;;  %v14611_v41 = vor.u32 %v18403_v61, %v14610_v46  ;;  %v14196_v63 = vld [vmem:[%s28962_s7 + $0x8f8] sm:$0xf0]  ;;  %6558 = vmatpush.bf16.msra.mxu3 %v13367_v33  ;;  %v14583_v46 = vor.u32 %v18391_v34, %v14580_v5 }
 0x3e0   :  { %v18523_v22 = vld [vmem:[%s28962_s7 + $0xff4] sm:$0xf0]  ;;  %v18191_v58 = vld [vmem:[%s28962_s7 + $0x59c] sm:$0xf]  ;;  %v14199_v61 = vor.u32 %v18295_v19, %v14196_v63 }
 0x3e1   :  { %6596 = vmatpush.bf16.msrb.mxu2 %v14263_v60  ;;  %v13843_v60 = vor.u32 %v18211_v43, %v13842_v31  ;;  %v15091_v21 = vor.u32 %v18523_v22, %v15090_v47  ;;  %v13780_v49 = vld [vmem:[%s28962_s7 + $0x5b8] sm:$0xf0]  ;;  %v15058_v32 = vld [vmem:[%s28962_s7 + $0xf98] sm:$0xf]  ;;  %6517 = vmatpush.bf16.msra.mxu0 %v14611_v41 }
 0x3e2   :  { %v18515_v31 = vld [vmem:[%s28962_s7 + $0xfb4] sm:$0xf0]  ;;  %v18383_v43 = vld [vmem:[%s28962_s7 + $0xb9c] sm:$0xf]  ;;  %v13783_v13 = vor.u32 %v18191_v58, %v13780_v49 }
 0x3e3   :  { %v14548_v23 = vld [vmem:[%s28962_s7 + $0xbb8] sm:$0xf0]  ;;  %6475 = vmatpush.bf16.msrb.mxu1 %v13843_v60  ;;  %6559 = vmatpush.bf16.msra.mxu3 %v13335_v54  ;;  %v15059_v18 = vor.u32 %v18515_v31, %v15058_v32  ;;  %v15026_v41 = vld [vmem:[%s28962_s7 + $0xf58] sm:$0xf] }
 0x3e4   :  { %v18287_v33 = vld [vmem:[%s28962_s7 + $0x89c] sm:$0xf]  ;;  %v14551_v22 = vor.u32 %v18383_v43, %v14548_v23  ;;  %v18507_v5 = vld [vmem:[%s28962_s7 + $0xf74] sm:$0xf0]  ;;  %6518 = vmatmul.bf16.vlgmr.msra.gmra.mxu0 %v22112_v50 }
 0x3e5   :  { %6597 = vmatpush.bf16.msrb.mxu2 %v14231_v16  ;;  %v14164_v37 = vld [vmem:[%s28962_s7 + $0x8b8] sm:$0xf0]  ;;  %6566 = vmatpush.bf16.msrb.mxu0 %v13815_v57  ;;  %v18499_v32 = vld [vmem:[%s28962_s7 + $0xf34] sm:$0xf0] }
 0x3e6   :  { %v18183_v16 = vld [vmem:[%s28962_s7 + $0x55c] sm:$0xf]  ;;  %v14167_v34 = vor.u32 %v18287_v33, %v14164_v37  ;;  %6476 = vmatmul.bf16.vlgmr.msrb.gmra.mxu1 %v21630_v6  ;;  %6560 = vmatmul.bf16.vlgmr.msra.gmra.mxu3 %v21507_v29  ;;  %v14994_v29 = vld [vmem:[%s28962_s7 + $0xf18] sm:$0xf] }
 0x3e7   :  { %6524 = vmatpush.bf16.msra.mxu1 %v15091_v21  ;;  %v13748_v47 = vld [vmem:[%s28962_s7 + $0x578] sm:$0xf0]  ;;  %6608 = vmatpush.bf16.msrb.mxu3 %v14583_v46  ;;  %v15027_v21 = vor.u32 %v18507_v5, %v15026_v41  ;;  %v14962_v5 = vld [vmem:[%s28962_s7 + $0xed8] sm:$0xf] }
 0x3e8   :  { %v18375_v19 = vld [vmem:[%s28962_s7 + $0xb5c] sm:$0xf]  ;;  %v13751_v54 = vor.u32 %v18183_v16, %v13748_v47  ;;  %v14995_v16 = vor.u32 %v18499_v32, %v14994_v29  ;;  %v14930_v32 = vld [vmem:[%s28962_s7 + $0xe98] sm:$0xf] }
 0x3e9   :  { %6598 = vmatpush.bf16.msrb.mxu2 %v14199_v61  ;;  %v14516_v63 = vld [vmem:[%s28962_s7 + $0xb78] sm:$0xf0]  ;;  %6567 = vmatpush.bf16.msrb.mxu0 %v13783_v13  ;;  %v15322_v13 = vld [vmem:[%s28965_s9 + $0x1c0] sm:$0xf] }
 0x3ea   :  { %v18279_v60 = vld [vmem:[%s28962_s7 + $0x85c] sm:$0xf]  ;;  %v14519_v46 = vor.u32 %v18375_v19, %v14516_v63  ;;  %v18491_v19 = vld [vmem:[%s28962_s7 + $0xef4] sm:$0xf0] }
 0x3eb   :  { %v14132_v57 = vld [vmem:[%s28962_s7 + $0x878] sm:$0xf0]  ;;  %6525 = vmatpush.bf16.msra.mxu1 %v15059_v18  ;;  %6609 = vmatpush.bf16.msrb.mxu3 %v14551_v22  ;;  %v18584_v18 = vld [vmem:[%s28965_s9 + $0x1dc] sm:$0xf0] }
 0x3ec   :  { %v18175_v58 = vld [vmem:[%s28962_s7 + $0x51c] sm:$0xf]  ;;  %v14135_v61 = vor.u32 %v18279_v60, %v14132_v57  ;;  %v15323_v63 = vor.u32 %v18584_v18, %v15322_v13  ;;  %v15258_v13 = vld [vmem:[%s28965_s9 + $0x140] sm:$0xf] }
 0x3ed   :  { %v13716_v49 = vld [vmem:[%s28962_s7 + $0x538] sm:$0xf0]  ;;  %6599 = vmatpush.bf16.msrb.mxu2 %v14167_v34  ;;  %6568 = vmatpush.bf16.msrb.mxu0 %v13751_v54  ;;  %v18568_v18 = vld [vmem:[%s28965_s9 + $0x15c] sm:$0xf0] }
 0x3ee   :  { %v18367_v31 = vld [vmem:[%s28962_s7 + $0xb1c] sm:$0xf]  ;;  %v13719_v37 = vor.u32 %v18175_v58, %v13716_v49  ;;  %v18576_v58 = vld [vmem:[%s28965_s9 + $0x19c] sm:$0xf0]  ;;  %v14963_v49 = vor.u32 %v18491_v19, %v14962_v5 }
 0x3ef   :  { %v14484_v43 = vld [vmem:[%s28962_s7 + $0xb38] sm:$0xf0]  ;;  %6526 = vmatpush.bf16.msra.mxu1 %v15027_v21  ;;  %6610 = vmatpush.bf16.msrb.mxu3 %v14519_v46  ;;  %v15290_v21 = vld [vmem:[%s28965_s9 + $0x180] sm:$0xf] }
 0x3f0   :  { %v18271_v23 = vld [vmem:[%s28962_s7 + $0x81c] sm:$0xf]  ;;  %v14487_v34 = vor.u32 %v18367_v31, %v14484_v43  ;;  %v18483_v31 = vld [vmem:[%s28962_s7 + $0xeb4] sm:$0xf0]  ;;  %v15291_v43 = vor.u32 %v18576_v58, %v15290_v21  ;;  %v18560_v58 = vld [vmem:[%s28965_s9 + $0x11c] sm:$0xf0] }
 0x3f1   :  { %v14100_v33 = vld [vmem:[%s28962_s7 + $0x838] sm:$0xf0]  ;;  %6600 = vmatpush.bf16.msrb.mxu2 %v14135_v61  ;;  %6569 = vmatpush.bf16.msrb.mxu0 %v13719_v37 }
 0x3f2   :  { %v18167_v47 = vld [vmem:[%s28962_s7 + $0x4dc] sm:$0xf]  ;;  %v14103_v41 = vor.u32 %v18271_v23, %v14100_v33 }
 0x3f3   :  { %v13684_v22 = vld [vmem:[%s28962_s7 + $0x4f8] sm:$0xf0]  ;;  %6527 = vmatpush.bf16.msra.mxu1 %v14995_v16  ;;  %6611 = vmatpush.bf16.msrb.mxu3 %v14487_v34  ;;  %v24486_v16 = vpop.f32.mrf.mxu2 }
 0x3f4   :  { %v18359_v60 = vld [vmem:[%s28962_s7 + $0xadc] sm:$0xf]  ;;  %v13687_v54 = vor.u32 %v18167_v47, %v13684_v22  ;;  %v14931_v47 = vor.u32 %v18483_v31, %v14930_v32 }
 0x3f5   :  { %v14452_v57 = vld [vmem:[%s28962_s7 + $0xaf8] sm:$0xf0]  ;;  %6601 = vmatpush.bf16.msrb.mxu2 %v14103_v41  ;;  %v28975_v41 = vperm.slane %v22248_v15, 0 }
 0x3f6   :  { %v18159_v46 = vld [vmem:[%s28962_s7 + $0x49c] sm:$0xf]  ;;  %v14455_v29 = vor.u32 %v18359_v60, %v14452_v57  ;;  %6570 = vmatpush.bf16.msrb.mxu0 %v13687_v54  ;;  %v15259_v60 = vor.u32 %v18568_v18, %v15258_v13  ;;  %v15226_v54 = vld [vmem:[%s28965_s9 + $0x100] sm:$0xf] }
 0x3f7   :  { %v13652_v61 = vld [vmem:[%s28962_s7 + $0x4b8] sm:$0xf0]  ;;  %6528 = vmatpush.bf16.msra.mxu1 %v14963_v49  ;;  %v5766_v5 = vadd.f32 %v22519_v40, %v28975_v41  ;;  %v14866_v49 = vld [vmem:[%s28962_s7 + $0xe18] sm:$0xf] }
 0x3f8   :  { %v18351_v23 = vld [vmem:[%s28962_s7 + $0xa9c] sm:$0xf]  ;;  %v13655_v37 = vor.u32 %v18159_v46, %v13652_v61  ;;  %6602 = vmatmul.bf16.vlgmr.msrb.gmra.mxu2 %v21778_v62  ;;  %6612 = vmatpush.bf16.msrb.mxu3 %v14455_v29  ;;  %v18475_v62 = vld [vmem:[%s28962_s7 + $0xe74] sm:$0xf0] }
 0x3f9   :  { %9764 = vmatpush.bf16.msra.mxu2 %v15323_v63  ;;  %v14420_v33 = vld [vmem:[%s28962_s7 + $0xab8] sm:$0xf0]  ;;  %v14898_v63 = vld [vmem:[%s28962_s7 + $0xe58] sm:$0xf] }
 0x3fa   :  { %v18151_v22 = vld [vmem:[%s28962_s7 + $0x45c] sm:$0xf]  ;;  %v14423_v19 = vor.u32 %v18351_v23, %v14420_v33  ;;  %6571 = vmatpush.bf16.msrb.mxu0 %v13655_v37  ;;  %v18467_v46 = vld [vmem:[%s28962_s7 + $0xe34] sm:$0xf0]  ;;  %v14899_v61 = vor.u32 %v18475_v62, %v14898_v63  ;;  %v24532_v23 = vpop.f32.mrf.mxu3  ;;  %v15194_v63 = vld [vmem:[%s28965_s9 + $0xc0] sm:$0xf] }
 0x3fb   :  { %v13620_v34 = vld [vmem:[%s28962_s7 + $0x478] sm:$0xf0]  ;;  %6529 = vmatpush.bf16.msra.mxu1 %v14931_v47  ;;  %v15227_v47 = vor.u32 %v18560_v58, %v15226_v54  ;;  %v18552_v62 = vld [vmem:[%s28965_s9 + $0xdc] sm:$0xf0]  ;;  %v24566_v54 = vpop.f32.mrf.mxu1 }
 0x3fc   :  { %v18343_v57 = vld [vmem:[%s28962_s7 + $0xa5c] sm:$0xf]  ;;  %v13623_v21 = vor.u32 %v18151_v22, %v13620_v34  ;;  %6613 = vmatpush.bf16.msrb.mxu3 %v14423_v19  ;;  %v15578_v34 = vld [vmem:[%s28965_s9 + $0x3c0] sm:$0xf] }
 0x3fd   :  { %9765 = vmatpush.bf16.msra.mxu2 %v15291_v43  ;;  %v14388_v40 = vld [vmem:[%s28962_s7 + $0xa78] sm:$0xf0]  ;;  %v5780_v43 = vadd.f32 %v22721_v55, %v5766_v5  ;;  %v18648_v19 = vld [vmem:[%s28965_s9 + $0x3dc] sm:$0xf0] }
 0x3fe   :  { %v18143_v29 = vld [vmem:[%s28962_s7 + $0x41c] sm:$0xf]  ;;  %v14391_v33 = vor.u32 %v18343_v57, %v14388_v40  ;;  %6572 = vmatpush.bf16.msrb.mxu0 %v13623_v21  ;;  %v14867_v57 = vor.u32 %v18467_v46, %v14866_v49 }
 0x3ff   :  { %v13588_v32 = vld [vmem:[%s28962_s7 + $0x438] sm:$0xf0]  ;;  %v5794_v41 = vadd.f32 %v22902_v36, %v5780_v43  ;;  %6530 = vmatpush.bf16.msra.mxu1 %v14899_v61  ;;  %v24564_v36 = vpop.f32.mrf.mxu0  ;;  %v15579_v43 = vor.u32 %v18648_v19, %v15578_v34  ;;  %v15195_v61 = vor.u32 %v18552_v62, %v15194_v63 }
 0x400   :  { %v18335_v31 = vld [vmem:[%s28962_s7 + $0xa1c] sm:$0xf]  ;;  %v13591_v5 = vor.u32 %v18143_v29, %v13588_v32  ;;  %6614 = vmatpush.bf16.msrb.mxu3 %v14391_v33 }
 0x401   :  { %v14356_v37 = vld [vmem:[%s28962_s7 + $0xa38] sm:$0xf0]  ;;  %9766 = vmatpush.bf16.msra.mxu2 %v15259_v60  ;;  %v24562_v60 = vpop.f32.mrf.mxu2  ;;  %v5808_v33 = vadd.f32 %v23118_v11, %v5794_v41 }
 0x402   :  { %v18455_v13 = vld [vmem:[%s28962_s7 + $0xddc] sm:$0xf]  ;;  %v14359_v21 = vor.u32 %v18335_v31, %v14356_v37  ;;  %v15546_v31 = vld [vmem:[%s28965_s9 + $0x380] sm:$0xf]  ;;  %6573 = vmatpush.bf16.msrb.mxu0 %v13591_v5  ;;  %v28976_v5 = vperm.slane %v22248_v15, 1 }
 0x403   :  { %v14836_v18 = vld [vmem:[%s28962_s7 + $0xdf8] sm:$0xf0]  ;;  %v18640_v37 = vld [vmem:[%s28965_s9 + $0x39c] sm:$0xf0]  ;;  %6531 = vmatpush.bf16.msra.mxu1 %v14867_v57 }
 0x404   :  { %v18263_v55 = vld [vmem:[%s28962_s7 + $0x7dc] sm:$0xf]  ;;  %v14839_v40 = vor.u32 %v18455_v13, %v14836_v18  ;;  %v15162_v13 = vld [vmem:[%s28965_s9 + $0x80] sm:$0xf]  ;;  %6615 = vmatpush.bf16.msrb.mxu3 %v14359_v21  ;;  %v5878_v19 = vadd.f32 %v23008_v24, %v28976_v5 }
 0x405   :  { %v14068_v22 = vld [vmem:[%s28962_s7 + $0x7f8] sm:$0xf0]  ;;  %9767 = vmatpush.bf16.msra.mxu2 %v15227_v47  ;;  %v18544_v18 = vld [vmem:[%s28965_s9 + $0x9c] sm:$0xf0]  ;;  %6574 = vmatmul.bf16.vlgmr.msrb.gmra.mxu0 %v21651_v2 }
 0x406   :  { %v14071_v58 = vor.u32 %v18263_v55, %v14068_v22  ;;  %v18447_v29 = vld [vmem:[%s28962_s7 + $0xd9c] sm:$0xf]  ;;  %6622 = vmatpush.bf16.msra.mxu0 %v14839_v40  ;;  %v5822_v55 = vadd.f32 %v22792_v27, %v5808_v33  ;;  %v24594_v22 = vpop.f32.mrf.mxu3  ;;  %v15547_v27 = vor.u32 %v18640_v37, %v15546_v31  ;;  %v15163_v63 = vor.u32 %v18544_v18, %v15162_v13  ;;  %v15514_v40 = vld [vmem:[%s28965_s9 + $0x340] sm:$0xf] }
 0x407   :  { %v14804_v32 = vld [vmem:[%s28962_s7 + $0xdb8] sm:$0xf0]  ;;  %6532 = vmatmul.bf16.vlgmr.msra.gmra.mxu1 %v22266_v8  ;;  %v18632_v24 = vld [vmem:[%s28965_s9 + $0x35c] sm:$0xf0]  ;;  %6616 = vmatmul.bf16.vlgmr.msrb.gmra.mxu3 %v21948_v10 }
 0x408   :  { %v18255_v49 = vld [vmem:[%s28962_s7 + $0x79c] sm:$0xf]  ;;  %v14807_v47 = vor.u32 %v18447_v29, %v14804_v32  ;;  %6580 = vmatpush.bf16.msrb.mxu1 %v14071_v58  ;;  %9778 = vmatpush.bf16.msra.mxu3 %v15579_v43  ;;  %v5836_v15 = vadd.f32 %v22838_v28, %v5822_v55  ;;  %v15130_v21 = vld [vmem:[%s28965_s9 + $0x40] sm:$0xf]  ;;  %v5892_v29 = vadd.f32 %v23025_v44, %v5878_v19  ;;  %v24629_v32 = vpop.f32.mrf.mxu0  ;;  %v24631_v43 = vpop.f32.mrf.mxu1 }
 0x409   :  { %v14036_v46 = vld [vmem:[%s28962_s7 + $0x7b8] sm:$0xf0]  ;;  %9768 = vmatpush.bf16.msra.mxu2 %v15195_v61  ;;  %v18536_v58 = vld [vmem:[%s28965_s9 + $0x5c] sm:$0xf0] }
 0x40a   :  { %v14039_v11 = vor.u32 %v18255_v49, %v14036_v46  ;;  %v18439_v34 = vld [vmem:[%s28962_s7 + $0xd5c] sm:$0xf]  ;;  %6623 = vmatpush.bf16.msra.mxu0 %v14807_v47  ;;  %v5850_v2 = vadd.f32 %v23010_v1, %v5836_v15  ;;  %v5906_v10 = vadd.f32 %v23214_v20, %v5892_v29  ;;  %v6213_v46 = vpop.f32.mrf.mxu2  ;;  %v15515_v1 = vor.u32 %v18632_v24, %v15514_v40  ;;  %v15482_v13 = vld [vmem:[%s28965_s9 + $0x300] sm:$0xf] }
 0x40b   :  { %v14772_v41 = vld [vmem:[%s28962_s7 + $0xd78] sm:$0xf0]  ;;  %v15131_v31 = vor.u32 %v18536_v58, %v15130_v21  ;;  %v18624_v20 = vld [vmem:[%s28965_s9 + $0x31c] sm:$0xf0] }
 0x40c   :  { %v18247_v62 = vld [vmem:[%s28962_s7 + $0x75c] sm:$0xf]  ;;  %v14775_v28 = vor.u32 %v18439_v34, %v14772_v41  ;;  %6581 = vmatpush.bf16.msrb.mxu1 %v14039_v11  ;;  %9779 = vmatpush.bf16.msra.mxu3 %v15547_v27  ;;  %v5864_v18 = vadd.f32 %v23243_v53, %v5850_v2  ;;  %v15098_v47 = vld [vmem:[%s28965_s9] sm:$0xf]  ;;  %v5920_v11 = vadd.f32 %v23369_v0, %v5906_v10 }
 0x40d   :  { %v14004_v57 = vld [vmem:[%s28962_s7 + $0x778] sm:$0xf0]  ;;  %9769 = vmatpush.bf16.msra.mxu2 %v15163_v63  ;;  %v18528_v55 = vld [vmem:[%s28965_s9 + $0x1c] sm:$0xf0]  ;;  %v15483_v27 = vor.u32 %v18624_v20, %v15482_v13 }
 0x40e   :  { %v14007_v61 = vor.u32 %v18247_v62, %v14004_v57  ;;  %v18431_v49 = vld [vmem:[%s28962_s7 + $0xd1c] sm:$0xf]  ;;  %6624 = vmatpush.bf16.msra.mxu0 %v14775_v28  ;;  %v16346_v53 = vld [vmem:[%s28965_s9 + $0x9c0] sm:$0xf]  ;;  %v15099_v63 = vor.u32 %v18528_v55, %v15098_v47  ;;  %v6658_v40 = vmax.f32 %v5864_v18, 0.0  ;;  %v6227_v15 = vpop.f32.mrf.mxu3  ;;  %v5934_v29 = vadd.f32 %v23147_v7, %v5920_v11 }
 0x40f   :  { %v14740_v44 = vld [vmem:[%s28962_s7 + $0xd38] sm:$0xf0]  ;;  %v18840_v41 = vld [vmem:[%s28965_s9 + $0x9dc] sm:$0xf0] }
 0x410   :  { %v18239_v33 = vld [vmem:[%s28962_s7 + $0x71c] sm:$0xf]  ;;  %v14743_v34 = vor.u32 %v18431_v49, %v14740_v44  ;;  %6582 = vmatpush.bf16.msrb.mxu1 %v14007_v61  ;;  %9780 = vmatpush.bf16.msra.mxu3 %v15515_v1  ;;  %v16347_v24 = vor.u32 %v18840_v41, %v16346_v53  ;;  %v15450_v21 = vld [vmem:[%s28965_s9 + $0x2c0] sm:$0xf]  ;;  %v6650_v49 = vmax.f32 %v23188_v38, 0.0  ;;  %v6241_v20 = vpop.f32.mrf.mxu0  ;;  %v6255_v47 = vpop.f32.mrf.mxu1  ;;  %v5948_v53 = vadd.f32 %v23179_v25, %v5934_v29 }
 0x411   :  { %v13972_v37 = vld [vmem:[%s28962_s7 + $0x738] sm:$0xf0]  ;;  %9770 = vmatpush.bf16.msra.mxu2 %v15131_v31  ;;  %v18616_v58 = vld [vmem:[%s28965_s9 + $0x2dc] sm:$0xf0] }
 0x412   :  { %v13975_v5 = vor.u32 %v18239_v33, %v13972_v37  ;;  %v18423_v19 = vld [vmem:[%s28962_s7 + $0xcdc] sm:$0xf]  ;;  %6625 = vmatpush.bf16.msra.mxu0 %v14743_v34  ;;  %v16314_v2 = vld [vmem:[%s28965_s9 + $0x980] sm:$0xf]  ;;  %v24704_v33 = vpop.f32.mrf.mxu2  ;;  %v15451_v38 = vor.u32 %v18616_v58, %v15450_v21  ;;  %v24712_v18 = vpack.c.bf16 %v6658_v40, %v6650_v49 }
 0x413   :  { %v14708_v0 = vld [vmem:[%s28962_s7 + $0xcf8] sm:$0xf0]  ;;  %v18832_v61 = vld [vmem:[%s28965_s9 + $0x99c] sm:$0xf0] }
 0x414   :  { %v18231_v62 = vld [vmem:[%s28962_s7 + $0x6dc] sm:$0xf]  ;;  %v14711_v28 = vor.u32 %v18423_v19, %v14708_v0  ;;  %6583 = vmatpush.bf16.msrb.mxu1 %v13975_v5  ;;  %v24701_v1 = vld [vmem:[%s28964_s8] sm:$0xff]  ;;  %9781 = vmatpush.bf16.msra.mxu3 %v15483_v27  ;;  %v16315_v55 = vor.u32 %v18832_v61, %v16314_v2 }
 0x415   :  { %v13940_v57 = vld [vmem:[%s28962_s7 + $0x6f8] sm:$0xf0]  ;;  %v3182_v31 = vperm.slane %v24701_v1, 4  ;;  %9771 = vmatpush.bf16.msra.mxu2 %v15099_v63  ;;  %v15418_v11 = vld [vmem:[%s28965_s9 + $0x280] sm:$0xf] }
 0x416   :  { %v13943_v44 = vor.u32 %v18231_v62, %v13940_v57  ;;  %v18415_v10 = vld [vmem:[%s28962_s7 + $0xc9c] sm:$0xf]  ;;  %v18608_v34 = vld [vmem:[%s28965_s9 + $0x29c] sm:$0xf0]  ;;  %6626 = vmatpush.bf16.msra.mxu0 %v14711_v28  ;;  %v24741_v21 = vpop.f32.mrf.mxu3  ;;  %v5962_v28 = vadd.f32 %v23366_v14, %v5948_v53 }
 0x417   :  { %v14676_v7 = vld [vmem:[%s28962_s7 + $0xcb8] sm:$0xf0]  ;;  %v6214_v41 = vadd.f32 %v6213_v46, %v3182_v31  ;;  %v16282_v19 = vld [vmem:[%s28965_s9 + $0x940] sm:$0xf]  ;;  %v6212_v46 = vadd.f32 %v24562_v60, %v3182_v31  ;;  %v15419_v57 = vor.u32 %v18608_v34, %v15418_v11 }
 0x418   :  { %v18223_v37 = vld [vmem:[%s28962_s7 + $0x69c] sm:$0xf]  ;;  %v14679_v5 = vor.u32 %v18415_v10, %v14676_v7  ;;  %v18824_v0 = vld [vmem:[%s28965_s9 + $0x95c] sm:$0xf0]  ;;  %6584 = vmatpush.bf16.msrb.mxu1 %v13943_v44  ;;  %9772 = vmatmul.bf16.vlgmr.msra.gmra.mxu2 %v24712_v18 }
 0x419   :  { %v13908_v13 = vld [vmem:[%s28962_s7 + $0x6b8] sm:$0xf0]  ;;  %9820 = vmatpush.bf16.msrb.mxu2 %v16347_v24  ;;  %v6228_v62 = vadd.f32 %v6227_v15, %v6214_v41  ;;  %9782 = vmatpush.bf16.msra.mxu3 %v15451_v38  ;;  %v16283_v58 = vor.u32 %v18824_v0, %v16282_v19  ;;  %v15386_v29 = vld [vmem:[%s28965_s9 + $0x240] sm:$0xf]  ;;  %v6226_v2 = vadd.f32 %v24594_v22, %v6212_v46  ;;  %v24783_v41 = vpop.f32.mrf.mxu0 }
 0x41a   :  { %v13911_v27 = vor.u32 %v18223_v37, %v13908_v13  ;;  %v18407_v63 = vld [vmem:[%s28962_s7 + $0xc5c] sm:$0xf]  ;;  %v18600_v60 = vld [vmem:[%s28965_s9 + $0x25c] sm:$0xf0]  ;;  %6627 = vmatpush.bf16.msra.mxu0 %v14679_v5  ;;  %v5976_v37 = vadd.f32 %v23579_v30, %v5962_v28  ;;  %v24785_v30 = vpop.f32.mrf.mxu1 }
 0x41b   :  { %v14644_v25 = vld [vmem:[%s28962_s7 + $0xc78] sm:$0xf0]  ;;  %v16250_v15 = vld [vmem:[%s28965_s9 + $0x900] sm:$0xf]  ;;  %v6242_v61 = vadd.f32 %v6241_v20, %v6228_v62  ;;  %v6240_v13 = vadd.f32 %v24629_v32, %v6226_v2  ;;  %v6269_v62 = vpop.f32.mrf.mxu2 }
 0x41c   :  { %v18215_v40 = vld [vmem:[%s28962_s7 + $0x65c] sm:$0xf]  ;;  %v14647_v49 = vor.u32 %v18407_v63, %v14644_v25  ;;  %v18816_v44 = vld [vmem:[%s28965_s9 + $0x91c] sm:$0xf0]  ;;  %6585 = vmatpush.bf16.msrb.mxu1 %v13911_v27 }
 0x41d   :  { %v13876_v24 = vld [vmem:[%s28962_s7 + $0x678] sm:$0xf0]  ;;  %9821 = vmatpush.bf16.msrb.mxu2 %v16315_v55  ;;  %v15354_v38 = vld [vmem:[%s28965_s9 + $0x200] sm:$0xf]  ;;  %v6256_v20 = vadd.f32 %v6255_v47, %v6242_v61  ;;  %9783 = vmatpush.bf16.msra.mxu3 %v15419_v57  ;;  %v15387_v55 = vor.u32 %v18600_v60, %v15386_v29  ;;  %v16251_v32 = vor.u32 %v18816_v44, %v16250_v15 }
 0x41e   :  { %v18207_v10 = vld [vmem:[%s28962_s7 + $0x61c] sm:$0xf]  ;;  %v13879_v31 = vor.u32 %v18215_v40, %v13876_v24  ;;  %v18592_v11 = vld [vmem:[%s28965_s9 + $0x21c] sm:$0xf0]  ;;  %v6254_v0 = vadd.f32 %v24631_v43, %v6240_v13  ;;  %6628 = vmatpush.bf16.msra.mxu0 %v14647_v49  ;;  %v6659_v24 = vmax.f32 %v5976_v37, 0.0 }
 0x41f   :  { %v13844_v7 = vld [vmem:[%s28962_s7 + $0x638] sm:$0xf0]  ;;  %v15834_v34 = vld [vmem:[%s28965_s9 + $0x5c0] sm:$0xf]  ;;  %v6270_v43 = vadd.f32 %v6269_v62, %v6256_v20 }
 0x420   :  { %v18399_v14 = vld [vmem:[%s28962_s7 + $0xc1c] sm:$0xf]  ;;  %v18712_v53 = vld [vmem:[%s28965_s9 + $0x5dc] sm:$0xf0]  ;;  %6586 = vmatpush.bf16.msrb.mxu1 %v13879_v31  ;;  %v13847_v57 = vor.u32 %v18207_v10, %v13844_v7  ;;  %v6268_v10 = vadd.f32 %v24704_v33, %v6254_v0  ;;  %v28977_v33 = vperm.slane %v23205_v51, 2 }
 0x421   :  { %v14612_v22 = vld [vmem:[%s28962_s7 + $0xc38] sm:$0xf0]  ;;  %9822 = vmatpush.bf16.msrb.mxu2 %v16283_v58  ;;  %v16602_v19 = vld [vmem:[%s28965_s9 + $0xbc0] sm:$0xf]  ;;  %v15835_v40 = vor.u32 %v18712_v53, %v15834_v34  ;;  %9784 = vmatpush.bf16.msra.mxu3 %v15387_v55  ;;  %v15355_v58 = vor.u32 %v18592_v11, %v15354_v38  ;;  %v6283_v38 = vpop.f32.mrf.mxu3 }
 0x422   :  { %v18519_v47 = vld [vmem:[%s28962_s7 + $0xfdc] sm:$0xf]  ;;  %v14615_v27 = vor.u32 %v18399_v14, %v14612_v22  ;;  %v18904_v63 = vld [vmem:[%s28965_s9 + $0xbdc] sm:$0xf0]  ;;  %v6651_v22 = vmax.f32 %v23428_v56, 0.0  ;;  %v5990_v13 = vadd.f32 %v23461_v35, %v28977_v33  ;;  %v6284_v20 = vadd.f32 %v6283_v38, %v6270_v43 }
 0x423   :  { %v15092_v5 = vld [vmem:[%s28962_s7 + $0xff8] sm:$0xf0]  ;;  %v16218_v25 = vld [vmem:[%s28965_s9 + $0x8c0] sm:$0xf]  ;;  %v16603_v28 = vor.u32 %v18904_v63, %v16602_v19  ;;  %v6282_v0 = vadd.f32 %v24741_v21, %v6268_v10 }
 0x424   :  { %v18808_v46 = vld [vmem:[%s28965_s9 + $0x8dc] sm:$0xf0]  ;;  %v15095_v29 = vor.u32 %v18519_v47, %v15092_v5  ;;  %v18511_v61 = vld [vmem:[%s28962_s7 + $0xf9c] sm:$0xf]  ;;  %6629 = vmatpush.bf16.msra.mxu0 %v14615_v27  ;;  %6587 = vmatpush.bf16.msrb.mxu1 %v13847_v57  ;;  %v24841_v34 = vpack.c.bf16 %v6659_v24, %v6651_v22  ;;  %v6004_v19 = vadd.f32 %v23496_v45, %v5990_v13  ;;  %v6311_v45 = vpop.f32.mrf.mxu1  ;;  %v24913_v13 = vpop.f32.mrf.mxu2 }
 0x425   :  { %v15802_v60 = vld [vmem:[%s28965_s9 + $0x580] sm:$0xf]  ;;  %9823 = vmatpush.bf16.msrb.mxu2 %v16251_v32  ;;  %v16219_v2 = vor.u32 %v18808_v46, %v16218_v25  ;;  %v15060_v49 = vld [vmem:[%s28962_s7 + $0xfb8] sm:$0xf0]  ;;  %9785 = vmatpush.bf16.msra.mxu3 %v15355_v58  ;;  %v6297_v46 = vpop.f32.mrf.mxu0 }
 0x426   :  { %v18704_v15 = vld [vmem:[%s28965_s9 + $0x59c] sm:$0xf0]  ;;  %v15063_v55 = vor.u32 %v18511_v61, %v15060_v49  ;;  %v18503_v35 = vld [vmem:[%s28962_s7 + $0xf5c] sm:$0xf]  ;;  %v6298_v21 = vadd.f32 %v6297_v46, %v6284_v20 }
 0x427   :  { %v16570_v44 = vld [vmem:[%s28965_s9 + $0xb80] sm:$0xf]  ;;  %v15803_v37 = vor.u32 %v18704_v15, %v15802_v60  ;;  %v15028_v47 = vld [vmem:[%s28962_s7 + $0xf78] sm:$0xf0]  ;;  %6588 = vmatmul.bf16.vlgmr.msrb.gmra.mxu1 %v21630_v6  ;;  %6630 = vmatmul.bf16.vlgmr.msra.gmra.mxu0 %v22112_v50  ;;  %v6018_v50 = vadd.f32 %v23620_v3, %v6004_v19  ;;  %v6296_v15 = vadd.f32 %v24783_v41, %v6282_v0  ;;  %v15324_v41 = vld [vmem:[%s28965_s9 + $0x1e0] sm:$0xf0] }
 0x428   :  { %v18896_v7 = vld [vmem:[%s28965_s9 + $0xb9c] sm:$0xf0]  ;;  %9792 = vmatpush.bf16.msrb.mxu0 %v15835_v40  ;;  %6636 = vmatpush.bf16.msra.mxu1 %v15095_v29  ;;  %v15031_v62 = vor.u32 %v18503_v35, %v15028_v47  ;;  %v18495_v58 = vld [vmem:[%s28962_s7 + $0xf1c] sm:$0xf] }
 0x429   :  { %v16186_v31 = vld [vmem:[%s28965_s9 + $0x880] sm:$0xf]  ;;  %9834 = vmatpush.bf16.msrb.mxu3 %v16603_v28  ;;  %9824 = vmatpush.bf16.msrb.mxu2 %v16219_v2  ;;  %v16571_v53 = vor.u32 %v18896_v7, %v16570_v44  ;;  %v14996_v3 = vld [vmem:[%s28962_s7 + $0xf38] sm:$0xf0]  ;;  %v6032_v60 = vadd.f32 %v23793_v26, %v6018_v50  ;;  %v6312_v28 = vadd.f32 %v6311_v45, %v6298_v21  ;;  %v18580_v26 = vld [vmem:[%s28965_s9 + $0x1c4] sm:$0xf]  ;;  %v24940_v46 = vpop.f32.mrf.mxu3 }
 0x42a   :  { %v18800_v14 = vld [vmem:[%s28965_s9 + $0x89c] sm:$0xf0]  ;;  %9786 = vmatmul.bf16.vlgmr.msra.gmra.mxu3 %v24841_v34  ;;  %v6310_v10 = vadd.f32 %v24785_v30, %v6296_v15  ;;  %v14999_v7 = vor.u32 %v18495_v58, %v14996_v3  ;;  %v14964_v30 = vld [vmem:[%s28962_s7 + $0xef8] sm:$0xf0]  ;;  %v3183_v58 = vperm.slane %v24701_v1, 5 }
 0x42b   :  { %v15770_v11 = vld [vmem:[%s28965_s9 + $0x540] sm:$0xf]  ;;  %v16187_v32 = vor.u32 %v18800_v14, %v16186_v31  ;;  %v6046_v33 = vadd.f32 %v23597_v48, %v6032_v60  ;;  %v6662_v20 = vmax.f32 %v6312_v28, 0.0  ;;  %v15292_v48 = vld [vmem:[%s28965_s9 + $0x1a0] sm:$0xf0] }
 0x42c   :  { %v18696_v56 = vld [vmem:[%s28965_s9 + $0x55c] sm:$0xf0]  ;;  %9793 = vmatpush.bf16.msrb.mxu0 %v15803_v37  ;;  %6637 = vmatpush.bf16.msra.mxu1 %v15063_v55  ;;  %v18487_v37 = vld [vmem:[%s28962_s7 + $0xedc] sm:$0xf]  ;;  %v15327_v55 = vor.u32 %v18580_v26, %v15324_v41  ;;  %v6654_v35 = vmax.f32 %v6310_v10, 0.0 }
 0x42d   :  { %v16538_v5 = vld [vmem:[%s28965_s9 + $0xb40] sm:$0xf]  ;;  %v15771_v6 = vor.u32 %v18696_v56, %v15770_v11  ;;  %9835 = vmatpush.bf16.msrb.mxu3 %v16571_v53  ;;  %9825 = vmatpush.bf16.msrb.mxu2 %v16187_v32  ;;  %v18572_v32 = vld [vmem:[%s28965_s9 + $0x184] sm:$0xf]  ;;  %v14967_v47 = vor.u32 %v18487_v37, %v14964_v30  ;;  %v14900_v60 = vld [vmem:[%s28962_s7 + $0xe78] sm:$0xf0]  ;;  %v24971_v28 = vpop.f32.mrf.mxu0 }
 0x42e   :  { %v18888_v27 = vld [vmem:[%s28965_s9 + $0xb5c] sm:$0xf0]  ;;  %v24942_v45 = vpack.c.bf16 %v6662_v20, %v6654_v35  ;;  %v18463_v41 = vld [vmem:[%s28962_s7 + $0xe1c] sm:$0xf]  ;;  %v15580_v35 = vld [vmem:[%s28965_s9 + $0x3e0] sm:$0xf0] }
 0x42f   :  { %v16154_v63 = vld [vmem:[%s28965_s9 + $0x840] sm:$0xf]  ;;  %v16539_v24 = vor.u32 %v18888_v27, %v16538_v5  ;;  %v18479_v27 = vld [vmem:[%s28962_s7 + $0xe9c] sm:$0xf] }
 0x430   :  { %v18792_v25 = vld [vmem:[%s28965_s9 + $0x85c] sm:$0xf0]  ;;  %9794 = vmatpush.bf16.msrb.mxu0 %v15771_v6  ;;  %6638 = vmatpush.bf16.msra.mxu1 %v15031_v62  ;;  %v15295_v6 = vor.u32 %v18572_v32, %v15292_v48  ;;  %v14868_v10 = vld [vmem:[%s28962_s7 + $0xe38] sm:$0xf0]  ;;  %v18644_v32 = vld [vmem:[%s28965_s9 + $0x3c4] sm:$0xf] }
 0x431   :  { %v15738_v57 = vld [vmem:[%s28965_s9 + $0x500] sm:$0xf]  ;;  %v16155_v43 = vor.u32 %v18792_v25, %v16154_v63  ;;  %9836 = vmatpush.bf16.msrb.mxu3 %v16539_v24  ;;  %v14932_v63 = vld [vmem:[%s28962_s7 + $0xeb8] sm:$0xf0]  ;;  %v6060_v25 = vadd.f32 %v23628_v42, %v6046_v33  ;;  %v18564_v42 = vld [vmem:[%s28965_s9 + $0x144] sm:$0xf] }
 0x432   :  { %v18688_v40 = vld [vmem:[%s28965_s9 + $0x51c] sm:$0xf0] }
 0x433   :  { %v16506_v29 = vld [vmem:[%s28965_s9 + $0xb00] sm:$0xf]  ;;  %v15739_v44 = vor.u32 %v18688_v40, %v15738_v57  ;;  %9826 = vmatpush.bf16.msrb.mxu2 %v16155_v43  ;;  %v15260_v57 = vld [vmem:[%s28965_s9 + $0x160] sm:$0xf0]  ;;  %v14935_v40 = vor.u32 %v18479_v27, %v14932_v63  ;;  %v6074_v15 = vadd.f32 %v23795_v12, %v6060_v25  ;;  %v14871_v27 = vor.u32 %v18463_v41, %v14868_v10 }
 0x434   :  { %v18880_v2 = vld [vmem:[%s28965_s9 + $0xb1c] sm:$0xf0]  ;;  %6639 = vmatpush.bf16.msra.mxu1 %v14999_v7  ;;  %v15228_v12 = vld [vmem:[%s28965_s9 + $0x120] sm:$0xf0]  ;;  %v6652_v25 = vmax.f32 %v23853_v4, 0.0  ;;  %v28978_v10 = vperm.slane %v23205_v51, 3 }
 0x435   :  { %v16122_v61 = vld [vmem:[%s28965_s9 + $0x800] sm:$0xf]  ;;  %v16507_v22 = vor.u32 %v18880_v2, %v16506_v29  ;;  %9795 = vmatpush.bf16.msrb.mxu0 %v15739_v44  ;;  %v18471_v29 = vld [vmem:[%s28962_s7 + $0xe5c] sm:$0xf]  ;;  %v15263_v2 = vor.u32 %v18564_v42, %v15260_v57  ;;  %v18556_v44 = vld [vmem:[%s28965_s9 + $0x104] sm:$0xf]  ;;  %v6088_v7 = vadd.f32 %v23999_v17, %v6074_v15  ;;  %v15583_v42 = vor.u32 %v18644_v32, %v15580_v35 }
 0x436   :  { %v18784_v49 = vld [vmem:[%s28965_s9 + $0x81c] sm:$0xf0] }
 0x437   :  { %v15706_v31 = vld [vmem:[%s28965_s9 + $0x4c0] sm:$0xf]  ;;  %v16123_v38 = vor.u32 %v18784_v49, %v16122_v61  ;;  %9837 = vmatpush.bf16.msrb.mxu3 %v16507_v22 }
 0x438   :  { %v18680_v14 = vld [vmem:[%s28965_s9 + $0x4dc] sm:$0xf0]  ;;  %6640 = vmatpush.bf16.msra.mxu1 %v14967_v47  ;;  %v18548_v47 = vld [vmem:[%s28965_s9 + $0xc4] sm:$0xf] }
 0x439   :  { %v16474_v11 = vld [vmem:[%s28965_s9 + $0xac0] sm:$0xf]  ;;  %v15707_v53 = vor.u32 %v18680_v14, %v15706_v31  ;;  %9827 = vmatpush.bf16.msrb.mxu2 %v16123_v38  ;;  %v6325_v31 = vpop.f32.mrf.mxu2  ;;  %v14903_v14 = vor.u32 %v18471_v29, %v14900_v60  ;;  %v18540_v29 = vld [vmem:[%s28965_s9 + $0x84] sm:$0xf] }
 0x43a   :  { %v18872_v56 = vld [vmem:[%s28965_s9 + $0xadc] sm:$0xf0]  ;;  %v15164_v60 = vld [vmem:[%s28965_s9 + $0xa0] sm:$0xf0] }
 0x43b   :  { %v15674_v5 = vld [vmem:[%s28965_s9 + $0x480] sm:$0xf]  ;;  %v16475_v0 = vor.u32 %v18872_v56, %v16474_v11  ;;  %9796 = vmatpush.bf16.msrb.mxu0 %v15707_v53  ;;  %v15231_v11 = vor.u32 %v18556_v44, %v15228_v12 }
 0x43c   :  { %v18672_v19 = vld [vmem:[%s28965_s9 + $0x49c] sm:$0xf0]  ;;  %9828 = vmatmul.bf16.vlgmr.msrb.gmra.mxu2 %v24942_v45  ;;  %6641 = vmatpush.bf16.msra.mxu1 %v14935_v40 }
 0x43d   :  { %9876 = vmatpush.bf16.msra.mxu2 %v15327_v55  ;;  %v16442_v50 = vld [vmem:[%s28965_s9 + $0xa80] sm:$0xf]  ;;  %v15675_v62 = vor.u32 %v18672_v19, %v15674_v5  ;;  %9838 = vmatpush.bf16.msrb.mxu3 %v16475_v0  ;;  %v25010_v55 = vpop.f32.mrf.mxu1  ;;  %v15196_v5 = vld [vmem:[%s28965_s9 + $0xe0] sm:$0xf0]  ;;  %v6660_v19 = vmax.f32 %v6088_v7, 0.0  ;;  %v6339_v0 = vpop.f32.mrf.mxu3  ;;  %v6102_v7 = vadd.f32 %v24008_v39, %v28978_v10 }
 0x43e   :  { %v18864_v21 = vld [vmem:[%s28965_s9 + $0xa9c] sm:$0xf0]  ;;  %v15199_v57 = vor.u32 %v18548_v47, %v15196_v5  ;;  %v15516_v39 = vld [vmem:[%s28965_s9 + $0x360] sm:$0xf0] }
 0x43f   :  { %v15642_v24 = vld [vmem:[%s28965_s9 + $0x440] sm:$0xf]  ;;  %v16443_v3 = vor.u32 %v18864_v21, %v16442_v50  ;;  %9797 = vmatpush.bf16.msrb.mxu0 %v15675_v62  ;;  %v25058_v15 = vpack.c.bf16 %v6660_v19, %v6652_v25  ;;  %v18620_v19 = vld [vmem:[%s28965_s9 + $0x304] sm:$0xf] }
 0x440   :  { %v18664_v43 = vld [vmem:[%s28965_s9 + $0x45c] sm:$0xf0]  ;;  %6642 = vmatpush.bf16.msra.mxu1 %v14903_v14  ;;  %v15100_v25 = vld [vmem:[%s28965_s9 + $0x20] sm:$0xf0] }
 0x441   :  { %9877 = vmatpush.bf16.msra.mxu2 %v15295_v6  ;;  %v16410_v61 = vld [vmem:[%s28965_s9 + $0xa40] sm:$0xf]  ;;  %v15643_v26 = vor.u32 %v18664_v43, %v15642_v24  ;;  %9839 = vmatpush.bf16.msrb.mxu3 %v16443_v3  ;;  %v18636_v24 = vld [vmem:[%s28965_s9 + $0x384] sm:$0xf]  ;;  %v6324_v43 = vadd.f32 %v24913_v13, %v3183_v58 }
 0x442   :  { %v18856_v49 = vld [vmem:[%s28965_s9 + $0xa5c] sm:$0xf0]  ;;  %v15548_v3 = vld [vmem:[%s28965_s9 + $0x3a0] sm:$0xf0] }
 0x443   :  { %v15610_v22 = vld [vmem:[%s28965_s9 + $0x400] sm:$0xf]  ;;  %v16411_v30 = vor.u32 %v18856_v49, %v16410_v61  ;;  %9798 = vmatpush.bf16.msrb.mxu0 %v15643_v26  ;;  %v6353_v61 = vpop.f32.mrf.mxu0  ;;  %v6326_v49 = vadd.f32 %v6325_v31, %v3183_v58  ;;  %v6338_v44 = vadd.f32 %v24940_v46, %v6324_v43  ;;  %v15551_v58 = vor.u32 %v18636_v24, %v15548_v3 }
 0x444   :  { %v18656_v38 = vld [vmem:[%s28965_s9 + $0x41c] sm:$0xf0]  ;;  %6643 = vmatpush.bf16.msra.mxu1 %v14871_v27  ;;  %v15167_v31 = vor.u32 %v18540_v29, %v15164_v60  ;;  %v15484_v27 = vld [vmem:[%s28965_s9 + $0x320] sm:$0xf0] }
 0x445   :  { %v16378_v37 = vld [vmem:[%s28965_s9 + $0xa00] sm:$0xf]  ;;  %9878 = vmatpush.bf16.msra.mxu2 %v15263_v2  ;;  %v15611_v48 = vor.u32 %v18656_v38, %v15610_v22  ;;  %9840 = vmatpush.bf16.msrb.mxu3 %v16411_v30  ;;  %v6379_v2 = vpop.f32.mrf.mxu2  ;;  %v18628_v22 = vld [vmem:[%s28965_s9 + $0x344] sm:$0xf]  ;;  %v6340_v38 = vadd.f32 %v6339_v0, %v6326_v49  ;;  %v6352_v51 = vadd.f32 %v24971_v28, %v6338_v44  ;;  %v6367_v28 = vpop.f32.mrf.mxu1 }
 0x446   :  { %v18848_v17 = vld [vmem:[%s28965_s9 + $0xa1c] sm:$0xf0]  ;;  %v15132_v30 = vld [vmem:[%s28965_s9 + $0x60] sm:$0xf0]  ;;  %v15487_v43 = vor.u32 %v18620_v19, %v15484_v27 }
 0x447   :  { %v16858_v33 = vld [vmem:[%s28965_s9 + $0xdc0] sm:$0xf]  ;;  %v16379_v6 = vor.u32 %v18848_v17, %v16378_v37  ;;  %9799 = vmatpush.bf16.msrb.mxu0 %v15611_v48  ;;  %6644 = vmatmul.bf16.vlgmr.msra.gmra.mxu1 %v22266_v8  ;;  %v18532_v37 = vld [vmem:[%s28965_s9 + $0x44] sm:$0xf]  ;;  %v6116_v17 = vadd.f32 %v24028_v9, %v6102_v7  ;;  %v15519_v9 = vor.u32 %v18628_v22, %v15516_v39 }
 0x448   :  { %v18968_v20 = vld [vmem:[%s28965_s9 + $0xddc] sm:$0xf0]  ;;  %v15135_v47 = vor.u32 %v18532_v37, %v15132_v30  ;;  %v15452_v49 = vld [vmem:[%s28965_s9 + $0x2e0] sm:$0xf0] }
 0x449   :  { %v16090_v56 = vld [vmem:[%s28965_s9 + $0x7c0] sm:$0xf]  ;;  %v16859_v63 = vor.u32 %v18968_v20, %v16858_v33  ;;  %9879 = vmatpush.bf16.msra.mxu2 %v15231_v11  ;;  %9841 = vmatpush.bf16.msrb.mxu3 %v16379_v6  ;;  %v6393_v33 = vpop.f32.mrf.mxu3  ;;  %v6354_v20 = vadd.f32 %v6353_v61, %v6340_v38  ;;  %v6366_v11 = vadd.f32 %v25010_v55, %v6352_v51  ;;  %v18604_v37 = vld [vmem:[%s28965_s9 + $0x284] sm:$0xf] }
 0x44a   :  { %v18776_v53 = vld [vmem:[%s28965_s9 + $0x7dc] sm:$0xf0]  ;;  %9800 = vmatmul.bf16.vlgmr.msrb.gmra.mxu0 %v25058_v15  ;;  %v15420_v30 = vld [vmem:[%s28965_s9 + $0x2a0] sm:$0xf0] }
 0x44b   :  { %v16091_v50 = vor.u32 %v18776_v53, %v16090_v56  ;;  %v16826_v21 = vld [vmem:[%s28965_s9 + $0xd80] sm:$0xf]  ;;  %9848 = vmatpush.bf16.msra.mxu0 %v16859_v63  ;;  %v6368_v0 = vadd.f32 %v6367_v28, %v6354_v20  ;;  %v18524_v63 = vld [vmem:[%s28965_s9 + $0x4] sm:$0xf] }
 0x44c   :  { %v18960_v62 = vld [vmem:[%s28965_s9 + $0xd9c] sm:$0xf0]  ;;  %v15103_v3 = vor.u32 %v18524_v63, %v15100_v25  ;;  %v16284_v28 = vld [vmem:[%s28965_s9 + $0x960] sm:$0xf0] }
 0x44d   :  { %v16058_v40 = vld [vmem:[%s28965_s9 + $0x780] sm:$0xf]  ;;  %v16827_v13 = vor.u32 %v18960_v62, %v16826_v21  ;;  %9806 = vmatpush.bf16.msrb.mxu1 %v16091_v50  ;;  %9890 = vmatpush.bf16.msra.mxu3 %v15583_v42  ;;  %v6407_v50 = vpop.f32.mrf.mxu0  ;;  %v18836_v21 = vld [vmem:[%s28965_s9 + $0x9c4] sm:$0xf]  ;;  %v6381_v24 = vpop.f32.mrf.mxu2 }
 0x44e   :  { %v18768_v4 = vld [vmem:[%s28965_s9 + $0x79c] sm:$0xf0]  ;;  %9880 = vmatpush.bf16.msra.mxu2 %v15199_v57  ;;  %v16348_v62 = vld [vmem:[%s28965_s9 + $0x9e0] sm:$0xf0]  ;;  %v6380_v57 = vadd.f32 %v6379_v2, %v6366_v11  ;;  %v6382_v2 = vadd.f32 %v6381_v24, %v6368_v0 }
 0x44f   :  { %v16059_v26 = vor.u32 %v18768_v4, %v16058_v40  ;;  %v16794_v12 = vld [vmem:[%s28965_s9 + $0xd40] sm:$0xf]  ;;  %9849 = vmatpush.bf16.msra.mxu0 %v16827_v13  ;;  %v16351_v61 = vor.u32 %v18836_v21, %v16348_v62  ;;  %v18612_v13 = vld [vmem:[%s28965_s9 + $0x2c4] sm:$0xf] }
 0x450   :  { %v18952_v41 = vld [vmem:[%s28965_s9 + $0xd5c] sm:$0xf0]  ;;  %v6394_v7 = vadd.f32 %v6393_v33, %v6380_v57  ;;  %v18820_v33 = vld [vmem:[%s28965_s9 + $0x944] sm:$0xf] }
 0x451   :  { %v16026_v46 = vld [vmem:[%s28965_s9 + $0x740] sm:$0xf]  ;;  %v16795_v8 = vor.u32 %v18952_v41, %v16794_v12  ;;  %9807 = vmatpush.bf16.msrb.mxu1 %v16059_v26  ;;  %9891 = vmatpush.bf16.msra.mxu3 %v15551_v58  ;;  %v6421_v26 = vpop.f32.mrf.mxu1  ;;  %v18828_v12 = vld [vmem:[%s28965_s9 + $0x984] sm:$0xf] }
 0x452   :  { %v18760_v14 = vld [vmem:[%s28965_s9 + $0x75c] sm:$0xf0]  ;;  %9881 = vmatpush.bf16.msra.mxu2 %v15167_v31  ;;  %v16316_v41 = vld [vmem:[%s28965_s9 + $0x9a0] sm:$0xf0]  ;;  %v6408_v20 = vadd.f32 %v6407_v50, %v6394_v7 }
 0x453   :  { %v16027_v56 = vor.u32 %v18760_v14, %v16026_v46  ;;  %v16762_v53 = vld [vmem:[%s28965_s9 + $0xd00] sm:$0xf]  ;;  %9850 = vmatpush.bf16.msra.mxu0 %v16795_v8  ;;  %v6395_v46 = vpop.f32.mrf.mxu3  ;;  %v15455_v14 = vor.u32 %v18612_v13, %v15452_v49  ;;  %v16319_v39 = vor.u32 %v18828_v12, %v16316_v41  ;;  %v15388_v19 = vld [vmem:[%s28965_s9 + $0x260] sm:$0xf0] }
 0x454   :  { %v18944_v32 = vld [vmem:[%s28965_s9 + $0xd1c] sm:$0xf0]  ;;  %v6396_v51 = vadd.f32 %v6395_v46, %v6382_v2  ;;  %v18812_v63 = vld [vmem:[%s28965_s9 + $0x904] sm:$0xf] }
 0x455   :  { %v28979_v48 = vld [vmem:[#allocation3_spill] sm:$0xff]  ;;  %v16763_v42 = vor.u32 %v18944_v32, %v16762_v53  ;;  %9808 = vmatpush.bf16.msrb.mxu1 %v16027_v56  ;;  %9892 = vmatpush.bf16.msra.mxu3 %v15519_v9  ;;  %v6409_v53 = vpop.f32.mrf.mxu0  ;;  %v15423_v32 = vor.u32 %v18604_v37, %v15420_v30 }
 0x456   :  { %v6130_v35 = vadd.f32 %v28979_v48, %v6116_v17  ;;  %v15994_v55 = vld [vmem:[%s28965_s9 + $0x700] sm:$0xf]  ;;  %9882 = vmatpush.bf16.msra.mxu2 %v15135_v47  ;;  %v6410_v9 = vadd.f32 %v6409_v53, %v6396_v51  ;;  %v6422_v47 = vadd.f32 %v6421_v26, %v6408_v20  ;;  %v16252_v25 = vld [vmem:[%s28965_s9 + $0x920] sm:$0xf0] }
 0x457   :  { %v18752_v5 = vld [vmem:[%s28965_s9 + $0x71c] sm:$0xf0]  ;;  %9851 = vmatpush.bf16.msra.mxu0 %v16763_v42  ;;  %v18708_v24 = vld [vmem:[%s28965_s9 + $0x5c4] sm:$0xf] }
 0x458   :  { %v6144_v6 = vadd.f32 %v24206_v59, %v6130_v35  ;;  %v15995_v40 = vor.u32 %v18752_v5, %v15994_v55  ;;  %v16730_v4 = vld [vmem:[%s28965_s9 + $0xcc0] sm:$0xf]  ;;  %v16287_v55 = vor.u32 %v18820_v33, %v16284_v28  ;;  %v18596_v5 = vld [vmem:[%s28965_s9 + $0x244] sm:$0xf] }
 0x459   :  { %v18936_v59 = vld [vmem:[%s28965_s9 + $0xcdc] sm:$0xf0]  ;;  %9893 = vmatpush.bf16.msra.mxu3 %v15487_v43  ;;  %v6423_v27 = vpop.f32.mrf.mxu1  ;;  %v15836_v43 = vld [vmem:[%s28965_s9 + $0x5e0] sm:$0xf0] }
 0x45a   :  { %v15962_v29 = vld [vmem:[%s28965_s9 + $0x6c0] sm:$0xf]  ;;  %v6158_v44 = vadd.f32 %v24486_v16, %v6144_v6  ;;  %v16731_v10 = vor.u32 %v18936_v59, %v16730_v4  ;;  %9809 = vmatpush.bf16.msrb.mxu1 %v15995_v40  ;;  %9883 = vmatpush.bf16.msra.mxu2 %v15103_v3  ;;  %v6424_v21 = vadd.f32 %v6423_v27, %v6410_v9  ;;  %v18588_v59 = vld [vmem:[%s28965_s9 + $0x204] sm:$0xf]  ;;  %v6655_v3 = vmax.f32 %v6422_v47, 0.0 }
 0x45b   :  { %v18744_v60 = vld [vmem:[%s28965_s9 + $0x6dc] sm:$0xf0]  ;;  %v15391_v4 = vor.u32 %v18596_v5, %v15388_v19  ;;  %v18900_v2 = vld [vmem:[%s28965_s9 + $0xbc4] sm:$0xf]  ;;  %v15839_v41 = vor.u32 %v18708_v24, %v15836_v43  ;;  %v15330_v19 = vld [vmem:[%s28965_s9 + $0x1c8] sm:$0xf] }
 0x45c   :  { %v15963_v58 = vor.u32 %v18744_v60, %v15962_v29  ;;  %v16698_v31 = vld [vmem:[%s28965_s9 + $0xc80] sm:$0xf]  ;;  %v6172_v17 = vadd.f32 %v24532_v23, %v6158_v44  ;;  %9852 = vmatpush.bf16.msra.mxu0 %v16731_v10  ;;  %v6663_v29 = vmax.f32 %v6424_v21, 0.0  ;;  %v16255_v60 = vor.u32 %v18812_v63, %v16252_v25  ;;  %v18804_v13 = vld [vmem:[%s28965_s9 + $0x8c4] sm:$0xf]  ;;  %v25313_v21 = vpop.f32.mrf.mxu2 }
 0x45d   :  { %v18928_v16 = vld [vmem:[%s28965_s9 + $0xc9c] sm:$0xf0]  ;;  %9884 = vmatmul.bf16.vlgmr.msra.gmra.mxu2 %v24712_v18  ;;  %9894 = vmatpush.bf16.msra.mxu3 %v15455_v14  ;;  %v16220_v49 = vld [vmem:[%s28965_s9 + $0x8e0] sm:$0xf0] }
 0x45e   :  { %v15930_v22 = vld [vmem:[%s28965_s9 + $0x680] sm:$0xf]  ;;  %9932 = vmatpush.bf16.msrb.mxu2 %v16351_v61  ;;  %v16699_v8 = vor.u32 %v18928_v16, %v16698_v31  ;;  %9810 = vmatpush.bf16.msrb.mxu1 %v15963_v58  ;;  %v6186_v0 = vadd.f32 %v24564_v36, %v6172_v17  ;;  %v16604_v61 = vld [vmem:[%s28965_s9 + $0xbe0] sm:$0xf0]  ;;  %v25240_v26 = vpack.c.bf16 %v6663_v29, %v6655_v3  ;;  %v6653_v16 = vmax.f32 %v24264_v52, 0.0  ;;  %v25333_v3 = vpop.f32.mrf.mxu3 }
 0x45f   :  { %v18736_v38 = vld [vmem:[%s28965_s9 + $0x69c] sm:$0xf0]  ;;  %v18700_v58 = vld [vmem:[%s28965_s9 + $0x584] sm:$0xf]  ;;  %v16607_v46 = vor.u32 %v18900_v2, %v16604_v61  ;;  %v16223_v14 = vor.u32 %v18804_v13, %v16220_v49  ;;  %v15266_v2 = vld [vmem:[%s28965_s9 + $0x148] sm:$0xf] }
 0x460   :  { %v15931_v11 = vor.u32 %v18736_v38, %v15930_v22  ;;  %v16666_v56 = vld [vmem:[%s28965_s9 + $0xc40] sm:$0xf]  ;;  %9853 = vmatpush.bf16.msra.mxu0 %v16699_v8  ;;  %v6200_v40 = vadd.f32 %v24566_v54, %v6186_v0  ;;  %v15356_v54 = vld [vmem:[%s28965_s9 + $0x220] sm:$0xf0]  ;;  %9842 = vmatmul.bf16.vlgmr.msrb.gmra.mxu3 %v25240_v26  ;;  %v18585_v0 = vld [vmem:[%s28965_s9 + $0x1e4] sm:$0xf0] }
 0x461   :  { %v18920_v23 = vld [vmem:[%s28965_s9 + $0xc5c] sm:$0xf0]  ;;  %9895 = vmatpush.bf16.msra.mxu3 %v15423_v32  ;;  %v15359_v7 = vor.u32 %v18588_v59, %v15356_v54  ;;  %v15804_v31 = vld [vmem:[%s28965_s9 + $0x5a0] sm:$0xf0]  ;;  %v18569_v61 = vld [vmem:[%s28965_s9 + $0x164] sm:$0xf0] }
 0x462   :  { %v15898_v48 = vld [vmem:[%s28965_s9 + $0x640] sm:$0xf]  ;;  %9933 = vmatpush.bf16.msrb.mxu2 %v16319_v39  ;;  %v16667_v50 = vor.u32 %v18920_v23, %v16666_v56  ;;  %9811 = vmatpush.bf16.msrb.mxu1 %v15931_v11  ;;  %v6661_v10 = vmax.f32 %v6200_v40, 0.0  ;;  %v18892_v22 = vld [vmem:[%s28965_s9 + $0xb84] sm:$0xf]  ;;  %v15807_v39 = vor.u32 %v18700_v58, %v15804_v31 }
 0x463   :  { %v18728_v35 = vld [vmem:[%s28965_s9 + $0x65c] sm:$0xf0]  ;;  %v16572_v38 = vld [vmem:[%s28965_s9 + $0xba0] sm:$0xf0]  ;;  %v18577_v40 = vld [vmem:[%s28965_s9 + $0x1a4] sm:$0xf0] }
 0x464   :  { %v15866_v6 = vld [vmem:[%s28965_s9 + $0x600] sm:$0xf]  ;;  %v15899_v62 = vor.u32 %v18728_v35, %v15898_v48  ;;  %9854 = vmatpush.bf16.msra.mxu0 %v16667_v50  ;;  %v18796_v51 = vld [vmem:[%s28965_s9 + $0x884] sm:$0xf]  ;;  %v25262_v37 = vpack.c.bf16 %v6661_v10, %v6653_v16  ;;  %v16575_v33 = vor.u32 %v18892_v22, %v16572_v38  ;;  %v15267_v10 = vor.u32 %v18569_v61, %v15266_v2  ;;  %v15234_v31 = vld [vmem:[%s28965_s9 + $0x108] sm:$0xf] }
 0x465   :  { %v18720_v36 = vld [vmem:[%s28965_s9 + $0x61c] sm:$0xf0]  ;;  %9896 = vmatpush.bf16.msra.mxu3 %v15391_v4  ;;  %v16188_v52 = vld [vmem:[%s28965_s9 + $0x8a0] sm:$0xf0]  ;;  %v18561_v16 = vld [vmem:[%s28965_s9 + $0x124] sm:$0xf0] }
 0x466   :  { %v16634_v42 = vld [vmem:[%s28965_s9 + $0xc00] sm:$0xf]  ;;  %9934 = vmatpush.bf16.msrb.mxu2 %v16287_v55  ;;  %9812 = vmatpush.bf16.msrb.mxu1 %v15899_v62  ;;  %v15867_v12 = vor.u32 %v18720_v36, %v15866_v6  ;;  %v18692_v30 = vld [vmem:[%s28965_s9 + $0x544] sm:$0xf]  ;;  %v16191_v28 = vor.u32 %v18796_v51, %v16188_v52  ;;  %v15331_v62 = vor.u32 %v18585_v0, %v15330_v19  ;;  %v3184_v51 = vperm.slane %v24701_v1, 6 }
 0x467   :  { %v18912_v57 = vld [vmem:[%s28965_s9 + $0xc1c] sm:$0xf0]  ;;  %v15772_v17 = vld [vmem:[%s28965_s9 + $0x560] sm:$0xf0] }
 0x468   :  { %v16635_v44 = vor.u32 %v18912_v57, %v16634_v42  ;;  %v18884_v8 = vld [vmem:[%s28965_s9 + $0xb44] sm:$0xf]  ;;  %v15775_v23 = vor.u32 %v18692_v30, %v15772_v17  ;;  %v15298_v57 = vld [vmem:[%s28965_s9 + $0x188] sm:$0xf]  ;;  %v19032_v30 = vld [vmem:[%s28965_s9 + $0xfdc] sm:$0xf0]  ;;  %v6477_v17 = vpop.f32.mrf.mxu1  ;;  %v6436_v0 = vadd.f32 %v25313_v21, %v3184_v51 }
 0x469   :  { %9897 = vmatpush.bf16.msra.mxu3 %v15359_v7  ;;  %v16540_v20 = vld [vmem:[%s28965_s9 + $0xb60] sm:$0xf0]  ;;  %v15299_v29 = vor.u32 %v18577_v40, %v15298_v57  ;;  %v17050_v21 = vld [vmem:[%s28965_s9 + $0xf40] sm:$0xf] }
 0x46a   :  { %9935 = vmatpush.bf16.msrb.mxu2 %v16255_v60  ;;  %9855 = vmatpush.bf16.msra.mxu0 %v16635_v44  ;;  %v18788_v11 = vld [vmem:[%s28965_s9 + $0x844] sm:$0xf]  ;;  %v16543_v48 = vor.u32 %v18884_v8, %v16540_v20  ;;  %v15586_v8 = vld [vmem:[%s28965_s9 + $0x3c8] sm:$0xf] }
 0x46b   :  { %9813 = vmatpush.bf16.msrb.mxu1 %v15867_v12  ;;  %v16156_v56 = vld [vmem:[%s28965_s9 + $0x860] sm:$0xf0] }
 0x46c   :  { %v18684_v53 = vld [vmem:[%s28965_s9 + $0x504] sm:$0xf]  ;;  %v16159_v35 = vor.u32 %v18788_v11, %v16156_v56  ;;  %v18649_v11 = vld [vmem:[%s28965_s9 + $0x3e4] sm:$0xf0] }
 0x46d   :  { %9946 = vmatpush.bf16.msrb.mxu3 %v16607_v46  ;;  %v15740_v32 = vld [vmem:[%s28965_s9 + $0x520] sm:$0xf0]  ;;  %v15202_v56 = vld [vmem:[%s28965_s9 + $0xc8] sm:$0xf] }
 0x46e   :  { %9904 = vmatpush.bf16.msrb.mxu0 %v15839_v41  ;;  %9936 = vmatpush.bf16.msrb.mxu2 %v16223_v14  ;;  %v18876_v9 = vld [vmem:[%s28965_s9 + $0xb04] sm:$0xf]  ;;  %v15743_v27 = vor.u32 %v18684_v53, %v15740_v32  ;;  %v6463_v41 = vpop.f32.mrf.mxu0  ;;  %v6437_v14 = vpop.f32.mrf.mxu2 }
 0x46f   :  { %9814 = vmatmul.bf16.vlgmr.msrb.gmra.mxu1 %v25262_v37  ;;  %v16508_v47 = vld [vmem:[%s28965_s9 + $0xb20] sm:$0xf0]  ;;  %v6451_v32 = vpop.f32.mrf.mxu3 }
 0x470   :  { %v18780_v55 = vld [vmem:[%s28965_s9 + $0x804] sm:$0xf]  ;;  %v16511_v6 = vor.u32 %v18876_v9, %v16508_v47  ;;  %9898 = vmatmul.bf16.vlgmr.msra.gmra.mxu3 %v24841_v34  ;;  %v19024_v9 = vld [vmem:[%s28965_s9 + $0xf9c] sm:$0xf0]  ;;  %v15587_v47 = vor.u32 %v18649_v11, %v15586_v8  ;;  %v6479_v2 = vpop.f32.mrf.mxu1  ;;  %v18617_v11 = vld [vmem:[%s28965_s9 + $0x2e4] sm:$0xf0] }
 0x471   :  { %9947 = vmatpush.bf16.msrb.mxu3 %v16575_v33  ;;  %v16124_v5 = vld [vmem:[%s28965_s9 + $0x820] sm:$0xf0]  ;;  %v15235_v33 = vor.u32 %v18561_v16, %v15234_v31  ;;  %v18625_v31 = vld [vmem:[%s28965_s9 + $0x324] sm:$0xf0] }
 0x472   :  { %9905 = vmatpush.bf16.msrb.mxu0 %v15807_v39  ;;  %9937 = vmatpush.bf16.msrb.mxu2 %v16191_v28  ;;  %v18676_v63 = vld [vmem:[%s28965_s9 + $0x4c4] sm:$0xf]  ;;  %v16127_v50 = vor.u32 %v18780_v55, %v16124_v5  ;;  %v17114_v39 = vld [vmem:[%s28965_s9 + $0xfc0] sm:$0xf]  ;;  %v15554_v5 = vld [vmem:[%s28965_s9 + $0x388] sm:$0xf] }
 0x473   :  { %v15708_v25 = vld [vmem:[%s28965_s9 + $0x4e0] sm:$0xf0]  ;;  %v17115_v20 = vor.u32 %v19032_v30, %v17114_v39  ;;  %v15106_v16 = vld [vmem:[%s28965_s9 + $0x8] sm:$0xf]  ;;  %v19000_v39 = vld [vmem:[%s28965_s9 + $0xedc] sm:$0xf0] }
 0x474   :  { %v18868_v36 = vld [vmem:[%s28965_s9 + $0xac4] sm:$0xf]  ;;  %v15711_v4 = vor.u32 %v18676_v63, %v15708_v25  ;;  %v15170_v63 = vld [vmem:[%s28965_s9 + $0x88] sm:$0xf] }
 0x475   :  { %9948 = vmatpush.bf16.msrb.mxu3 %v16543_v48  ;;  %v16476_v42 = vld [vmem:[%s28965_s9 + $0xae0] sm:$0xf0]  ;;  %9862 = vmatpush.bf16.msra.mxu1 %v17115_v20  ;;  %v18545_v25 = vld [vmem:[%s28965_s9 + $0xa4] sm:$0xf0] }
 0x476   :  { %9906 = vmatpush.bf16.msrb.mxu0 %v15775_v23  ;;  %9938 = vmatpush.bf16.msrb.mxu2 %v16159_v35  ;;  %v18668_v59 = vld [vmem:[%s28965_s9 + $0x484] sm:$0xf]  ;;  %v16479_v43 = vor.u32 %v18868_v36, %v16476_v42  ;;  %v18553_v23 = vld [vmem:[%s28965_s9 + $0xe4] sm:$0xf0]  ;;  %v17082_v35 = vld [vmem:[%s28965_s9 + $0xf80] sm:$0xf]  ;;  %v6450_v36 = vadd.f32 %v25333_v3, %v6436_v0  ;;  %v15171_v40 = vor.u32 %v18545_v25, %v15170_v63 }
 0x477   :  { %v15676_v24 = vld [vmem:[%s28965_s9 + $0x4a0] sm:$0xf0]  ;;  %v15203_v55 = vor.u32 %v18553_v23, %v15202_v56  ;;  %v17083_v19 = vor.u32 %v19024_v9, %v17082_v35  ;;  %v19016_v42 = vld [vmem:[%s28965_s9 + $0xf5c] sm:$0xf0]  ;;  %v18633_v3 = vld [vmem:[%s28965_s9 + $0x364] sm:$0xf0] }
 0x478   :  { %v18860_v60 = vld [vmem:[%s28965_s9 + $0xa84] sm:$0xf]  ;;  %v15679_v13 = vor.u32 %v18668_v59, %v15676_v24  ;;  %v17051_v59 = vor.u32 %v19016_v42, %v17050_v21  ;;  %v15458_v20 = vld [vmem:[%s28965_s9 + $0x2c8] sm:$0xf]  ;;  %v18992_v35 = vld [vmem:[%s28965_s9 + $0xe9c] sm:$0xf0] }
 0x479   :  { %9949 = vmatpush.bf16.msrb.mxu3 %v16511_v6  ;;  %v16444_v54 = vld [vmem:[%s28965_s9 + $0xaa0] sm:$0xf0]  ;;  %v6491_v6 = vpop.f32.mrf.mxu2  ;;  %9863 = vmatpush.bf16.msra.mxu1 %v17083_v19  ;;  %v16322_v23 = vld [vmem:[%s28965_s9 + $0x988] sm:$0xf] }
 0x47a   :  { %9907 = vmatpush.bf16.msrb.mxu0 %v15743_v27  ;;  %9939 = vmatpush.bf16.msrb.mxu2 %v16127_v50  ;;  %v18660_v49 = vld [vmem:[%s28965_s9 + $0x444] sm:$0xf]  ;;  %v16447_v12 = vor.u32 %v18860_v60, %v16444_v54  ;;  %v18641_v27 = vld [vmem:[%s28965_s9 + $0x3a4] sm:$0xf0]  ;;  %v6465_v50 = vpop.f32.mrf.mxu0  ;;  %v6505_v54 = vpop.f32.mrf.mxu3 }
 0x47b   :  { %v15644_v44 = vld [vmem:[%s28965_s9 + $0x460] sm:$0xf0]  ;;  %v15555_v57 = vor.u32 %v18641_v27, %v15554_v5  ;;  %v18537_v60 = vld [vmem:[%s28965_s9 + $0x64] sm:$0xf0] }
 0x47c   :  { %v18852_v7 = vld [vmem:[%s28965_s9 + $0xa44] sm:$0xf]  ;;  %v15647_v46 = vor.u32 %v18660_v49, %v15644_v44  ;;  %v17018_v49 = vld [vmem:[%s28965_s9 + $0xf00] sm:$0xf]  ;;  %v15426_v0 = vld [vmem:[%s28965_s9 + $0x288] sm:$0xf] }
 0x47d   :  { %9940 = vmatmul.bf16.vlgmr.msrb.gmra.mxu2 %v24942_v45  ;;  %9950 = vmatpush.bf16.msrb.mxu3 %v16479_v43  ;;  %v16412_v58 = vld [vmem:[%s28965_s9 + $0xa60] sm:$0xf0]  ;;  %v6464_v43 = vadd.f32 %v6463_v41, %v6450_v36  ;;  %v19008_v44 = vld [vmem:[%s28965_s9 + $0xf1c] sm:$0xf0]  ;;  %v18609_v27 = vld [vmem:[%s28965_s9 + $0x2a4] sm:$0xf0] }
 0x47e   :  { %9988 = vmatpush.bf16.msra.mxu2 %v15331_v62  ;;  %9908 = vmatpush.bf16.msrb.mxu0 %v15711_v4  ;;  %v18652_v22 = vld [vmem:[%s28965_s9 + $0x404] sm:$0xf]  ;;  %v16415_v52 = vor.u32 %v18852_v7, %v16412_v58  ;;  %v6438_v62 = vadd.f32 %v6437_v14, %v3184_v51  ;;  %v15522_v4 = vld [vmem:[%s28965_s9 + $0x348] sm:$0xf]  ;;  %v17019_v7 = vor.u32 %v19008_v44, %v17018_v49 }
 0x47f   :  { %v15612_v38 = vld [vmem:[%s28965_s9 + $0x420] sm:$0xf0]  ;;  %9864 = vmatpush.bf16.msra.mxu1 %v17051_v59  ;;  %v16290_v63 = vld [vmem:[%s28965_s9 + $0x948] sm:$0xf]  ;;  %v15427_v21 = vor.u32 %v18609_v27, %v15426_v0 }
 0x480   :  { %v18844_v28 = vld [vmem:[%s28965_s9 + $0xa04] sm:$0xf]  ;;  %v15615_v53 = vor.u32 %v18652_v22, %v15612_v38  ;;  %v6452_v24 = vadd.f32 %v6451_v32, %v6438_v62  ;;  %v16354_v22 = vld [vmem:[%s28965_s9 + $0x9c8] sm:$0xf]  ;;  %v18984_v62 = vld [vmem:[%s28965_s9 + $0xe5c] sm:$0xf0] }
 0x481   :  { %9951 = vmatpush.bf16.msrb.mxu3 %v16447_v12  ;;  %v16380_v1 = vld [vmem:[%s28965_s9 + $0xa20] sm:$0xf0]  ;;  %v15523_v12 = vor.u32 %v18633_v3, %v15522_v4  ;;  %v18841_v38 = vld [vmem:[%s28965_s9 + $0x9e4] sm:$0xf0]  ;;  %v6493_v30 = vpop.f32.mrf.mxu2 }
 0x482   :  { %9989 = vmatpush.bf16.msra.mxu2 %v15299_v29  ;;  %9909 = vmatpush.bf16.msrb.mxu0 %v15679_v13  ;;  %v16383_v48 = vor.u32 %v18844_v28, %v16380_v1  ;;  %v15138_v29 = vld [vmem:[%s28965_s9 + $0x48] sm:$0xf]  ;;  %v6466_v61 = vadd.f32 %v6465_v50, %v6452_v24  ;;  %v6478_v13 = vadd.f32 %v6477_v17, %v6464_v43  ;;  %v6519_v14 = vpop.f32.mrf.mxu0  ;;  %v6507_v9 = vpop.f32.mrf.mxu3  ;;  %v16922_v50 = vld [vmem:[%s28965_s9 + $0xe40] sm:$0xf]  ;;  %v18964_v3 = vld [vmem:[%s28965_s9 + $0xdc4] sm:$0xf] }
 0x483   :  { %v15139_v41 = vor.u32 %v18537_v60, %v15138_v29  ;;  %9865 = vmatpush.bf16.msra.mxu1 %v17019_v7  ;;  %v16355_v8 = vor.u32 %v18841_v38, %v16354_v22  ;;  %v18825_v25 = vld [vmem:[%s28965_s9 + $0x964] sm:$0xf0]  ;;  %v16923_v42 = vor.u32 %v18984_v62, %v16922_v50  ;;  %v18940_v62 = vld [vmem:[%s28965_s9 + $0xd04] sm:$0xf] }
 0x484   :  { %v6480_v58 = vadd.f32 %v6479_v2, %v6466_v61  ;;  %v6492_v51 = vadd.f32 %v6491_v6, %v6478_v13  ;;  %v6533_v56 = vpop.f32.mrf.mxu1  ;;  %v16291_v4 = vor.u32 %v18825_v25, %v16290_v63  ;;  %v15394_v59 = vld [vmem:[%s28965_s9 + $0x248] sm:$0xf]  ;;  %v16860_v2 = vld [vmem:[%s28965_s9 + $0xde0] sm:$0xf0]  ;;  %v16890_v61 = vld [vmem:[%s28965_s9 + $0xe00] sm:$0xf] }
 0x485   :  { %9952 = vmatpush.bf16.msrb.mxu3 %v16415_v52  ;;  %v16986_v52 = vld [vmem:[%s28965_s9 + $0xec0] sm:$0xf]  ;;  %v18601_v24 = vld [vmem:[%s28965_s9 + $0x264] sm:$0xf0]  ;;  %v16863_v22 = vor.u32 %v18964_v3, %v16860_v2  ;;  %v18932_v3 = vld [vmem:[%s28965_s9 + $0xcc4] sm:$0xf] }
 0x486   :  { %9990 = vmatpush.bf16.msra.mxu2 %v15267_v10  ;;  %9910 = vmatpush.bf16.msrb.mxu0 %v15647_v46  ;;  %v15490_v10 = vld [vmem:[%s28965_s9 + $0x308] sm:$0xf]  ;;  %v16987_v28 = vor.u32 %v19000_v39, %v16986_v52  ;;  %v6494_v1 = vadd.f32 %v6493_v30, %v6480_v58  ;;  %v6506_v32 = vadd.f32 %v6505_v54, %v6492_v51  ;;  %v18976_v13 = vld [vmem:[%s28965_s9 + $0xe1c] sm:$0xf0]  ;;  %v18956_v30 = vld [vmem:[%s28965_s9 + $0xd84] sm:$0xf] }
 0x487   :  { %v18529_v46 = vld [vmem:[%s28965_s9 + $0x24] sm:$0xf0]  ;;  %v15491_v17 = vor.u32 %v18625_v31, %v15490_v10  ;;  %v15395_v49 = vor.u32 %v18601_v24, %v15394_v59  ;;  %v16092_v10 = vld [vmem:[%s28965_s9 + $0x7e0] sm:$0xf0]  ;;  %v18581_v2 = vld [vmem:[%s28965_s9 + $0x1cc] sm:$0xf] }
 0x488   :  { %9866 = vmatpush.bf16.msra.mxu1 %v16987_v28  ;;  %v6508_v5 = vadd.f32 %v6507_v9, %v6494_v1  ;;  %v6520_v6 = vadd.f32 %v6519_v14, %v6506_v32  ;;  %v16258_v29 = vld [vmem:[%s28965_s9 + $0x908] sm:$0xf]  ;;  %v18764_v28 = vld [vmem:[%s28965_s9 + $0x784] sm:$0xf] }
 0x489   :  { %9953 = vmatpush.bf16.msrb.mxu3 %v16383_v48  ;;  %v16954_v48 = vld [vmem:[%s28965_s9 + $0xe80] sm:$0xf]  ;;  %v18817_v60 = vld [vmem:[%s28965_s9 + $0x924] sm:$0xf0]  ;;  %v16060_v1 = vld [vmem:[%s28965_s9 + $0x7a0] sm:$0xf0] }
 0x48a   :  { %9991 = vmatpush.bf16.msra.mxu2 %v15235_v33  ;;  %9911 = vmatpush.bf16.msrb.mxu0 %v15615_v53  ;;  %v15107_v33 = vor.u32 %v18529_v46, %v15106_v16  ;;  %v18833_v53 = vld [vmem:[%s28965_s9 + $0x9a4] sm:$0xf0]  ;;  %v6521_v36 = vpop.f32.mrf.mxu0  ;;  %v16259_v31 = vor.u32 %v18817_v60, %v16258_v29  ;;  %v16796_v9 = vld [vmem:[%s28965_s9 + $0xd60] sm:$0xf0] }
 0x48b   :  { %v16323_v19 = vor.u32 %v18833_v53, %v16322_v23  ;;  %v15362_v44 = vld [vmem:[%s28965_s9 + $0x208] sm:$0xf]  ;;  %v16732_v29 = vld [vmem:[%s28965_s9 + $0xce0] sm:$0xf0] }
 0x48c   :  { %9954 = vmatmul.bf16.vlgmr.msrb.gmra.mxu3 %v25240_v26  ;;  %v6535_v43 = vpop.f32.mrf.mxu1  ;;  %v18593_v16 = vld [vmem:[%s28965_s9 + $0x224] sm:$0xf0] }
 0x48d   :  { %10002 = vmatpush.bf16.msra.mxu3 %v15587_v47  ;;  %v15459_v47 = vor.u32 %v18617_v11, %v15458_v20  ;;  %v16610_v46 = vld [vmem:[%s28965_s9 + $0xbc8] sm:$0xf] }
 0x48e   :  { %9992 = vmatpush.bf16.msra.mxu2 %v15203_v55  ;;  %v16955_v55 = vor.u32 %v18992_v35, %v16954_v48  ;;  %v18905_v38 = vld [vmem:[%s28965_s9 + $0xbe4] sm:$0xf0]  ;;  %v18948_v35 = vld [vmem:[%s28965_s9 + $0xd44] sm:$0xf] }
 0x48f   :  { %v16226_v51 = vld [vmem:[%s28965_s9 + $0x8c8] sm:$0xf]  ;;  %v16799_v63 = vor.u32 %v18948_v35, %v16796_v9 }
 0x490   :  { %9867 = vmatpush.bf16.msra.mxu1 %v16955_v55  ;;  %v18809_v52 = vld [vmem:[%s28965_s9 + $0x8e4] sm:$0xf0]  ;;  %v16028_v55 = vld [vmem:[%s28965_s9 + $0x760] sm:$0xf0] }
 0x491   :  { %10003 = vmatpush.bf16.msra.mxu3 %v15555_v57  ;;  %v6522_v57 = vadd.f32 %v6521_v36, %v6508_v5  ;;  %v16227_v20 = vor.u32 %v18809_v52, %v16226_v51  ;;  %v16578_v11 = vld [vmem:[%s28965_s9 + $0xb88] sm:$0xf]  ;;  %v16764_v36 = vld [vmem:[%s28965_s9 + $0xd20] sm:$0xf0] }
 0x492   :  { %9993 = vmatpush.bf16.msra.mxu2 %v15171_v40  ;;  %v6534_v40 = vadd.f32 %v6533_v56, %v6520_v6  ;;  %v16063_v56 = vor.u32 %v18764_v28, %v16060_v1  ;;  %v18897_v53 = vld [vmem:[%s28965_s9 + $0xba4] sm:$0xf0]  ;;  %v16767_v24 = vor.u32 %v18940_v62, %v16764_v36  ;;  %v18732_v51 = vld [vmem:[%s28965_s9 + $0x684] sm:$0xf]  ;;  %v15236_v36 = vld [vmem:[%s28965_s9 + $0x128] sm:$0xf0] }
 0x493   :  { %v6536_v54 = vadd.f32 %v6535_v43, %v6522_v57  ;;  %v16194_v32 = vld [vmem:[%s28965_s9 + $0x888] sm:$0xf]  ;;  %v16579_v5 = vor.u32 %v18897_v53, %v16578_v11  ;;  %v15932_v52 = vld [vmem:[%s28965_s9 + $0x6a0] sm:$0xf0]  ;;  %v15268_v53 = vld [vmem:[%s28965_s9 + $0x168] sm:$0xf0] }
 0x494   :  { %9868 = vmatpush.bf16.msra.mxu1 %v16923_v42  ;;  %v6656_v7 = vmax.f32 %v6534_v40, 0.0  ;;  %v18801_v48 = vld [vmem:[%s28965_s9 + $0x8a4] sm:$0xf0]  ;;  %v15996_v42 = vld [vmem:[%s28965_s9 + $0x720] sm:$0xf0] }
 0x495   :  { %10004 = vmatpush.bf16.msra.mxu3 %v15523_v12  ;;  %v16891_v12 = vor.u32 %v18976_v13, %v16890_v61  ;;  %v6664_v58 = vmax.f32 %v6536_v54, 0.0  ;;  %v16546_v0 = vld [vmem:[%s28965_s9 + $0xb48] sm:$0xf]  ;;  %v15332_v61 = vld [vmem:[%s28965_s9 + $0x1e8] sm:$0xf0] }
 0x496   :  { %9994 = vmatpush.bf16.msra.mxu2 %v15139_v41  ;;  %v18772_v41 = vld [vmem:[%s28965_s9 + $0x7c4] sm:$0xf]  ;;  %v18889_v25 = vld [vmem:[%s28965_s9 + $0xb64] sm:$0xf0] }
 0x497   :  { %v16095_v14 = vor.u32 %v18772_v41, %v16092_v10  ;;  %v25552_v39 = vpack.c.bf16 %v6664_v58, %v6656_v7  ;;  %v16162_v6 = vld [vmem:[%s28965_s9 + $0x848] sm:$0xf]  ;;  %v16547_v57 = vor.u32 %v18889_v25, %v16546_v0  ;;  %v18740_v13 = vld [vmem:[%s28965_s9 + $0x6c4] sm:$0xf]  ;;  %v25646_v41 = vpop.f32.mrf.mxu2  ;;  %v16735_v10 = vor.u32 %v18932_v3, %v16732_v29 }
 0x498   :  { %9869 = vmatpush.bf16.msra.mxu1 %v16891_v12  ;;  %v18793_v50 = vld [vmem:[%s28965_s9 + $0x864] sm:$0xf0]  ;;  %v18916_v11 = vld [vmem:[%s28965_s9 + $0xc44] sm:$0xf] }
 0x499   :  { %10005 = vmatpush.bf16.msra.mxu3 %v15491_v17  ;;  %v16828_v17 = vld [vmem:[%s28965_s9 + $0xda0] sm:$0xf0]  ;;  %9856 = vmatmul.bf16.vlgmr.msra.gmra.mxu0 %v25552_v39  ;;  %v16163_v40 = vor.u32 %v18793_v50, %v16162_v6  ;;  %v18881_v43 = vld [vmem:[%s28965_s9 + $0xb24] sm:$0xf0]  ;;  %v18557_v50 = vld [vmem:[%s28965_s9 + $0x10c] sm:$0xf] }
 0x49a   :  { %9995 = vmatpush.bf16.msra.mxu2 %v15107_v33  ;;  %v15363_v33 = vor.u32 %v18593_v16, %v15362_v44  ;;  %9960 = vmatpush.bf16.msra.mxu0 %v16863_v22  ;;  %v16831_v23 = vor.u32 %v18956_v30, %v16828_v17  ;;  %v16130_v60 = vld [vmem:[%s28965_s9 + $0x808] sm:$0xf]  ;;  %v15335_v16 = vor.u32 %v18581_v2, %v15332_v61  ;;  %v18573_v22 = vld [vmem:[%s28965_s9 + $0x18c] sm:$0xf]  ;;  %v18908_v0 = vld [vmem:[%s28965_s9 + $0xc04] sm:$0xf] }
 0x49b   :  { %v18785_v54 = vld [vmem:[%s28965_s9 + $0x824] sm:$0xf0]  ;;  %v15935_v17 = vor.u32 %v18732_v51, %v15932_v52  ;;  %v18645_v2 = vld [vmem:[%s28965_s9 + $0x3cc] sm:$0xf] }
 0x49c   :  { %9918 = vmatpush.bf16.msrb.mxu1 %v16095_v14  ;;  %v16131_v7 = vor.u32 %v18785_v54, %v16130_v60  ;;  %v16482_v58 = vld [vmem:[%s28965_s9 + $0xac8] sm:$0xf]  ;;  %v16700_v14 = vld [vmem:[%s28965_s9 + $0xca0] sm:$0xf0]  ;;  %v15239_v54 = vor.u32 %v18557_v50, %v15236_v36  ;;  %v15588_v61 = vld [vmem:[%s28965_s9 + $0x3e8] sm:$0xf0] }
 0x49d   :  { %9996 = vmatmul.bf16.vlgmr.msra.gmra.mxu2 %v24712_v18  ;;  %10006 = vmatpush.bf16.msra.mxu3 %v15459_v47  ;;  %v18756_v47 = vld [vmem:[%s28965_s9 + $0x744] sm:$0xf]  ;;  %v16450_v1 = vld [vmem:[%s28965_s9 + $0xa88] sm:$0xf]  ;;  %v15492_v50 = vld [vmem:[%s28965_s9 + $0x328] sm:$0xf0] }
 0x49e   :  { %10044 = vmatpush.bf16.msrb.mxu2 %v16355_v8  ;;  %v16611_v8 = vor.u32 %v18905_v38, %v16610_v46  ;;  %v16031_v27 = vor.u32 %v18756_v47, %v16028_v55  ;;  %9961 = vmatpush.bf16.msra.mxu0 %v16831_v23  ;;  %v18924_v46 = vld [vmem:[%s28965_s9 + $0xc84] sm:$0xf]  ;;  %v15300_v38 = vld [vmem:[%s28965_s9 + $0x1a8] sm:$0xf0]  ;;  %v16418_v9 = vld [vmem:[%s28965_s9 + $0xa48] sm:$0xf]  ;;  %v6575_v55 = vpop.f32.mrf.mxu0 }
 0x49f   :  { %v16703_v28 = vor.u32 %v18924_v46, %v16700_v14  ;;  %v18565_v23 = vld [vmem:[%s28965_s9 + $0x14c] sm:$0xf]  ;;  %v15842_v25 = vld [vmem:[%s28965_s9 + $0x5c8] sm:$0xf]  ;;  %v6549_v62 = vpop.f32.mrf.mxu2 }
 0x4a0   :  { %9919 = vmatpush.bf16.msrb.mxu1 %v16063_v56  ;;  %v16668_v56 = vld [vmem:[%s28965_s9 + $0xc60] sm:$0xf0]  ;;  %v18713_v6 = vld [vmem:[%s28965_s9 + $0x5e4] sm:$0xf0]  ;;  %v18637_v14 = vld [vmem:[%s28965_s9 + $0x38c] sm:$0xf] }
 0x4a1   :  { %10007 = vmatpush.bf16.msra.mxu3 %v15427_v21  ;;  %v18748_v21 = vld [vmem:[%s28965_s9 + $0x704] sm:$0xf]  ;;  %v16386_v3 = vld [vmem:[%s28965_s9 + $0xa08] sm:$0xf]  ;;  %v15843_v60 = vor.u32 %v18713_v6, %v15842_v25  ;;  %v18621_v6 = vld [vmem:[%s28965_s9 + $0x30c] sm:$0xf] }
 0x4a2   :  { %10045 = vmatpush.bf16.msrb.mxu2 %v16323_v19  ;;  %v16195_v19 = vor.u32 %v18801_v48, %v16194_v32  ;;  %v15999_v59 = vor.u32 %v18748_v21, %v15996_v42  ;;  %9962 = vmatpush.bf16.msra.mxu0 %v16799_v63  ;;  %v18724_v32 = vld [vmem:[%s28965_s9 + $0x644] sm:$0xf]  ;;  %v15271_v63 = vor.u32 %v18565_v23, %v15268_v53  ;;  %v18849_v29 = vld [vmem:[%s28965_s9 + $0xa24] sm:$0xf0]  ;;  %v18629_v53 = vld [vmem:[%s28965_s9 + $0x34c] sm:$0xf] }
 0x4a3   :  { %v15900_v48 = vld [vmem:[%s28965_s9 + $0x660] sm:$0xf0] }
 0x4a4   :  { %9920 = vmatpush.bf16.msrb.mxu1 %v16031_v27  ;;  %v15903_v47 = vor.u32 %v18724_v32, %v15900_v48  ;;  %v16636_v27 = vld [vmem:[%s28965_s9 + $0xc20] sm:$0xf0]  ;;  %v15524_v32 = vld [vmem:[%s28965_s9 + $0x368] sm:$0xf0] }
 0x4a5   :  { %10008 = vmatpush.bf16.msra.mxu3 %v15395_v49  ;;  %v15964_v49 = vld [vmem:[%s28965_s9 + $0x6e0] sm:$0xf0] }
 0x4a6   :  { %10046 = vmatpush.bf16.msrb.mxu2 %v16291_v4  ;;  %v16514_v4 = vld [vmem:[%s28965_s9 + $0xb08] sm:$0xf]  ;;  %v15967_v12 = vor.u32 %v18740_v13, %v15964_v49  ;;  %9963 = vmatpush.bf16.msra.mxu0 %v16767_v24  ;;  %v18716_v21 = vld [vmem:[%s28965_s9 + $0x604] sm:$0xf]  ;;  %v6589_v24 = vpop.f32.mrf.mxu1 }
 0x4a7   :  { %v16515_v44 = vor.u32 %v18881_v43, %v16514_v4  ;;  %v15868_v42 = vld [vmem:[%s28965_s9 + $0x620] sm:$0xf0]  ;;  %v16639_v43 = vor.u32 %v18908_v0, %v16636_v27  ;;  %v15810_v13 = vld [vmem:[%s28965_s9 + $0x588] sm:$0xf]  ;;  %v6603_v52 = vpop.f32.mrf.mxu2  ;;  %v15527_v0 = vor.u32 %v18629_v53, %v15524_v32 }
 0x4a8   :  { %9921 = vmatpush.bf16.msrb.mxu1 %v15999_v59  ;;  %v19183_v4 = vld [vmem:[%s28964_s8] sm:$0xff] }
 0x4a9   :  { %10009 = vmatpush.bf16.msra.mxu3 %v15363_v33  ;;  %9912 = vmatmul.bf16.vlgmr.msrb.gmra.mxu0 %v25058_v15  ;;  %v25673_v33 = vpop.f32.mrf.mxu3  ;;  %v3185_v59 = vperm.slane %v19183_v4, 7  ;;  %v18837_v4 = vld [vmem:[%s28965_s9 + $0x9cc] sm:$0xf] }
 0x4aa   :  { %10047 = vmatpush.bf16.msrb.mxu2 %v16259_v31  ;;  %v18873_v31 = vld [vmem:[%s28965_s9 + $0xae4] sm:$0xf0]  ;;  %9964 = vmatpush.bf16.msra.mxu0 %v16735_v10  ;;  %v15204_v10 = vld [vmem:[%s28965_s9 + $0xe8] sm:$0xf0] }
 0x4ab   :  { %v16483_v30 = vor.u32 %v18873_v31, %v16482_v58  ;;  %v15591_v58 = vor.u32 %v18645_v2, %v15588_v61  ;;  %v6548_v31 = vadd.f32 %v25646_v41, %v3185_v59  ;;  %v6550_v51 = vadd.f32 %v6549_v62, %v3185_v59  ;;  %v18697_v41 = vld [vmem:[%s28965_s9 + $0x564] sm:$0xf0]  ;;  %v16356_v59 = vld [vmem:[%s28965_s9 + $0x9e8] sm:$0xf0] }
 0x4ac   :  { %10010 = vmatmul.bf16.vlgmr.msra.gmra.mxu3 %v24841_v34  ;;  %9922 = vmatpush.bf16.msrb.mxu1 %v15967_v12  ;;  %v18549_v12 = vld [vmem:[%s28965_s9 + $0xcc] sm:$0xf]  ;;  %v15714_v62 = vld [vmem:[%s28965_s9 + $0x4c8] sm:$0xf] }
 0x4ad   :  { %10058 = vmatpush.bf16.msrb.mxu3 %v16611_v8  ;;  %v18865_v8 = vld [vmem:[%s28965_s9 + $0xaa4] sm:$0xf0]  ;;  %v15207_v46 = vor.u32 %v18549_v12, %v15204_v10  ;;  %v15460_v2 = vld [vmem:[%s28965_s9 + $0x2e8] sm:$0xf0] }
 0x4ae   :  { %10048 = vmatpush.bf16.msrb.mxu2 %v16227_v20  ;;  %v15303_v20 = vor.u32 %v18573_v22, %v15300_v38  ;;  %v16451_v35 = vor.u32 %v18865_v8, %v16450_v1  ;;  %9965 = vmatpush.bf16.msra.mxu0 %v16703_v28  ;;  %v15556_v22 = vld [vmem:[%s28965_s9 + $0x3a8] sm:$0xf0]  ;;  %v15778_v38 = vld [vmem:[%s28965_s9 + $0x548] sm:$0xf]  ;;  %v6562_v1 = vadd.f32 %v25673_v33, %v6548_v31 }
 0x4af   :  { %v15172_v28 = vld [vmem:[%s28965_s9 + $0xa8] sm:$0xf0]  ;;  %v15746_v33 = vld [vmem:[%s28965_s9 + $0x508] sm:$0xf] }
 0x4b0   :  { %9923 = vmatpush.bf16.msrb.mxu1 %v15935_v17  ;;  %v18541_v17 = vld [vmem:[%s28965_s9 + $0x8c] sm:$0xf] }
 0x4b1   :  { %10059 = vmatpush.bf16.msrb.mxu3 %v16579_v5  ;;  %v16671_v5 = vor.u32 %v18916_v11, %v16668_v56  ;;  %v6563_v49 = vpop.f32.mrf.mxu3  ;;  %v6576_v11 = vadd.f32 %v6575_v55, %v6562_v1  ;;  %v15779_v56 = vor.u32 %v18697_v41, %v15778_v38  ;;  %v15175_v23 = vor.u32 %v18541_v17, %v15172_v28  ;;  %v15140_v55 = vld [vmem:[%s28965_s9 + $0x68] sm:$0xf0] }
 0x4b2   :  { %10049 = vmatpush.bf16.msrb.mxu2 %v16195_v19  ;;  %v18857_v19 = vld [vmem:[%s28965_s9 + $0xa64] sm:$0xf0]  ;;  %v6564_v8 = vadd.f32 %v6563_v49, %v6550_v51  ;;  %v18829_v10 = vld [vmem:[%s28965_s9 + $0x98c] sm:$0xf] }
 0x4b3   :  { %9966 = vmatpush.bf16.msra.mxu0 %v16671_v5  ;;  %v15682_v49 = vld [vmem:[%s28965_s9 + $0x488] sm:$0xf]  ;;  %v18821_v41 = vld [vmem:[%s28965_s9 + $0x94c] sm:$0xf] }
 0x4b4   :  { %9924 = vmatpush.bf16.msrb.mxu1 %v15903_v47  ;;  %v18533_v47 = vld [vmem:[%s28965_s9 + $0x4c] sm:$0xf]  ;;  %v15650_v51 = vld [vmem:[%s28965_s9 + $0x448] sm:$0xf] }
 0x4b5   :  { %10060 = vmatpush.bf16.msrb.mxu3 %v16547_v57  ;;  %v16419_v57 = vor.u32 %v18857_v19, %v16418_v9  ;;  %v18689_v9 = vld [vmem:[%s28965_s9 + $0x524] sm:$0xf0]  ;;  %v6590_v19 = vadd.f32 %v6589_v24, %v6576_v11  ;;  %v15143_v25 = vor.u32 %v18533_v47, %v15140_v55  ;;  %v6605_v24 = vpop.f32.mrf.mxu2  ;;  %v16292_v17 = vld [vmem:[%s28965_s9 + $0x968] sm:$0xf0]  ;;  %v17116_v47 = vld [vmem:[%s28965_s9 + $0xfe0] sm:$0xf0] }
 0x4b6   :  { %10050 = vmatpush.bf16.msrb.mxu2 %v16163_v40  ;;  %v15871_v40 = vor.u32 %v18716_v21, %v15868_v42  ;;  %v18681_v21 = vld [vmem:[%s28965_s9 + $0x4e4] sm:$0xf0]  ;;  %v18525_v42 = vld [vmem:[%s28965_s9 + $0xc] sm:$0xf]  ;;  %v16295_v32 = vor.u32 %v18821_v41, %v16292_v17  ;;  %v17020_v17 = vld [vmem:[%s28965_s9 + $0xf20] sm:$0xf0] }
 0x4b7   :  { %9967 = vmatpush.bf16.msra.mxu0 %v16639_v43  ;;  %v15495_v43 = vor.u32 %v18621_v6, %v15492_v50  ;;  %v16866_v55 = vld [vmem:[%s28965_s9 + $0xdc8] sm:$0xf]  ;;  %v18589_v50 = vld [vmem:[%s28965_s9 + $0x20c] sm:$0xf] }
 0x4b8   :  { %9925 = vmatpush.bf16.msrb.mxu1 %v15871_v40  ;;  %v6604_v40 = vadd.f32 %v6603_v52, %v6590_v19  ;;  %v18665_v52 = vld [vmem:[%s28965_s9 + $0x464] sm:$0xf0] }
 0x4b9   :  { %10061 = vmatpush.bf16.msrb.mxu3 %v16515_v44  ;;  %v18705_v44 = vld [vmem:[%s28965_s9 + $0x5a4] sm:$0xf0]  ;;  %v6617_v48 = vpop.f32.mrf.mxu3  ;;  %v15651_v11 = vor.u32 %v18665_v52, %v15650_v51  ;;  %v18885_v51 = vld [vmem:[%s28965_s9 + $0xb4c] sm:$0xf] }
 0x4ba   :  { %10051 = vmatpush.bf16.msrb.mxu2 %v16131_v7  ;;  %v16387_v7 = vor.u32 %v18849_v29, %v16386_v3  ;;  %9968 = vmatmul.bf16.vlgmr.msra.gmra.mxu0 %v25552_v39  ;;  %v15715_v29 = vor.u32 %v18681_v21, %v15714_v62  ;;  %v6618_v12 = vadd.f32 %v6617_v48, %v6604_v40  ;;  %v18657_v48 = vld [vmem:[%s28965_s9 + $0x424] sm:$0xf0]  ;;  %v15364_v62 = vld [vmem:[%s28965_s9 + $0x228] sm:$0xf0]  ;;  %v19020_v40 = vld [vmem:[%s28965_s9 + $0xf84] sm:$0xf] }
 0x4bb   :  { %10016 = vmatpush.bf16.msrb.mxu0 %v15843_v60  ;;  %v16548_v52 = vld [vmem:[%s28965_s9 + $0xb68] sm:$0xf0] }
 0x4bd   :  { %10052 = vmatmul.bf16.vlgmr.msrb.gmra.mxu2 %v24942_v45  ;;  %10062 = vmatpush.bf16.msrb.mxu3 %v16483_v30  ;;  %v6577_v30 = vpop.f32.mrf.mxu0 }
 0x4be   :  { %10100 = vmatpush.bf16.msra.mxu2 %v15335_v16  ;;  %v15811_v16 = vor.u32 %v18705_v44, %v15810_v13  ;;  %v6578_v5 = vadd.f32 %v6577_v30, %v6564_v8  ;;  %v16359_v13 = vor.u32 %v18837_v4, %v16356_v59  ;;  %v18673_v44 = vld [vmem:[%s28965_s9 + $0x4a4] sm:$0xf0] }
 0x4c0   :  { %10017 = vmatpush.bf16.msrb.mxu0 %v15811_v16 }
 0x4c1   :  { %10063 = vmatpush.bf16.msrb.mxu3 %v16451_v35  ;;  %v6591_v35 = vpop.f32.mrf.mxu1 }
 0x4c2   :  { %10101 = vmatpush.bf16.msra.mxu2 %v15303_v20  ;;  %v15559_v20 = vor.u32 %v18637_v14, %v15556_v22  ;;  %v6592_v27 = vadd.f32 %v6591_v35, %v6578_v5  ;;  %v18605_v14 = vld [vmem:[%s28965_s9 + $0x28c] sm:$0xf]  ;;  %v19028_v35 = vld [vmem:[%s28965_s9 + $0xfc4] sm:$0xf]  ;;  %v18969_v5 = vld [vmem:[%s28965_s9 + $0xde4] sm:$0xf0] }
 0x4c3   :  { %v15428_v22 = vld [vmem:[%s28965_s9 + $0x2a8] sm:$0xf0]  ;;  %v16867_v21 = vor.u32 %v18969_v5, %v16866_v55 }
 0x4c4   :  { %10018 = vmatpush.bf16.msrb.mxu0 %v15779_v56  ;;  %v6606_v3 = vadd.f32 %v6605_v24, %v6592_v27  ;;  %v15431_v1 = vor.u32 %v18605_v14, %v15428_v22  ;;  %v18597_v56 = vld [vmem:[%s28965_s9 + $0x24c] sm:$0xf]  ;;  %v17084_v24 = vld [vmem:[%s28965_s9 + $0xfa0] sm:$0xf0] }
 0x4c5   :  { %10064 = vmatpush.bf16.msrb.mxu3 %v16419_v57  ;;  %v6631_v36 = vpop.f32.mrf.mxu0  ;;  %v15108_v57 = vld [vmem:[%s28965_s9 + $0x28] sm:$0xf0] }
 0x4c6   :  { %10102 = vmatpush.bf16.msra.mxu2 %v15271_v63  ;;  %v15747_v63 = vor.u32 %v18689_v9, %v15746_v33  ;;  %v15111_v60 = vor.u32 %v18525_v42, %v15108_v57  ;;  %v6632_v30 = vadd.f32 %v6631_v36, %v6618_v12  ;;  %v15618_v33 = vld [vmem:[%s28965_s9 + $0x408] sm:$0xf]  ;;  %v16260_v27 = vld [vmem:[%s28965_s9 + $0x928] sm:$0xf0]  ;;  %v17119_v36 = vor.u32 %v19028_v35, %v17116_v47  ;;  %v19012_v12 = vld [vmem:[%s28965_s9 + $0xf44] sm:$0xf] }
 0x4c7   :  { %v15619_v6 = vor.u32 %v18657_v48, %v15618_v33  ;;  %v18901_v42 = vld [vmem:[%s28965_s9 + $0xbcc] sm:$0xf]  ;;  %v18996_v33 = vld [vmem:[%s28965_s9 + $0xec4] sm:$0xf]  ;;  %v18937_v47 = vld [vmem:[%s28965_s9 + $0xce4] sm:$0xf0] }
 0x4c8   :  { %10019 = vmatpush.bf16.msrb.mxu0 %v15747_v63  ;;  %v16612_v57 = vld [vmem:[%s28965_s9 + $0xbe8] sm:$0xf0]  ;;  %v16988_v35 = vld [vmem:[%s28965_s9 + $0xee0] sm:$0xf0] }
 0x4c9   :  { %10065 = vmatpush.bf16.msrb.mxu3 %v16387_v7  ;;  %v6645_v61 = vpop.f32.mrf.mxu1  ;;  %v16324_v7 = vld [vmem:[%s28965_s9 + $0x9a8] sm:$0xf0] }
 0x4ca   :  { %10103 = vmatpush.bf16.msra.mxu2 %v15239_v54  ;;  %v18613_v54 = vld [vmem:[%s28965_s9 + $0x2cc] sm:$0xf]  ;;  %v16327_v38 = vor.u32 %v18829_v10, %v16324_v7  ;;  %v17052_v7 = vld [vmem:[%s28965_s9 + $0xf60] sm:$0xf0] }
 0x4cb   :  { %v15463_v31 = vor.u32 %v18613_v54, %v15460_v2  ;;  %v16228_v54 = vld [vmem:[%s28965_s9 + $0x8e8] sm:$0xf0]  ;;  %v16615_v2 = vor.u32 %v18901_v42, %v16612_v57  ;;  %v17055_v22 = vor.u32 %v19012_v12, %v17052_v7  ;;  %v16706_v57 = vld [vmem:[%s28965_s9 + $0xc88] sm:$0xf]  ;;  %v18570_v7 = vld [vmem:[%s28965_s9 + $0x16c] sm:$0xf0] }
 0x4cc   :  { %10066 = vmatmul.bf16.vlgmr.msrb.gmra.mxu3 %v25240_v26  ;;  %10020 = vmatpush.bf16.msrb.mxu0 %v15715_v29  ;;  %v15367_v29 = vor.u32 %v18589_v50, %v15364_v62  ;;  %v18781_v55 = vld [vmem:[%s28965_s9 + $0x80c] sm:$0xf] }
 0x4cd   :  { %10114 = vmatpush.bf16.msra.mxu3 %v15591_v58  ;;  %v6619_v58 = vpop.f32.mrf.mxu3  ;;  %v6633_v28 = vpop.f32.mrf.mxu0  ;;  %v16132_v5 = vld [vmem:[%s28965_s9 + $0x828] sm:$0xf0] }
 0x4ce   :  { %10104 = vmatpush.bf16.msra.mxu2 %v15207_v46  ;;  %v6620_v16 = vadd.f32 %v6619_v58, %v6606_v3  ;;  %v15683_v46 = vor.u32 %v18673_v44, %v15682_v49  ;;  %v18961_v3 = vld [vmem:[%s28965_s9 + $0xda4] sm:$0xf0]  ;;  %v18893_v49 = vld [vmem:[%s28965_s9 + $0xb8c] sm:$0xf]  ;;  %v16135_v62 = vor.u32 %v18781_v55, %v16132_v5 }
 0x4cf   :  { %v16580_v44 = vld [vmem:[%s28965_s9 + $0xba8] sm:$0xf0]  ;;  %v16802_v58 = vld [vmem:[%s28965_s9 + $0xd48] sm:$0xf] }
 0x4d0   :  { %v6634_v8 = vadd.f32 %v6633_v28, %v6620_v16  ;;  %10021 = vmatpush.bf16.msrb.mxu0 %v15683_v46  ;;  %v18797_v16 = vld [vmem:[%s28965_s9 + $0x88c] sm:$0xf]  ;;  %v16583_v14 = vor.u32 %v18893_v49, %v16580_v44  ;;  %v16770_v28 = vld [vmem:[%s28965_s9 + $0xd08] sm:$0xf] }
 0x4d1   :  { %10115 = vmatpush.bf16.msra.mxu3 %v15559_v20  ;;  %v6646_v20 = vadd.f32 %v6645_v61, %v6632_v30  ;;  %v6647_v53 = vpop.f32.mrf.mxu1  ;;  %v17087_v61 = vor.u32 %v19020_v40, %v17084_v24  ;;  %v16196_v46 = vld [vmem:[%s28965_s9 + $0x8a8] sm:$0xf0]  ;;  %v19004_v30 = vld [vmem:[%s28965_s9 + $0xf04] sm:$0xf]  ;;  %v18929_v40 = vld [vmem:[%s28965_s9 + $0xca4] sm:$0xf0] }
 0x4d2   :  { %10105 = vmatpush.bf16.msra.mxu2 %v15175_v23  ;;  %v15396_v23 = vld [vmem:[%s28965_s9 + $0x268] sm:$0xf0]  ;;  %v6648_v9 = vadd.f32 %v6647_v53, %v6634_v8  ;;  %v16199_v41 = vor.u32 %v18797_v16, %v16196_v46  ;;  %v15306_v24 = vld [vmem:[%s28965_s9 + $0x190] sm:$0xf]  ;;  %v16674_v49 = vld [vmem:[%s28965_s9 + $0xc48] sm:$0xf] }
 0x4d3   :  { %v15399_v19 = vor.u32 %v18597_v56, %v15396_v23  ;;  %v6657_v63 = vmax.f32 %v6646_v20, 0.0  ;;  %v18789_v8 = vld [vmem:[%s28965_s9 + $0x84c] sm:$0xf]  ;;  %v17023_v56 = vor.u32 %v19004_v30, %v17020_v17  ;;  %v18921_v44 = vld [vmem:[%s28965_s9 + $0xc64] sm:$0xf0] }
 0x4d4   :  { %10022 = vmatpush.bf16.msrb.mxu0 %v15651_v11  ;;  %v16164_v20 = vld [vmem:[%s28965_s9 + $0x868] sm:$0xf0]  ;;  %v16551_v11 = vor.u32 %v18885_v51, %v16548_v52  ;;  %v18972_v46 = vld [vmem:[%s28965_s9 + $0xe04] sm:$0xf]  ;;  %v18913_v51 = vld [vmem:[%s28965_s9 + $0xc24] sm:$0xf0] }
 0x4d5   :  { %10116 = vmatpush.bf16.msra.mxu3 %v15527_v0  ;;  %v18813_v0 = vld [vmem:[%s28965_s9 + $0x90c] sm:$0xf]  ;;  %v16167_v48 = vor.u32 %v18789_v8, %v16164_v20  ;;  %v16098_v30 = vld [vmem:[%s28965_s9 + $0x7c8] sm:$0xf]  ;;  %v15242_v8 = vld [vmem:[%s28965_s9 + $0x110] sm:$0xf] }
 0x4d6   :  { %10106 = vmatpush.bf16.msra.mxu2 %v15143_v25  ;;  %v6665_v25 = vmax.f32 %v6648_v9, 0.0  ;;  %v16263_v59 = vor.u32 %v18813_v0, %v16260_v27  ;;  %v18877_v53 = vld [vmem:[%s28965_s9 + $0xb0c] sm:$0xf]  ;;  %v16738_v9 = vld [vmem:[%s28965_s9 + $0xcc8] sm:$0xf] }
 0x4d7   :  { %v15338_v0 = vld [vmem:[%s28965_s9 + $0x1d0] sm:$0xf]  ;;  %v16484_v50 = vld [vmem:[%s28965_s9 + $0xae8] sm:$0xf0]  ;;  %v18769_v55 = vld [vmem:[%s28965_s9 + $0x7a4] sm:$0xf0] }
 0x4d8   :  { %v25903_v4 = vpack.c.bf16 %v6665_v25, %v6657_v63  ;;  %10023 = vmatpush.bf16.msrb.mxu0 %v15619_v6  ;;  %v18586_v27 = vld [vmem:[%s28965_s9 + $0x1ec] sm:$0xf0]  ;;  %v16991_v63 = vor.u32 %v18996_v33, %v16988_v35  ;;  %v16739_v25 = vor.u32 %v18937_v47, %v16738_v9  ;;  %v18869_v6 = vld [vmem:[%s28965_s9 + $0xacc] sm:$0xf]  ;;  %v16066_v47 = vld [vmem:[%s28965_s9 + $0x788] sm:$0xf] }
 0x4d9   :  { %10117 = vmatpush.bf16.msra.mxu3 %v15495_v43  ;;  %v16834_v43 = vld [vmem:[%s28965_s9 + $0xd88] sm:$0xf]  ;;  %v15339_v42 = vor.u32 %v18586_v27, %v15338_v0  ;;  %v16420_v16 = vld [vmem:[%s28965_s9 + $0xa68] sm:$0xf0]  ;;  %v18562_v20 = vld [vmem:[%s28965_s9 + $0x12c] sm:$0xf0] }
 0x4da   :  { %10107 = vmatpush.bf16.msra.mxu2 %v15111_v60  ;;  %v18805_v60 = vld [vmem:[%s28965_s9 + $0x8cc] sm:$0xf]  ;;  %9870 = vmatmul.bf16.vlgmr.msra.gmra.mxu1 %v25903_v4  ;;  %v15594_v33 = vld [vmem:[%s28965_s9 + $0x3d0] sm:$0xf]  ;;  %v15243_v9 = vor.u32 %v18562_v20, %v15242_v8 }
 0x4db   :  { %9974 = vmatpush.bf16.msra.mxu1 %v17119_v36  ;;  %v16231_v10 = vor.u32 %v18805_v60, %v16228_v54  ;;  %10024 = vmatmul.bf16.vlgmr.msrb.gmra.mxu0 %v25058_v15  ;;  %v18988_v36 = vld [vmem:[%s28965_s9 + $0xe84] sm:$0xf]  ;;  %v16452_v60 = vld [vmem:[%s28965_s9 + $0xaa8] sm:$0xf0]  ;;  %v16707_v54 = vor.u32 %v18929_v40, %v16706_v57  ;;  %v15210_v27 = vld [vmem:[%s28965_s9 + $0xd0] sm:$0xf] }
 0x4dc   :  { %10072 = vmatpush.bf16.msra.mxu0 %v16867_v21  ;;  %v16956_v21 = vld [vmem:[%s28965_s9 + $0xea0] sm:$0xf0]  ;;  %v18709_v17 = vld [vmem:[%s28965_s9 + $0x5cc] sm:$0xf]  ;;  %v18761_v57 = vld [vmem:[%s28965_s9 + $0x764] sm:$0xf0] }
 0x4dd   :  { %10108 = vmatmul.bf16.vlgmr.msra.gmra.mxu2 %v24712_v18  ;;  %10118 = vmatpush.bf16.msra.mxu3 %v15463_v31  ;;  %v18953_v31 = vld [vmem:[%s28965_s9 + $0xd64] sm:$0xf0]  ;;  %v18701_v5 = vld [vmem:[%s28965_s9 + $0x58c] sm:$0xf]  ;;  %v18842_v8 = vld [vmem:[%s28965_s9 + $0x9ec] sm:$0xf0] }
 0x4de   :  { %10156 = vmatpush.bf16.msrb.mxu2 %v16359_v13  ;;  %v16835_v13 = vor.u32 %v18961_v3, %v16834_v43  ;;  %v18578_v43 = vld [vmem:[%s28965_s9 + $0x1ac] sm:$0xf0]  ;;  %v16959_v3 = vor.u32 %v18988_v36, %v16956_v21  ;;  %v15812_v0 = vld [vmem:[%s28965_s9 + $0x5a8] sm:$0xf0] }
 0x4df   :  { %9975 = vmatpush.bf16.msra.mxu1 %v17087_v61  ;;  %v16924_v61 = vld [vmem:[%s28965_s9 + $0xe60] sm:$0xf0]  ;;  %v15815_v36 = vor.u32 %v18701_v5, %v15812_v0  ;;  %v18693_v40 = vld [vmem:[%s28965_s9 + $0x54c] sm:$0xf]  ;;  %v18834_v5 = vld [vmem:[%s28965_s9 + $0x9ac] sm:$0xf0] }
 0x4e0   :  { %10073 = vmatpush.bf16.msra.mxu0 %v16835_v13  ;;  %v15307_v13 = vor.u32 %v18578_v43, %v15306_v24  ;;  %v15178_v24 = vld [vmem:[%s28965_s9 + $0x90] sm:$0xf] }
 0x4e1   :  { %10119 = vmatpush.bf16.msra.mxu3 %v15431_v1  ;;  %v18945_v1 = vld [vmem:[%s28965_s9 + $0xd24] sm:$0xf0]  ;;  %v18546_v43 = vld [vmem:[%s28965_s9 + $0xac] sm:$0xf0] }
 0x4e2   :  { %10157 = vmatpush.bf16.msrb.mxu2 %v16327_v38  ;;  %v16803_v38 = vor.u32 %v18953_v31, %v16802_v58  ;;  %v16771_v23 = vor.u32 %v18945_v1, %v16770_v28  ;;  %v18853_v31 = vld [vmem:[%s28965_s9 + $0xa4c] sm:$0xf]  ;;  %v15434_v0 = vld [vmem:[%s28965_s9 + $0x290] sm:$0xf] }
 0x4e3   :  { %9976 = vmatpush.bf16.msra.mxu1 %v17055_v22  ;;  %v16892_v22 = vld [vmem:[%s28965_s9 + $0xe20] sm:$0xf0]  ;;  %v16423_v28 = vor.u32 %v18853_v31, %v16420_v16  ;;  %v15844_v1 = vld [vmem:[%s28965_s9 + $0x5e8] sm:$0xf0]  ;;  %v15498_v16 = vld [vmem:[%s28965_s9 + $0x310] sm:$0xf] }
 0x4e4   :  { %10074 = vmatpush.bf16.msra.mxu0 %v16803_v38  ;;  %v16642_v38 = vld [vmem:[%s28965_s9 + $0xc08] sm:$0xf]  ;;  %v15847_v35 = vor.u32 %v18709_v17, %v15844_v1  ;;  %v18530_v17 = vld [vmem:[%s28965_s9 + $0x2c] sm:$0xf0] }
 0x4e5   :  { %10120 = vmatpush.bf16.msra.mxu3 %v15399_v19  ;;  %v16362_v1 = vld [vmem:[%s28965_s9 + $0x9d0] sm:$0xf] }
 0x4e6   :  { %10158 = vmatpush.bf16.msrb.mxu2 %v16295_v32  ;;  %v16516_v32 = vld [vmem:[%s28965_s9 + $0xb28] sm:$0xf0] }
 0x4e7   :  { %v16519_v19 = vor.u32 %v18877_v53, %v16516_v32  ;;  %9977 = vmatpush.bf16.msra.mxu1 %v17023_v56  ;;  %v18845_v56 = vld [vmem:[%s28965_s9 + $0xa0c] sm:$0xf]  ;;  %v16643_v53 = vor.u32 %v18913_v51, %v16642_v38  ;;  %v15970_v38 = vld [vmem:[%s28965_s9 + $0x6c8] sm:$0xf] }
 0x4e8   :  { %10075 = vmatpush.bf16.msra.mxu0 %v16771_v23  ;;  %v16388_v23 = vld [vmem:[%s28965_s9 + $0xa28] sm:$0xf0]  ;;  %v18745_v51 = vld [vmem:[%s28965_s9 + $0x6e4] sm:$0xf0] }
 0x4e9   :  { %10121 = vmatpush.bf16.msra.mxu3 %v15367_v29  ;;  %v18861_v29 = vld [vmem:[%s28965_s9 + $0xa8c] sm:$0xf]  ;;  %v15971_v20 = vor.u32 %v18745_v51, %v15970_v38  ;;  %v18906_v38 = vld [vmem:[%s28965_s9 + $0xbec] sm:$0xf0] }
 0x4ea   :  { %10159 = vmatpush.bf16.msrb.mxu2 %v16263_v59  ;;  %9926 = vmatmul.bf16.vlgmr.msrb.gmra.mxu1 %v25262_v37  ;;  %v16487_v59 = vor.u32 %v18869_v6, %v16484_v50  ;;  %v16455_v12 = vor.u32 %v18861_v29, %v16452_v60  ;;  %v16067_v6 = vor.u32 %v18769_v55, %v16066_v47  ;;  %v15562_v50 = vld [vmem:[%s28965_s9 + $0x390] sm:$0xf] }
 0x4eb   :  { %9978 = vmatpush.bf16.msra.mxu1 %v16991_v63  ;;  %v18554_v63 = vld [vmem:[%s28965_s9 + $0xec] sm:$0xf0] }
 0x4ec   :  { %10122 = vmatmul.bf16.vlgmr.msra.gmra.mxu3 %v24841_v34  ;;  %10076 = vmatpush.bf16.msra.mxu0 %v16739_v25  ;;  %v15211_v21 = vor.u32 %v18554_v63, %v15210_v27  ;;  %v15530_v60 = vld [vmem:[%s28965_s9 + $0x350] sm:$0xf] }
 0x4ed   :  { %10170 = vmatpush.bf16.msrb.mxu3 %v16615_v2  ;;  %v18980_v2 = vld [vmem:[%s28965_s9 + $0xe44] sm:$0xf]  ;;  %v16330_v55 = vld [vmem:[%s28965_s9 + $0x990] sm:$0xf] }
 0x4ee   :  { %10160 = vmatpush.bf16.msrb.mxu2 %v16231_v10  ;;  %v15274_v10 = vld [vmem:[%s28965_s9 + $0x150] sm:$0xf]  ;;  %v16927_v58 = vor.u32 %v18980_v2, %v16924_v61  ;;  %v15179_v61 = vor.u32 %v18546_v43, %v15178_v24  ;;  %v15874_v43 = vld [vmem:[%s28965_s9 + $0x608] sm:$0xf] }
 0x4ef   :  { %9979 = vmatpush.bf16.msra.mxu1 %v16959_v3  ;;  %v15275_v52 = vor.u32 %v18570_v7, %v15274_v10  ;;  %v15146_v10 = vld [vmem:[%s28965_s9 + $0x50] sm:$0xf] }
 0x4f0   :  { %10077 = vmatpush.bf16.msra.mxu0 %v16707_v54  ;;  %v18634_v54 = vld [vmem:[%s28965_s9 + $0x36c] sm:$0xf0] }
 0x4f1   :  { %10171 = vmatpush.bf16.msrb.mxu3 %v16583_v14  ;;  %v16675_v14 = vor.u32 %v18921_v44, %v16674_v49  ;;  %v18753_v49 = vld [vmem:[%s28965_s9 + $0x724] sm:$0xf0]  ;;  %v18685_v44 = vld [vmem:[%s28965_s9 + $0x50c] sm:$0xf]  ;;  %v18538_v7 = vld [vmem:[%s28965_s9 + $0x6c] sm:$0xf0] }
 0x4f2   :  { %10161 = vmatpush.bf16.msrb.mxu2 %v16199_v41  ;;  %v18777_v41 = vld [vmem:[%s28965_s9 + $0x7e4] sm:$0xf0]  ;;  %v18610_v27 = vld [vmem:[%s28965_s9 + $0x2ac] sm:$0xf0] }
 0x4f3   :  { %9980 = vmatpush.bf16.msra.mxu1 %v16927_v58  ;;  %v16099_v32 = vor.u32 %v18777_v41, %v16098_v30  ;;  %v15531_v58 = vor.u32 %v18634_v54, %v15530_v60  ;;  %v15716_v30 = vld [vmem:[%s28965_s9 + $0x4e8] sm:$0xf0]  ;;  %v15114_v41 = vld [vmem:[%s28965_s9 + $0x10] sm:$0xf] }
 0x4f4   :  { %10078 = vmatpush.bf16.msra.mxu0 %v16675_v14  ;;  %v18602_v24 = vld [vmem:[%s28965_s9 + $0x26c] sm:$0xf0]  ;;  %v18653_v60 = vld [vmem:[%s28965_s9 + $0x40c] sm:$0xf] }
 0x4f5   :  { %10172 = vmatpush.bf16.msrb.mxu3 %v16551_v11  ;;  %v16895_v11 = vor.u32 %v18972_v46, %v16892_v22  ;;  %v18626_v46 = vld [vmem:[%s28965_s9 + $0x32c] sm:$0xf0]  ;;  %v15147_v22 = vor.u32 %v18538_v7, %v15146_v10  ;;  %v15620_v54 = vld [vmem:[%s28965_s9 + $0x428] sm:$0xf0] }
 0x4f6   :  { %10162 = vmatpush.bf16.msrb.mxu2 %v16167_v48  ;;  %v18650_v48 = vld [vmem:[%s28965_s9 + $0x3ec] sm:$0xf0] }
 0x4f7   :  { %9981 = vmatpush.bf16.msra.mxu1 %v16895_v11  ;;  %v15595_v25 = vor.u32 %v18650_v48, %v15594_v33  ;;  %v15466_v11 = vld [vmem:[%s28965_s9 + $0x2d0] sm:$0xf]  ;;  %v18737_v33 = vld [vmem:[%s28965_s9 + $0x6a4] sm:$0xf0]  ;;  %v16363_v48 = vor.u32 %v18842_v8, %v16362_v1  ;;  %v16836_v1 = vld [vmem:[%s28965_s9 + $0xda8] sm:$0xf0] }
 0x4f8   :  { %10079 = vmatpush.bf16.msra.mxu0 %v16643_v53  ;;  %v15115_v53 = vor.u32 %v18530_v17, %v15114_v41  ;;  %v16266_v10 = vld [vmem:[%s28965_s9 + $0x910] sm:$0xf]  ;;  %v19025_v41 = vld [vmem:[%s28965_s9 + $0xfa4] sm:$0xf0]  ;;  %v18957_v17 = vld [vmem:[%s28965_s9 + $0xd8c] sm:$0xf] }
 0x4f9   :  { %10173 = vmatpush.bf16.msrb.mxu3 %v16519_v19  ;;  %v16391_v19 = vor.u32 %v18845_v56, %v16388_v23  ;;  %v18618_v56 = vld [vmem:[%s28965_s9 + $0x2ec] sm:$0xf0] }
 0x4fa   :  { %10163 = vmatpush.bf16.msrb.mxu2 %v16135_v62  ;;  %v18642_v62 = vld [vmem:[%s28965_s9 + $0x3ac] sm:$0xf0]  ;;  %9982 = vmatmul.bf16.vlgmr.msra.gmra.mxu1 %v25903_v4  ;;  %v15467_v47 = vor.u32 %v18618_v56, %v15466_v11 }
 0x4fb   :  { %10030 = vmatpush.bf16.msrb.mxu1 %v16099_v32  ;;  %10080 = vmatmul.bf16.vlgmr.msra.gmra.mxu0 %v25552_v39  ;;  %v15563_v3 = vor.u32 %v18642_v62, %v15562_v50  ;;  %v15938_v32 = vld [vmem:[%s28965_s9 + $0x688] sm:$0xf]  ;;  %v16331_v50 = vor.u32 %v18834_v5, %v16330_v55  ;;  %v18661_v62 = vld [vmem:[%s28965_s9 + $0x44c] sm:$0xf]  ;;  %v18818_v7 = vld [vmem:[%s28965_s9 + $0x92c] sm:$0xf0] }
 0x4fc   :  { %10128 = vmatpush.bf16.msrb.mxu0 %v15847_v35  ;;  %v18669_v35 = vld [vmem:[%s28965_s9 + $0x48c] sm:$0xf]  ;;  %v16234_v8 = vld [vmem:[%s28965_s9 + $0x8d0] sm:$0xf] }
 0x4fd   :  { %10174 = vmatpush.bf16.msrb.mxu3 %v16487_v59  ;;  %10164 = vmatmul.bf16.vlgmr.msrb.gmra.mxu2 %v24942_v45  ;;  %v15780_v59 = vld [vmem:[%s28965_s9 + $0x568] sm:$0xf0]  ;;  %v16202_v55 = vld [vmem:[%s28965_s9 + $0x890] sm:$0xf] }
 0x4fe   :  { %10212 = vmatpush.bf16.msra.mxu2 %v15339_v42  ;;  %v16034_v42 = vld [vmem:[%s28965_s9 + $0x748] sm:$0xf]  ;;  %v15783_v2 = vor.u32 %v18693_v40, %v15780_v59  ;;  %v15402_v59 = vld [vmem:[%s28965_s9 + $0x250] sm:$0xf] }
 0x4ff   :  { %10031 = vmatpush.bf16.msrb.mxu1 %v16067_v6  ;;  %v16035_v29 = vor.u32 %v18761_v57, %v16034_v42  ;;  %v18729_v6 = vld [vmem:[%s28965_s9 + $0x664] sm:$0xf0]  ;;  %v16298_v42 = vld [vmem:[%s28965_s9 + $0x950] sm:$0xf] }
 0x500   :  { %10129 = vmatpush.bf16.msrb.mxu0 %v15815_v36  ;;  %v15652_v36 = vld [vmem:[%s28965_s9 + $0x468] sm:$0xf0]  ;;  %v18826_v57 = vld [vmem:[%s28965_s9 + $0x96c] sm:$0xf0] }
 0x501   :  { %10175 = vmatpush.bf16.msrb.mxu3 %v16455_v12  ;;  %v15748_v12 = vld [vmem:[%s28965_s9 + $0x528] sm:$0xf0]  ;;  %v18802_v5 = vld [vmem:[%s28965_s9 + $0x8ac] sm:$0xf0] }
 0x502   :  { %10213 = vmatpush.bf16.msra.mxu2 %v15307_v13  ;;  %v16002_v13 = vld [vmem:[%s28965_s9 + $0x708] sm:$0xf]  ;;  %v15751_v14 = vor.u32 %v18685_v44, %v15748_v12  ;;  %v15403_v44 = vor.u32 %v18602_v24, %v15402_v59  ;;  %v16868_v12 = vld [vmem:[%s28965_s9 + $0xde8] sm:$0xf0]  ;;  %v16522_v24 = vld [vmem:[%s28965_s9 + $0xb10] sm:$0xf] }
 0x503   :  { %10032 = vmatpush.bf16.msrb.mxu1 %v16035_v29  ;;  %v16003_v31 = vor.u32 %v18753_v49, %v16002_v13  ;;  %v18721_v29 = vld [vmem:[%s28965_s9 + $0x624] sm:$0xf0]  ;;  %v18965_v49 = vld [vmem:[%s28965_s9 + $0xdcc] sm:$0xf] }
 0x504   :  { %10130 = vmatpush.bf16.msrb.mxu0 %v15783_v2  ;;  %v16299_v2 = vor.u32 %v18826_v57, %v16298_v42  ;;  %v19033_v13 = vld [vmem:[%s28965_s9 + $0xfe4] sm:$0xf0]  ;;  %v16871_v51 = vor.u32 %v18965_v49, %v16868_v12  ;;  %v16170_v42 = vld [vmem:[%s28965_s9 + $0x850] sm:$0xf]  ;;  %v18582_v12 = vld [vmem:[%s28965_s9 + $0x1d4] sm:$0xf] }
 0x505   :  { %10176 = vmatpush.bf16.msrb.mxu3 %v16423_v28  ;;  %v15499_v28 = vor.u32 %v18626_v46, %v15498_v16  ;;  %v18594_v16 = vld [vmem:[%s28965_s9 + $0x22c] sm:$0xf0]  ;;  %v15623_v46 = vor.u32 %v18653_v60, %v15620_v54  ;;  %v16994_v60 = vld [vmem:[%s28965_s9 + $0xec8] sm:$0xf] }
 0x506   :  { %10214 = vmatpush.bf16.msra.mxu2 %v15275_v52  ;;  %v18677_v52 = vld [vmem:[%s28965_s9 + $0x4cc] sm:$0xf]  ;;  %v18794_v57 = vld [vmem:[%s28965_s9 + $0x86c] sm:$0xf0]  ;;  %v19001_v54 = vld [vmem:[%s28965_s9 + $0xee4] sm:$0xf0] }
 0x507   :  { %10033 = vmatpush.bf16.msrb.mxu1 %v16003_v31  ;;  %v15719_v23 = vor.u32 %v18677_v52, %v15716_v30  ;;  %v15370_v31 = vld [vmem:[%s28965_s9 + $0x210] sm:$0xf]  ;;  %v16267_v52 = vor.u32 %v18818_v7, %v16266_v10  ;;  %v17090_v30 = vld [vmem:[%s28965_s9 + $0xf88] sm:$0xf]  ;;  %v15340_v10 = vld [vmem:[%s28965_s9 + $0x1f0] sm:$0xf0]  ;;  %v16995_v7 = vor.u32 %v19001_v54, %v16994_v60 }
 0x508   :  { %10131 = vmatpush.bf16.msrb.mxu0 %v15751_v14  ;;  %v17091_v56 = vor.u32 %v19025_v41, %v17090_v30  ;;  %v18786_v49 = vld [vmem:[%s28965_s9 + $0x82c] sm:$0xf0]  ;;  %v18574_v41 = vld [vmem:[%s28965_s9 + $0x194] sm:$0xf] }
 0x509   :  { %10177 = vmatpush.bf16.msrb.mxu3 %v16391_v19  ;;  %v15939_v19 = vor.u32 %v18737_v33, %v15938_v32  ;;  %v16839_v32 = vor.u32 %v18957_v17, %v16836_v1  ;;  %v15308_v17 = vld [vmem:[%s28965_s9 + $0x1b0] sm:$0xf0]  ;;  %v16458_v1 = vld [vmem:[%s28965_s9 + $0xa90] sm:$0xf] }
 0x50a   :  { %10215 = vmatpush.bf16.msra.mxu2 %v15243_v9  ;;  %v15684_v9 = vld [vmem:[%s28965_s9 + $0x4a8] sm:$0xf0]  ;;  %v15596_v60 = vld [vmem:[%s28965_s9 + $0x3f0] sm:$0xf0] }
 0x50b   :  { %10034 = vmatpush.bf16.msrb.mxu1 %v15971_v20  ;;  %v15687_v63 = vor.u32 %v18669_v35, %v15684_v9  ;;  %v18810_v20 = vld [vmem:[%s28965_s9 + $0x8ec] sm:$0xf0]  ;;  %v19017_v35 = vld [vmem:[%s28965_s9 + $0xf64] sm:$0xf0]  ;;  %v18949_v9 = vld [vmem:[%s28965_s9 + $0xd4c] sm:$0xf] }
 0x50c   :  { %10178 = vmatmul.bf16.vlgmr.msrb.gmra.mxu3 %v25240_v26  ;;  %10132 = vmatpush.bf16.msrb.mxu0 %v15719_v23  ;;  %v16586_v23 = vld [vmem:[%s28965_s9 + $0xb90] sm:$0xf]  ;;  %v16235_v33 = vor.u32 %v18810_v20, %v16234_v8 }
 0x50d   :  { %10226 = vmatpush.bf16.msra.mxu3 %v15595_v25  ;;  %v15906_v25 = vld [vmem:[%s28965_s9 + $0x648] sm:$0xf]  ;;  %v18866_v8 = vld [vmem:[%s28965_s9 + $0xaac] sm:$0xf0] }
 0x50e   :  { %10216 = vmatpush.bf16.msra.mxu2 %v15211_v21  ;;  %v15435_v21 = vor.u32 %v18610_v27, %v15434_v0  ;;  %v15907_v40 = vor.u32 %v18729_v6, %v15906_v25  ;;  %v16554_v27 = vld [vmem:[%s28965_s9 + $0xb50] sm:$0xf]  ;;  %v16203_v6 = vor.u32 %v18802_v5, %v16202_v55  ;;  %v16898_v5 = vld [vmem:[%s28965_s9 + $0xe08] sm:$0xf] }
 0x50f   :  { %10035 = vmatpush.bf16.msrb.mxu1 %v15939_v19  ;;  %v18858_v55 = vld [vmem:[%s28965_s9 + $0xa6c] sm:$0xf0] }
 0x510   :  { %10133 = vmatpush.bf16.msrb.mxu0 %v15687_v63  ;;  %v18890_v63 = vld [vmem:[%s28965_s9 + $0xb6c] sm:$0xf0] }
 0x511   :  { %10227 = vmatpush.bf16.msra.mxu3 %v15563_v3  ;;  %v15655_v3 = vor.u32 %v18661_v62, %v15652_v36  ;;  %v19009_v62 = vld [vmem:[%s28965_s9 + $0xf24] sm:$0xf0]  ;;  %v18941_v36 = vld [vmem:[%s28965_s9 + $0xd0c] sm:$0xf] }
 0x512   :  { %10217 = vmatpush.bf16.msra.mxu2 %v15179_v61  ;;  %v17122_v61 = vld [vmem:[%s28965_s9 + $0xfc8] sm:$0xf] }
 0x513   :  { %10036 = vmatpush.bf16.msrb.mxu1 %v15907_v40  ;;  %v17123_v14 = vor.u32 %v19033_v13, %v17122_v61  ;;  %v16555_v40 = vor.u32 %v18890_v63, %v16554_v27  ;;  %v16740_v61 = vld [vmem:[%s28965_s9 + $0xce8] sm:$0xf0]  ;;  %v16138_v13 = vld [vmem:[%s28965_s9 + $0x810] sm:$0xf] }
 0x514   :  { %10134 = vmatpush.bf16.msrb.mxu0 %v15655_v3  ;;  %v18909_v27 = vld [vmem:[%s28965_s9 + $0xc0c] sm:$0xf] }
 0x515   :  { %10228 = vmatpush.bf16.msra.mxu3 %v15531_v58  ;;  %v15875_v58 = vor.u32 %v18721_v29, %v15874_v43  ;;  %v18882_v43 = vld [vmem:[%s28965_s9 + $0xb2c] sm:$0xf0]  ;;  %v16171_v29 = vor.u32 %v18794_v57, %v16170_v42  ;;  %v16644_v63 = vld [vmem:[%s28965_s9 + $0xc28] sm:$0xf0]  ;;  %v18558_v42 = vld [vmem:[%s28965_s9 + $0x114] sm:$0xf] }
 0x516   :  { %10218 = vmatpush.bf16.msra.mxu2 %v15147_v22  ;;  %v16618_v22 = vld [vmem:[%s28965_s9 + $0xbd0] sm:$0xf]  ;;  %v15244_v57 = vld [vmem:[%s28965_s9 + $0x130] sm:$0xf0] }
 0x517   :  { %10037 = vmatpush.bf16.msrb.mxu1 %v15875_v58  ;;  %v16619_v11 = vor.u32 %v18906_v38, %v16618_v22  ;;  %v16490_v58 = vld [vmem:[%s28965_s9 + $0xad0] sm:$0xf]  ;;  %v18993_v22 = vld [vmem:[%s28965_s9 + $0xea4] sm:$0xf0]  ;;  %v15343_v38 = vor.u32 %v18582_v12, %v15340_v10  ;;  %v18550_v10 = vld [vmem:[%s28965_s9 + $0xd4] sm:$0xf] }
 0x518   :  { %10135 = vmatpush.bf16.msrb.mxu0 %v15623_v46  ;;  %v16139_v46 = vor.u32 %v18786_v49, %v16138_v13  ;;  %v16068_v13 = vld [vmem:[%s28965_s9 + $0x7a8] sm:$0xf0]  ;;  %v15818_v49 = vld [vmem:[%s28965_s9 + $0x590] sm:$0xf] }
 0x519   :  { %10229 = vmatpush.bf16.msra.mxu3 %v15499_v28  ;;  %v15371_v28 = vor.u32 %v18594_v16, %v15370_v31  ;;  %v18874_v31 = vld [vmem:[%s28965_s9 + $0xaec] sm:$0xf0] }
 0x51a   :  { %10219 = vmatpush.bf16.msra.mxu2 %v15115_v53  ;;  %v18898_v53 = vld [vmem:[%s28965_s9 + $0xbac] sm:$0xf0]  ;;  %10038 = vmatmul.bf16.vlgmr.msrb.gmra.mxu1 %v25262_v37  ;;  %v16491_v30 = vor.u32 %v18874_v31, %v16490_v58 }
 0x51b   :  { %10086 = vmatpush.bf16.msra.mxu1 %v17123_v14  ;;  %10136 = vmatmul.bf16.vlgmr.msrb.gmra.mxu0 %v25058_v15  ;;  %v16587_v19 = vor.u32 %v18898_v53, %v16586_v23  ;;  %v16962_v14 = vld [vmem:[%s28965_s9 + $0xe88] sm:$0xf]  ;;  %v15311_v23 = vor.u32 %v18574_v41, %v15308_v17  ;;  %v18917_v53 = vld [vmem:[%s28965_s9 + $0xc4c] sm:$0xf]  ;;  %v18706_v12 = vld [vmem:[%s28965_s9 + $0x5ac] sm:$0xf0] }
 0x51c   :  { %10184 = vmatpush.bf16.msra.mxu0 %v16871_v51  ;;  %v18925_v51 = vld [vmem:[%s28965_s9 + $0xc8c] sm:$0xf]  ;;  %v18542_v41 = vld [vmem:[%s28965_s9 + $0x94] sm:$0xf] }
 0x51d   :  { %10230 = vmatpush.bf16.msra.mxu3 %v15467_v47  ;;  %10220 = vmatmul.bf16.vlgmr.msra.gmra.mxu2 %v24712_v18  ;;  %v16804_v47 = vld [vmem:[%s28965_s9 + $0xd68] sm:$0xf0]  ;;  %v15180_v17 = vld [vmem:[%s28965_s9 + $0xb0] sm:$0xf0] }
 0x51e   :  { %10268 = vmatpush.bf16.msrb.mxu2 %v16363_v48  ;;  %v17058_v48 = vld [vmem:[%s28965_s9 + $0xf48] sm:$0xf]  ;;  %v16807_v25 = vor.u32 %v18949_v9, %v16804_v47  ;;  %v16426_v47 = vld [vmem:[%s28965_s9 + $0xa50] sm:$0xf] }
 0x51f   :  { %10087 = vmatpush.bf16.msra.mxu1 %v17091_v56  ;;  %v17059_v0 = vor.u32 %v19017_v35, %v17058_v48  ;;  %v18985_v56 = vld [vmem:[%s28965_s9 + $0xe64] sm:$0xf0]  ;;  %v18566_v48 = vld [vmem:[%s28965_s9 + $0x154] sm:$0xf] }
 0x520   :  { %10185 = vmatpush.bf16.msra.mxu0 %v16839_v32  ;;  %v16676_v32 = vld [vmem:[%s28965_s9 + $0xc68] sm:$0xf0]  ;;  %v15276_v35 = vld [vmem:[%s28965_s9 + $0x170] sm:$0xf0] }
 0x521   :  { %10231 = vmatpush.bf16.msra.mxu3 %v15435_v21  ;;  %v16772_v21 = vld [vmem:[%s28965_s9 + $0xd28] sm:$0xf0] }
 0x522   :  { %10269 = vmatpush.bf16.msrb.mxu2 %v16331_v50  ;;  %v17026_v50 = vld [vmem:[%s28965_s9 + $0xf08] sm:$0xf]  ;;  %v16775_v3 = vor.u32 %v18941_v36, %v16772_v21  ;;  %v16427_v36 = vor.u32 %v18858_v55, %v16426_v47  ;;  %v18714_v21 = vld [vmem:[%s28965_s9 + $0x5ec] sm:$0xf0]  ;;  %v15148_v47 = vld [vmem:[%s28965_s9 + $0x70] sm:$0xf0]  ;;  %v26564_v55 = vpop.f32.mrf.mxu0 }
 0x523   :  { %10088 = vmatpush.bf16.msra.mxu1 %v17059_v0  ;;  %v17027_v59 = vor.u32 %v19009_v62, %v17026_v50  ;;  %v18977_v0 = vld [vmem:[%s28965_s9 + $0xe24] sm:$0xf0]  ;;  %v16100_v50 = vld [vmem:[%s28965_s9 + $0x7e8] sm:$0xf0]  ;;  %v15850_v62 = vld [vmem:[%s28965_s9 + $0x5d0] sm:$0xf] }
 0x524   :  { %10186 = vmatpush.bf16.msra.mxu0 %v16807_v25  ;;  %v15279_v25 = vor.u32 %v18566_v48, %v15276_v35  ;;  %v15851_v54 = vor.u32 %v18714_v21, %v15850_v62  ;;  %v15754_v48 = vld [vmem:[%s28965_s9 + $0x510] sm:$0xf]  ;;  %v18526_v21 = vld [vmem:[%s28965_s9 + $0x14] sm:$0xf] }
 0x525   :  { %10232 = vmatpush.bf16.msra.mxu3 %v15403_v44  ;;  %v16523_v44 = vor.u32 %v18882_v43, %v16522_v24  ;;  %v18850_v24 = vld [vmem:[%s28965_s9 + $0xa2c] sm:$0xf0]  ;;  %v16647_v43 = vor.u32 %v18909_v27, %v16644_v63  ;;  %v15500_v27 = vld [vmem:[%s28965_s9 + $0x330] sm:$0xf0] }
 0x526   :  { %10270 = vmatpush.bf16.msrb.mxu2 %v16299_v2  ;;  %v18933_v2 = vld [vmem:[%s28965_s9 + $0xccc] sm:$0xf]  ;;  %v18690_v35 = vld [vmem:[%s28965_s9 + $0x52c] sm:$0xf0] }
 0x527   :  { %10089 = vmatpush.bf16.msra.mxu1 %v17027_v59  ;;  %v16743_v16 = vor.u32 %v18933_v2, %v16740_v61  ;;  %v16394_v59 = vld [vmem:[%s28965_s9 + $0xa10] sm:$0xf]  ;;  %v15247_v2 = vor.u32 %v18558_v42, %v15244_v57  ;;  %v18765_v61 = vld [vmem:[%s28965_s9 + $0x78c] sm:$0xf]  ;;  %v15755_v63 = vor.u32 %v18690_v35, %v15754_v48  ;;  %v15116_v42 = vld [vmem:[%s28965_s9 + $0x30] sm:$0xf0] }
 0x528   :  { %10187 = vmatpush.bf16.msra.mxu0 %v16775_v3  ;;  %v16071_v31 = vor.u32 %v18765_v61, %v16068_v13  ;;  %v15722_v62 = vld [vmem:[%s28965_s9 + $0x4d0] sm:$0xf]  ;;  %v15940_v61 = vld [vmem:[%s28965_s9 + $0x6a8] sm:$0xf0] }
 0x529   :  { %10233 = vmatpush.bf16.msra.mxu3 %v15371_v28  ;;  %v16963_v28 = vor.u32 %v18993_v22, %v16962_v14  ;;  %v15819_v14 = vor.u32 %v18706_v12, %v15818_v49  ;;  %v15690_v49 = vld [vmem:[%s28965_s9 + $0x490] sm:$0xf]  ;;  %v15876_v35 = vld [vmem:[%s28965_s9 + $0x628] sm:$0xf0] }
 0x52a   :  { %10271 = vmatpush.bf16.msrb.mxu2 %v16267_v52  ;;  %v16708_v52 = vld [vmem:[%s28965_s9 + $0xca8] sm:$0xf0] }
 0x52b   :  { %10090 = vmatpush.bf16.msra.mxu1 %v16995_v7  ;;  %v16711_v20 = vor.u32 %v18925_v51, %v16708_v52  ;;  %v15212_v7 = vld [vmem:[%s28965_s9 + $0xf0] sm:$0xf0]  ;;  %v16036_v51 = vld [vmem:[%s28965_s9 + $0x768] sm:$0xf0]  ;;  %v15786_v52 = vld [vmem:[%s28965_s9 + $0x550] sm:$0xf] }
 0x52c   :  { %10234 = vmatmul.bf16.vlgmr.msra.gmra.mxu3 %v24841_v34  ;;  %10188 = vmatpush.bf16.msra.mxu0 %v16743_v16  ;;  %v18638_v16 = vld [vmem:[%s28965_s9 + $0x394] sm:$0xf]  ;;  %v15215_v22 = vor.u32 %v18550_v10, %v15212_v7 }
 0x52d   :  { %10282 = vmatpush.bf16.msrb.mxu3 %v16619_v11  ;;  %v16930_v11 = vld [vmem:[%s28965_s9 + $0xe48] sm:$0xf]  ;;  %v18830_v7 = vld [vmem:[%s28965_s9 + $0x994] sm:$0xf] }
 0x52e   :  { %10272 = vmatpush.bf16.msrb.mxu2 %v16235_v33  ;;  %v16459_v33 = vor.u32 %v18866_v8, %v16458_v1  ;;  %v16931_v9 = vor.u32 %v18985_v56, %v16930_v11  ;;  %v15532_v11 = vld [vmem:[%s28965_s9 + $0x370] sm:$0xf0]  ;;  %v26543_v56 = vpop.f32.mrf.mxu3 }
 0x52f   :  { %10091 = vmatpush.bf16.msra.mxu1 %v16963_v28  ;;  %v26534_v28 = vpop.f32.mrf.mxu2 }
 0x530   :  { %10189 = vmatpush.bf16.msra.mxu0 %v16711_v20  ;;  %v18630_v20 = vld [vmem:[%s28965_s9 + $0x354] sm:$0xf] }
 0x531   :  { %10283 = vmatpush.bf16.msrb.mxu3 %v16587_v19  ;;  %v16679_v19 = vor.u32 %v18917_v53, %v16676_v32  ;;  %v15183_v53 = vor.u32 %v18542_v41, %v15180_v17  ;;  %v18749_v32 = vld [vmem:[%s28965_s9 + $0x70c] sm:$0xf]  ;;  %v18666_v41 = vld [vmem:[%s28965_s9 + $0x46c] sm:$0xf0]  ;;  %v26644_v17 = vpop.f32.mrf.mxu1 }
 0x532   :  { %10273 = vmatpush.bf16.msrb.mxu2 %v16203_v6  ;;  %v18773_v6 = vld [vmem:[%s28965_s9 + $0x7cc] sm:$0xf] }
 0x533   :  { %10092 = vmatpush.bf16.msra.mxu1 %v16931_v9  ;;  %v16103_v3 = vor.u32 %v18773_v6, %v16100_v50  ;;  %v18534_v9 = vld [vmem:[%s28965_s9 + $0x54] sm:$0xf]  ;;  %v18741_v6 = vld [vmem:[%s28965_s9 + $0x6cc] sm:$0xf] }
 0x534   :  { %10190 = vmatpush.bf16.msra.mxu0 %v16679_v19  ;;  %v15972_v50 = vld [vmem:[%s28965_s9 + $0x6e8] sm:$0xf0] }
 0x535   :  { %10284 = vmatpush.bf16.msrb.mxu3 %v16555_v40  ;;  %v16899_v40 = vor.u32 %v18977_v0, %v16898_v5  ;;  %v15535_v5 = vor.u32 %v18630_v20, %v15532_v11  ;;  %v18622_v0 = vld [vmem:[%s28965_s9 + $0x314] sm:$0xf] }
 0x536   :  { %10274 = vmatpush.bf16.msrb.mxu2 %v16171_v29  ;;  %v18646_v29 = vld [vmem:[%s28965_s9 + $0x3d4] sm:$0xf]  ;;  %v15503_v57 = vor.u32 %v18622_v0, %v15500_v27  ;;  %v26616_v12 = vpop.f32.mrf.mxu3  ;;  %v17124_v0 = vld [vmem:[%s28965_s9 + $0xfe8] sm:$0xf0]  ;;  %v16874_v27 = vld [vmem:[%s28965_s9 + $0xdd0] sm:$0xf] }
 0x537   :  { %10093 = vmatpush.bf16.msra.mxu1 %v16899_v40  ;;  %v15599_v58 = vor.u32 %v18646_v29, %v15596_v60  ;;  %v18838_v40 = vld [vmem:[%s28965_s9 + $0x9d4] sm:$0xf]  ;;  %v26602_v29 = vpop.f32.mrf.mxu2 }
 0x538   :  { %10191 = vmatpush.bf16.msra.mxu0 %v16647_v43  ;;  %v18614_v43 = vld [vmem:[%s28965_s9 + $0x2d4] sm:$0xf] }
 0x539   :  { %10285 = vmatpush.bf16.msrb.mxu3 %v16523_v44  ;;  %v16395_v44 = vor.u32 %v18850_v24, %v16394_v59  ;;  %v16364_v59 = vld [vmem:[%s28965_s9 + $0x9f0] sm:$0xf0]  ;;  %v15975_v24 = vor.u32 %v18741_v6, %v15972_v50  ;;  %v18970_v6 = vld [vmem:[%s28965_s9 + $0xdec] sm:$0xf0] }
 0x53a   :  { %10275 = vmatpush.bf16.msrb.mxu2 %v16139_v46  ;;  %v15564_v46 = vld [vmem:[%s28965_s9 + $0x3b0] sm:$0xf0]  ;;  %10094 = vmatmul.bf16.vlgmr.msra.gmra.mxu1 %v25903_v4  ;;  %v16367_v13 = vor.u32 %v18838_v40, %v16364_v59 }
 0x53b   :  { %10142 = vmatpush.bf16.msrb.mxu1 %v16103_v3  ;;  %10192 = vmatmul.bf16.vlgmr.msra.gmra.mxu0 %v25552_v39  ;;  %v15567_v1 = vor.u32 %v18638_v16, %v15564_v46  ;;  %v15468_v3 = vld [vmem:[%s28965_s9 + $0x2f0] sm:$0xf0] }
 0x53c   :  { %10240 = vmatpush.bf16.msrb.mxu0 %v15851_v54  ;;  %v15119_v54 = vor.u32 %v18526_v21, %v15116_v42  ;;  %v15471_v10 = vor.u32 %v18614_v43, %v15468_v3  ;;  %v18606_v16 = vld [vmem:[%s28965_s9 + $0x294] sm:$0xf]  ;;  %v16875_v3 = vor.u32 %v18970_v6, %v16874_v27  ;;  %v18946_v27 = vld [vmem:[%s28965_s9 + $0xd2c] sm:$0xf0] }
 0x53d   :  { %10286 = vmatpush.bf16.msrb.mxu3 %v16491_v30  ;;  %10276 = vmatmul.bf16.vlgmr.msrb.gmra.mxu2 %v24942_v45  ;;  %v18698_v30 = vld [vmem:[%s28965_s9 + $0x56c] sm:$0xf0]  ;;  %v15436_v46 = vld [vmem:[%s28965_s9 + $0x2b0] sm:$0xf0] }
 0x53e   :  { %10324 = vmatpush.bf16.msra.mxu2 %v15343_v38  ;;  %v18757_v38 = vld [vmem:[%s28965_s9 + $0x74c] sm:$0xf]  ;;  %v16300_v20 = vld [vmem:[%s28965_s9 + $0x970] sm:$0xf0] }
 0x53f   :  { %10143 = vmatpush.bf16.msrb.mxu1 %v16071_v31  ;;  %v16039_v8 = vor.u32 %v18757_v38, %v16036_v51  ;;  %v18725_v38 = vld [vmem:[%s28965_s9 + $0x64c] sm:$0xf]  ;;  %v18814_v50 = vld [vmem:[%s28965_s9 + $0x914] sm:$0xf] }
 0x540   :  { %10241 = vmatpush.bf16.msrb.mxu0 %v15819_v14  ;;  %v26630_v14 = vpop.f32.mrf.mxu0  ;;  %v15908_v51 = vld [vmem:[%s28965_s9 + $0x668] sm:$0xf0]  ;;  %v18590_v21 = vld [vmem:[%s28965_s9 + $0x214] sm:$0xf] }
 0x541   :  { %10287 = vmatpush.bf16.msrb.mxu3 %v16459_v33  ;;  %v16004_v33 = vld [vmem:[%s28965_s9 + $0x728] sm:$0xf0]  ;;  %v15911_v11 = vor.u32 %v18725_v38, %v15908_v51  ;;  %v15372_v42 = vld [vmem:[%s28965_s9 + $0x230] sm:$0xf0] }
 0x542   :  { %10325 = vmatpush.bf16.msra.mxu2 %v15311_v23  ;;  %v15787_v23 = vor.u32 %v18698_v30, %v15786_v52  ;;  %v16007_v19 = vor.u32 %v18749_v32, %v16004_v33  ;;  %v15658_v30 = vld [vmem:[%s28965_s9 + $0x450] sm:$0xf]  ;;  %v18717_v32 = vld [vmem:[%s28965_s9 + $0x60c] sm:$0xf]  ;;  %v26662_v33 = vpop.f32.mrf.mxu2  ;;  %v16620_v43 = vld [vmem:[%s28965_s9 + $0xbf0] sm:$0xf0] }
 0x543   :  { %10144 = vmatpush.bf16.msrb.mxu1 %v16039_v8  ;;  %v18822_v8 = vld [vmem:[%s28965_s9 + $0x954] sm:$0xf]  ;;  %v15659_v48 = vor.u32 %v18666_v41, %v15658_v30  ;;  %v19013_v51 = vld [vmem:[%s28965_s9 + $0xf4c] sm:$0xf]  ;;  %v16810_v30 = vld [vmem:[%s28965_s9 + $0xd50] sm:$0xf] }
 0x544   :  { %10242 = vmatpush.bf16.msrb.mxu0 %v15787_v23  ;;  %v18598_v23 = vld [vmem:[%s28965_s9 + $0x254] sm:$0xf] }
 0x545   :  { %10288 = vmatpush.bf16.msrb.mxu3 %v16427_v36  ;;  %v18682_v36 = vld [vmem:[%s28965_s9 + $0x4ec] sm:$0xf0]  ;;  %v16172_v6 = vld [vmem:[%s28965_s9 + $0x870] sm:$0xf0] }
 0x546   :  { %10326 = vmatpush.bf16.msra.mxu2 %v15279_v25  ;;  %v15151_v25 = vor.u32 %v18534_v9, %v15148_v47  ;;  %v15723_v60 = vor.u32 %v18682_v36, %v15722_v62  ;;  %v15626_v9 = vld [vmem:[%s28965_s9 + $0x410] sm:$0xf]  ;;  %v16268_v62 = vld [vmem:[%s28965_s9 + $0x930] sm:$0xf0]  ;;  %v15879_v36 = vor.u32 %v18717_v32, %v15876_v35 }
 0x547   :  { %10145 = vmatpush.bf16.msrb.mxu1 %v16007_v19  ;;  %v18658_v47 = vld [vmem:[%s28965_s9 + $0x42c] sm:$0xf0]  ;;  %v19029_v19 = vld [vmem:[%s28965_s9 + $0xfcc] sm:$0xf]  ;;  %v18886_v32 = vld [vmem:[%s28965_s9 + $0xb54] sm:$0xf] }
 0x548   :  { %10243 = vmatpush.bf16.msrb.mxu0 %v15755_v63  ;;  %v26682_v63 = vpop.f32.mrf.mxu3  ;;  %v15627_v40 = vor.u32 %v18658_v47, %v15626_v9  ;;  %v17127_v59 = vor.u32 %v19029_v19, %v17124_v0  ;;  %v19005_v47 = vld [vmem:[%s28965_s9 + $0xf0c] sm:$0xf]  ;;  %v16778_v19 = vld [vmem:[%s28965_s9 + $0xd10] sm:$0xf] }
 0x549   :  { %10289 = vmatpush.bf16.msrb.mxu3 %v16395_v44  ;;  %v18674_v44 = vld [vmem:[%s28965_s9 + $0x4ac] sm:$0xf0] }
 0x54a   :  { %10327 = vmatpush.bf16.msra.mxu2 %v15247_v2  ;;  %v18733_v2 = vld [vmem:[%s28965_s9 + $0x68c] sm:$0xf]  ;;  %v26742_v41 = vpop.f32.mrf.mxu2 }
 0x54b   :  { %10146 = vmatpush.bf16.msrb.mxu1 %v15975_v24  ;;  %v15943_v31 = vor.u32 %v18733_v2, %v15940_v61  ;;  %v18902_v24 = vld [vmem:[%s28965_s9 + $0xbd4] sm:$0xf]  ;;  %v17092_v2 = vld [vmem:[%s28965_s9 + $0xfa8] sm:$0xf0]  ;;  %v16842_v61 = vld [vmem:[%s28965_s9 + $0xd90] sm:$0xf] }
 0x54c   :  { %10290 = vmatmul.bf16.vlgmr.msrb.gmra.mxu3 %v25240_v26  ;;  %10244 = vmatpush.bf16.msrb.mxu0 %v15723_v60  ;;  %v16271_v60 = vor.u32 %v18814_v50, %v16268_v62 }
 0x54d   :  { %10338 = vmatpush.bf16.msra.mxu3 %v15599_v58  ;;  %v16332_v58 = vld [vmem:[%s28965_s9 + $0x9b0] sm:$0xf0] }
 0x54e   :  { %10328 = vmatpush.bf16.msra.mxu2 %v15215_v22  ;;  %v15691_v22 = vor.u32 %v18674_v44, %v15690_v49  ;;  %v16335_v52 = vor.u32 %v18830_v7, %v16332_v58  ;;  %v18962_v49 = vld [vmem:[%s28965_s9 + $0xdac] sm:$0xf0]  ;;  %v18806_v44 = vld [vmem:[%s28965_s9 + $0x8d4] sm:$0xf]  ;;  %v16623_v7 = vor.u32 %v18902_v24, %v16620_v43  ;;  %v26725_v58 = vpop.f32.mrf.mxu1  ;;  %v18997_v24 = vld [vmem:[%s28965_s9 + $0xecc] sm:$0xf] }
 0x54f   :  { %10147 = vmatpush.bf16.msrb.mxu1 %v15943_v31  ;;  %v16996_v43 = vld [vmem:[%s28965_s9 + $0xee8] sm:$0xf0] }
 0x550   :  { %10245 = vmatpush.bf16.msrb.mxu0 %v15691_v22  ;;  %v16843_v22 = vor.u32 %v18962_v49, %v16842_v61  ;;  %v16140_v61 = vld [vmem:[%s28965_s9 + $0x830] sm:$0xf0]  ;;  %v15346_v49 = vld [vmem:[%s28965_s9 + $0x1d8] sm:$0xf] }
 0x551   :  { %10339 = vmatpush.bf16.msra.mxu3 %v15567_v1  ;;  %v15439_v1 = vor.u32 %v18606_v16, %v15436_v46  ;;  %v18894_v16 = vld [vmem:[%s28965_s9 + $0xb94] sm:$0xf] }
 0x552   :  { %10329 = vmatpush.bf16.msra.mxu2 %v15183_v53  ;;  %v15404_v53 = vld [vmem:[%s28965_s9 + $0x270] sm:$0xf0] }
 0x553   :  { %10148 = vmatpush.bf16.msrb.mxu1 %v15911_v11  ;;  %v16588_v46 = vld [vmem:[%s28965_s9 + $0xbb0] sm:$0xf0] }
 0x554   :  { %10246 = vmatpush.bf16.msrb.mxu0 %v15659_v48  ;;  %v16591_v11 = vor.u32 %v18894_v16, %v16588_v46  ;;  %v16556_v48 = vld [vmem:[%s28965_s9 + $0xb70] sm:$0xf0] }
 0x555   :  { %10340 = vmatpush.bf16.msra.mxu3 %v15535_v5  ;;  %v16303_v5 = vor.u32 %v18822_v8, %v16300_v20  ;;  %v18798_v8 = vld [vmem:[%s28965_s9 + $0x894] sm:$0xf]  ;;  %v16559_v50 = vor.u32 %v18886_v32, %v16556_v48 }
 0x556   :  { %10330 = vmatpush.bf16.msra.mxu2 %v15151_v25  ;;  %v15407_v25 = vor.u32 %v18598_v23, %v15404_v53  ;;  %v16204_v20 = vld [vmem:[%s28965_s9 + $0x8b0] sm:$0xf0]  ;;  %v26755_v23 = vpop.f32.mrf.mxu3 }
 0x557   :  { %10149 = vmatpush.bf16.msrb.mxu1 %v15879_v36  ;;  %v16207_v9 = vor.u32 %v18798_v8, %v16204_v20  ;;  %v26784_v62 = vpop.f32.mrf.mxu1  ;;  %v18930_v8 = vld [vmem:[%s28965_s9 + $0xcac] sm:$0xf0] }
 0x558   :  { %10247 = vmatpush.bf16.msrb.mxu0 %v15627_v40  ;;  %v16779_v40 = vor.u32 %v18946_v27, %v16778_v19 }
 0x559   :  { %10341 = vmatpush.bf16.msra.mxu3 %v15503_v57  ;;  %v26699_v57 = vpop.f32.mrf.mxu0 }
 0x55a   :  { %10331 = vmatpush.bf16.msra.mxu2 %v15119_v54  ;;  %v19021_v54 = vld [vmem:[%s28965_s9 + $0xf8c] sm:$0xf]  ;;  %10150 = vmatmul.bf16.vlgmr.msrb.gmra.mxu1 %v25262_v37 }
 0x55b   :  { %10198 = vmatpush.bf16.msra.mxu1 %v17127_v59  ;;  %v17095_v31 = vor.u32 %v19021_v54, %v17092_v2  ;;  %10248 = vmatmul.bf16.vlgmr.msrb.gmra.mxu0 %v25058_v15  ;;  %v18938_v54 = vld [vmem:[%s28965_s9 + $0xcec] sm:$0xf0]  ;;  %v18782_v2 = vld [vmem:[%s28965_s9 + $0x814] sm:$0xf] }
 0x55c   :  { %10296 = vmatpush.bf16.msra.mxu0 %v16875_v3  ;;  %v16746_v3 = vld [vmem:[%s28965_s9 + $0xcd0] sm:$0xf]  ;;  %v16143_v46 = vor.u32 %v18782_v2, %v16140_v61  ;;  %v18973_v2 = vld [vmem:[%s28965_s9 + $0xe0c] sm:$0xf] }
 0x55d   :  { %10342 = vmatpush.bf16.msra.mxu3 %v15471_v10  ;;  %10332 = vmatmul.bf16.vlgmr.msra.gmra.mxu2 %v24712_v18  ;;  %v16236_v10 = vld [vmem:[%s28965_s9 + $0x8f0] sm:$0xf0]  ;;  %v16747_v16 = vor.u32 %v18938_v54, %v16746_v3 }
 0x55e   :  { %10380 = vmatpush.bf16.msrb.mxu2 %v16367_v13  ;;  %v15375_v13 = vor.u32 %v18590_v21, %v15372_v42  ;;  %v16239_v38 = vor.u32 %v18806_v44, %v16236_v10  ;;  %v18878_v21 = vld [vmem:[%s28965_s9 + $0xb14] sm:$0xf]  ;;  %v18587_v44 = vld [vmem:[%s28965_s9 + $0x1f4] sm:$0xf0]  ;;  %v16999_v10 = vor.u32 %v18997_v24, %v16996_v43 }
 0x55f   :  { %10199 = vmatpush.bf16.msra.mxu1 %v17095_v31  ;;  %v16524_v42 = vld [vmem:[%s28965_s9 + $0xb30] sm:$0xf0]  ;;  %v26845_v48 = vpop.f32.mrf.mxu1 }
 0x560   :  { %10297 = vmatpush.bf16.msra.mxu0 %v16843_v22  ;;  %v16492_v31 = vld [vmem:[%s28965_s9 + $0xaf0] sm:$0xf0]  ;;  %v18989_v22 = vld [vmem:[%s28965_s9 + $0xe8c] sm:$0xf] }
 0x561   :  { %10343 = vmatpush.bf16.msra.mxu3 %v15439_v1  ;;  %v18954_v1 = vld [vmem:[%s28965_s9 + $0xd6c] sm:$0xf0]  ;;  %v26772_v0 = vpop.f32.mrf.mxu0  ;;  %v18854_v3 = vld [vmem:[%s28965_s9 + $0xa54] sm:$0xf] }
 0x562   :  { %10381 = vmatpush.bf16.msrb.mxu2 %v16335_v52  ;;  %v17060_v52 = vld [vmem:[%s28965_s9 + $0xf68] sm:$0xf0]  ;;  %v16811_v35 = vor.u32 %v18954_v1, %v16810_v30  ;;  %v15347_v30 = vor.u32 %v18587_v44, %v15346_v49  ;;  %v16714_v1 = vld [vmem:[%s28965_s9 + $0xc90] sm:$0xf]  ;;  %v16428_v54 = vld [vmem:[%s28965_s9 + $0xa70] sm:$0xf0] }
 0x563   :  { %v17063_v53 = vor.u32 %v19013_v51, %v17060_v52  ;;  %v26831_v51 = vld [vmem:[%s28966_s10] sm:$0xff]  ;;  %v9899_v52 = vpop.f32.mrf.mxu3  ;;  %v16715_v27 = vor.u32 %v18930_v8, %v16714_v1  ;;  %v16900_v44 = vld [vmem:[%s28965_s9 + $0xe28] sm:$0xf0]  ;;  %v15250_v1 = vld [vmem:[%s28965_s9 + $0x118] sm:$0xf] }
 0x564   :  { %10298 = vmatpush.bf16.msra.mxu0 %v16811_v35  ;;  %v7189_v19 = vperm.slane %v26831_v51, 1  ;;  %v18563_v8 = vld [vmem:[%s28965_s9 + $0x134] sm:$0xf0] }
 0x565   :  { %10344 = vmatpush.bf16.msra.mxu3 %v15407_v25  ;;  %v18790_v25 = vld [vmem:[%s28965_s9 + $0x854] sm:$0xf]  ;;  %10200 = vmatpush.bf16.msra.mxu1 %v17063_v53  ;;  %v18579_v53 = vld [vmem:[%s28965_s9 + $0x1b4] sm:$0xf0] }
 0x566   :  { %10382 = vmatpush.bf16.msrb.mxu2 %v16303_v5  ;;  %v17028_v5 = vld [vmem:[%s28965_s9 + $0xf28] sm:$0xf0]  ;;  %v16175_v59 = vor.u32 %v18790_v25, %v16172_v6 }
 0x567   :  { %v17031_v36 = vor.u32 %v19005_v47, %v17028_v5  ;;  %v16460_v47 = vld [vmem:[%s28965_s9 + $0xab0] sm:$0xf0]  ;;  %v7188_v5 = vperm.slane %v26831_v51, 0  ;;  %v18981_v25 = vld [vmem:[%s28965_s9 + $0xe4c] sm:$0xf] }
 0x568   :  { %10299 = vmatpush.bf16.msra.mxu0 %v16779_v40  ;;  %v16932_v6 = vld [vmem:[%s28965_s9 + $0xe68] sm:$0xf0]  ;;  %v15282_v40 = vld [vmem:[%s28965_s9 + $0x158] sm:$0xf]  ;;  %v16042_v51 = vld [vmem:[%s28965_s9 + $0x750] sm:$0xf] }
 0x569   :  { %10345 = vmatpush.bf16.msra.mxu3 %v15375_v13  ;;  %v16527_v13 = vor.u32 %v18878_v21, %v16524_v42  ;;  %10201 = vmatpush.bf16.msra.mxu1 %v17031_v36  ;;  %v9913_v32 = vpop.f32.mrf.mxu0  ;;  %v16682_v36 = vld [vmem:[%s28965_s9 + $0xc50] sm:$0xf]  ;;  %v16935_v43 = vor.u32 %v18981_v25, %v16932_v6  ;;  %v9774_v61 = vadd.f32 %v26534_v28, %v7188_v5  ;;  %v15602_v25 = vld [vmem:[%s28965_s9 + $0x3d8] sm:$0xf] }
 0x56a   :  { %10383 = vmatpush.bf16.msrb.mxu2 %v16271_v60  ;;  %v9885_v60 = vpop.f32.mrf.mxu2  ;;  %v18922_v21 = vld [vmem:[%s28965_s9 + $0xc6c] sm:$0xf0]  ;;  %v18651_v6 = vld [vmem:[%s28965_s9 + $0x3f4] sm:$0xf0] }
 0x56b   :  { %v16683_v49 = vor.u32 %v18922_v21, %v16682_v36  ;;  %v16106_v28 = vld [vmem:[%s28965_s9 + $0x7d0] sm:$0xf]  ;;  %v15251_v21 = vor.u32 %v18563_v8, %v15250_v1 }
 0x56c   :  { %10346 = vmatmul.bf16.vlgmr.msra.gmra.mxu3 %v24841_v34  ;;  %10300 = vmatpush.bf16.msra.mxu0 %v16747_v16  ;;  %v18710_v16 = vld [vmem:[%s28965_s9 + $0x5d4] sm:$0xf] }
 0x56d   :  { %10394 = vmatpush.bf16.msrb.mxu3 %v16623_v7  ;;  %v18870_v7 = vld [vmem:[%s28965_s9 + $0xad4] sm:$0xf]  ;;  %10202 = vmatpush.bf16.msra.mxu1 %v16999_v10  ;;  %v16650_v10 = vld [vmem:[%s28965_s9 + $0xc10] sm:$0xf] }
 0x56e   :  { %10384 = vmatpush.bf16.msrb.mxu2 %v16239_v38  ;;  %v16964_v38 = vld [vmem:[%s28965_s9 + $0xea8] sm:$0xf0]  ;;  %v16495_v20 = vor.u32 %v18870_v7, %v16492_v31  ;;  %v18914_v7 = vld [vmem:[%s28965_s9 + $0xc2c] sm:$0xf0] }
 0x56f   :  { %v16967_v35 = vor.u32 %v18989_v22, %v16964_v38  ;;  %v16431_v38 = vor.u32 %v18854_v3, %v16428_v54  ;;  %v15820_v3 = vld [vmem:[%s28965_s9 + $0x5b0] sm:$0xf0]  ;;  %v15218_v54 = vld [vmem:[%s28965_s9 + $0xd8] sm:$0xf] }
 0x570   :  { %10301 = vmatpush.bf16.msra.mxu0 %v16715_v27 }
 0x571   :  { %10395 = vmatpush.bf16.msrb.mxu3 %v16591_v11  ;;  %v15314_v11 = vld [vmem:[%s28965_s9 + $0x198] sm:$0xf]  ;;  %10203 = vmatpush.bf16.msra.mxu1 %v16967_v35 }
 0x572   :  { %10385 = vmatpush.bf16.msrb.mxu2 %v16207_v9  ;;  %v18862_v9 = vld [vmem:[%s28965_s9 + $0xa94] sm:$0xf]  ;;  %v9887_v24 = vpop.f32.mrf.mxu2 }
 0x573   :  { %v16463_v42 = vor.u32 %v18862_v9, %v16460_v47  ;;  %v16651_v47 = vor.u32 %v18914_v7, %v16650_v10  ;;  %v15570_v10 = vld [vmem:[%s28965_s9 + $0x398] sm:$0xf] }
 0x574   :  { %10302 = vmatpush.bf16.msra.mxu0 %v16683_v49  ;;  %v9888_v49 = vadd.f32 %v9887_v24, %v7189_v19  ;;  %v18643_v7 = vld [vmem:[%s28965_s9 + $0x3b4] sm:$0xf0]  ;;  %v18694_v24 = vld [vmem:[%s28965_s9 + $0x554] sm:$0xf] }
 0x575   :  { %10396 = vmatpush.bf16.msrb.mxu3 %v16559_v50  ;;  %v15315_v50 = vor.u32 %v18579_v53, %v15314_v11  ;;  %10204 = vmatpush.bf16.msra.mxu1 %v16935_v43  ;;  %v9927_v11 = vpop.f32.mrf.mxu1  ;;  %v16903_v53 = vor.u32 %v18973_v2, %v16900_v44  ;;  %v18555_v2 = vld [vmem:[%s28965_s9 + $0xf4] sm:$0xf0]  ;;  %v15571_v1 = vor.u32 %v18643_v7, %v15570_v10 }
 0x576   :  { %10386 = vmatpush.bf16.msrb.mxu2 %v16175_v59  ;;  %v18571_v59 = vld [vmem:[%s28965_s9 + $0x174] sm:$0xf0] }
 0x577   :  { %v15283_v31 = vor.u32 %v18571_v59, %v15282_v40  ;;  %v18531_v10 = vld [vmem:[%s28965_s9 + $0x34] sm:$0xf0] }
 0x578   :  { %10303 = vmatpush.bf16.msra.mxu0 %v16651_v47  ;;  %v18686_v47 = vld [vmem:[%s28965_s9 + $0x514] sm:$0xf] }
 0x579   :  { %10397 = vmatpush.bf16.msrb.mxu3 %v16527_v13  ;;  %v9886_v13 = vadd.f32 %v9885_v60, %v7189_v19  ;;  %v18778_v60 = vld [vmem:[%s28965_s9 + $0x7ec] sm:$0xf0]  ;;  %10205 = vmatpush.bf16.msra.mxu1 %v16903_v53  ;;  %v18635_v53 = vld [vmem:[%s28965_s9 + $0x374] sm:$0xf0] }
 0x57a   :  { %10387 = vmatpush.bf16.msrb.mxu2 %v16143_v46  ;;  %v9788_v46 = vadd.f32 %v26543_v56, %v9774_v61  ;;  %v18846_v56 = vld [vmem:[%s28965_s9 + $0xa14] sm:$0xf]  ;;  %v16107_v27 = vor.u32 %v18778_v60, %v16106_v28  ;;  %v9776_v61 = vadd.f32 %v26602_v29, %v7188_v5  ;;  %v15219_v5 = vor.u32 %v18555_v2, %v15218_v54  ;;  %v18762_v19 = vld [vmem:[%s28965_s9 + $0x76c] sm:$0xf0] }
 0x57b   :  { %v9900_v22 = vadd.f32 %v9899_v52, %v9886_v13  ;;  %v16396_v52 = vld [vmem:[%s28965_s9 + $0xa30] sm:$0xf0]  ;;  %v15603_v13 = vor.u32 %v18651_v6, %v15602_v25  ;;  %10304 = vmatmul.bf16.vlgmr.msra.gmra.mxu0 %v25552_v39  ;;  %v18746_v2 = vld [vmem:[%s28965_s9 + $0x6ec] sm:$0xf0] }
 0x57c   :  { %v9802_v35 = vadd.f32 %v26564_v55, %v9788_v46  ;;  %v16074_v55 = vld [vmem:[%s28965_s9 + $0x790] sm:$0xf]  ;;  %v16399_v43 = vor.u32 %v18846_v56, %v16396_v52  ;;  %10206 = vmatmul.bf16.vlgmr.msra.gmra.mxu1 %v25903_v4  ;;  %v15186_v46 = vld [vmem:[%s28965_s9 + $0x98] sm:$0xf]  ;;  %v15756_v6 = vld [vmem:[%s28965_s9 + $0x530] sm:$0xf0] }
 0x57d   :  { %10398 = vmatpush.bf16.msrb.mxu3 %v16495_v20  ;;  %10388 = vmatmul.bf16.vlgmr.msrb.gmra.mxu2 %v24942_v45  ;;  %v9901_v20 = vpop.f32.mrf.mxu3  ;;  %v9914_v9 = vadd.f32 %v9913_v32, %v9900_v22  ;;  %v18770_v32 = vld [vmem:[%s28965_s9 + $0x7ac] sm:$0xf0]  ;;  %v18547_v22 = vld [vmem:[%s28965_s9 + $0xb4] sm:$0xf0] }
 0x57e   :  { %10436 = vmatpush.bf16.msra.mxu2 %v15347_v30  ;;  %v15852_v30 = vld [vmem:[%s28965_s9 + $0x5f0] sm:$0xf0]  ;;  %v9816_v40 = vadd.f32 %v26644_v17, %v9802_v35  ;;  %v9941_v17 = vpop.f32.mrf.mxu2  ;;  %10254 = vmatpush.bf16.msrb.mxu1 %v16107_v27  ;;  %v16075_v44 = vor.u32 %v18770_v32, %v16074_v55  ;;  %v9902_v60 = vadd.f32 %v9901_v20, %v9888_v49  ;;  %v16010_v35 = vld [vmem:[%s28965_s9 + $0x710] sm:$0xf] }
 0x57f   :  { %v15855_v36 = vor.u32 %v18710_v16, %v15852_v30  ;;  %v9928_v59 = vadd.f32 %v9927_v11, %v9914_v9  ;;  %v15788_v16 = vld [vmem:[%s28965_s9 + $0x570] sm:$0xf0]  ;;  %v9929_v30 = vpop.f32.mrf.mxu1  ;;  %v16043_v20 = vor.u32 %v18762_v19, %v16042_v51  ;;  %v15538_v11 = vld [vmem:[%s28965_s9 + $0x358] sm:$0xf]  ;;  %v15187_v52 = vor.u32 %v18547_v22, %v15186_v46  ;;  %v18754_v9 = vld [vmem:[%s28965_s9 + $0x72c] sm:$0xf0] }
 0x580   :  { %v9830_v28 = vadd.f32 %v26662_v33, %v9816_v40  ;;  %v15539_v55 = vor.u32 %v18635_v53, %v15538_v11  ;;  %v16011_v32 = vor.u32 %v18754_v9, %v16010_v35  ;;  %v18627_v40 = vld [vmem:[%s28965_s9 + $0x334] sm:$0xf0]  ;;  %v15724_v49 = vld [vmem:[%s28965_s9 + $0x4f0] sm:$0xf0]  ;;  %v15946_v46 = vld [vmem:[%s28965_s9 + $0x690] sm:$0xf] }
 0x581   :  { %10399 = vmatpush.bf16.msrb.mxu3 %v16463_v42  ;;  %v18702_v42 = vld [vmem:[%s28965_s9 + $0x594] sm:$0xf]  ;;  %10352 = vmatpush.bf16.msrb.mxu0 %v15855_v36  ;;  %v18539_v36 = vld [vmem:[%s28965_s9 + $0x74] sm:$0xf0]  ;;  %v18738_v22 = vld [vmem:[%s28965_s9 + $0x6ac] sm:$0xf0] }
 0x582   :  { %10437 = vmatpush.bf16.msra.mxu2 %v15315_v50  ;;  %v9915_v50 = vpop.f32.mrf.mxu0  ;;  %v15823_v29 = vor.u32 %v18702_v42, %v15820_v3  ;;  %10255 = vmatpush.bf16.msrb.mxu1 %v16075_v44  ;;  %v9844_v27 = vadd.f32 %v26682_v63, %v9830_v28  ;;  %v15506_v42 = vld [vmem:[%s28965_s9 + $0x318] sm:$0xf]  ;;  %v15759_v3 = vor.u32 %v18686_v47, %v15756_v6 }
 0x583   :  { %v9916_v8 = vadd.f32 %v9915_v50, %v9902_v60  ;;  %v15154_v50 = vld [vmem:[%s28965_s9 + $0x58] sm:$0xf] }
 0x584   :  { %v9858_v63 = vadd.f32 %v26699_v57, %v9844_v27  ;;  %v15155_v54 = vor.u32 %v18539_v36, %v15154_v50  ;;  %v15978_v57 = vld [vmem:[%s28965_s9 + $0x6d0] sm:$0xf]  ;;  %v15122_v44 = vld [vmem:[%s28965_s9 + $0x18] sm:$0xf]  ;;  %v18662_v36 = vld [vmem:[%s28965_s9 + $0x454] sm:$0xf] }
 0x585   :  { %10400 = vmatpush.bf16.msrb.mxu3 %v16431_v38  ;;  %v9955_v33 = vpop.f32.mrf.mxu3  ;;  %10353 = vmatpush.bf16.msrb.mxu0 %v15823_v29  ;;  %v9930_v25 = vadd.f32 %v9929_v30, %v9916_v8  ;;  %v18843_v29 = vld [vmem:[%s28965_s9 + $0x9f4] sm:$0xf0]  ;;  %v15979_v51 = vor.u32 %v18746_v2, %v15978_v57  ;;  %v15692_v8 = vld [vmem:[%s28965_s9 + $0x4b0] sm:$0xf0] }
 0x586   :  { %10438 = vmatpush.bf16.msra.mxu2 %v15283_v31  ;;  %v9790_v31 = vadd.f32 %v26616_v12, %v9776_v61  ;;  %v9942_v12 = vadd.f32 %v9941_v17, %v9928_v59  ;;  %10256 = vmatpush.bf16.msrb.mxu1 %v16043_v20  ;;  %v18678_v61 = vld [vmem:[%s28965_s9 + $0x4d4] sm:$0xf]  ;;  %v9872_v17 = vadd.f32 %v26784_v62, %v9858_v63  ;;  %v16370_v62 = vld [vmem:[%s28965_s9 + $0x9d8] sm:$0xf] }
 0x587   :  { %v9983_v7 = vpop.f32.mrf.mxu1  ;;  %v15474_v19 = vld [vmem:[%s28965_s9 + $0x2d8] sm:$0xf]  ;;  %v16371_v30 = vor.u32 %v18843_v29, %v16370_v62  ;;  %v18654_v2 = vld [vmem:[%s28965_s9 + $0x414] sm:$0xf] }
 0x588   :  { %v9804_v38 = vadd.f32 %v26630_v14, %v9790_v31  ;;  %v15791_v14 = vor.u32 %v18694_v24, %v15788_v16  ;;  %v15507_v31 = vor.u32 %v18627_v40, %v15506_v42  ;;  %v18619_v24 = vld [vmem:[%s28965_s9 + $0x2f4] sm:$0xf0]  ;;  %v15123_v16 = vor.u32 %v18531_v10, %v15122_v44  ;;  %v19034_v44 = vld [vmem:[%s28965_s9 + $0xfec] sm:$0xf0]  ;;  %v18966_v10 = vld [vmem:[%s28965_s9 + $0xdd4] sm:$0xf] }
 0x589   :  { %10401 = vmatpush.bf16.msrb.mxu3 %v16399_v43  ;;  %v9943_v43 = vpop.f32.mrf.mxu2  ;;  %v15475_v20 = vor.u32 %v18619_v24, %v15474_v19  ;;  %v16338_v11 = vld [vmem:[%s28965_s9 + $0x998] sm:$0xf] }
 0x58a   :  { %10439 = vmatpush.bf16.msra.mxu2 %v15251_v21  ;;  %v9818_v56 = vadd.f32 %v26725_v58, %v9804_v38  ;;  %v9956_v58 = vadd.f32 %v9955_v33, %v9942_v12  ;;  %v9969_v21 = vpop.f32.mrf.mxu0  ;;  %10354 = vmatpush.bf16.msrb.mxu0 %v15791_v14  ;;  %v15727_v12 = vor.u32 %v18678_v61, %v15724_v49  ;;  %v10660_v38 = vmax.f32 %v9872_v17, 0.0  ;;  %v18835_v53 = vld [vmem:[%s28965_s9 + $0x9b4] sm:$0xf0]  ;;  %v15628_v61 = vld [vmem:[%s28965_s9 + $0x430] sm:$0xf0] }
 0x58b   :  { %10257 = vmatpush.bf16.msrb.mxu1 %v16011_v32  ;;  %v15442_v35 = vld [vmem:[%s28965_s9 + $0x298] sm:$0xf]  ;;  %v16339_v50 = vor.u32 %v18835_v53, %v16338_v11  ;;  %v17130_v17 = vld [vmem:[%s28965_s9 + $0xfd0] sm:$0xf] }
 0x58c   :  { %10402 = vmatmul.bf16.vlgmr.msrb.gmra.mxu3 %v25240_v26  ;;  %v9832_v59 = vadd.f32 %v26742_v41, %v9818_v56  ;;  %v9944_v41 = vadd.f32 %v9943_v43, %v9930_v25  ;;  %v18611_v9 = vld [vmem:[%s28965_s9 + $0x2b4] sm:$0xf0]  ;;  %v15914_v25 = vld [vmem:[%s28965_s9 + $0x650] sm:$0xf] }
 0x58d   :  { %10450 = vmatpush.bf16.msra.mxu3 %v15603_v13  ;;  %v9970_v13 = vadd.f32 %v9969_v21, %v9956_v58  ;;  %v9957_v60 = vpop.f32.mrf.mxu3  ;;  %v15660_v21 = vld [vmem:[%s28965_s9 + $0x470] sm:$0xf0]  ;;  %v15443_v63 = vor.u32 %v18611_v9, %v15442_v35  ;;  %v16306_v32 = vld [vmem:[%s28965_s9 + $0x958] sm:$0xf]  ;;  %v17066_v9 = vld [vmem:[%s28965_s9 + $0xf50] sm:$0xf] }
 0x58e   :  { %10440 = vmatpush.bf16.msra.mxu2 %v15219_v5  ;;  %v9846_v28 = vadd.f32 %v26755_v23, %v9832_v59  ;;  %10355 = vmatpush.bf16.msrb.mxu0 %v15759_v3  ;;  %v18670_v23 = vld [vmem:[%s28965_s9 + $0x494] sm:$0xf]  ;;  %v15410_v42 = vld [vmem:[%s28965_s9 + $0x258] sm:$0xf]  ;;  %v15882_v3 = vld [vmem:[%s28965_s9 + $0x610] sm:$0xf]  ;;  %v15663_v57 = vor.u32 %v18662_v36, %v15660_v21 }
 0x58f   :  { %v9984_v5 = vadd.f32 %v9983_v7, %v9970_v13  ;;  %10258 = vmatpush.bf16.msrb.mxu1 %v15979_v51  ;;  %v15695_v27 = vor.u32 %v18670_v23, %v15692_v8  ;;  %v18603_v43 = vld [vmem:[%s28965_s9 + $0x274] sm:$0xf0]  ;;  %v16844_v23 = vld [vmem:[%s28965_s9 + $0xdb0] sm:$0xf0] }
 0x590   :  { %v9860_v56 = vadd.f32 %v26772_v0, %v9846_v28  ;;  %v18730_v0 = vld [vmem:[%s28965_s9 + $0x66c] sm:$0xf0]  ;;  %v15411_v7 = vor.u32 %v18603_v43, %v15410_v42  ;;  %v16274_v62 = vld [vmem:[%s28965_s9 + $0x918] sm:$0xf]  ;;  %v15631_v28 = vor.u32 %v18654_v2, %v15628_v61  ;;  %v18942_v42 = vld [vmem:[%s28965_s9 + $0xd14] sm:$0xf] }
 0x591   :  { %10451 = vmatpush.bf16.msra.mxu3 %v15571_v1  ;;  %v10661_v33 = vmax.f32 %v9984_v5, 0.0  ;;  %v9958_v1 = vadd.f32 %v9957_v60, %v9944_v41  ;;  %v15915_v59 = vor.u32 %v18730_v0, %v15914_v25  ;;  %v18819_v29 = vld [vmem:[%s28965_s9 + $0x934] sm:$0xf0]  ;;  %v17131_v60 = vor.u32 %v19034_v44, %v17130_v17  ;;  %v16812_v25 = vld [vmem:[%s28965_s9 + $0xd70] sm:$0xf0] }
 0x592   :  { %10441 = vmatpush.bf16.msra.mxu2 %v15187_v52  ;;  %v15947_v52 = vor.u32 %v18738_v22, %v15946_v46  ;;  %v9971_v47 = vpop.f32.mrf.mxu0  ;;  %10356 = vmatpush.bf16.msrb.mxu0 %v15727_v12  ;;  %v9874_v58 = vadd.f32 %v26845_v48, %v9860_v56  ;;  %v18827_v48 = vld [vmem:[%s28965_s9 + $0x974] sm:$0xf0]  ;;  %v17098_v46 = vld [vmem:[%s28965_s9 + $0xf90] sm:$0xf]  ;;  %v16748_v44 = vld [vmem:[%s28965_s9 + $0xcf0] sm:$0xf0] }
 0x593   :  { %v10676_v14 = vpack.c.bf16 %v10661_v33, %v10660_v38  ;;  %v9972_v6 = vadd.f32 %v9971_v47, %v9958_v1  ;;  %v16307_v49 = vor.u32 %v18827_v48, %v16306_v32  ;;  %v15378_v19 = vld [vmem:[%s28965_s9 + $0x218] sm:$0xf]  ;;  %v16275_v38 = vor.u32 %v18819_v29, %v16274_v62  ;;  %v19026_v33 = vld [vmem:[%s28965_s9 + $0xfac] sm:$0xf0]  ;;  %v18583_v62 = vld [vmem:[%s28965_s9 + $0x1dc] sm:$0xf] }
 0x594   :  { %10259 = vmatpush.bf16.msrb.mxu1 %v15947_v52  ;;  %v10668_v41 = vmax.f32 %v9874_v58, 0.0  ;;  %v18595_v24 = vld [vmem:[%s28965_s9 + $0x234] sm:$0xf0]  ;;  %v17099_v53 = vor.u32 %v19026_v33, %v17098_v46  ;;  %v19018_v47 = vld [vmem:[%s28965_s9 + $0xf6c] sm:$0xf0] }
 0x595   :  { %10452 = vmatpush.bf16.msra.mxu3 %v15539_v55  ;;  %10684 = vst [vmem:[#allocation2] sm:$0xff] %v10676_v14  ;;  %v9985_v55 = vpop.f32.mrf.mxu1  ;;  %v16626_v12 = vld [vmem:[%s28965_s9 + $0xbd8] sm:$0xf]  ;;  %v15379_v1 = vor.u32 %v18595_v24, %v15378_v19  ;;  %v17034_v32 = vld [vmem:[%s28965_s9 + $0xf10] sm:$0xf] }
 0x596   :  { %10442 = vmatpush.bf16.msra.mxu2 %v15155_v54  ;;  %v9986_v40 = vadd.f32 %v9985_v55, %v9972_v6  ;;  %v18722_v54 = vld [vmem:[%s28965_s9 + $0x62c] sm:$0xf0]  ;;  %10357 = vmatpush.bf16.msrb.mxu0 %v15695_v27  ;;  %v16242_v8 = vld [vmem:[%s28965_s9 + $0x8d8] sm:$0xf]  ;;  %v18950_v27 = vld [vmem:[%s28965_s9 + $0xd54] sm:$0xf] }
 0x597   :  { %v15883_v51 = vor.u32 %v18722_v54, %v15882_v3  ;;  %v16594_v56 = vld [vmem:[%s28965_s9 + $0xb98] sm:$0xf]  ;;  %v16815_v55 = vor.u32 %v18950_v27, %v16812_v25  ;;  %v19010_v48 = vld [vmem:[%s28965_s9 + $0xf2c] sm:$0xf0]  ;;  %v15348_v29 = vld [vmem:[%s28965_s9 + $0x1f8] sm:$0xf0] }
 0x598   :  { %v10669_v13 = vmax.f32 %v9986_v40, 0.0  ;;  %10260 = vmatpush.bf16.msrb.mxu1 %v15915_v59  ;;  %v18899_v14 = vld [vmem:[%s28965_s9 + $0xbb4] sm:$0xf0]  ;;  %v16780_v40 = vld [vmem:[%s28965_s9 + $0xd30] sm:$0xf0]  ;;  %v17035_v54 = vor.u32 %v19010_v48, %v17034_v32 }
 0x599   :  { %10453 = vmatpush.bf16.msra.mxu3 %v15507_v31  ;;  %v16876_v31 = vld [vmem:[%s28965_s9 + $0xdf0] sm:$0xf0]  ;;  %v16210_v0 = vld [vmem:[%s28965_s9 + $0x898] sm:$0xf]  ;;  %v16595_v6 = vor.u32 %v18899_v14, %v16594_v56  ;;  %v16783_v61 = vor.u32 %v18942_v42, %v16780_v40  ;;  %v18575_v33 = vld [vmem:[%s28965_s9 + $0x19c] sm:$0xf] }
 0x59a   :  { %10443 = vmatpush.bf16.msra.mxu2 %v15123_v16  ;;  %v10680_v5 = vpack.c.bf16 %v10669_v13, %v10668_v41  ;;  %10358 = vmatpush.bf16.msrb.mxu0 %v15663_v57  ;;  %v18907_v16 = vld [vmem:[%s28965_s9 + $0xbf4] sm:$0xf0]  ;;  %v16879_v22 = vor.u32 %v18966_v10, %v16876_v31  ;;  %v17002_v41 = vld [vmem:[%s28965_s9 + $0xed0] sm:$0xf]  ;;  %v18926_v46 = vld [vmem:[%s28965_s9 + $0xc94] sm:$0xf] }
 0x59b   :  { %v16627_v11 = vor.u32 %v18907_v16, %v16626_v12  ;;  %v18803_v58 = vld [vmem:[%s28965_s9 + $0x8b4] sm:$0xf0]  ;;  %v19002_v13 = vld [vmem:[%s28965_s9 + $0xeec] sm:$0xf0]  ;;  %v15351_v16 = vor.u32 %v18583_v62, %v15348_v29  ;;  %v18918_v14 = vld [vmem:[%s28965_s9 + $0xc54] sm:$0xf] }
 0x59c   :  { %10688 = vst [vmem:[#allocation2 + $0x20] sm:$0xff] %v10680_v5  ;;  %10261 = vmatpush.bf16.msrb.mxu1 %v15883_v51  ;;  %v16562_v36 = vld [vmem:[%s28965_s9 + $0xb58] sm:$0xf]  ;;  %v17003_v5 = vor.u32 %v19002_v13, %v17002_v41  ;;  %v18994_v12 = vld [vmem:[%s28965_s9 + $0xeac] sm:$0xf0] }
 0x59d   :  { %10454 = vmatpush.bf16.msra.mxu3 %v15475_v20  ;;  %10444 = vmatmul.bf16.vlgmr.msra.gmra.mxu2 %v24712_v18  ;;  %v18811_v20 = vld [vmem:[%s28965_s9 + $0x8f4] sm:$0xf0]  ;;  %v16108_v32 = vld [vmem:[%s28965_s9 + $0x7f0] sm:$0xf0]  ;;  %v15604_v41 = vld [vmem:[%s28965_s9 + $0x3f8] sm:$0xf0] }
 0x59e   :  { %10492 = vmatpush.bf16.msrb.mxu2 %v16371_v30  ;;  %v18958_v30 = vld [vmem:[%s28965_s9 + $0xd94] sm:$0xf]  ;;  %10359 = vmatpush.bf16.msrb.mxu0 %v15631_v28  ;;  %v16243_v35 = vor.u32 %v18811_v20, %v16242_v8  ;;  %v18891_v21 = vld [vmem:[%s28965_s9 + $0xb74] sm:$0xf0]  ;;  %v18551_v29 = vld [vmem:[%s28965_s9 + $0xdc] sm:$0xf] }
 0x59f   :  { %v16847_v52 = vor.u32 %v18958_v30, %v16844_v23  ;;  %10262 = vmatmul.bf16.vlgmr.msrb.gmra.mxu1 %v25262_v37  ;;  %v16178_v59 = vld [vmem:[%s28965_s9 + $0x858] sm:$0xf]  ;;  %v16563_v3 = vor.u32 %v18891_v21, %v16562_v36  ;;  %v15316_v30 = vld [vmem:[%s28965_s9 + $0x1b8] sm:$0xf0]  ;;  %v18910_v36 = vld [vmem:[%s28965_s9 + $0xc14] sm:$0xf] }
 0x5a0   :  { %10310 = vmatpush.bf16.msra.mxu1 %v17131_v60  ;;  %v18795_v43 = vld [vmem:[%s28965_s9 + $0x874] sm:$0xf0]  ;;  %v16970_v60 = vld [vmem:[%s28965_s9 + $0xe90] sm:$0xf]  ;;  %v15319_v56 = vor.u32 %v18575_v33, %v15316_v30  ;;  %v16652_v21 = vld [vmem:[%s28965_s9 + $0xc30] sm:$0xf0] }
 0x5a1   :  { %10455 = vmatpush.bf16.msra.mxu3 %v15443_v63  ;;  %10360 = vmatmul.bf16.vlgmr.msrb.gmra.mxu0 %v25058_v15  ;;  %v16211_v63 = vor.u32 %v18803_v58, %v16210_v0  ;;  %v16530_v57 = vld [vmem:[%s28965_s9 + $0xb18] sm:$0xf]  ;;  %v16179_v17 = vor.u32 %v18795_v43, %v16178_v59  ;;  %v16906_v58 = vld [vmem:[%s28965_s9 + $0xe10] sm:$0xf]  ;;  %v18559_v59 = vld [vmem:[%s28965_s9 + $0x11c] sm:$0xf] }
 0x5a2   :  { %10493 = vmatpush.bf16.msrb.mxu2 %v16339_v50  ;;  %10408 = vmatpush.bf16.msra.mxu0 %v16879_v22  ;;  %v17067_v50 = vor.u32 %v19018_v47, %v17066_v9  ;;  %v18883_v2 = vld [vmem:[%s28965_s9 + $0xb34] sm:$0xf0]  ;;  %v16716_v22 = vld [vmem:[%s28965_s9 + $0xcb0] sm:$0xf0]  ;;  %v18567_v9 = vld [vmem:[%s28965_s9 + $0x15c] sm:$0xf] }
 0x5a3   :  { %v16146_v10 = vld [vmem:[%s28965_s9 + $0x818] sm:$0xf]  ;;  %v16531_v31 = vor.u32 %v18883_v2, %v16530_v57  ;;  %v16719_v20 = vor.u32 %v18926_v46, %v16716_v22  ;;  %v15284_v47 = vld [vmem:[%s28965_s9 + $0x178] sm:$0xf0]  ;;  %v16655_v2 = vor.u32 %v18910_v36, %v16652_v21  ;;  %v16044_v46 = vld [vmem:[%s28965_s9 + $0x770] sm:$0xf0] }
 0x5a4   :  { %10311 = vmatpush.bf16.msra.mxu1 %v17099_v53  ;;  %v16498_v51 = vld [vmem:[%s28965_s9 + $0xad8] sm:$0xf]  ;;  %v18986_v53 = vld [vmem:[%s28965_s9 + $0xe6c] sm:$0xf0]  ;;  %v15252_v43 = vld [vmem:[%s28965_s9 + $0x138] sm:$0xf0] }
 0x5a5   :  { %10456 = vmatpush.bf16.msra.mxu3 %v15411_v7  ;;  %v18787_v7 = vld [vmem:[%s28965_s9 + $0x834] sm:$0xf0]  ;;  %v18543_v33 = vld [vmem:[%s28965_s9 + $0x9c] sm:$0xf] }
 0x5a6   :  { %10494 = vmatpush.bf16.msrb.mxu2 %v16307_v49  ;;  %10409 = vmatpush.bf16.msra.mxu0 %v16847_v52  ;;  %v18934_v49 = vld [vmem:[%s28965_s9 + $0xcd4] sm:$0xf]  ;;  %v18875_v19 = vld [vmem:[%s28965_s9 + $0xaf4] sm:$0xf0]  ;;  %v16147_v28 = vor.u32 %v18787_v7, %v16146_v10  ;;  %v15188_v30 = vld [vmem:[%s28965_s9 + $0xb8] sm:$0xf0] }
 0x5a7   :  { %v16751_v24 = vor.u32 %v18934_v49, %v16748_v44  ;;  %v16466_v23 = vld [vmem:[%s28965_s9 + $0xa98] sm:$0xf]  ;;  %v16684_v52 = vld [vmem:[%s28965_s9 + $0xc70] sm:$0xf0]  ;;  %v15255_v49 = vor.u32 %v18559_v59, %v15252_v43  ;;  %v27435_v59 = vpop.f32.mrf.mxu0 }
 0x5a8   :  { %10312 = vmatpush.bf16.msra.mxu1 %v17067_v50  ;;  %v18867_v8 = vld [vmem:[%s28965_s9 + $0xab4] sm:$0xf0]  ;;  %v18978_v50 = vld [vmem:[%s28965_s9 + $0xe2c] sm:$0xf0]  ;;  %v18766_v44 = vld [vmem:[%s28965_s9 + $0x794] sm:$0xf] }
 0x5a9   :  { %10457 = vmatpush.bf16.msra.mxu3 %v15379_v1  ;;  %v16971_v1 = vor.u32 %v18994_v12, %v16970_v60  ;;  %v16434_v25 = vld [vmem:[%s28965_s9 + $0xa58] sm:$0xf]  ;;  %v16076_v10 = vld [vmem:[%s28965_s9 + $0x7b0] sm:$0xf0] }
 0x5aa   :  { %10495 = vmatpush.bf16.msrb.mxu2 %v16275_v38  ;;  %10410 = vmatpush.bf16.msra.mxu0 %v16815_v55  ;;  %v16499_v38 = vor.u32 %v18875_v19, %v16498_v51  ;;  %v18859_v0 = vld [vmem:[%s28965_s9 + $0xa74] sm:$0xf0]  ;;  %v15287_v55 = vor.u32 %v18567_v9, %v15284_v47  ;;  %v16079_v19 = vor.u32 %v18766_v44, %v16076_v10  ;;  %v18535_v47 = vld [vmem:[%s28965_s9 + $0x5c] sm:$0xf]  ;;  %v15948_v44 = vld [vmem:[%s28965_s9 + $0x6b0] sm:$0xf0] }
 0x5ab   :  { %v15858_v48 = vld [vmem:[%s28965_s9 + $0x5d8] sm:$0xf]  ;;  %v16435_v42 = vor.u32 %v18859_v0, %v16434_v25  ;;  %v27409_v25 = vpop.f32.mrf.mxu3 }
 0x5ac   :  { %10458 = vmatmul.bf16.vlgmr.msra.gmra.mxu3 %v24841_v34  ;;  %10313 = vmatpush.bf16.msra.mxu1 %v17035_v54  ;;  %v18715_v40 = vld [vmem:[%s28965_s9 + $0x5f4] sm:$0xf0] }
 0x5ad   :  { %10506 = vmatpush.bf16.msrb.mxu3 %v16627_v11  ;;  %v16938_v11 = vld [vmem:[%s28965_s9 + $0xe50] sm:$0xf]  ;;  %v16402_v54 = vld [vmem:[%s28965_s9 + $0xa18] sm:$0xf]  ;;  %v15859_v13 = vor.u32 %v18715_v40, %v15858_v48  ;;  %v15124_v40 = vld [vmem:[%s28965_s9 + $0x38] sm:$0xf0] }
 0x5ae   :  { %10496 = vmatpush.bf16.msrb.mxu2 %v16243_v35  ;;  %10411 = vmatpush.bf16.msra.mxu0 %v16783_v61  ;;  %v16467_v35 = vor.u32 %v18867_v8, %v16466_v23  ;;  %v16939_v27 = vor.u32 %v18986_v53, %v16938_v11  ;;  %v18851_v57 = vld [vmem:[%s28965_s9 + $0xa34] sm:$0xf0]  ;;  %v15540_v11 = vld [vmem:[%s28965_s9 + $0x378] sm:$0xf0] }
 0x5af   :  { %v15826_v7 = vld [vmem:[%s28965_s9 + $0x598] sm:$0xf] }
 0x5b0   :  { %10314 = vmatpush.bf16.msra.mxu1 %v17003_v5  ;;  %v18707_v62 = vld [vmem:[%s28965_s9 + $0x5b4] sm:$0xf0]  ;;  %v15220_v5 = vld [vmem:[%s28965_s9 + $0xf8] sm:$0xf0] }
 0x5b1   :  { %10507 = vmatpush.bf16.msrb.mxu3 %v16595_v6  ;;  %v16687_v6 = vor.u32 %v18918_v14, %v16684_v52  ;;  %v15827_v60 = vor.u32 %v18707_v62, %v15826_v7  ;;  %v15223_v12 = vor.u32 %v18551_v29, %v15220_v5  ;;  %v15794_v22 = vld [vmem:[%s28965_s9 + $0x558] sm:$0xf]  ;;  %v18750_v14 = vld [vmem:[%s28965_s9 + $0x714] sm:$0xf]  ;;  %v27463_v62 = vpop.f32.mrf.mxu1  ;;  %v18831_v5 = vld [vmem:[%s28965_s9 + $0x99c] sm:$0xf] }
 0x5b2   :  { %10497 = vmatpush.bf16.msrb.mxu2 %v16211_v63  ;;  %10412 = vmatpush.bf16.msra.mxu0 %v16751_v24  ;;  %v18774_v63 = vld [vmem:[%s28965_s9 + $0x7d4] sm:$0xf]  ;;  %v18639_v24 = vld [vmem:[%s28965_s9 + $0x39c] sm:$0xf]  ;;  %v18691_v9 = vld [vmem:[%s28965_s9 + $0x534] sm:$0xf0] }
 0x5b3   :  { %v16111_v61 = vor.u32 %v18774_v63, %v16108_v32  ;;  %v16012_v52 = vld [vmem:[%s28965_s9 + $0x730] sm:$0xf0]  ;;  %v15730_v32 = vld [vmem:[%s28965_s9 + $0x4d8] sm:$0xf] }
 0x5b4   :  { %10315 = vmatpush.bf16.msra.mxu1 %v16971_v1  ;;  %v27381_v1 = vpop.f32.mrf.mxu2  ;;  %v15980_v63 = vld [vmem:[%s28965_s9 + $0x6f0] sm:$0xf0]  ;;  %v18683_v48 = vld [vmem:[%s28965_s9 + $0x4f4] sm:$0xf0] }
 0x5b5   :  { %10508 = vmatpush.bf16.msrb.mxu3 %v16563_v3  ;;  %v16907_v3 = vor.u32 %v18978_v50, %v16906_v58  ;;  %v16015_v58 = vor.u32 %v18750_v14, %v16012_v52  ;;  %v15508_v50 = vld [vmem:[%s28965_s9 + $0x338] sm:$0xf0]  ;;  %v15698_v7 = vld [vmem:[%s28965_s9 + $0x498] sm:$0xf]  ;;  %v27509_v52 = vpop.f32.mrf.mxu0 }
 0x5b6   :  { %10498 = vmatpush.bf16.msrb.mxu2 %v16179_v17  ;;  %10413 = vmatpush.bf16.msra.mxu0 %v16719_v20  ;;  %v18647_v17 = vld [vmem:[%s28965_s9 + $0x3dc] sm:$0xf] }
 0x5b7   :  { %v15607_v51 = vor.u32 %v18647_v17, %v15604_v41  ;;  %v18631_v20 = vld [vmem:[%s28965_s9 + $0x35c] sm:$0xf]  ;;  %v15731_v41 = vor.u32 %v18683_v48, %v15730_v32 }
 0x5b8   :  { %10316 = vmatpush.bf16.msra.mxu1 %v16939_v27  ;;  %v15156_v27 = vld [vmem:[%s28965_s9 + $0x78] sm:$0xf0]  ;;  %v15543_v0 = vor.u32 %v18631_v20, %v15540_v11 }
 0x5b9   :  { %10509 = vmatpush.bf16.msrb.mxu3 %v16531_v31  ;;  %v16403_v31 = vor.u32 %v18851_v57, %v16402_v54  ;;  %v15159_v21 = vor.u32 %v18535_v47, %v15156_v27  ;;  %v16372_v54 = vld [vmem:[%s28965_s9 + $0x9f8] sm:$0xf0]  ;;  %v18659_v47 = vld [vmem:[%s28965_s9 + $0x434] sm:$0xf0] }
 0x5ba   :  { %10499 = vmatpush.bf16.msrb.mxu2 %v16147_v28  ;;  %10414 = vmatpush.bf16.msra.mxu0 %v16687_v6  ;;  %v15572_v28 = vld [vmem:[%s28965_s9 + $0x3b8] sm:$0xf0] }
 0x5bb   :  { %v15575_v23 = vor.u32 %v18639_v24, %v15572_v28  ;;  %v18623_v6 = vld [vmem:[%s28965_s9 + $0x31c] sm:$0xf] }
 0x5bc   :  { %10317 = vmatpush.bf16.msra.mxu1 %v16907_v3  ;;  %v15511_v43 = vor.u32 %v18623_v6, %v15508_v50  ;;  %v18839_v3 = vld [vmem:[%s28965_s9 + $0x9dc] sm:$0xf]  ;;  %v27449_v17 = vpop.f32.mrf.mxu2  ;;  %v16882_v6 = vld [vmem:[%s28965_s9 + $0xdd8] sm:$0xf] }
 0x5bd   :  { %10510 = vmatpush.bf16.msrb.mxu3 %v16499_v38  ;;  %10500 = vmatmul.bf16.vlgmr.msrb.gmra.mxu2 %v24942_v45  ;;  %v18699_v38 = vld [vmem:[%s28965_s9 + $0x574] sm:$0xf0]  ;;  %v16375_v10 = vor.u32 %v18839_v3, %v16372_v54  ;;  %v18607_v24 = vld [vmem:[%s28965_s9 + $0x29c] sm:$0xf] }
 0x5be   :  { %10548 = vmatpush.bf16.msra.mxu2 %v15351_v16  ;;  %10415 = vmatpush.bf16.msra.mxu0 %v16655_v2  ;;  %v18758_v16 = vld [vmem:[%s28965_s9 + $0x754] sm:$0xf]  ;;  %v15795_v53 = vor.u32 %v18699_v38, %v15794_v22  ;;  %v18615_v2 = vld [vmem:[%s28965_s9 + $0x2dc] sm:$0xf]  ;;  %v15666_v38 = vld [vmem:[%s28965_s9 + $0x458] sm:$0xf] }
 0x5bf   :  { %10318 = vmatmul.bf16.vlgmr.msra.gmra.mxu1 %v25903_v4  ;;  %v16047_v8 = vor.u32 %v18758_v16, %v16044_v46  ;;  %v15444_v28 = vld [vmem:[%s28965_s9 + $0x2b8] sm:$0xf0]  ;;  %v18726_v16 = vld [vmem:[%s28965_s9 + $0x654] sm:$0xf] }
 0x5c0   :  { %10366 = vmatpush.bf16.msrb.mxu1 %v16111_v61  ;;  %v15476_v61 = vld [vmem:[%s28965_s9 + $0x2f8] sm:$0xf0]  ;;  %v15916_v46 = vld [vmem:[%s28965_s9 + $0x670] sm:$0xf0] }
 0x5c1   :  { %10511 = vmatpush.bf16.msrb.mxu3 %v16467_v35  ;;  %10416 = vmatmul.bf16.vlgmr.msra.gmra.mxu0 %v25552_v39  ;;  %v15762_v35 = vld [vmem:[%s28965_s9 + $0x518] sm:$0xf]  ;;  %v15479_v29 = vor.u32 %v18615_v2, %v15476_v61  ;;  %v15919_v20 = vor.u32 %v18726_v16, %v15916_v46  ;;  %v18599_v11 = vld [vmem:[%s28965_s9 + $0x25c] sm:$0xf]  ;;  %v19014_v16 = vld [vmem:[%s28965_s9 + $0xf54] sm:$0xf] }
 0x5c2   :  { %10549 = vmatpush.bf16.msra.mxu2 %v15319_v56  ;;  %10464 = vmatpush.bf16.msrb.mxu0 %v15859_v13  ;;  %v15191_v56 = vor.u32 %v18543_v33, %v15188_v30  ;;  %v15763_v36 = vor.u32 %v18691_v9, %v15762_v35  ;;  %v18667_v33 = vld [vmem:[%s28965_s9 + $0x474] sm:$0xf0]  ;;  %v15447_v30 = vor.u32 %v18607_v24, %v15444_v28  ;;  %v15884_v35 = vld [vmem:[%s28965_s9 + $0x630] sm:$0xf0]  ;;  %v18591_v32 = vld [vmem:[%s28965_s9 + $0x21c] sm:$0xf] }
 0x5c3   :  { %v15634_v9 = vld [vmem:[%s28965_s9 + $0x418] sm:$0xf]  ;;  %v15380_v48 = vld [vmem:[%s28965_s9 + $0x238] sm:$0xf0]  ;;  %v17068_v46 = vld [vmem:[%s28965_s9 + $0xf70] sm:$0xf0] }
 0x5c4   :  { %10367 = vmatpush.bf16.msrb.mxu1 %v16079_v19  ;;  %v27507_v14 = vpop.f32.mrf.mxu2  ;;  %v18903_v54 = vld [vmem:[%s28965_s9 + $0xbdc] sm:$0xf] }
 0x5c5   :  { %10512 = vmatpush.bf16.msrb.mxu3 %v16435_v42  ;;  %v18527_v42 = vld [vmem:[%s28965_s9 + $0x1c] sm:$0xf] }
 0x5c6   :  { %10550 = vmatpush.bf16.msra.mxu2 %v15287_v55  ;;  %10465 = vmatpush.bf16.msrb.mxu0 %v15827_v60  ;;  %v18742_v55 = vld [vmem:[%s28965_s9 + $0x6d4] sm:$0xf]  ;;  %v15127_v13 = vor.u32 %v18527_v42, %v15124_v40  ;;  %v27477_v60 = vpop.f32.mrf.mxu3  ;;  %v27546_v40 = vpop.f32.mrf.mxu1  ;;  %v16596_v24 = vld [vmem:[%s28965_s9 + $0xbb8] sm:$0xf0] }
 0x5c7   :  { %v15983_v57 = vor.u32 %v18742_v55, %v15980_v63  ;;  %v16276_v55 = vld [vmem:[%s28965_s9 + $0x938] sm:$0xf0] }
 0x5c8   :  { %10368 = vmatpush.bf16.msrb.mxu1 %v16047_v8  ;;  %v16308_v8 = vld [vmem:[%s28965_s9 + $0x978] sm:$0xf0] }
 0x5c9   :  { %10513 = vmatpush.bf16.msrb.mxu3 %v16403_v31  ;;  %v18675_v31 = vld [vmem:[%s28965_s9 + $0x4b4] sm:$0xf0] }
 0x5ca   :  { %10551 = vmatpush.bf16.msra.mxu2 %v15255_v49  ;;  %10466 = vmatpush.bf16.msrb.mxu0 %v15795_v53  ;;  %v18734_v49 = vld [vmem:[%s28965_s9 + $0x694] sm:$0xf]  ;;  %v15412_v53 = vld [vmem:[%s28965_s9 + $0x278] sm:$0xf0] }
 0x5cb   :  { %v15951_v19 = vor.u32 %v18734_v49, %v15948_v44  ;;  %v15415_v50 = vor.u32 %v18599_v11, %v15412_v53  ;;  %v16850_v49 = vld [vmem:[%s28965_s9 + $0xd98] sm:$0xf]  ;;  %v15383_v44 = vor.u32 %v18591_v32, %v15380_v48  ;;  %v17071_v11 = vor.u32 %v19014_v16, %v17068_v46  ;;  %v18887_v53 = vld [vmem:[%s28965_s9 + $0xb5c] sm:$0xf]  ;;  %v18998_v48 = vld [vmem:[%s28965_s9 + $0xed4] sm:$0xf] }
 0x5cc   :  { %10514 = vmatmul.bf16.vlgmr.msrb.gmra.mxu3 %v25240_v26  ;;  %10369 = vmatpush.bf16.msrb.mxu1 %v16015_v58  ;;  %v17132_v58 = vld [vmem:[%s28965_s9 + $0xff0] sm:$0xf0]  ;;  %v16722_v46 = vld [vmem:[%s28965_s9 + $0xc98] sm:$0xf] }
 0x5cd   :  { %10562 = vmatpush.bf16.msra.mxu3 %v15607_v51  ;;  %v16340_v51 = vld [vmem:[%s28965_s9 + $0x9b8] sm:$0xf0] }
 0x5ce   :  { %10552 = vmatpush.bf16.msra.mxu2 %v15223_v12  ;;  %10467 = vmatpush.bf16.msrb.mxu0 %v15763_v36  ;;  %v15699_v12 = vor.u32 %v18675_v31, %v15698_v7  ;;  %v16343_v22 = vor.u32 %v18831_v5, %v16340_v51  ;;  %v18971_v36 = vld [vmem:[%s28965_s9 + $0xdf4] sm:$0xf0]  ;;  %v27544_v42 = vpop.f32.mrf.mxu3  ;;  %v18807_v7 = vld [vmem:[%s28965_s9 + $0x8dc] sm:$0xf]  ;;  %v27572_v5 = vpop.f32.mrf.mxu0 }
 0x5cf   :  { %v16883_v2 = vor.u32 %v18971_v36, %v16882_v6  ;;  %v16244_v31 = vld [vmem:[%s28965_s9 + $0x8f8] sm:$0xf0] }
 0x5d0   :  { %10370 = vmatpush.bf16.msrb.mxu1 %v15983_v57  ;;  %v16628_v57 = vld [vmem:[%s28965_s9 + $0xbf8] sm:$0xf0] }
 0x5d1   :  { %10563 = vmatpush.bf16.msra.mxu3 %v15575_v23  ;;  %v18823_v23 = vld [vmem:[%s28965_s9 + $0x95c] sm:$0xf] }
 0x5d2   :  { %10553 = vmatpush.bf16.msra.mxu2 %v15191_v56  ;;  %10468 = vmatpush.bf16.msrb.mxu0 %v15731_v41  ;;  %v18718_v56 = vld [vmem:[%s28965_s9 + $0x614] sm:$0xf]  ;;  %v16311_v27 = vor.u32 %v18823_v23, %v16308_v8  ;;  %v16212_v23 = vld [vmem:[%s28965_s9 + $0x8b8] sm:$0xf0] }
 0x5d3   :  { %v15887_v63 = vor.u32 %v18718_v56, %v15884_v35  ;;  %v19022_v41 = vld [vmem:[%s28965_s9 + $0xf94] sm:$0xf]  ;;  %v16564_v56 = vld [vmem:[%s28965_s9 + $0xb78] sm:$0xf0] }
 0x5d4   :  { %10371 = vmatpush.bf16.msrb.mxu1 %v15951_v19  ;;  %v18895_v19 = vld [vmem:[%s28965_s9 + $0xb9c] sm:$0xf]  ;;  %v16567_v36 = vor.u32 %v18887_v53, %v16564_v56 }
 0x5d5   :  { %10564 = vmatpush.bf16.msra.mxu3 %v15543_v0  ;;  %v19030_v0 = vld [vmem:[%s28965_s9 + $0xfd4] sm:$0xf]  ;;  %v16599_v8 = vor.u32 %v18895_v19, %v16596_v24  ;;  %v18791_v6 = vld [vmem:[%s28965_s9 + $0x85c] sm:$0xf] }
 0x5d6   :  { %10554 = vmatpush.bf16.msra.mxu2 %v15159_v21  ;;  %10469 = vmatpush.bf16.msrb.mxu0 %v15699_v12  ;;  %v18815_v21 = vld [vmem:[%s28965_s9 + $0x91c] sm:$0xf]  ;;  %v17135_v3 = vor.u32 %v19030_v0, %v17132_v58  ;;  %v16247_v12 = vor.u32 %v18807_v7, %v16244_v31  ;;  %v27619_v0 = vpop.f32.mrf.mxu3  ;;  %v18947_v58 = vld [vmem:[%s28965_s9 + $0xd34] sm:$0xf0]  ;;  %v18990_v19 = vld [vmem:[%s28965_s9 + $0xe94] sm:$0xf] }
 0x5d7   :  { %v16279_v61 = vor.u32 %v18815_v21, %v16276_v55  ;;  %v16532_v55 = vld [vmem:[%s28965_s9 + $0xb38] sm:$0xf0]  ;;  %v16972_v24 = vld [vmem:[%s28965_s9 + $0xeb0] sm:$0xf0] }
 0x5d8   :  { %10372 = vmatpush.bf16.msrb.mxu1 %v15919_v20  ;;  %v27602_v20 = vpop.f32.mrf.mxu1  ;;  %v18871_v7 = vld [vmem:[%s28965_s9 + $0xadc] sm:$0xf]  ;;  %v16975_v53 = vor.u32 %v18990_v19, %v16972_v24  ;;  %v17210_v24 = vld [vmem:[%s28967_s11 + $0x40] sm:$0xf] }
 0x5d9   :  { %10565 = vmatpush.bf16.msra.mxu3 %v15511_v43  ;;  %v15635_v43 = vor.u32 %v18659_v47, %v15634_v9  ;;  %v19006_v9 = vld [vmem:[%s28965_s9 + $0xf14] sm:$0xf]  ;;  %v16500_v31 = vld [vmem:[%s28965_s9 + $0xaf8] sm:$0xf0] }
 0x5da   :  { %10555 = vmatpush.bf16.msra.mxu2 %v15127_v13  ;;  %v17100_v13 = vld [vmem:[%s28965_s9 + $0xfb0] sm:$0xf0]  ;;  %v18863_v56 = vld [vmem:[%s28965_s9 + $0xa9c] sm:$0xf] }
 0x5db   :  { %v17103_v51 = vor.u32 %v19022_v41, %v17100_v13  ;;  %v17036_v47 = vld [vmem:[%s28965_s9 + $0xf30] sm:$0xf0]  ;;  %v16148_v41 = vld [vmem:[%s28965_s9 + $0x838] sm:$0xf0] }
 0x5dc   :  { %10373 = vmatpush.bf16.msrb.mxu1 %v15887_v63  ;;  %v17039_v21 = vor.u32 %v19006_v9, %v17036_v47  ;;  %v18982_v47 = vld [vmem:[%s28965_s9 + $0xe54] sm:$0xf]  ;;  %v15860_v19 = vld [vmem:[%s28965_s9 + $0x5f8] sm:$0xf0] }
 0x5dd   :  { %10566 = vmatpush.bf16.msra.mxu3 %v15479_v29  ;;  %10556 = vmatmul.bf16.vlgmr.msra.gmra.mxu2 %v24712_v18  ;;  %v15667_v18 = vor.u32 %v18667_v33, %v15666_v38  ;;  %v16631_v29 = vor.u32 %v18903_v54, %v16628_v57  ;;  %v27589_v38 = vpop.f32.mrf.mxu2  ;;  %v18955_v33 = vld [vmem:[%s28965_s9 + $0xd74] sm:$0xf0]  ;;  %v27646_v57 = vpop.f32.mrf.mxu0 }
 0x5de   :  { %10604 = vmatpush.bf16.msrb.mxu2 %v16375_v10  ;;  %v18963_v10 = vld [vmem:[%s28965_s9 + $0xdb4] sm:$0xf0] }
 0x5df   :  { %10470 = vmatpush.bf16.msrb.mxu0 %v15667_v18  ;;  %v16851_v28 = vor.u32 %v18963_v10, %v16850_v49  ;;  %10374 = vmatmul.bf16.vlgmr.msrb.gmra.mxu1 %v25262_v37  ;;  %v17234_v49 = vld [vmem:[%s28967_s11 + $0x70] sm:$0xf] }
 0x5e0   :  { %10422 = vmatpush.bf16.msra.mxu1 %v17135_v3  ;;  %v16754_v3 = vld [vmem:[%s28965_s9 + $0xcd8] sm:$0xf] }
 0x5e1   :  { %10567 = vmatpush.bf16.msra.mxu3 %v15447_v30  ;;  %v18799_v30 = vld [vmem:[%s28965_s9 + $0x89c] sm:$0xf] }
 0x5e2   :  { %10605 = vmatpush.bf16.msrb.mxu2 %v16343_v22  ;;  %v16818_v22 = vld [vmem:[%s28965_s9 + $0xd58] sm:$0xf]  ;;  %v16215_v35 = vor.u32 %v18799_v30, %v16212_v23  ;;  %v16503_v23 = vor.u32 %v18871_v7, %v16500_v31  ;;  %v18711_v7 = vld [vmem:[%s28965_s9 + $0x5dc] sm:$0xf] }
 0x5e3   :  { %10471 = vmatpush.bf16.msrb.mxu0 %v15635_v43  ;;  %v16819_v18 = vor.u32 %v18955_v33, %v16818_v22  ;;  %v17004_v43 = vld [vmem:[%s28965_s9 + $0xef0] sm:$0xf0]  ;;  %v18931_v22 = vld [vmem:[%s28965_s9 + $0xcb4] sm:$0xf0]  ;;  %v27686_v33 = vld [vmem:[%s28966_s10] sm:$0xff] }
 0x5e4   :  { %10423 = vmatpush.bf16.msra.mxu1 %v17103_v51  ;;  %v17007_v10 = vor.u32 %v18998_v48, %v17004_v43  ;;  %v7190_v30 = vperm.slane %v27686_v33, 2  ;;  %v16723_v9 = vor.u32 %v18931_v22, %v16722_v46  ;;  %v18855_v43 = vld [vmem:[%s28965_s9 + $0xa5c] sm:$0xf] }
 0x5e5   :  { %10568 = vmatpush.bf16.msra.mxu3 %v15415_v50  ;;  %v16180_v50 = vld [vmem:[%s28965_s9 + $0x878] sm:$0xf0]  ;;  %v10109_v54 = vpop.f32.mrf.mxu2 }
 0x5e6   :  { %10606 = vmatpush.bf16.msrb.mxu2 %v16311_v27  ;;  %10472 = vmatmul.bf16.vlgmr.msrb.gmra.mxu0 %v25058_v15  ;;  %v16786_v27 = vld [vmem:[%s28965_s9 + $0xd18] sm:$0xf]  ;;  %v16183_v32 = vor.u32 %v18791_v6, %v16180_v50 }
 0x5e7   :  { %10520 = vmatpush.bf16.msra.mxu0 %v16883_v2  ;;  %v16787_v63 = vor.u32 %v18947_v58, %v16786_v27  ;;  %v18939_v2 = vld [vmem:[%s28965_s9 + $0xcf4] sm:$0xf0]  ;;  %v16940_v27 = vld [vmem:[%s28965_s9 + $0xe70] sm:$0xf0]  ;;  %v10137_v58 = vpop.f32.mrf.mxu0 }
 0x5e8   :  { %10424 = vmatpush.bf16.msra.mxu1 %v17071_v11  ;;  %v19057_v11 = vld [vmem:[%s28967_s11 + $0x64] sm:$0xf0]  ;;  %v16690_v50 = vld [vmem:[%s28965_s9 + $0xc58] sm:$0xf]  ;;  %v16943_v48 = vor.u32 %v18982_v47, %v16940_v27  ;;  %v15863_v47 = vor.u32 %v18711_v7, %v15860_v19 }
 0x5e9   :  { %10569 = vmatpush.bf16.msra.mxu3 %v15383_v44  ;;  %v19059_v44 = vld [vmem:[%s28967_s11 + $0x74] sm:$0xf0] }
 0x5ea   :  { %10607 = vmatpush.bf16.msrb.mxu2 %v16279_v61  ;;  %v18783_v61 = vld [vmem:[%s28965_s9 + $0x81c] sm:$0xf]  ;;  %v17235_v16 = vor.u32 %v19059_v44, %v17234_v49  ;;  %v18915_v49 = vld [vmem:[%s28965_s9 + $0xc34] sm:$0xf0] }
 0x5eb   :  { %10521 = vmatpush.bf16.msra.mxu0 %v16851_v28  ;;  %v16151_v51 = vor.u32 %v18783_v61, %v16148_v41  ;;  %v10123_v28 = vpop.f32.mrf.mxu3  ;;  %v16908_v41 = vld [vmem:[%s28965_s9 + $0xe30] sm:$0xf0] }
 0x5ec   :  { %10570 = vmatmul.bf16.vlgmr.msra.gmra.mxu3 %v24841_v34  ;;  %v18879_v34 = vld [vmem:[%s28965_s9 + $0xb1c] sm:$0xf]  ;;  %10425 = vmatpush.bf16.msra.mxu1 %v17039_v21  ;;  %v9998_v21 = vadd.f32 %v27381_v1, %v7190_v30 }
 0x5ed   :  { %10618 = vmatpush.bf16.msrb.mxu3 %v16631_v29  ;;  %v16535_v13 = vor.u32 %v18879_v34, %v16532_v55  ;;  %v16755_v29 = vor.u32 %v18939_v2, %v16754_v3  ;;  %v17218_v55 = vld [vmem:[%s28967_s11 + $0x50] sm:$0xf]  ;;  %v16436_v1 = vld [vmem:[%s28965_s9 + $0xa78] sm:$0xf0]  ;;  %v18974_v3 = vld [vmem:[%s28965_s9 + $0xe14] sm:$0xf] }
 0x5ee   :  { %10608 = vmatpush.bf16.msrb.mxu2 %v16247_v12  ;;  %v27675_v12 = vpop.f32.mrf.mxu1  ;;  %v10012_v2 = vadd.f32 %v27409_v25, %v9998_v21  ;;  %v16911_v22 = vor.u32 %v18974_v3, %v16908_v41  ;;  %v19051_v21 = vld [vmem:[%s28967_s11 + $0x34] sm:$0xf0] }
 0x5ef   :  { %10522 = vmatpush.bf16.msra.mxu0 %v16819_v18  ;;  %v16468_v18 = vld [vmem:[%s28965_s9 + $0xab8] sm:$0xf0] }
 0x5f0   :  { %10426 = vmatpush.bf16.msra.mxu1 %v17007_v10  ;;  %v16471_v34 = vor.u32 %v18863_v56, %v16468_v18  ;;  %v18779_v10 = vld [vmem:[%s28965_s9 + $0x7f4] sm:$0xf0]  ;;  %v10026_v31 = vadd.f32 %v27435_v59, %v10012_v2  ;;  %v18847_v59 = vld [vmem:[%s28965_s9 + $0xa1c] sm:$0xf]  ;;  %v17298_v56 = vld [vmem:[%s28967_s11 + $0xf0] sm:$0xf] }
 0x5f1   :  { %10619 = vmatpush.bf16.msrb.mxu3 %v16599_v8  ;;  %v17226_v8 = vld [vmem:[%s28967_s11 + $0x60] sm:$0xf]  ;;  %v19075_v18 = vld [vmem:[%s28967_s11 + $0xf4] sm:$0xf0] }
 0x5f2   :  { %10609 = vmatpush.bf16.msrb.mxu2 %v16215_v35  ;;  %v7191_v35 = vperm.slane %v27686_v33, 3  ;;  %v17227_v6 = vor.u32 %v19057_v11, %v17226_v8  ;;  %v17290_v2 = vld [vmem:[%s28967_s11 + $0xe0] sm:$0xf] }
 0x5f3   :  { %10523 = vmatpush.bf16.msra.mxu0 %v16787_v63  ;;  %v19055_v63 = vld [vmem:[%s28967_s11 + $0x54] sm:$0xf0]  ;;  %v10125_v46 = vpop.f32.mrf.mxu3 }
 0x5f4   :  { %10427 = vmatpush.bf16.msra.mxu1 %v16975_v53  ;;  %v10110_v61 = vadd.f32 %v10109_v54, %v7191_v35  ;;  %v17219_v25 = vor.u32 %v19055_v63, %v17218_v55  ;;  %v16114_v54 = vld [vmem:[%s28965_s9 + $0x7d8] sm:$0xf]  ;;  %v10139_v63 = vpop.f32.mrf.mxu0 }
 0x5f5   :  { %10620 = vmatpush.bf16.msrb.mxu3 %v16567_v36  ;;  %v18923_v36 = vld [vmem:[%s28965_s9 + $0xc74] sm:$0xf0]  ;;  %v16115_v53 = vor.u32 %v18779_v10, %v16114_v54  ;;  %v19049_v54 = vld [vmem:[%s28967_s11 + $0x24] sm:$0xf0] }
 0x5f6   :  { %10610 = vmatpush.bf16.msrb.mxu2 %v16183_v32  ;;  %v10111_v32 = vpop.f32.mrf.mxu2  ;;  %v10151_v44 = vpop.f32.mrf.mxu1 }
 0x5f7   :  { %10524 = vmatpush.bf16.msra.mxu0 %v16755_v29  ;;  %v10124_v29 = vadd.f32 %v10123_v28, %v10110_v61  ;;  %v16404_v28 = vld [vmem:[%s28965_s9 + $0xa38] sm:$0xf0] }
 0x5f8   :  { %10428 = vmatpush.bf16.msra.mxu1 %v16943_v48  ;;  %v17299_v48 = vor.u32 %v19075_v18, %v17298_v56 }
 0x5f9   :  { %10621 = vmatpush.bf16.msrb.mxu3 %v16535_v13  ;;  %v16658_v13 = vld [vmem:[%s28965_s9 + $0xc18] sm:$0xf]  ;;  %v10138_v8 = vadd.f32 %v10137_v58, %v10124_v29 }
 0x5fa   :  { %10611 = vmatpush.bf16.msrb.mxu2 %v16151_v51  ;;  %v16439_v51 = vor.u32 %v18855_v43, %v16436_v1  ;;  %v16659_v11 = vor.u32 %v18915_v49, %v16658_v13  ;;  %v18771_v58 = vld [vmem:[%s28965_s9 + $0x7b4] sm:$0xf0]  ;;  %v10112_v43 = vadd.f32 %v10111_v32, %v7191_v35  ;;  %v18695_v32 = vld [vmem:[%s28965_s9 + $0x55c] sm:$0xf] }
 0x5fb   :  { %10525 = vmatpush.bf16.msra.mxu0 %v16723_v9  ;;  %v10000_v9 = vadd.f32 %v27449_v17, %v7190_v30  ;;  %v15828_v17 = vld [vmem:[%s28965_s9 + $0x5b8] sm:$0xf0]  ;;  %v17202_v30 = vld [vmem:[%s28967_s11 + $0x30] sm:$0xf]  ;;  %v16050_v35 = vld [vmem:[%s28965_s9 + $0x758] sm:$0xf]  ;;  %v10179_v10 = vpop.f32.mrf.mxu3 }
 0x5fc   :  { %10429 = vmatpush.bf16.msra.mxu1 %v16911_v22  ;;  %v10126_v13 = vadd.f32 %v10125_v46, %v10112_v43  ;;  %v10193_v56 = vpop.f32.mrf.mxu0 }
 0x5fd   :  { %10622 = vmatpush.bf16.msrb.mxu3 %v16503_v23  ;;  %10612 = vmatmul.bf16.vlgmr.msrb.gmra.mxu2 %v24942_v45  ;;  %v16691_v45 = vor.u32 %v18923_v36, %v16690_v50  ;;  %v10040_v23 = vadd.f32 %v27463_v62, %v10026_v31  ;;  %v16082_v62 = vld [vmem:[%s28965_s9 + $0x798] sm:$0xf]  ;;  %v10152_v50 = vadd.f32 %v10151_v44, %v10138_v8  ;;  %v15796_v44 = vld [vmem:[%s28965_s9 + $0x578] sm:$0xf0] }
 0x5fe   :  { %11514 = vmatpush.bf16.msra.mxu2 %v17235_v16  ;;  %v19053_v16 = vld [vmem:[%s28967_s11 + $0x44] sm:$0xf0]  ;;  %v16407_v36 = vor.u32 %v18847_v59, %v16404_v28  ;;  %v10165_v55 = vpop.f32.mrf.mxu2  ;;  %v16083_v3 = vor.u32 %v18771_v58, %v16082_v62  ;;  %v10153_v7 = vpop.f32.mrf.mxu1  ;;  %v10140_v29 = vadd.f32 %v10139_v63, %v10126_v13  ;;  %v15799_v46 = vor.u32 %v18695_v32, %v15796_v44  ;;  %v18687_v59 = vld [vmem:[%s28965_s9 + $0x51c] sm:$0xf] }
 0x5ff   :  { %10526 = vmatpush.bf16.msra.mxu0 %v16691_v45  ;;  %v17211_v27 = vor.u32 %v19053_v16, %v17210_v24  ;;  %v10054_v1 = vadd.f32 %v27507_v14, %v10040_v23  ;;  %v17203_v45 = vor.u32 %v19051_v21, %v17202_v30  ;;  %v18763_v14 = vld [vmem:[%s28965_s9 + $0x774] sm:$0xf0]  ;;  %v10166_v49 = vadd.f32 %v10165_v55, %v10152_v50  ;;  %v17282_v24 = vld [vmem:[%s28967_s11 + $0xd0] sm:$0xf]  ;;  %v15764_v8 = vld [vmem:[%s28965_s9 + $0x538] sm:$0xf0] }
 0x600   :  { %10478 = vmatpush.bf16.msrb.mxu1 %v16115_v53  ;;  %v16051_v19 = vor.u32 %v18763_v14, %v16050_v35  ;;  %v19071_v16 = vld [vmem:[%s28967_s11 + $0xd4] sm:$0xf0]  ;;  %v10154_v28 = vadd.f32 %v10153_v7, %v10140_v29  ;;  %v19069_v62 = vld [vmem:[%s28967_s11 + $0xc4] sm:$0xf0]  ;;  %v17178_v55 = vld [vmem:[%s28967_s11] sm:$0xf] }
 0x601   :  { %10623 = vmatpush.bf16.msrb.mxu3 %v16471_v34  ;;  %v10014_v34 = vadd.f32 %v27477_v60, %v10000_v9  ;;  %v19073_v60 = vld [vmem:[%s28967_s11 + $0xe4] sm:$0xf0]  ;;  %10430 = vmatmul.bf16.vlgmr.msra.gmra.mxu1 %v25903_v4  ;;  %v10180_v23 = vadd.f32 %v10179_v10, %v10166_v49  ;;  %v19047_v53 = vld [vmem:[%s28967_s11 + $0x14] sm:$0xf0]  ;;  %v17283_v18 = vor.u32 %v19071_v16, %v17282_v24  ;;  %v18671_v49 = vld [vmem:[%s28965_s9 + $0x49c] sm:$0xf] }
 0x602   :  { %11515 = vmatpush.bf16.msra.mxu2 %v17227_v6  ;;  %v18703_v6 = vld [vmem:[%s28965_s9 + $0x59c] sm:$0xf]  ;;  %v19045_v63 = vld [vmem:[%s28967_s11 + $0x4] sm:$0xf0]  ;;  %v18739_v14 = vld [vmem:[%s28965_s9 + $0x6b4] sm:$0xf0] }
 0x603   :  { %10527 = vmatpush.bf16.msra.mxu0 %v16659_v11  ;;  %v15831_v61 = vor.u32 %v18703_v6, %v15828_v17  ;;  %v10028_v41 = vadd.f32 %v27509_v52, %v10014_v34  ;;  %v17291_v52 = vor.u32 %v19073_v60, %v17290_v2  ;;  %v17186_v11 = vld [vmem:[%s28967_s11 + $0x10] sm:$0xf]  ;;  %v15767_v6 = vor.u32 %v18687_v59, %v15764_v8  ;;  %v15732_v34 = vld [vmem:[%s28965_s9 + $0x4f8] sm:$0xf0]  ;;  %v19067_v60 = vld [vmem:[%s28967_s11 + $0xb4] sm:$0xf0] }
 0x604   :  { %10479 = vmatpush.bf16.msrb.mxu1 %v16083_v3  ;;  %v17187_v50 = vor.u32 %v19047_v53, %v17186_v11  ;;  %v10194_v21 = vadd.f32 %v10193_v56, %v10180_v23  ;;  %v17266_v2 = vld [vmem:[%s28967_s11 + $0xb0] sm:$0xf]  ;;  %v17179_v35 = vor.u32 %v19045_v63, %v17178_v55  ;;  %v15700_v44 = vld [vmem:[%s28965_s9 + $0x4b8] sm:$0xf0]  ;;  %v19065_v29 = vld [vmem:[%s28967_s11 + $0xa4] sm:$0xf0] }
 0x605   :  { %10624 = vmatpush.bf16.msrb.mxu3 %v16439_v51  ;;  %v10042_v31 = vadd.f32 %v27546_v40, %v10028_v41  ;;  %v10068_v51 = vadd.f32 %v27544_v42, %v10054_v1  ;;  %v16018_v40 = vld [vmem:[%s28965_s9 + $0x718] sm:$0xf]  ;;  %v15703_v24 = vor.u32 %v18671_v49, %v15700_v44  ;;  %v15668_v59 = vld [vmem:[%s28965_s9 + $0x478] sm:$0xf0]  ;;  %v17250_v11 = vld [vmem:[%s28967_s11 + $0x90] sm:$0xf] }
 0x606   :  { %11516 = vmatpush.bf16.msra.mxu2 %v17219_v25  ;;  %v17194_v25 = vld [vmem:[%s28967_s11 + $0x20] sm:$0xf]  ;;  %10528 = vmatmul.bf16.vlgmr.msra.gmra.mxu0 %v25552_v39  ;;  %v18755_v42 = vld [vmem:[%s28965_s9 + $0x734] sm:$0xf0]  ;;  %v10167_v58 = vpop.f32.mrf.mxu2 }
 0x607   :  { %10576 = vmatpush.bf16.msrb.mxu0 %v15863_v47  ;;  %v17195_v22 = vor.u32 %v19049_v54, %v17194_v25  ;;  %v10056_v9 = vadd.f32 %v27589_v38, %v10042_v31  ;;  %v16019_v47 = vor.u32 %v18755_v42, %v16018_v40  ;;  %v15986_v38 = vld [vmem:[%s28965_s9 + $0x6d8] sm:$0xf]  ;;  %v10168_v30 = vadd.f32 %v10167_v58, %v10154_v28  ;;  %v19040_v25 = vld [vmem:[#allocation2 + $0x1c] sm:$0xf0]  ;;  %v18663_v42 = vld [vmem:[%s28965_s9 + $0x45c] sm:$0xf] }
 0x608   :  { %10480 = vmatpush.bf16.msrb.mxu1 %v16051_v19  ;;  %v17267_v54 = vor.u32 %v19067_v60, %v17266_v2  ;;  %v17258_v31 = vld [vmem:[%s28967_s11 + $0xa0] sm:$0xf]  ;;  %v18731_v16 = vld [vmem:[%s28965_s9 + $0x674] sm:$0xf0]  ;;  %v17148_v60 = vld [vmem:[#allocation2 + $0x20] sm:$0xf0] }
 0x609   :  { %10625 = vmatpush.bf16.msrb.mxu3 %v16407_v36  ;;  %v18679_v36 = vld [vmem:[%s28965_s9 + $0x4dc] sm:$0xf]  ;;  %v10070_v1 = vadd.f32 %v27619_v0, %v10056_v9  ;;  %v15954_v0 = vld [vmem:[%s28965_s9 + $0x698] sm:$0xf]  ;;  %v17146_v19 = vld [vmem:[#allocation2] sm:$0xf]  ;;  %v17259_v23 = vor.u32 %v19065_v29, %v17258_v31 }
 0x60a   :  { %11517 = vmatpush.bf16.msra.mxu2 %v17211_v27  ;;  %v17274_v27 = vld [vmem:[%s28967_s11 + $0xc0] sm:$0xf]  ;;  %v27916_v40 = vor.u32 %v19040_v25, %v17146_v19  ;;  %v19063_v53 = vld [vmem:[%s28967_s11 + $0x94] sm:$0xf0]  ;;  %v18935_v29 = vld [vmem:[%s28965_s9 + $0xcdc] sm:$0xf] }
 0x60b   :  { %10577 = vmatpush.bf16.msrb.mxu0 %v15831_v61  ;;  %v17275_v43 = vor.u32 %v19069_v62, %v17274_v27  ;;  %v10181_v61 = vpop.f32.mrf.mxu3  ;;  %v10084_v10 = vadd.f32 %v27646_v57, %v10070_v1  ;;  %v15922_v57 = vld [vmem:[%s28965_s9 + $0x658] sm:$0xf] }
 0x60c   :  { %10626 = vmatmul.bf16.vlgmr.msrb.gmra.mxu3 %v25240_v26  ;;  %v10082_v26 = vadd.f32 %v27572_v5, %v10068_v51  ;;  %v18747_v5 = vld [vmem:[%s28965_s9 + $0x6f4] sm:$0xf0]  ;;  %10481 = vmatpush.bf16.msrb.mxu1 %v16019_v47  ;;  %v10182_v13 = vadd.f32 %v10181_v61, %v10168_v30  ;;  %v10195_v51 = vpop.f32.mrf.mxu0  ;;  %v15636_v47 = vld [vmem:[%s28965_s9 + $0x438] sm:$0xf0]  ;;  %v17242_v30 = vld [vmem:[%s28967_s11 + $0x80] sm:$0xf] }
 0x60d   :  { %11528 = vmatpush.bf16.msra.mxu3 %v17299_v48  ;;  %v10207_v48 = vpop.f32.mrf.mxu1  ;;  %v15987_v3 = vor.u32 %v18747_v5, %v15986_v38  ;;  %v15890_v56 = vld [vmem:[%s28965_s9 + $0x618] sm:$0xf]  ;;  %v18967_v38 = vld [vmem:[%s28965_s9 + $0xddc] sm:$0xf] }
 0x60e   :  { %11518 = vmatpush.bf16.msra.mxu2 %v17203_v45  ;;  %v10096_v17 = vadd.f32 %v27602_v20, %v10082_v26  ;;  %v10208_v20 = vadd.f32 %v10207_v48, %v10194_v21  ;;  %v15735_v45 = vor.u32 %v18679_v36, %v15732_v34  ;;  %v18723_v9 = vld [vmem:[%s28965_s9 + $0x634] sm:$0xf0]  ;;  %v18655_v26 = vld [vmem:[%s28965_s9 + $0x41c] sm:$0xf]  ;;  %v19061_v21 = vld [vmem:[%s28967_s11 + $0x84] sm:$0xf0] }
 0x60f   :  { %10578 = vmatpush.bf16.msrb.mxu0 %v15799_v46  ;;  %v10098_v46 = vadd.f32 %v27675_v12, %v10084_v10  ;;  %v15923_v12 = vor.u32 %v18731_v16, %v15922_v57  ;;  %v17138_v58 = vld [vmem:[%s28965_s9 + $0xfd8] sm:$0xf]  ;;  %v16884_v5 = vld [vmem:[%s28965_s9 + $0xdf8] sm:$0xf0]  ;;  %v15639_v34 = vor.u32 %v18655_v26, %v15636_v47  ;;  %v17243_v1 = vor.u32 %v19061_v21, %v17242_v30  ;;  %v17354_v30 = vld [vmem:[%s28967_s11 + $0x160] sm:$0xf] }
 0x610   :  { %v10662_v32 = vmax.f32 %v10096_v17, 0.0  ;;  %v10663_v41 = vmax.f32 %v10208_v20, 0.0  ;;  %10482 = vmatpush.bf16.msrb.mxu1 %v15987_v3  ;;  %v15891_v17 = vor.u32 %v18723_v9, %v15890_v56  ;;  %v16887_v63 = vor.u32 %v18967_v38, %v16884_v5  ;;  %v17106_v48 = vld [vmem:[%s28965_s9 + $0xf98] sm:$0xf]  ;;  %v18959_v20 = vld [vmem:[%s28965_s9 + $0xd9c] sm:$0xf] }
 0x611   :  { %11529 = vmatpush.bf16.msra.mxu3 %v17291_v52  ;;  %v15955_v52 = vor.u32 %v18739_v14, %v15954_v0  ;;  %v10670_v27 = vmax.f32 %v10098_v46, 0.0  ;;  %v16852_v3 = vld [vmem:[%s28965_s9 + $0xdb8] sm:$0xf0]  ;;  %v19036_v0 = vld [vmem:[#allocation2 + $0x4] sm:$0xf] }
 0x612   :  { %11519 = vmatpush.bf16.msra.mxu2 %v17195_v22  ;;  %v10677_v7 = vpack.c.bf16 %v10663_v41, %v10662_v32  ;;  %v10196_v22 = vadd.f32 %v10195_v51, %v10182_v13  ;;  %v16855_v61 = vor.u32 %v18959_v20, %v16852_v3  ;;  %v18951_v14 = vld [vmem:[%s28965_s9 + $0xd5c] sm:$0xf]  ;;  %v27987_v41 = vor.u32 %v19036_v0, %v17148_v60  ;;  %v17042_v44 = vld [vmem:[%s28965_s9 + $0xf18] sm:$0xf]  ;;  %v19089_v21 = vld [vmem:[%s28967_s11 + $0x164] sm:$0xf0]  ;;  %v28087_v20 = vpop.f32.mrf.mxu2 }
 0x613   :  { %10579 = vmatpush.bf16.msrb.mxu0 %v15767_v6  ;;  %v19035_v6 = vld [vmem:[%s28965_s9 + $0xff4] sm:$0xf0]  ;;  %v16820_v32 = vld [vmem:[%s28965_s9 + $0xd78] sm:$0xf0]  ;;  %v17338_v0 = vld [vmem:[%s28967_s11 + $0x140] sm:$0xf] }
 0x614   :  { %10685 = vst [vmem:[#allocation2 + $0x8] sm:$0xff] %v10677_v7  ;;  %10483 = vmatpush.bf16.msrb.mxu1 %v15955_v52  ;;  %v17139_v55 = vor.u32 %v19035_v6, %v17138_v58  ;;  %v16823_v49 = vor.u32 %v18951_v14, %v16820_v32  ;;  %v19011_v25 = vld [vmem:[%s28965_s9 + $0xf34] sm:$0xf0]  ;;  %v16756_v51 = vld [vmem:[%s28965_s9 + $0xcf8] sm:$0xf0] }
 0x615   :  { %11530 = vmatpush.bf16.msra.mxu3 %v17283_v18  ;;  %v10209_v28 = vpop.f32.mrf.mxu1  ;;  %v15671_v18 = vor.u32 %v18663_v42, %v15668_v59  ;;  %v17043_v10 = vor.u32 %v19011_v25, %v17042_v44  ;;  %v17010_v52 = vld [vmem:[%s28965_s9 + $0xed8] sm:$0xf]  ;;  %v18927_v46 = vld [vmem:[%s28965_s9 + $0xc9c] sm:$0xf]  ;;  %v19085_v14 = vld [vmem:[%s28967_s11 + $0x144] sm:$0xf0] }
 0x616   :  { %11520 = vmatpush.bf16.msra.mxu2 %v17187_v50  ;;  %v10210_v8 = vadd.f32 %v10209_v28, %v10196_v22  ;;  %v17251_v50 = vor.u32 %v19063_v53, %v17250_v11  ;;  %v19003_v31 = vld [vmem:[%s28965_s9 + $0xef4] sm:$0xf0]  ;;  %v16724_v22 = vld [vmem:[%s28965_s9 + $0xcb8] sm:$0xf0] }
 0x617   :  { %10580 = vmatpush.bf16.msrb.mxu0 %v15735_v45  ;;  %v17074_v45 = vld [vmem:[%s28965_s9 + $0xf58] sm:$0xf]  ;;  %v17011_v19 = vor.u32 %v19003_v31, %v17010_v52  ;;  %v16727_v59 = vor.u32 %v18927_v46, %v16724_v22  ;;  %v18911_v9 = vld [vmem:[%s28965_s9 + $0xc1c] sm:$0xf]  ;;  %v17482_v31 = vld [vmem:[%s28967_s11 + $0x260] sm:$0xf] }
 0x618   :  { %v10671_v62 = vmax.f32 %v10210_v8, 0.0  ;;  %10484 = vmatpush.bf16.msrb.mxu1 %v15923_v12  ;;  %v16978_v57 = vld [vmem:[%s28965_s9 + $0xe98] sm:$0xf]  ;;  %v18919_v8 = vld [vmem:[%s28965_s9 + $0xc5c] sm:$0xf] }
 0x619   :  { %11531 = vmatpush.bf16.msra.mxu3 %v17275_v43  ;;  %v19027_v43 = vld [vmem:[%s28965_s9 + $0xfb4] sm:$0xf0]  ;;  %v16692_v12 = vld [vmem:[%s28965_s9 + $0xc78] sm:$0xf0] }
 0x61a   :  { %11521 = vmatpush.bf16.msra.mxu2 %v17179_v35  ;;  %v10681_v36 = vpack.c.bf16 %v10671_v62, %v10670_v27  ;;  %v17107_v2 = vor.u32 %v19027_v43, %v17106_v48  ;;  %v19019_v35 = vld [vmem:[%s28965_s9 + $0xf74] sm:$0xf0]  ;;  %v16695_v53 = vor.u32 %v18919_v8, %v16692_v12  ;;  %v16660_v26 = vld [vmem:[%s28965_s9 + $0xc38] sm:$0xf0]  ;;  %v17362_v62 = vld [vmem:[%s28967_s11 + $0x170] sm:$0xf] }
 0x61b   :  { %10581 = vmatpush.bf16.msrb.mxu0 %v15703_v24  ;;  %v17075_v13 = vor.u32 %v19019_v35, %v17074_v45  ;;  %v16759_v24 = vor.u32 %v18935_v29, %v16756_v51  ;;  %v18995_v16 = vld [vmem:[%s28965_s9 + $0xeb4] sm:$0xf0]  ;;  %v18775_v47 = vld [vmem:[%s28965_s9 + $0x7dc] sm:$0xf]  ;;  %v17346_v43 = vld [vmem:[%s28967_s11 + $0x150] sm:$0xf]  ;;  %v28131_v29 = vpop.f32.mrf.mxu0 }
 0x61c   :  { %10689 = vst [vmem:[#allocation2 + $0x28] sm:$0xff] %v10681_v36  ;;  %10485 = vmatpush.bf16.msrb.mxu1 %v15891_v17  ;;  %v16979_v42 = vor.u32 %v18995_v16, %v16978_v57  ;;  %v16946_v28 = vld [vmem:[%s28965_s9 + $0xe58] sm:$0xf]  ;;  %v16116_v27 = vld [vmem:[%s28965_s9 + $0x7f8] sm:$0xf0] }
 0x61d   :  { %11532 = vmatpush.bf16.msra.mxu3 %v17267_v54  ;;  %11522 = vmatmul.bf16.vlgmr.msra.gmra.mxu2 %v27916_v40  ;;  %v16788_v54 = vld [vmem:[%s28965_s9 + $0xd38] sm:$0xf0]  ;;  %v16914_v56 = vld [vmem:[%s28965_s9 + $0xe18] sm:$0xf]  ;;  %v16119_v38 = vor.u32 %v18775_v47, %v16116_v27  ;;  %v17490_v45 = vld [vmem:[%s28967_s11 + $0x270] sm:$0xf] }
 0x61e   :  { %v19091_v58 = vld [vmem:[%s28967_s11 + $0x174] sm:$0xf0]  ;;  %v18767_v36 = vld [vmem:[%s28965_s9 + $0x79c] sm:$0xf]  ;;  %v17554_v35 = vld [vmem:[%s28967_s11 + $0x2f0] sm:$0xf] }
 0x61f   :  { %10582 = vmatpush.bf16.msrb.mxu0 %v15671_v18  ;;  %10486 = vmatmul.bf16.vlgmr.msrb.gmra.mxu1 %v25262_v37  ;;  %v18979_v18 = vld [vmem:[%s28965_s9 + $0xe34] sm:$0xf0]  ;;  %v17363_v5 = vor.u32 %v19091_v58, %v17362_v62  ;;  %v16084_v17 = vld [vmem:[%s28965_s9 + $0x7b8] sm:$0xf0]  ;;  %v19121_v51 = vld [vmem:[%s28967_s11 + $0x264] sm:$0xf0] }
 0x620   :  { %10534 = vmatpush.bf16.msra.mxu1 %v17139_v55  ;;  %v16915_v6 = vor.u32 %v18979_v18, %v16914_v56  ;;  %v17355_v55 = vor.u32 %v19089_v21, %v17354_v30  ;;  %v16052_v48 = vld [vmem:[%s28965_s9 + $0x778] sm:$0xf0]  ;;  %v19083_v52 = vld [vmem:[%s28967_s11 + $0x134] sm:$0xf0]  ;;  %v17483_v22 = vor.u32 %v19121_v51, %v17482_v31  ;;  %v17538_v12 = vld [vmem:[%s28967_s11 + $0x2d0] sm:$0xf] }
 0x621   :  { %11533 = vmatpush.bf16.msra.mxu3 %v17259_v23  ;;  %v18987_v23 = vld [vmem:[%s28965_s9 + $0xe74] sm:$0xf0]  ;;  %v16020_v60 = vld [vmem:[%s28965_s9 + $0x738] sm:$0xf0]  ;;  %v17530_v30 = vld [vmem:[%s28967_s11 + $0x2c0] sm:$0xf] }
 0x622   :  { %v16947_v11 = vor.u32 %v18987_v23, %v16946_v28  ;;  %v18735_v16 = vld [vmem:[%s28965_s9 + $0x69c] sm:$0xf]  ;;  %v17474_v23 = vld [vmem:[%s28967_s11 + $0x250] sm:$0xf]  ;;  %v19119_v8 = vld [vmem:[%s28967_s11 + $0x254] sm:$0xf0] }
 0x623   :  { %10583 = vmatpush.bf16.msrb.mxu0 %v15639_v34  ;;  %v16087_v34 = vor.u32 %v18767_v36, %v16084_v17  ;;  %v15956_v46 = vld [vmem:[%s28965_s9 + $0x6b8] sm:$0xf0]  ;;  %v17475_v56 = vor.u32 %v19119_v8, %v17474_v23  ;;  %v19135_v18 = vld [vmem:[%s28967_s11 + $0x2d4] sm:$0xf0]  ;;  %v19117_v17 = vld [vmem:[%s28967_s11 + $0x244] sm:$0xf0] }
 0x624   :  { %10535 = vmatpush.bf16.msra.mxu1 %v17107_v2  ;;  %v18751_v2 = vld [vmem:[%s28965_s9 + $0x71c] sm:$0xf]  ;;  %v15959_v47 = vor.u32 %v18735_v16, %v15956_v46  ;;  %v19133_v21 = vld [vmem:[%s28967_s11 + $0x2c4] sm:$0xf0]  ;;  %v17450_v51 = vld [vmem:[%s28967_s11 + $0x220] sm:$0xf] }
 0x625   :  { %11534 = vmatpush.bf16.msra.mxu3 %v17251_v50  ;;  %v16663_v50 = vor.u32 %v18911_v9, %v16660_v26  ;;  %v16023_v25 = vor.u32 %v18751_v2, %v16020_v60  ;;  %v28168_v9 = vpop.f32.mrf.mxu1  ;;  %v17539_v26 = vor.u32 %v19135_v18, %v17538_v12  ;;  %v18727_v58 = vld [vmem:[%s28965_s9 + $0x65c] sm:$0xf]  ;;  %v28210_v2 = vpop.f32.mrf.mxu0  ;;  %v17154_v16 = vld [vmem:[#allocation2 + $0x8] sm:$0xf]  ;;  %v19111_v8 = vld [vmem:[%s28967_s11 + $0x214] sm:$0xf0] }
 0x626   :  { %10584 = vmatmul.bf16.vlgmr.msrb.gmra.mxu0 %v25058_v15  ;;  %v18943_v15 = vld [vmem:[%s28965_s9 + $0xd1c] sm:$0xf]  ;;  %v17506_v12 = vld [vmem:[%s28967_s11 + $0x290] sm:$0xf] }
 0x627   :  { %10632 = vmatpush.bf16.msra.mxu0 %v16887_v63  ;;  %v16791_v7 = vor.u32 %v18943_v15, %v16788_v54  ;;  %v18759_v63 = vld [vmem:[%s28965_s9 + $0x75c] sm:$0xf]  ;;  %v17339_v15 = vor.u32 %v19085_v14, %v17338_v0 }
 0x628   :  { %10536 = vmatpush.bf16.msra.mxu1 %v17075_v13  ;;  %v16055_v3 = vor.u32 %v18759_v63, %v16052_v48  ;;  %v19139_v13 = vld [vmem:[%s28967_s11 + $0x2f4] sm:$0xf0]  ;;  %v18743_v54 = vld [vmem:[%s28965_s9 + $0x6dc] sm:$0xf]  ;;  %v17306_v63 = vld [vmem:[%s28967_s11 + $0x100] sm:$0xf] }
 0x629   :  { %11535 = vmatpush.bf16.msra.mxu3 %v17243_v1  ;;  %v19087_v1 = vld [vmem:[%s28967_s11 + $0x154] sm:$0xf0]  ;;  %v17555_v44 = vor.u32 %v19139_v13, %v17554_v35  ;;  %v18719_v36 = vld [vmem:[%s28965_s9 + $0x61c] sm:$0xf]  ;;  %v19077_v48 = vld [vmem:[%s28967_s11 + $0x104] sm:$0xf0] }
 0x62a   :  { %v19031_v35 = vld [vmem:[%s28965_s9 + $0xfdc] sm:$0xf] }
 0x62b   :  { %10633 = vmatpush.bf16.msra.mxu0 %v16855_v61  ;;  %v17347_v61 = vor.u32 %v19087_v1, %v17346_v43  ;;  %v17531_v1 = vor.u32 %v19133_v21, %v17530_v30  ;;  %v17140_v0 = vld [vmem:[%s28965_s9 + $0xff8] sm:$0xf0] }
 0x62c   :  { %11536 = vmatmul.bf16.vlgmr.msra.gmra.mxu3 %v27987_v41  ;;  %10537 = vmatpush.bf16.msra.mxu1 %v17043_v10  ;;  %v15988_v10 = vld [vmem:[%s28965_s9 + $0x6f8] sm:$0xf0] }
 0x62d   :  { %11584 = vmatpush.bf16.msrb.mxu3 %v17555_v44  ;;  %v15991_v57 = vor.u32 %v18743_v54, %v15988_v10  ;;  %v17307_v54 = vor.u32 %v19077_v48, %v17306_v63  ;;  %v17143_v10 = vor.u32 %v19031_v35, %v17140_v0  ;;  %v17108_v31 = vld [vmem:[%s28965_s9 + $0xfb8] sm:$0xf0]  ;;  %v19074_v63 = vld [vmem:[%s28967_s11 + $0xf4] sm:$0xf] }
 0x62e   :  { %v17076_v18 = vld [vmem:[%s28965_s9 + $0xf78] sm:$0xf0] }
 0x62f   :  { %10634 = vmatpush.bf16.msra.mxu0 %v16823_v49  ;;  %v28114_v49 = vpop.f32.mrf.mxu3 }
 0x630   :  { %10538 = vmatpush.bf16.msra.mxu1 %v17011_v19  ;;  %v17546_v19 = vld [vmem:[%s28967_s11 + $0x2e0] sm:$0xf] }
 0x633   :  { %10635 = vmatpush.bf16.msra.mxu0 %v16791_v7  ;;  %v17330_v7 = vld [vmem:[%s28967_s11 + $0x130] sm:$0xf] }
 0x634   :  { %10539 = vmatpush.bf16.msra.mxu1 %v16979_v42  ;;  %v17331_v28 = vor.u32 %v19083_v52, %v17330_v7  ;;  %v19041_v7 = vld [vmem:[#allocation2 + $0x24] sm:$0xf0]  ;;  %v19023_v52 = vld [vmem:[%s28965_s9 + $0xf9c] sm:$0xf] }
 0x635   :  { %v17111_v23 = vor.u32 %v19023_v52, %v17108_v31  ;;  %v18991_v52 = vld [vmem:[%s28965_s9 + $0xe9c] sm:$0xf] }
 0x636   :  { %v16980_v31 = vld [vmem:[%s28965_s9 + $0xeb8] sm:$0xf0] }
 0x637   :  { %10636 = vmatpush.bf16.msra.mxu0 %v16759_v24  ;;  %v19137_v24 = vld [vmem:[%s28967_s11 + $0x2e4] sm:$0xf0]  ;;  %v28170_v27 = vpop.f32.mrf.mxu3 }
 0x638   :  { %10540 = vmatpush.bf16.msra.mxu1 %v16947_v11  ;;  %v17547_v42 = vor.u32 %v19137_v24, %v17546_v19  ;;  %v17322_v11 = vld [vmem:[%s28967_s11 + $0x120] sm:$0xf]  ;;  %v19113_v19 = vld [vmem:[%s28967_s11 + $0x224] sm:$0xf0] }
 0x639   :  { %v17514_v24 = vld [vmem:[%s28967_s11 + $0x2a0] sm:$0xf]  ;;  %v17451_v46 = vor.u32 %v19113_v19, %v17450_v51  ;;  %v7192_v51 = vperm.slane %v27686_v33, 4 }
 0x63a   :  { %11585 = vmatpush.bf16.msrb.mxu3 %v17547_v42  ;;  %v17442_v42 = vld [vmem:[%s28967_s11 + $0x210] sm:$0xf] }
 0x63b   :  { %10637 = vmatpush.bf16.msra.mxu0 %v16727_v59  ;;  %v28148_v59 = vpop.f32.mrf.mxu2 }
 0x63c   :  { %10541 = vmatpush.bf16.msra.mxu1 %v16915_v6  ;;  %v15924_v6 = vld [vmem:[%s28965_s9 + $0x678] sm:$0xf0] }
 0x63e   :  { %11586 = vmatpush.bf16.msrb.mxu3 %v17539_v26  ;;  %v17443_v26 = vor.u32 %v19111_v8, %v17442_v42  ;;  %v16983_v42 = vor.u32 %v18991_v52, %v16980_v31  ;;  %v10224_v52 = vadd.f32 %v28148_v59, %v7192_v51  ;;  %v19046_v59 = vld [vmem:[%s28967_s11 + $0x14] sm:$0xf] }
 0x63f   :  { %10638 = vmatpush.bf16.msra.mxu0 %v16695_v53  ;;  %10542 = vmatmul.bf16.vlgmr.msra.gmra.mxu1 %v25903_v4  ;;  %v19081_v53 = vld [vmem:[%s28967_s11 + $0x124] sm:$0xf0] }
 0x640   :  { %10590 = vmatpush.bf16.msrb.mxu1 %v16119_v38  ;;  %v17323_v62 = vor.u32 %v19081_v53, %v17322_v11  ;;  %v19079_v38 = vld [vmem:[%s28967_s11 + $0x114] sm:$0xf0]  ;;  %v28266_v53 = vor.u32 %v19041_v7, %v17154_v16  ;;  %v17220_v16 = vld [vmem:[%s28967_s11 + $0x58] sm:$0xf0] }
 0x641   :  { %v19127_v11 = vld [vmem:[%s28967_s11 + $0x294] sm:$0xf0] }
 0x642   :  { %11587 = vmatpush.bf16.msrb.mxu3 %v17531_v1  ;;  %v17300_v1 = vld [vmem:[%s28967_s11 + $0xf8] sm:$0xf0] }
 0x643   :  { %10639 = vmatpush.bf16.msra.mxu0 %v16663_v50  ;;  %v17314_v50 = vld [vmem:[%s28967_s11 + $0x110] sm:$0xf] }
 0x644   :  { %10591 = vmatpush.bf16.msrb.mxu1 %v16087_v34  ;;  %v15927_v34 = vor.u32 %v18727_v58, %v15924_v6  ;;  %v17315_v60 = vor.u32 %v19079_v38, %v17314_v50  ;;  %v17434_v58 = vld [vmem:[%s28967_s11 + $0x200] sm:$0xf]  ;;  %v19109_v6 = vld [vmem:[%s28967_s11 + $0x204] sm:$0xf0] }
 0x645   :  { %v17498_v50 = vld [vmem:[%s28967_s11 + $0x280] sm:$0xf]  ;;  %v17435_v30 = vor.u32 %v19109_v6, %v17434_v58  ;;  %v19068_v58 = vld [vmem:[%s28967_s11 + $0xc4] sm:$0xf]  ;;  %v17276_v6 = vld [vmem:[%s28967_s11 + $0xc8] sm:$0xf0] }
 0x646   :  { %10640 = vmatmul.bf16.vlgmr.msra.gmra.mxu0 %v25552_v39  ;;  %v19123_v39 = vld [vmem:[%s28967_s11 + $0x274] sm:$0xf0] }
 0x647   :  { %11542 = vmatpush.bf16.msrb.mxu0 %v17363_v5  ;;  %v17491_v32 = vor.u32 %v19123_v39, %v17490_v45  ;;  %v17466_v5 = vld [vmem:[%s28967_s11 + $0x240] sm:$0xf]  ;;  %v19115_v45 = vld [vmem:[%s28967_s11 + $0x234] sm:$0xf0]  ;;  %v17522_v39 = vld [vmem:[%s28967_s11 + $0x2b0] sm:$0xf] }
 0x648   :  { %10592 = vmatpush.bf16.msrb.mxu1 %v16055_v3  ;;  %v17467_v43 = vor.u32 %v19117_v17, %v17466_v5  ;;  %v28208_v3 = vpop.f32.mrf.mxu2  ;;  %v19125_v17 = vld [vmem:[%s28967_s11 + $0x284] sm:$0xf0] }
 0x649   :  { %11570 = vmatpush.bf16.msrb.mxu2 %v17491_v32  ;;  %v19131_v32 = vld [vmem:[%s28967_s11 + $0x2b4] sm:$0xf0]  ;;  %v17499_v21 = vor.u32 %v19125_v17, %v17498_v50 }
 0x64a   :  { %v17523_v13 = vor.u32 %v19131_v32, %v17522_v39  ;;  %v17012_v39 = vld [vmem:[%s28965_s9 + $0xef8] sm:$0xf0]  ;;  %v17228_v32 = vld [vmem:[%s28967_s11 + $0x68] sm:$0xf0] }
 0x64b   :  { %11543 = vmatpush.bf16.msrb.mxu0 %v17355_v55  ;;  %v15892_v55 = vld [vmem:[%s28965_s9 + $0x638] sm:$0xf0] }
 0x64c   :  { %10593 = vmatpush.bf16.msrb.mxu1 %v16023_v25  ;;  %v15895_v44 = vor.u32 %v18719_v36, %v15892_v55  ;;  %v28230_v25 = vpop.f32.mrf.mxu3  ;;  %11588 = vmatpush.bf16.msrb.mxu3 %v17523_v13  ;;  %v17044_v36 = vld [vmem:[%s28965_s9 + $0xf38] sm:$0xf0]  ;;  %v19072_v13 = vld [vmem:[%s28967_s11 + $0xe4] sm:$0xf] }
 0x64d   :  { %11571 = vmatpush.bf16.msrb.mxu2 %v17483_v22  ;;  %v17236_v55 = vld [vmem:[%s28967_s11 + $0x78] sm:$0xf0] }
 0x64f   :  { %11544 = vmatpush.bf16.msrb.mxu0 %v17347_v61  ;;  %v17458_v61 = vld [vmem:[%s28967_s11 + $0x230] sm:$0xf] }
 0x650   :  { %10594 = vmatpush.bf16.msrb.mxu1 %v15991_v57  ;;  %v17459_v14 = vor.u32 %v19115_v45, %v17458_v61  ;;  %v19129_v57 = vld [vmem:[%s28967_s11 + $0x2a4] sm:$0xf0]  ;;  %v18999_v45 = vld [vmem:[%s28965_s9 + $0xedc] sm:$0xf] }
 0x651   :  { %11572 = vmatpush.bf16.msrb.mxu2 %v17475_v56  ;;  %v17515_v22 = vor.u32 %v19129_v57, %v17514_v24  ;;  %v19015_v56 = vld [vmem:[%s28965_s9 + $0xf5c] sm:$0xf]  ;;  %v19054_v57 = vld [vmem:[%s28967_s11 + $0x54] sm:$0xf] }
 0x652   :  { %v17079_v5 = vor.u32 %v19015_v56, %v17076_v18  ;;  %v16948_v56 = vld [vmem:[%s28965_s9 + $0xe78] sm:$0xf0] }
 0x653   :  { %11545 = vmatpush.bf16.msrb.mxu0 %v17339_v15  ;;  %v28232_v15 = vpop.f32.mrf.mxu1  ;;  %11589 = vmatpush.bf16.msrb.mxu3 %v17515_v22  ;;  %v17284_v22 = vld [vmem:[%s28967_s11 + $0xd8] sm:$0xf0] }
 0x654   :  { %10595 = vmatpush.bf16.msrb.mxu1 %v15959_v47  ;;  %v17507_v47 = vor.u32 %v19127_v11, %v17506_v12  ;;  %v28307_v48 = vpop.f32.mrf.mxu3  ;;  %v7193_v12 = vperm.slane %v27686_v33, 5  ;;  %v18983_v11 = vld [vmem:[%s28965_s9 + $0xe5c] sm:$0xf]  ;;  %v17212_v33 = vld [vmem:[%s28967_s11 + $0x48] sm:$0xf0] }
 0x655   :  { %11573 = vmatpush.bf16.msrb.mxu2 %v17467_v43 }
 0x657   :  { %11546 = vmatpush.bf16.msrb.mxu0 %v17331_v28  ;;  %v28255_v28 = vpop.f32.mrf.mxu0  ;;  %11590 = vmatpush.bf16.msrb.mxu3 %v17507_v47  ;;  %v10222_v47 = vadd.f32 %v28087_v20, %v7192_v51  ;;  %v17188_v51 = vld [vmem:[%s28967_s11 + $0x18] sm:$0xf0] }
 0x658   :  { %10596 = vmatpush.bf16.msrb.mxu1 %v15927_v34  ;;  %v19058_v34 = vld [vmem:[%s28967_s11 + $0x74] sm:$0xf] }
 0x659   :  { %11574 = vmatpush.bf16.msrb.mxu2 %v17459_v14  ;;  %v17239_v43 = vor.u32 %v19058_v34, %v17236_v55  ;;  %v19056_v14 = vld [vmem:[%s28967_s11 + $0x64] sm:$0xf]  ;;  %v10236_v17 = vadd.f32 %v28114_v49, %v10222_v47  ;;  %v17426_v55 = vld [vmem:[%s28967_s11 + $0x1f0] sm:$0xf]  ;;  %v19050_v49 = vld [vmem:[%s28967_s11 + $0x34] sm:$0xf] }
 0x65a   :  { %v17410_v47 = vld [vmem:[%s28967_s11 + $0x1d0] sm:$0xf] }
 0x65b   :  { %11547 = vmatpush.bf16.msrb.mxu0 %v17323_v62  ;;  %v28274_v62 = vpop.f32.mrf.mxu2  ;;  %v28287_v38 = vpop.f32.mrf.mxu1  ;;  %11591 = vmatpush.bf16.msrb.mxu3 %v17499_v21  ;;  %v16916_v21 = vld [vmem:[%s28965_s9 + $0xe38] sm:$0xf0] }
 0x65c   :  { %10597 = vmatpush.bf16.msrb.mxu1 %v15895_v44  ;;  %v17292_v44 = vld [vmem:[%s28967_s11 + $0xe8] sm:$0xf0]  ;;  %v10347_v19 = vpop.f32.mrf.mxu3 }
 0x65d   :  { %11575 = vmatpush.bf16.msrb.mxu2 %v17451_v46  ;;  %v17295_v7 = vor.u32 %v19072_v13, %v17292_v44  ;;  %v19070_v46 = vld [vmem:[%s28967_s11 + $0xd4] sm:$0xf] }
 0x65e   :  { %v17287_v8 = vor.u32 %v19070_v46, %v17284_v22 }
 0x65f   :  { %11548 = vmatpush.bf16.msrb.mxu0 %v17315_v60  ;;  %10598 = vmatmul.bf16.vlgmr.msrb.gmra.mxu1 %v25262_v37  ;;  %v19007_v37 = vld [vmem:[%s28965_s9 + $0xf1c] sm:$0xf]  ;;  %v17303_v60 = vor.u32 %v19074_v63, %v17300_v1  ;;  %v28318_v0 = vpop.f32.mrf.mxu0  ;;  %v19107_v63 = vld [vmem:[%s28967_s11 + $0x1f4] sm:$0xf0] }
 0x660   :  { %10646 = vmatpush.bf16.msra.mxu1 %v17143_v10  ;;  %v17047_v61 = vor.u32 %v19007_v37, %v17044_v36  ;;  %v17231_v10 = vor.u32 %v19056_v14, %v17228_v32  ;;  %v17279_v36 = vor.u32 %v19068_v58, %v17276_v6  ;;  %v17427_v44 = vor.u32 %v19107_v63, %v17426_v55 }
 0x661   :  { %11576 = vmatpush.bf16.msrb.mxu2 %v17443_v26  ;;  %11640 = vmatpush.bf16.msra.mxu3 %v17303_v60  ;;  %v19052_v26 = vld [vmem:[%s28967_s11 + $0x44] sm:$0xf]  ;;  %v17204_v60 = vld [vmem:[%s28967_s11 + $0x38] sm:$0xf0] }
 0x662   :  { %v17215_v37 = vor.u32 %v19052_v26, %v17212_v33  ;;  %v17207_v14 = vor.u32 %v19050_v49, %v17204_v60  ;;  %v17252_v26 = vld [vmem:[%s28967_s11 + $0x98] sm:$0xf0]  ;;  %v19103_v33 = vld [vmem:[%s28967_s11 + $0x1d4] sm:$0xf0] }
 0x663   :  { %11549 = vmatpush.bf16.msrb.mxu0 %v17307_v54  ;;  %v10333_v35 = vpop.f32.mrf.mxu2  ;;  %v17015_v54 = vor.u32 %v18999_v45, %v17012_v39  ;;  %v28339_v24 = vpop.f32.mrf.mxu1  ;;  %v17268_v45 = vld [vmem:[%s28967_s11 + $0xb8] sm:$0xf0] }
 0x664   :  { %10647 = vmatpush.bf16.msra.mxu1 %v17111_v23  ;;  %v17223_v23 = vor.u32 %v19054_v57, %v17220_v16  ;;  %v10334_v20 = vadd.f32 %v10333_v35, %v7193_v12  ;;  %v10349_v39 = vpop.f32.mrf.mxu3  ;;  %v17260_v57 = vld [vmem:[%s28967_s11 + $0xa8] sm:$0xf0] }
 0x665   :  { %11577 = vmatpush.bf16.msrb.mxu2 %v17435_v30  ;;  %11641 = vmatpush.bf16.msra.mxu3 %v17295_v7  ;;  %v18975_v30 = vld [vmem:[%s28965_s9 + $0xe1c] sm:$0xf]  ;;  %v19048_v7 = vld [vmem:[%s28967_s11 + $0x24] sm:$0xf] }
 0x666   :  { %11550 = vmatmul.bf16.vlgmr.msrb.gmra.mxu0 %v28266_v53  ;;  %v10348_v1 = vadd.f32 %v10347_v19, %v10334_v20  ;;  %v16919_v35 = vor.u32 %v18975_v30, %v16916_v21  ;;  %v19064_v19 = vld [vmem:[%s28967_s11 + $0xa4] sm:$0xf]  ;;  %v17411_v20 = vor.u32 %v19103_v33, %v17410_v47  ;;  %v19037_v47 = vld [vmem:[#allocation2 + $0xc] sm:$0xf] }
 0x667   :  { %v10361_v18 = vpop.f32.mrf.mxu0  ;;  %v19044_v30 = vld [vmem:[%s28967_s11 + $0x4] sm:$0xf] }
 0x668   :  { %10648 = vmatpush.bf16.msra.mxu1 %v17079_v5  ;;  %v16951_v5 = vor.u32 %v18983_v11, %v16948_v56  ;;  %v10362_v13 = vadd.f32 %v10361_v18, %v10348_v1 }
 0x669   :  { %11626 = vmatpush.bf16.msra.mxu2 %v17239_v43  ;;  %11642 = vmatpush.bf16.msra.mxu3 %v17287_v8  ;;  %v10250_v43 = vadd.f32 %v28131_v29, %v10236_v17  ;;  %v10238_v8 = vadd.f32 %v28170_v27, %v10224_v52  ;;  %v17191_v27 = vor.u32 %v19046_v59, %v17188_v51 }
 0x66b   :  { %v10335_v50 = vpop.f32.mrf.mxu2  ;;  %v10375_v34 = vpop.f32.mrf.mxu1  ;;  %v10264_v29 = vadd.f32 %v28168_v9, %v10250_v43  ;;  %v17196_v9 = vld [vmem:[%s28967_s11 + $0x28] sm:$0xf0] }
 0x66c   :  { %10649 = vmatpush.bf16.msra.mxu1 %v17047_v61  ;;  %v19066_v61 = vld [vmem:[%s28967_s11 + $0xb4] sm:$0xf]  ;;  %v10376_v31 = vadd.f32 %v10375_v34, %v10362_v13  ;;  %v17199_v22 = vor.u32 %v19048_v7, %v17196_v9  ;;  %v10336_v11 = vadd.f32 %v10335_v50, %v7193_v12  ;;  %v10403_v50 = vpop.f32.mrf.mxu3  ;;  %v17244_v34 = vld [vmem:[%s28967_s11 + $0x88] sm:$0xf0]  ;;  %v19097_v7 = vld [vmem:[%s28967_s11 + $0x1a4] sm:$0xf0] }
 0x66d   :  { %11627 = vmatpush.bf16.msra.mxu2 %v17231_v10  ;;  %11643 = vmatpush.bf16.msra.mxu3 %v17279_v36  ;;  %v17271_v32 = vor.u32 %v19066_v61, %v17268_v45  ;;  %v19105_v10 = vld [vmem:[%s28967_s11 + $0x1e4] sm:$0xf0]  ;;  %v10278_v56 = vadd.f32 %v28208_v3, %v10264_v29  ;;  %v10252_v3 = vadd.f32 %v28210_v2, %v10238_v8  ;;  %v17180_v2 = vld [vmem:[%s28967_s11 + $0x8] sm:$0xf0] }
 0x66e   :  { %v10350_v58 = vadd.f32 %v10349_v39, %v10336_v11  ;;  %v17183_v21 = vor.u32 %v19044_v30, %v17180_v2  ;;  %v17394_v39 = vld [vmem:[%s28967_s11 + $0x1b0] sm:$0xf]  ;;  %v19093_v8 = vld [vmem:[%s28967_s11 + $0x184] sm:$0xf0] }
 0x66f   :  { %v10363_v46 = vpop.f32.mrf.mxu0  ;;  %v10292_v17 = vadd.f32 %v28230_v25, %v10278_v56  ;;  %v19101_v25 = vld [vmem:[%s28967_s11 + $0x1c4] sm:$0xf0] }
 0x670   :  { %10650 = vmatpush.bf16.msra.mxu1 %v17015_v54  ;;  %v17418_v54 = vld [vmem:[%s28967_s11 + $0x1e0] sm:$0xf]  ;;  %v10364_v36 = vadd.f32 %v10363_v46, %v10350_v58  ;;  %v19095_v46 = vld [vmem:[%s28967_s11 + $0x194] sm:$0xf0]  ;;  %v17556_v58 = vld [vmem:[%s28967_s11 + $0x2f8] sm:$0xf0] }
 0x671   :  { %11628 = vmatpush.bf16.msra.mxu2 %v17223_v23  ;;  %11644 = vmatpush.bf16.msra.mxu3 %v17271_v32  ;;  %v19062_v23 = vld [vmem:[%s28967_s11 + $0x94] sm:$0xf]  ;;  %v17419_v18 = vor.u32 %v19105_v10, %v17418_v54  ;;  %v10306_v60 = vadd.f32 %v28255_v28, %v10292_v17  ;;  %v17386_v10 = vld [vmem:[%s28967_s11 + $0x1a0] sm:$0xf] }
 0x672   :  { %v17255_v12 = vor.u32 %v19062_v23, %v17252_v26  ;;  %v17370_v23 = vld [vmem:[%s28967_s11 + $0x180] sm:$0xf] }
 0x673   :  { %v10389_v16 = vpop.f32.mrf.mxu2  ;;  %v17371_v26 = vor.u32 %v19093_v8, %v17370_v23  ;;  %v19108_v23 = vld [vmem:[%s28967_s11 + $0x204] sm:$0xf]  ;;  %v17436_v8 = vld [vmem:[%s28967_s11 + $0x208] sm:$0xf0] }
 0x674   :  { %10651 = vmatpush.bf16.msra.mxu1 %v16983_v42  ;;  %v17263_v42 = vor.u32 %v19064_v19, %v17260_v57  ;;  %v10390_v6 = vadd.f32 %v10389_v16, %v10376_v31  ;;  %v10405_v54 = vpop.f32.mrf.mxu3  ;;  %v17378_v16 = vld [vmem:[%s28967_s11 + $0x190] sm:$0xf] }
 0x675   :  { %11629 = vmatpush.bf16.msra.mxu2 %v17215_v37  ;;  %v10266_v37 = vadd.f32 %v28232_v15, %v10252_v3  ;;  %v17402_v15 = vld [vmem:[%s28967_s11 + $0x1c0] sm:$0xf]  ;;  %v19138_v3 = vld [vmem:[%s28967_s11 + $0x2f4] sm:$0xf] }
 0x676   :  { %11645 = vmatpush.bf16.msra.mxu3 %v17263_v42  ;;  %v10404_v63 = vadd.f32 %v10403_v50, %v10390_v6  ;;  %v17403_v61 = vor.u32 %v19101_v25, %v17402_v15  ;;  %v19120_v50 = vld [vmem:[%s28967_s11 + $0x264] sm:$0xf]  ;;  %v17548_v25 = vld [vmem:[%s28967_s11 + $0x2e8] sm:$0xf0] }
 0x677   :  { %v10417_v43 = vpop.f32.mrf.mxu0  ;;  %v10280_v1 = vadd.f32 %v28274_v62, %v10266_v37  ;;  %v19136_v15 = vld [vmem:[%s28967_s11 + $0x2e4] sm:$0xf] }
 0x678   :  { %10652 = vmatpush.bf16.msra.mxu1 %v16951_v5  ;;  %v10377_v5 = vpop.f32.mrf.mxu1  ;;  %v10418_v29 = vadd.f32 %v10417_v43, %v10404_v63  ;;  %v17476_v63 = vld [vmem:[%s28967_s11 + $0x258] sm:$0xf0] }
 0x679   :  { %11630 = vmatpush.bf16.msra.mxu2 %v17207_v14  ;;  %v10378_v55 = vadd.f32 %v10377_v5, %v10364_v36  ;;  %v10320_v14 = vadd.f32 %v28287_v38, %v10306_v60  ;;  %v10294_v28 = vadd.f32 %v28307_v48, %v10280_v1  ;;  %v17387_v48 = vor.u32 %v19097_v7, %v17386_v10  ;;  %v17540_v43 = vld [vmem:[%s28967_s11 + $0x2d8] sm:$0xf0]  ;;  %v17682_v10 = vld [vmem:[%s28967_s11 + $0x3f0] sm:$0xf] }
 0x67a   :  { %11646 = vmatpush.bf16.msra.mxu3 %v17255_v12  ;;  %v17492_v12 = vld [vmem:[%s28967_s11 + $0x278] sm:$0xf0] }
 0x67b   :  { %v10391_v45 = vpop.f32.mrf.mxu2  ;;  %v10664_v52 = vmax.f32 %v10320_v14, 0.0  ;;  %v10308_v9 = vadd.f32 %v28318_v0, %v10294_v28  ;;  %v17379_v0 = vor.u32 %v19095_v46, %v17378_v16  ;;  %v19130_v28 = vld [vmem:[%s28967_s11 + $0x2b4] sm:$0xf] }
 0x67c   :  { %10653 = vmatpush.bf16.msra.mxu1 %v16919_v35  ;;  %v19099_v35 = vld [vmem:[%s28967_s11 + $0x1b4] sm:$0xf0]  ;;  %v10392_v32 = vadd.f32 %v10391_v45, %v10378_v55  ;;  %v19118_v55 = vld [vmem:[%s28967_s11 + $0x254] sm:$0xf]  ;;  %v17468_v45 = vld [vmem:[%s28967_s11 + $0x248] sm:$0xf0] }
 0x67d   :  { %11631 = vmatpush.bf16.msra.mxu2 %v17199_v22  ;;  %v10322_v22 = vadd.f32 %v28339_v24, %v10308_v9  ;;  %v17156_v24 = vld [vmem:[#allocation2 + $0x28] sm:$0xf0]  ;;  %v17479_v1 = vor.u32 %v19118_v55, %v17476_v63  ;;  %v19171_v9 = vld [vmem:[%s28967_s11 + $0x3f4] sm:$0xf0]  ;;  %v17658_v55 = vld [vmem:[%s28967_s11 + $0x3c0] sm:$0xf] }
 0x67e   :  { %v10406_v38 = vadd.f32 %v10405_v54, %v10392_v32  ;;  %v28491_v33 = vor.u32 %v19037_v47, %v17156_v24  ;;  %v19155_v54 = vld [vmem:[%s28967_s11 + $0x374] sm:$0xf0]  ;;  %v17683_v16 = vor.u32 %v19171_v9, %v17682_v10  ;;  %v28612_v47 = vpop.f32.mrf.mxu3 }
 0x67f   :  { %10654 = vmatmul.bf16.vlgmr.msra.gmra.mxu1 %v25903_v4  ;;  %v19060_v4 = vld [vmem:[%s28967_s11 + $0x84] sm:$0xf]  ;;  %v10419_v57 = vpop.f32.mrf.mxu0  ;;  %v10672_v11 = vmax.f32 %v10322_v22, 0.0  ;;  %v19159_v9 = vld [vmem:[%s28967_s11 + $0x394] sm:$0xf0] }
 0x680   :  { %11556 = vmatpush.bf16.msrb.mxu1 %v17427_v44  ;;  %v17247_v49 = vor.u32 %v19060_v4, %v17244_v34  ;;  %v10431_v62 = vpop.f32.mrf.mxu1  ;;  %v17395_v44 = vor.u32 %v19099_v35, %v17394_v39  ;;  %v10420_v42 = vadd.f32 %v10419_v57, %v10406_v38  ;;  %v17484_v4 = vld [vmem:[%s28967_s11 + $0x268] sm:$0xf0]  ;;  %v17551_v34 = vor.u32 %v19136_v15, %v17548_v25  ;;  %v19132_v39 = vld [vmem:[%s28967_s11 + $0x2c4] sm:$0xf] }
 0x681   :  { %11632 = vmatpush.bf16.msra.mxu2 %v17191_v27  ;;  %v10432_v13 = vadd.f32 %v10431_v62, %v10418_v29  ;;  %v19122_v27 = vld [vmem:[%s28967_s11 + $0x274] sm:$0xf]  ;;  %v17532_v35 = vld [vmem:[%s28967_s11 + $0x2c8] sm:$0xf0]  ;;  %v17460_v62 = vld [vmem:[%s28967_s11 + $0x238] sm:$0xf0] }
 0x682   :  { %11647 = vmatpush.bf16.msra.mxu3 %v17247_v49  ;;  %v17495_v17 = vor.u32 %v19122_v27, %v17492_v12  ;;  %v19134_v49 = vld [vmem:[%s28967_s11 + $0x2d4] sm:$0xf]  ;;  %v17535_v32 = vor.u32 %v19132_v39, %v17532_v35  ;;  %v17516_v57 = vld [vmem:[%s28967_s11 + $0x2a8] sm:$0xf0]  ;;  %v17610_v27 = vld [vmem:[%s28967_s11 + $0x360] sm:$0xf] }
 0x683   :  { %v10665_v31 = vmax.f32 %v10432_v13, 0.0  ;;  %v17543_v60 = vor.u32 %v19134_v49, %v17540_v43  ;;  %v19114_v29 = vld [vmem:[%s28967_s11 + $0x234] sm:$0xf]  ;;  %v17524_v13 = vld [vmem:[%s28967_s11 + $0x2b8] sm:$0xf0] }
 0x684   :  { %11557 = vmatpush.bf16.msrb.mxu1 %v17419_v18  ;;  %v17463_v7 = vor.u32 %v19114_v29, %v17460_v62  ;;  %v19153_v12 = vld [vmem:[%s28967_s11 + $0x364] sm:$0xf0]  ;;  %v17586_v43 = vld [vmem:[%s28967_s11 + $0x330] sm:$0xf]  ;;  %v17578_v29 = vld [vmem:[%s28967_s11 + $0x320] sm:$0xf] }
 0x685   :  { %11633 = vmatpush.bf16.msra.mxu2 %v17183_v21  ;;  %v10678_v19 = vpack.c.bf16 %v10665_v31, %v10664_v52  ;;  %v17487_v21 = vor.u32 %v19120_v50, %v17484_v4  ;;  %v17527_v52 = vor.u32 %v19130_v28, %v17524_v13  ;;  %v19112_v31 = vld [vmem:[%s28967_s11 + $0x224] sm:$0xf]  ;;  %v19169_v50 = vld [vmem:[%s28967_s11 + $0x3e4] sm:$0xf0]  ;;  %v17642_v28 = vld [vmem:[%s28967_s11 + $0x3a0] sm:$0xf] }
 0x686   :  { %v28646_v25 = vpop.f32.mrf.mxu3  ;;  %v19165_v49 = vld [vmem:[%s28967_s11 + $0x3c4] sm:$0xf0] }
 0x687   :  { %10686 = vst [vmem:[#allocation2 + $0x10] sm:$0xff] %v10678_v19  ;;  %v17452_v19 = vld [vmem:[%s28967_s11 + $0x228] sm:$0xf0]  ;;  %v19145_v62 = vld [vmem:[%s28967_s11 + $0x324] sm:$0xf0] }
 0x688   :  { %11558 = vmatpush.bf16.msrb.mxu1 %v17411_v20  ;;  %v10433_v59 = vpop.f32.mrf.mxu1  ;;  %v17559_v20 = vor.u32 %v19138_v3, %v17556_v58  ;;  %v17455_v46 = vor.u32 %v19112_v31, %v17452_v19  ;;  %v17674_v3 = vld [vmem:[%s28967_s11 + $0x3e0] sm:$0xf]  ;;  %v28625_v58 = vpop.f32.mrf.mxu0  ;;  %v19161_v13 = vld [vmem:[%s28967_s11 + $0x3a4] sm:$0xf0]  ;;  %v17579_v10 = vor.u32 %v19145_v62, %v17578_v29  ;;  %v19143_v31 = vld [vmem:[%s28967_s11 + $0x314] sm:$0xf0] }
 0x689   :  { %v10434_v51 = vadd.f32 %v10433_v59, %v10420_v42  ;;  %v19110_v42 = vld [vmem:[%s28967_s11 + $0x214] sm:$0xf]  ;;  %v17444_v59 = vld [vmem:[%s28967_s11 + $0x218] sm:$0xf0]  ;;  %v17404_v62 = vld [vmem:[%s28967_s11 + $0x1c8] sm:$0xf0] }
 0x68b   :  { %v10673_v56 = vmax.f32 %v10434_v51, 0.0  ;;  %v19126_v51 = vld [vmem:[%s28967_s11 + $0x294] sm:$0xf] }
 0x68c   :  { %11559 = vmatpush.bf16.msrb.mxu1 %v17403_v61  ;;  %v19116_v61 = vld [vmem:[%s28967_s11 + $0x244] sm:$0xf] }
 0x68d   :  { %v10682_v18 = vpack.c.bf16 %v10673_v56, %v10672_v11  ;;  %v17471_v14 = vor.u32 %v19116_v61, %v17468_v45  ;;  %v19124_v11 = vld [vmem:[%s28967_s11 + $0x284] sm:$0xf]  ;;  %v17500_v56 = vld [vmem:[%s28967_s11 + $0x288] sm:$0xf0]  ;;  %v17650_v61 = vld [vmem:[%s28967_s11 + $0x3b0] sm:$0xf] }
 0x68e   :  { %v17162_v6 = vld [vmem:[#allocation2 + $0x10] sm:$0xf]  ;;  %v19038_v37 = vld [vmem:[#allocation2 + $0x14] sm:$0xf]  ;;  %v17503_v24 = vor.u32 %v19124_v11, %v17500_v56  ;;  %v19163_v45 = vld [vmem:[%s28967_s11 + $0x3b4] sm:$0xf0] }
 0x68f   :  { %10690 = vst [vmem:[#allocation2 + $0x30] sm:$0xff] %v10682_v18  ;;  %v28610_v18 = vpop.f32.mrf.mxu2 }
 0x690   :  { %11560 = vmatpush.bf16.msrb.mxu1 %v17395_v44  ;;  %v17618_v44 = vld [vmem:[%s28967_s11 + $0x370] sm:$0xf]  ;;  %v28674_v35 = vpop.f32.mrf.mxu0 }
 0x691   :  { %v17619_v38 = vor.u32 %v19155_v54, %v17618_v44  ;;  %v28688_v44 = vpop.f32.mrf.mxu3 }
 0x693   :  { %11598 = vmatpush.bf16.msra.mxu0 %v17619_v38  ;;  %v17634_v38 = vld [vmem:[%s28967_s11 + $0x390] sm:$0xf] }
 0x694   :  { %11561 = vmatpush.bf16.msrb.mxu1 %v17387_v48  ;;  %v19128_v48 = vld [vmem:[%s28967_s11 + $0x2a4] sm:$0xf] }
 0x695   :  { %v17519_v22 = vor.u32 %v19128_v48, %v17516_v57  ;;  %v17635_v57 = vor.u32 %v19159_v9, %v17634_v38  ;;  %v19098_v38 = vld [vmem:[%s28967_s11 + $0x1b4] sm:$0xf] }
 0x696   :  { %v19042_v5 = vld [vmem:[#allocation2 + $0x2c] sm:$0xf0]  ;;  %v17164_v36 = vld [vmem:[#allocation2 + $0x30] sm:$0xf0] }
 0x697   :  { %v28509_v30 = vor.u32 %v19042_v5, %v17162_v6  ;;  %v28511_v2 = vor.u32 %v19038_v37, %v17164_v36  ;;  %v17611_v6 = vor.u32 %v19153_v12, %v17610_v27  ;;  %v17602_v5 = vld [vmem:[%s28967_s11 + $0x350] sm:$0xf]  ;;  %v19151_v37 = vld [vmem:[%s28967_s11 + $0x354] sm:$0xf0]  ;;  %v17675_v36 = vor.u32 %v19169_v50, %v17674_v3  ;;  %v19088_v3 = vld [vmem:[%s28967_s11 + $0x164] sm:$0xf] }
 0x698   :  { %11562 = vmatpush.bf16.msrb.mxu1 %v17379_v0  ;;  %v28704_v19 = vpop.f32.mrf.mxu0  ;;  %v19104_v50 = vld [vmem:[%s28967_s11 + $0x1e4] sm:$0xf] }
 0x699   :  { %11578 = vmatmul.bf16.vlgmr.msrb.gmra.mxu2 %v28509_v30  ;;  %11592 = vmatmul.bf16.vlgmr.msrb.gmra.mxu3 %v28511_v2 }
 0x69a   :  { %11682 = vmatpush.bf16.msrb.mxu2 %v17495_v17  ;;  %11696 = vmatpush.bf16.msrb.mxu3 %v17559_v20  ;;  %v17666_v17 = vld [vmem:[%s28967_s11 + $0x3d0] sm:$0xf]  ;;  %v19167_v20 = vld [vmem:[%s28967_s11 + $0x3d4] sm:$0xf0] }
 0x69b   :  { %11599 = vmatpush.bf16.msra.mxu0 %v17611_v6  ;;  %v17667_v4 = vor.u32 %v19167_v20, %v17666_v17  ;;  %v17356_v6 = vld [vmem:[%s28967_s11 + $0x168] sm:$0xf0] }
 0x69c   :  { %11563 = vmatpush.bf16.msrb.mxu1 %v17371_v26  ;;  %v17439_v26 = vor.u32 %v19108_v23, %v17436_v8  ;;  %v28644_v15 = vpop.f32.mrf.mxu1 }
 0x69e   :  { %11683 = vmatpush.bf16.msrb.mxu2 %v17487_v21  ;;  %11697 = vmatpush.bf16.msrb.mxu3 %v17551_v34  ;;  %v17594_v21 = vld [vmem:[%s28967_s11 + $0x340] sm:$0xf]  ;;  %v19149_v34 = vld [vmem:[%s28967_s11 + $0x344] sm:$0xf0] }
 0x69f   :  { %11564 = vmatmul.bf16.vlgmr.msrb.gmra.mxu1 %v28491_v33  ;;  %v17595_v63 = vor.u32 %v19149_v34, %v17594_v21  ;;  %v19102_v21 = vld [vmem:[%s28967_s11 + $0x1d4] sm:$0xf]  ;;  %v19185_v34 = vld [vmem:[%s28966_s10] sm:$0xff] }
 0x6a0   :  { %11612 = vmatpush.bf16.msra.mxu1 %v17683_v16  ;;  %v17562_v16 = vld [vmem:[%s28967_s11 + $0x300] sm:$0xf]  ;;  %v28736_v12 = vpop.f32.mrf.mxu0 }
 0x6a2   :  { %11684 = vmatpush.bf16.msrb.mxu2 %v17479_v1  ;;  %11698 = vmatpush.bf16.msrb.mxu3 %v17543_v60  ;;  %v19147_v1 = vld [vmem:[%s28967_s11 + $0x334] sm:$0xf0]  ;;  %v17659_v60 = vor.u32 %v19165_v49, %v17658_v55  ;;  %v7194_v55 = vperm.slane %v19185_v34, 6  ;;  %v17412_v49 = vld [vmem:[%s28967_s11 + $0x1d8] sm:$0xf0] }
 0x6a4   :  { %11613 = vmatpush.bf16.msra.mxu1 %v17675_v36  ;;  %v28690_v54 = vpop.f32.mrf.mxu1 }
 0x6a6   :  { %11685 = vmatpush.bf16.msrb.mxu2 %v17471_v14  ;;  %11699 = vmatpush.bf16.msrb.mxu3 %v17535_v32  ;;  %v17587_v14 = vor.u32 %v19147_v1, %v17586_v43  ;;  %v17651_v32 = vor.u32 %v19163_v45, %v17650_v61  ;;  %v17415_v43 = vor.u32 %v19102_v21, %v17412_v49  ;;  %v7195_v1 = vperm.slane %v19185_v34, 7  ;;  %v19084_v61 = vld [vmem:[%s28967_s11 + $0x144] sm:$0xf]  ;;  %v17340_v45 = vld [vmem:[%s28967_s11 + $0x148] sm:$0xf0] }
 0x6a7   :  { %v17343_v29 = vor.u32 %v19084_v61, %v17340_v45 }
 0x6a8   :  { %11614 = vmatpush.bf16.msra.mxu1 %v17667_v4  ;;  %v17348_v4 = vld [vmem:[%s28967_s11 + $0x158] sm:$0xf0] }
 0x6a9   :  { %11634 = vmatmul.bf16.vlgmr.msra.gmra.mxu2 %v27916_v40  ;;  %11648 = vmatmul.bf16.vlgmr.msra.gmra.mxu3 %v27987_v41  ;;  %v17508_v40 = vld [vmem:[%s28967_s11 + $0x298] sm:$0xf0]  ;;  %v17447_v41 = vor.u32 %v19110_v42, %v17444_v59  ;;  %v19157_v59 = vld [vmem:[%s28967_s11 + $0x384] sm:$0xf0] }
 0x6aa   :  { %11686 = vmatpush.bf16.msrb.mxu2 %v17463_v7  ;;  %11700 = vmatpush.bf16.msrb.mxu3 %v17527_v52  ;;  %v17511_v0 = vor.u32 %v19126_v51, %v17508_v40  ;;  %v17643_v7 = vor.u32 %v19161_v13, %v17642_v28  ;;  %v17570_v52 = vld [vmem:[%s28967_s11 + $0x310] sm:$0xf]  ;;  %v19090_v51 = vld [vmem:[%s28967_s11 + $0x174] sm:$0xf]  ;;  %v17364_v40 = vld [vmem:[%s28967_s11 + $0x178] sm:$0xf0] }
 0x6ab   :  { %v17571_v48 = vor.u32 %v19143_v31, %v17570_v52  ;;  %v17367_v56 = vor.u32 %v19090_v51, %v17364_v40  ;;  %v19082_v31 = vld [vmem:[%s28967_s11 + $0x134] sm:$0xf]  ;;  %v17388_v51 = vld [vmem:[%s28967_s11 + $0x1a8] sm:$0xf0] }
 0x6ac   :  { %11615 = vmatpush.bf16.msra.mxu1 %v17659_v60  ;;  %v10585_v60 = vpop.f32.mrf.mxu0 }
 0x6ae   :  { %11687 = vmatpush.bf16.msrb.mxu2 %v17455_v46  ;;  %11701 = vmatpush.bf16.msrb.mxu3 %v17519_v22  ;;  %v19141_v46 = vld [vmem:[%s28967_s11 + $0x304] sm:$0xf0]  ;;  %v17626_v22 = vld [vmem:[%s28967_s11 + $0x380] sm:$0xf] }
 0x6af   :  { %v17563_v8 = vor.u32 %v19141_v46, %v17562_v16  ;;  %v17627_v11 = vor.u32 %v19157_v59, %v17626_v22  ;;  %v19080_v16 = vld [vmem:[%s28967_s11 + $0x124] sm:$0xf]  ;;  %v17324_v46 = vld [vmem:[%s28967_s11 + $0x128] sm:$0xf0] }
 0x6b0   :  { %11616 = vmatpush.bf16.msra.mxu1 %v17651_v32  ;;  %v10446_v32 = vadd.f32 %v28610_v18, %v7194_v55  ;;  %v17332_v18 = vld [vmem:[%s28967_s11 + $0x138] sm:$0xf0] }
 0x6b2   :  { %11688 = vmatpush.bf16.msrb.mxu2 %v17447_v41  ;;  %11702 = vmatpush.bf16.msrb.mxu3 %v17511_v0  ;;  %v19106_v41 = vld [vmem:[%s28967_s11 + $0x1f4] sm:$0xf]  ;;  %v17428_v0 = vld [vmem:[%s28967_s11 + $0x1f8] sm:$0xf0] }
 0x6b4   :  { %11617 = vmatpush.bf16.msra.mxu1 %v17643_v7 }
 0x6b6   :  { %11689 = vmatpush.bf16.msrb.mxu2 %v17439_v26  ;;  %11703 = vmatpush.bf16.msrb.mxu3 %v17503_v24  ;;  %v28734_v26 = vpop.f32.mrf.mxu3  ;;  %v17431_v24 = vor.u32 %v19106_v41, %v17428_v0  ;;  %v17327_v0 = vor.u32 %v19080_v16, %v17324_v46 }
 0x6b8   :  { %11618 = vmatpush.bf16.msra.mxu1 %v17635_v57  ;;  %v17396_v57 = vld [vmem:[%s28967_s11 + $0x1b8] sm:$0xf0] }
 0x6b9   :  { %11690 = vmatmul.bf16.vlgmr.msrb.gmra.mxu2 %v28509_v30  ;;  %11704 = vmatmul.bf16.vlgmr.msrb.gmra.mxu3 %v28511_v2  ;;  %v28642_v30 = vpop.f32.mrf.mxu2  ;;  %v17603_v2 = vor.u32 %v19151_v37, %v17602_v5  ;;  %v17359_v5 = vor.u32 %v19088_v3, %v17356_v6  ;;  %v17420_v37 = vld [vmem:[%s28967_s11 + $0x1e8] sm:$0xf0]  ;;  %v17399_v59 = vor.u32 %v19098_v38, %v17396_v57  ;;  %v17380_v3 = vld [vmem:[%s28967_s11 + $0x198] sm:$0xf0] }
 0x6ba   :  { %v17423_v36 = vor.u32 %v19104_v50, %v17420_v37  ;;  %v10587_v50 = vpop.f32.mrf.mxu0 }
 0x6bb   :  { %11600 = vmatpush.bf16.msra.mxu0 %v17603_v2  ;;  %v19086_v2 = vld [vmem:[%s28967_s11 + $0x154] sm:$0xf] }
 0x6bc   :  { %v28732_v23 = vpop.f32.mrf.mxu1  ;;  %11619 = vmatpush.bf16.msra.mxu1 %v17627_v11  ;;  %v19078_v11 = vld [vmem:[%s28967_s11 + $0x114] sm:$0xf] }
 0x6be   :  { %v10571_v17 = vpop.f32.mrf.mxu3 }
 0x6bf   :  { %11601 = vmatpush.bf16.msra.mxu0 %v17595_v63  ;;  %v17351_v63 = vor.u32 %v19086_v2, %v17348_v4 }
 0x6c0   :  { %11668 = vmatpush.bf16.msrb.mxu1 %v17431_v24  ;;  %v10448_v24 = vadd.f32 %v28642_v30, %v7194_v55 }
 0x6c1   :  { %v28672_v39 = vpop.f32.mrf.mxu2 }
 0x6c3   :  { %11602 = vmatpush.bf16.msra.mxu0 %v17587_v14  ;;  %v19100_v14 = vld [vmem:[%s28967_s11 + $0x1c4] sm:$0xf]  ;;  %v10641_v45 = vpop.f32.mrf.mxu0 }
 0x6c4   :  { %v28750_v20 = vpop.f32.mrf.mxu1  ;;  %11669 = vmatpush.bf16.msrb.mxu1 %v17423_v36  ;;  %v17407_v13 = vor.u32 %v19100_v14, %v17404_v62 }
 0x6c6   :  { %v10573_v22 = vpop.f32.mrf.mxu3 }
 0x6c7   :  { %11603 = vmatpush.bf16.msra.mxu0 %v17579_v10  ;;  %v10460_v10 = vadd.f32 %v28612_v47, %v10446_v32  ;;  %v17335_v47 = vor.u32 %v19082_v31, %v17332_v18 }
 0x6c8   :  { %11670 = vmatpush.bf16.msrb.mxu1 %v17415_v43 }
 0x6c9   :  { %v28715_v42 = vpop.f32.mrf.mxu2  ;;  %v10474_v9 = vadd.f32 %v28625_v58, %v10460_v10  ;;  %v19096_v58 = vld [vmem:[%s28967_s11 + $0x1a4] sm:$0xf] }
 0x6cb   :  { %11604 = vmatpush.bf16.msra.mxu0 %v17571_v48  ;;  %v10488_v40 = vadd.f32 %v28644_v15, %v10474_v9  ;;  %v19094_v15 = vld [vmem:[%s28967_s11 + $0x194] sm:$0xf] }
 0x6cc   :  { %11671 = vmatpush.bf16.msrb.mxu1 %v17407_v13  ;;  %v17383_v30 = vor.u32 %v19094_v15, %v17380_v3  ;;  %v17612_v15 = vld [vmem:[%s28967_s11 + $0x368] sm:$0xf0]  ;;  %v19168_v3 = vld [vmem:[%s28967_s11 + $0x3e4] sm:$0xf] }
 0x6cd   :  { %v10502_v36 = vadd.f32 %v28672_v39, %v10488_v40  ;;  %v17308_v39 = vld [vmem:[%s28967_s11 + $0x108] sm:$0xf0]  ;;  %v19152_v40 = vld [vmem:[%s28967_s11 + $0x364] sm:$0xf] }
 0x6ce   :  { %v10627_v34 = vpop.f32.mrf.mxu3 }
 0x6cf   :  { %11605 = vmatpush.bf16.msra.mxu0 %v17563_v8  ;;  %v17391_v8 = vor.u32 %v19096_v58, %v17388_v51  ;;  %v10516_v43 = vadd.f32 %v28688_v44, %v10502_v36  ;;  %v17684_v58 = vld [vmem:[%s28967_s11 + $0x3f8] sm:$0xf0] }
 0x6d0   :  { %11672 = vmatpush.bf16.msrb.mxu1 %v17399_v59  ;;  %v17604_v36 = vld [vmem:[%s28967_s11 + $0x358] sm:$0xf0] }
 0x6d1   :  { %v10557_v27 = vpop.f32.mrf.mxu2  ;;  %v10530_v32 = vadd.f32 %v28704_v19, %v10516_v43 }
 0x6d2   :  { %v10558_v7 = vadd.f32 %v10557_v27, %v7195_v1 }
 0x6d3   :  { %11654 = vmatpush.bf16.msrb.mxu0 %v17367_v56  ;;  %v17316_v56 = vld [vmem:[%s28967_s11 + $0x118] sm:$0xf0]  ;;  %v10544_v62 = vadd.f32 %v28732_v23, %v10530_v32 }
 0x6d4   :  { %v10572_v48 = vadd.f32 %v10571_v17, %v10558_v7  ;;  %v17319_v17 = vor.u32 %v19078_v11, %v17316_v56  ;;  %11673 = vmatpush.bf16.msrb.mxu1 %v17391_v8 }
 0x6d5   :  { %v10666_v18 = vmax.f32 %v10544_v62, 0.0  ;;  %v19142_v62 = vld [vmem:[%s28967_s11 + $0x314] sm:$0xf] }
 0x6d6   :  { %v10586_v41 = vadd.f32 %v10585_v60, %v10572_v48  ;;  %v10629_v31 = vpop.f32.mrf.mxu3 }
 0x6d7   :  { %11655 = vmatpush.bf16.msrb.mxu0 %v17359_v5  ;;  %v10462_v5 = vadd.f32 %v28646_v25, %v10448_v24  ;;  %v19076_v25 = vld [vmem:[%s28967_s11 + $0x104] sm:$0xf] }
 0x6d8   :  { %11674 = vmatpush.bf16.msrb.mxu1 %v17383_v30  ;;  %v17668_v30 = vld [vmem:[%s28967_s11 + $0x3d8] sm:$0xf0] }
 0x6d9   :  { %v10559_v28 = vpop.f32.mrf.mxu2  ;;  %v10476_v2 = vadd.f32 %v28674_v35, %v10462_v5  ;;  %v19092_v35 = vld [vmem:[%s28967_s11 + $0x184] sm:$0xf] }
 0x6da   :  { %v10560_v37 = vadd.f32 %v10559_v28, %v7195_v1  ;;  %v17311_v1 = vor.u32 %v19076_v25, %v17308_v39  ;;  %v19146_v25 = vld [vmem:[%s28967_s11 + $0x334] sm:$0xf]  ;;  %v17588_v39 = vld [vmem:[%s28967_s11 + $0x338] sm:$0xf0] }
 0x6db   :  { %11656 = vmatpush.bf16.msrb.mxu0 %v17351_v63  ;;  %v10490_v63 = vadd.f32 %v28690_v54, %v10476_v2  ;;  %v17372_v54 = vld [vmem:[%s28967_s11 + $0x188] sm:$0xf0] }
 0x6dc   :  { %v10599_v52 = vpop.f32.mrf.mxu1  ;;  %v10574_v4 = vadd.f32 %v10573_v22, %v10560_v37  ;;  %v17375_v61 = vor.u32 %v19092_v35, %v17372_v54  ;;  %v19150_v37 = vld [vmem:[%s28967_s11 + $0x354] sm:$0xf]  ;;  %v17591_v54 = vor.u32 %v19146_v25, %v17588_v39 }
 0x6dd   :  { %v10600_v27 = vadd.f32 %v10599_v52, %v10586_v41  ;;  %v10504_v14 = vadd.f32 %v28715_v42, %v10490_v63  ;;  %v17607_v2 = vor.u32 %v19150_v37, %v17604_v36  ;;  %v17660_v63 = vld [vmem:[%s28967_s11 + $0x3c8] sm:$0xf0]  ;;  %v19162_v35 = vld [vmem:[%s28967_s11 + $0x3b4] sm:$0xf] }
 0x6de   :  { %v10588_v49 = vadd.f32 %v10587_v50, %v10574_v4  ;;  %11675 = vmatpush.bf16.msrb.mxu1 %v17375_v61  ;;  %v17615_v50 = vor.u32 %v19152_v40, %v17612_v15  ;;  %v17580_v61 = vld [vmem:[%s28967_s11 + $0x328] sm:$0xf0] }
 0x6df   :  { %11657 = vmatpush.bf16.msrb.mxu0 %v17343_v29  ;;  %v10518_v7 = vadd.f32 %v28734_v26, %v10504_v14  ;;  %v19154_v26 = vld [vmem:[%s28967_s11 + $0x374] sm:$0xf]  ;;  %v17644_v14 = vld [vmem:[%s28967_s11 + $0x3a8] sm:$0xf0] }
 0x6e1   :  { %v10613_v6 = vpop.f32.mrf.mxu2  ;;  %v10532_v48 = vadd.f32 %v28736_v12, %v10518_v7  ;;  %v17620_v12 = vld [vmem:[%s28967_s11 + $0x378] sm:$0xf0]  ;;  %v19140_v7 = vld [vmem:[%s28967_s11 + $0x304] sm:$0xf] }
 0x6e2   :  { %v10614_v21 = vadd.f32 %v10613_v6, %v10600_v27  ;;  %v17623_v11 = vor.u32 %v19154_v26, %v17620_v12  ;;  %v17676_v6 = vld [vmem:[%s28967_s11 + $0x3e8] sm:$0xf0] }
 0x6e3   :  { %11658 = vmatpush.bf16.msrb.mxu0 %v17335_v47  ;;  %v10643_v47 = vpop.f32.mrf.mxu0  ;;  %v10546_v19 = vadd.f32 %v28750_v20, %v10532_v48  ;;  %v19170_v20 = vld [vmem:[%s28967_s11 + $0x3f4] sm:$0xf]  ;;  %v17679_v5 = vor.u32 %v19168_v3, %v17676_v6 }
 0x6e4   :  { %v10601_v55 = vpop.f32.mrf.mxu1  ;;  %v10628_v60 = vadd.f32 %v10627_v34, %v10614_v21  ;;  %v17687_v56 = vor.u32 %v19170_v20, %v17684_v58  ;;  %v19148_v21 = vld [vmem:[%s28967_s11 + $0x344] sm:$0xf]  ;;  %v17596_v34 = vld [vmem:[%s28967_s11 + $0x348] sm:$0xf0] }
 0x6e5   :  { %v10602_v44 = vadd.f32 %v10601_v55, %v10588_v49  ;;  %v10674_v46 = vmax.f32 %v10546_v19, 0.0  ;;  %v19164_v55 = vld [vmem:[%s28967_s11 + $0x3c4] sm:$0xf]  ;;  %v17599_v49 = vor.u32 %v19148_v21, %v17596_v34 }
 0x6e6   :  { %v10642_v13 = vadd.f32 %v10641_v45, %v10628_v60  ;;  %v17663_v43 = vor.u32 %v19164_v55, %v17660_v63  ;;  %v19144_v60 = vld [vmem:[%s28967_s11 + $0x324] sm:$0xf] }
 0x6e7   :  { %11659 = vmatpush.bf16.msrb.mxu0 %v17327_v0  ;;  %v19160_v45 = vld [vmem:[%s28967_s11 + $0x3a4] sm:$0xf]  ;;  %v17583_v32 = vor.u32 %v19144_v60, %v17580_v61 }
 0x6e9   :  { %v10615_v29 = vpop.f32.mrf.mxu2 }
 0x6ea   :  { %v10616_v28 = vadd.f32 %v10615_v29, %v10602_v44  ;;  %v17647_v29 = vor.u32 %v19160_v45, %v17644_v14 }
 0x6eb   :  { %11660 = vmatpush.bf16.msrb.mxu0 %v17319_v17  ;;  %v19166_v17 = vld [vmem:[%s28967_s11 + $0x3d4] sm:$0xf] }
 0x6ec   :  { %v10630_v9 = vadd.f32 %v10629_v31, %v10616_v28  ;;  %v17671_v4 = vor.u32 %v19166_v17, %v17668_v30  ;;  %v17572_v28 = vld [vmem:[%s28967_s11 + $0x318] sm:$0xf0]  ;;  %v19156_v31 = vld [vmem:[%s28967_s11 + $0x384] sm:$0xf] }
 0x6ee   :  { %v10644_v57 = vadd.f32 %v10643_v47, %v10630_v9 }
 0x6ef   :  { %11661 = vmatpush.bf16.msrb.mxu0 %v17311_v1  ;;  %v17652_v1 = vld [vmem:[%s28967_s11 + $0x3b8] sm:$0xf0] }
 0x6f0   :  { %v17655_v44 = vor.u32 %v19162_v35, %v17652_v1 }
 0x6f1   :  { %v11523_v48 = vpop.f32.mrf.mxu2 }
 0x6f9   :  { %v11525_v47 = vpop.f32.mrf.mxu2 }
 0x6fc   :  { %v10655_v10 = vpop.f32.mrf.mxu1 }
 0x6fd   :  { %v10656_v52 = vadd.f32 %v10655_v10, %v10642_v13  ;;  %v19158_v13 = vld [vmem:[%s28967_s11 + $0x394] sm:$0xf] }
 0x6ff   :  { %v10667_v38 = vmax.f32 %v10656_v52, 0.0  ;;  %v17564_v52 = vld [vmem:[%s28967_s11 + $0x308] sm:$0xf0] }
 0x701   :  { %v10679_v42 = vpack.c.bf16 %v10667_v38, %v10666_v18  ;;  %v17628_v18 = vld [vmem:[%s28967_s11 + $0x388] sm:$0xf0]  ;;  %v17567_v38 = vor.u32 %v19140_v7, %v17564_v52 }
 0x702   :  { %v17631_v9 = vor.u32 %v19156_v31, %v17628_v18 }
 0x703   :  { %10687 = vst [vmem:[#allocation2 + $0x18] sm:$0xff] %v10679_v42  ;;  %v11537_v42 = vpop.f32.mrf.mxu3 }
 0x704   :  { %v10657_v16 = vpop.f32.mrf.mxu1 }
 0x705   :  { %v10658_v23 = vadd.f32 %v10657_v16, %v10644_v57  ;;  %v10828_v57 = vld [vmem:[%s28968_s12] sm:$0x3]  ;;  %v11551_v16 = vpop.f32.mrf.mxu0 }
 0x706   :  { %v10831_v21 = vperm.slane %v10828_v57, 1 }
 0x707   :  { %v10675_v22 = vmax.f32 %v10658_v23, 0.0 }
 0x709   :  { %v10683_v59 = vpack.c.bf16 %v10675_v22, %v10674_v46  ;;  %v10830_v46 = vperm.slane %v10828_v57, 0 }
 0x70a   :  { %v17170_v51 = vld [vmem:[#allocation2 + $0x18] sm:$0xf]  ;;  %v19039_v0 = vld [vmem:[#allocation2 + $0x1c] sm:$0xf] }
 0x70b   :  { %10691 = vst [vmem:[#allocation2 + $0x38] sm:$0xff] %v10683_v59  ;;  %v11539_v19 = vpop.f32.mrf.mxu3  ;;  %v11524_v59 = vadd.f32 %v11523_v48, %v10830_v46 }
 0x70d   :  { %v11538_v12 = vadd.f32 %v11537_v42, %v11524_v59  ;;  %v11553_v58 = vpop.f32.mrf.mxu0 }
 0x70f   :  { %v11552_v20 = vadd.f32 %v11551_v16, %v11538_v12 }
 0x712   :  { %v19043_v41 = vld [vmem:[#allocation2 + $0x34] sm:$0xf0]  ;;  %v17172_v8 = vld [vmem:[#allocation2 + $0x38] sm:$0xf0] }
 0x713   :  { %v17171_v24 = vor.u32 %v19043_v41, %v17170_v51  ;;  %v17175_v27 = vor.u32 %v19039_v0, %v17172_v8  ;;  %v11526_v0 = vadd.f32 %v11525_v47, %v10830_v46 }
 0x715   :  { %11606 = vmatmul.bf16.vlgmr.msra.gmra.mxu0 %v17171_v24  ;;  %11620 = vmatmul.bf16.vlgmr.msra.gmra.mxu1 %v17175_v27 }
 0x716   :  { %11710 = vmatpush.bf16.msra.mxu0 %v17623_v11  ;;  %11724 = vmatpush.bf16.msra.mxu1 %v17687_v56  ;;  %v11540_v11 = vadd.f32 %v11539_v19, %v11526_v0 }
 0x71a   :  { %11711 = vmatpush.bf16.msra.mxu0 %v17615_v50  ;;  %11725 = vmatpush.bf16.msra.mxu1 %v17679_v5 }
 0x71c   :  { %v11565_v23 = vpop.f32.mrf.mxu1  ;;  %v11579_v22 = vpop.f32.mrf.mxu2 }
 0x71d   :  { %v11593_v26 = vpop.f32.mrf.mxu3  ;;  %v11566_v40 = vadd.f32 %v11565_v23, %v11552_v20 }
 0x71e   :  { %11712 = vmatpush.bf16.msra.mxu0 %v17607_v2  ;;  %11726 = vmatpush.bf16.msra.mxu1 %v17671_v4 }
 0x71f   :  { %v11580_v8 = vadd.f32 %v11579_v22, %v11566_v40 }
 0x722   :  { %11713 = vmatpush.bf16.msra.mxu0 %v17599_v49  ;;  %11727 = vmatpush.bf16.msra.mxu1 %v17663_v43 }
 0x724   :  { %v11567_v51 = vpop.f32.mrf.mxu1  ;;  %v11581_v41 = vpop.f32.mrf.mxu2 }
 0x725   :  { %11662 = vmatmul.bf16.vlgmr.msrb.gmra.mxu0 %v28266_v53  ;;  %11676 = vmatmul.bf16.vlgmr.msrb.gmra.mxu1 %v28491_v33  ;;  %v17636_v53 = vld [vmem:[%s28967_s11 + $0x398] sm:$0xf0]  ;;  %v17575_v33 = vor.u32 %v19142_v62, %v17572_v28  ;;  %v11595_v56 = vpop.f32.mrf.mxu3 }
 0x726   :  { %11714 = vmatpush.bf16.msra.mxu0 %v17591_v54  ;;  %11728 = vmatpush.bf16.msra.mxu1 %v17655_v44  ;;  %v17639_v10 = vor.u32 %v19158_v13, %v17636_v53 }
 0x72a   :  { %11715 = vmatpush.bf16.msra.mxu0 %v17583_v32  ;;  %11729 = vmatpush.bf16.msra.mxu1 %v17647_v29 }
 0x72c   :  { %v11635_v37 = vpop.f32.mrf.mxu2 }
 0x72d   :  { %v11649_v30 = vpop.f32.mrf.mxu3  ;;  %v11636_v49 = vadd.f32 %v11635_v37, %v10831_v21 }
 0x72e   :  { %11716 = vmatpush.bf16.msra.mxu0 %v17575_v33  ;;  %11730 = vmatpush.bf16.msra.mxu1 %v17639_v10 }
 0x72f   :  { %v11650_v35 = vadd.f32 %v11649_v30, %v11636_v49 }
 0x732   :  { %11717 = vmatpush.bf16.msra.mxu0 %v17567_v38  ;;  %11731 = vmatpush.bf16.msra.mxu1 %v17631_v9 }
 0x734   :  { %v11637_v43 = vpop.f32.mrf.mxu2 }
 0x735   :  { %11718 = vmatmul.bf16.vlgmr.msra.gmra.mxu0 %v17171_v24  ;;  %11732 = vmatmul.bf16.vlgmr.msra.gmra.mxu1 %v17175_v27  ;;  %v11554_v24 = vadd.f32 %v11553_v58, %v11540_v11  ;;  %v11594_v27 = vadd.f32 %v11593_v26, %v11580_v8  ;;  %v11651_v1 = vpop.f32.mrf.mxu3  ;;  %v11638_v60 = vadd.f32 %v11637_v43, %v10831_v21 }
 0x737   :  { %v11568_v6 = vadd.f32 %v11567_v51, %v11554_v24  ;;  %v11652_v29 = vadd.f32 %v11651_v1, %v11638_v60 }
 0x739   :  { %v11582_v5 = vadd.f32 %v11581_v41, %v11568_v6 }
 0x73b   :  { %v11596_v17 = vadd.f32 %v11595_v56, %v11582_v5 }
 0x73c   :  { %v11691_v61 = vpop.f32.mrf.mxu2 }
 0x73d   :  { %v11705_v13 = vpop.f32.mrf.mxu3 }
 0x744   :  { %v11693_v31 = vpop.f32.mrf.mxu2 }
 0x745   :  { %v11707_v9 = vpop.f32.mrf.mxu3 }
 0x792   :  { %v11607_v15 = vpop.f32.mrf.mxu0  ;;  %v11621_v3 = vpop.f32.mrf.mxu1 }
 0x793   :  { %v11608_v50 = vadd.f32 %v11607_v15, %v11594_v27 }
 0x795   :  { %v11622_v36 = vadd.f32 %v11621_v3, %v11608_v50 }
 0x797   :  { %19172 = vtanh.f32 %v11622_v36 }
 0x79a   :  { %v11609_v2 = vpop.f32.mrf.mxu0  ;;  %v11623_v4 = vpop.f32.mrf.mxu1 }
 0x79b   :  { %v11610_v34 = vadd.f32 %v11609_v2, %v11596_v17 }
 0x79d   :  { %v19173_v55 = vpop.eup %19172  ;;  %v11624_v63 = vadd.f32 %v11623_v4, %v11610_v34 }
 0x79e   :  { %11742 = vst [vmem:[%s28969_s13] sm:$0xff] %v19173_v55 }
 0x79f   :  { %19174 = vtanh.f32 %v11624_v63 }
 0x7a2   :  { %v11663_v25 = vpop.f32.mrf.mxu0  ;;  %v11677_v39 = vpop.f32.mrf.mxu1 }
 0x7a3   :  { %v11664_v44 = vadd.f32 %v11663_v25, %v11650_v35 }
 0x7a5   :  { %v19175_v54 = vpop.eup %19174  ;;  %v11678_v45 = vadd.f32 %v11677_v39, %v11664_v44 }
 0x7a6   :  { %11744 = vst [vmem:[%s28969_s13 + $0x10] sm:$0xff] %v19175_v54 }
 0x7a7   :  { %v11692_v62 = vadd.f32 %v11691_v61, %v11678_v45 }
 0x7a9   :  { %v11706_v33 = vadd.f32 %v11705_v13, %v11692_v62 }
 0x7aa   :  { %v11665_v14 = vpop.f32.mrf.mxu0  ;;  %v11679_v32 = vpop.f32.mrf.mxu1 }
 0x7ab   :  { %v11666_v28 = vadd.f32 %v11665_v14, %v11652_v29 }
 0x7ad   :  { %v11680_v53 = vadd.f32 %v11679_v32, %v11666_v28 }
 0x7af   :  { %v11694_v18 = vadd.f32 %v11693_v31, %v11680_v53 }
 0x7b1   :  { %v11708_v48 = vadd.f32 %v11707_v9, %v11694_v18 }
 0x7b2   :  { %v11719_v10 = vpop.f32.mrf.mxu0  ;;  %v11733_v7 = vpop.f32.mrf.mxu1 }
 0x7b3   :  { %v11720_v52 = vadd.f32 %v11719_v10, %v11706_v33 }
 0x7b5   :  { %v11734_v38 = vadd.f32 %v11733_v7, %v11720_v52 }
 0x7b7   :  { %19176 = vtanh.f32 %v11734_v38 }
 0x7ba   :  { %v11721_v42 = vpop.f32.mrf.mxu0  ;;  %v11735_v19 = vpop.f32.mrf.mxu1 }
 0x7bb   :  { %v11722_v47 = vadd.f32 %v11721_v42, %v11708_v48 }
 0x7bd   :  { %v19177_v57 = vpop.eup %19176  ;;  %v11736_v16 = vadd.f32 %v11735_v19, %v11722_v47 }
 0x7be   :  { %11743 = vst [vmem:[%s28969_s13 + $0x8] sm:$0xff] %v19177_v57 }
 0x7bf   :  { %19178 = vtanh.f32 %v11736_v16 }
 0x7c5   :  { %v19179_v23 = vpop.eup %19178 }
 0x7c6   :  { %11745 = vst [vmem:[%s28969_s13 + $0x18] sm:$0xff] %v19179_v23 }

</bundles_post_ra>
